<compile_context>
chip_gen: v5e
topology: v5e:2x2
jax: 0.10.0
libtpu: 0.0.40
codegen_flags: <defaults>
</compile_context>

<pallas_src>
import jax
import jax.numpy as jnp
from jax.experimental import pallas as pl
from jax.experimental.pallas import tpu as pltpu


# ---------------------------------------------------------------------------
# Pallas kernels
# ---------------------------------------------------------------------------
def _conv_bn_lrelu_pool_kernel(p00_ref, p01_ref, p10_ref, p11_ref,
                               w_ref, s_ref, o_ref):
    """(tm, N) tile of MaxPool2x2(LeakyReLU_0.2(im2col(x) @ W_folded + shift)).

    p00..p11 hold the im2col rows of the four 2x2 pool-window positions for
    the same pooled output pixels, so pooling is just an elementwise max of
    the four MXU results.  max-then-activate is exact because LeakyReLU is
    monotone and the per-channel shift is common to all four positions.
    """
    w = w_ref[...]
    a = jnp.dot(p00_ref[...], w, preferred_element_type=jnp.float32)
    a = jnp.maximum(a, jnp.dot(p01_ref[...], w, preferred_element_type=jnp.float32))
    a = jnp.maximum(a, jnp.dot(p10_ref[...], w, preferred_element_type=jnp.float32))
    a = jnp.maximum(a, jnp.dot(p11_ref[...], w, preferred_element_type=jnp.float32))
    a = a + s_ref[...]
    o_ref[...] = jnp.maximum(a, 0.2 * a).astype(o_ref.dtype)   # LeakyReLU(0.2)


def _conv_fc_kernel(p_ref, w_ref, s_ref, wfc_ref, bfc_ref, feat_ref, res_ref):
    """Fused head: conv3 (as matmul) + BN + LeakyReLU + flatten + Linear."""
    acc = jnp.dot(p_ref[...], w_ref[...], preferred_element_type=jnp.float32)
    acc = acc + s_ref[...]
    feat = jnp.maximum(acc, 0.2 * acc)
    feat_ref[...] = feat.astype(feat_ref.dtype)
    res = jnp.dot(feat, wfc_ref[...], preferred_element_type=jnp.float32)
    res_ref[...] = (res + bfc_ref[...]).astype(res_ref.dtype)


# ---------------------------------------------------------------------------
# Wrapper helpers (im2col, BN folding, tile sizing)
# ---------------------------------------------------------------------------
def _round_up(x, m):
    return (x + m - 1) // m * m


def _vmem_budget_bytes():
    """Per-generation VMEM budget for tile sizing (conservative on v7x)."""
    try:
        phys = pltpu.get_tpu_info().vmem_capacity_bytes
    except Exception:  # unknown generation / emulation -> assume the small one
        phys = 64 << 20
    # v7x: 64 MiB physical VMEM -> budget 24 MiB; v5e/v6e (128 MiB) -> 48 MiB.
    return (24 << 20) if phys <= (64 << 20) else (48 << 20)


def _fold_bn(w_hwio, b, gamma, beta, mean, var, *, k_pad=None, n_pad=None,
             eps=1e-5):
    """Fold eval-mode BatchNorm2d into the conv weight matrix / shift vector.

    Optionally zero-pads the contraction dim to ``k_pad`` and the output
    channel dim to ``n_pad`` so the MXU operands / stores are lane-dense.
    """
    # TODO(synk): train-mode BatchNorm (batch statistics + running-stat
    # updates) is not implemented; eval-mode running-stats normalization only.
    scale = gamma * jax.lax.rsqrt(var + eps)                     # (Cout,)
    k = w_hwio.shape[0] * w_hwio.shape[1] * w_hwio.shape[2]
    n = w_hwio.shape[3]
    w_mat = w_hwio.reshape(k, n) * scale[None, :]                # (K, Cout) f32
    shift = (b - mean) * scale + beta                            # (Cout,)
    k_pad = k if k_pad is None else k_pad
    n_pad = n if n_pad is None else n_pad
    w_mat = jnp.pad(w_mat, ((0, k_pad - k), (0, n_pad - n)))
    shift = jnp.pad(shift, (0, n_pad - n))
    return w_mat.astype(jnp.bfloat16), shift.reshape(1, n_pad).astype(jnp.float32)


def _im2col_pool_quadrants(x_nhwc, ksize, padding):
    """im2col split by 2x2 pool-window position.

    Returns four (B*Hp*Wp, K) matrices (conv-output positions (0,0), (0,1),
    (1,0), (1,1) of each pool window), the pooled spatial (Hp, Wp) and K.
    Patch column layout is (ky, kx, Cin), matching the HWIO weight reshape.
    """
    B, H, W, C = x_nhwc.shape
    if padding:
        x_nhwc = jnp.pad(
            x_nhwc, ((0, 0), (padding, padding), (padding, padding), (0, 0)))
    Ho = H + 2 * padding - ksize + 1
    Wo = W + 2 * padding - ksize + 1
    taps = [x_nhwc[:, dy:dy + Ho, dx:dx + Wo, :]
            for dy in range(ksize) for dx in range(ksize)]
    patches = jnp.concatenate(taps, axis=-1)                     # (B,Ho,Wo,K)
    K = ksize * ksize * C
    Hp, Wp = Ho // 2, Wo // 2          # floor, matches torch MaxPool2d(2,2)
    quads = [patches[:, dy:dy + 2 * Hp:2, dx:dx + 2 * Wp:2, :]
             .reshape(B * Hp * Wp, K)
             for dy in range(2) for dx in range(2)]
    return quads, Hp, Wp, K


def _pick_tm(M, K, N, *, n_lhs, vmem_budget_bytes):
    """VMEM-budgeted M tile; megacore split only for compute-heavy layers."""
    resident = 2 * (K * N * 2 + N * 4)            # dbl-buffered bf16 W + f32 shift
    per_row = n_lhs * 2 * (2 * K) + 2 * (2 * N)   # dbl-buffered bf16 LHS + bf16 out
    avail = max(vmem_budget_bytes - resident, per_row * 8)
    cap = max(8, (avail // per_row) // 8 * 8)
    # Split across >=2 grid steps (v7x megacore) only when the layer is large
    # enough to be MXU-bound; tiny layers would just pay per-step overhead.
    flops = 2 * M * K * N * n_lhs
    min_tiles = 2 if (M >= 512 and flops >= (1 << 28)) else 1
    n_tiles = max(min_tiles, pl.cdiv(M, cap))
    return min(_round_up(pl.cdiv(M, n_tiles), 8), _round_up(M, 8))


# ---------------------------------------------------------------------------
# Layer wrappers
# ---------------------------------------------------------------------------
def conv_bn_lrelu_pool(x_nhwc, w_hwio, b, gamma, beta, mean, var, *,
                       ksize, padding, k_pad=None, n_pad=None):
    """Conv2d(stride=1) + eval-BN + LeakyReLU(0.2) + MaxPool2d(2,2), fused."""
    B = x_nhwc.shape[0]
    cout = w_hwio.shape[-1]
    quads, Hp, Wp, K = _im2col_pool_quadrants(x_nhwc, ksize, padding)
    k_pad = K if k_pad is None else k_pad
    n_pad = cout if n_pad is None else n_pad
    w_mat, shift = _fold_bn(w_hwio, b, gamma, beta, mean, var,
                            k_pad=k_pad, n_pad=n_pad)

    M = B * Hp * Wp
    budget = _vmem_budget_bytes()
    tm = _pick_tm(M, k_pad, n_pad, n_lhs=4, vmem_budget_bytes=budget)
    grid_m = pl.cdiv(M, tm)
    M_pad = grid_m * tm
    quads = [jnp.pad(q, ((0, M_pad - M), (0, k_pad - K))).astype(jnp.bfloat16)
             for q in quads]

    lhs_spec = pl.BlockSpec((tm, k_pad), lambda i: (i, 0))
    out = pl.pallas_call(
        _conv_bn_lrelu_pool_kernel,
        out_shape=jax.ShapeDtypeStruct((M_pad, n_pad), jnp.bfloat16),  # bf16 writeback
        grid=(grid_m,),
        in_specs=[lhs_spec, lhs_spec, lhs_spec, lhs_spec,
                  pl.BlockSpec((k_pad, n_pad), lambda i: (0, 0)),  # resident weight
                  pl.BlockSpec((1, n_pad), lambda i: (0, 0))],     # folded BN shift
        out_specs=pl.BlockSpec((tm, n_pad), lambda i: (i, 0)),
        compiler_params=pltpu.CompilerParams(
            dimension_semantics=("parallel",),
            vmem_limit_bytes=budget + (8 << 20)),
        cost_estimate=pl.CostEstimate(
            flops=2 * 4 * M_pad * k_pad * n_pad,
            transcendentals=0,
            bytes_accessed=(4 * M_pad * k_pad * 2 + k_pad * n_pad * 2
                            + M_pad * n_pad * 2 + 8 * n_pad)),
    )(*quads, w_mat, shift)

    # Slice off padded rows / lane-padding channels (fuses into next im2col).
    return out[:M].reshape(B, Hp, Wp, n_pad)[..., :cout]


def conv_bn_lrelu_fc(x_nhwc, w_hwio, b, gamma, beta, mean, var, w_fc, b_fc, *,
                     ksize):
    """Fused head: final conv (1x1 output) + eval-BN + LeakyReLU + flatten + FC."""
    B, H, W, Cin = x_nhwc.shape
    assert H == ksize and W == ksize, "MCNN requires 1x1 final spatial (feat_dim=256)"
    cout = w_hwio.shape[-1]
    n_classes = w_fc.shape[-1]
    # 1x1 output spatial -> the (ky,kx,Cin) im2col row is just the flat input.
    K = ksize * ksize * Cin
    patches = x_nhwc.reshape(B, K).astype(jnp.bfloat16)
    w_mat, shift = _fold_bn(w_hwio, b, gamma, beta, mean, var)

    M_pad = max(8, _round_up(B, 8))                 # sublane-aligned batch rows
    if M_pad != B:
        patches = jnp.pad(patches, ((0, M_pad - B), (0, 0)))

    feature, res = pl.pallas_call(
        _conv_fc_kernel,
        out_shape=(jax.ShapeDtypeStruct((M_pad, cout), jnp.float32),
                   jax.ShapeDtypeStruct((M_pad, n_classes), jnp.float32)),
        grid=(1,),
        in_specs=[
            pl.BlockSpec((M_pad, K), lambda i: (0, 0)),
            pl.BlockSpec((K, cout), lambda i: (0, 0)),
            pl.BlockSpec((1, cout), lambda i: (0, 0)),
            pl.BlockSpec((cout, n_classes), lambda i: (0, 0)),
            pl.BlockSpec((1, n_classes), lambda i: (0, 0)),
        ],
        out_specs=(pl.BlockSpec((M_pad, cout), lambda i: (0, 0)),
                   pl.BlockSpec((M_pad, n_classes), lambda i: (0, 0))),
        compiler_params=pltpu.CompilerParams(
            vmem_limit_bytes=_vmem_budget_bytes()),
        cost_estimate=pl.CostEstimate(
            flops=2 * M_pad * K * cout + 2 * M_pad * cout * n_classes,
            transcendentals=0,
            bytes_accessed=(M_pad * K * 2 + K * cout * 2 + M_pad * cout * 4
                            + cout * n_classes * 4 + M_pad * n_classes * 4)),
    )(patches, w_mat, shift, w_fc, b_fc.reshape(1, -1))
    return feature[:B], res[:B]


def mcnn_forward(x_nchw, params):
    """Equivalent of MCNN.forward: returns (feature, out)."""
    # NCHW -> NHWC (free here: Cin == 1, so this is just a reshape/bitcast).
    x = jnp.transpose(x_nchw, (0, 2, 3, 1))
    # conv1: pad K 49->128 and Cout 64->128 so LHS loads and output stores are
    # unmasked 128-lane ops; pad channels are zero and sliced off afterwards.
    x = conv_bn_lrelu_pool(x, *params["conv1"], ksize=7, padding=1,
                           k_pad=128, n_pad=128)
    x = conv_bn_lrelu_pool(x, *params["conv2"], ksize=5, padding=0)
    # Final spatial is 1x1, so NCHW flatten order == (ky,kx,cin) patch order.
    feature, res = conv_bn_lrelu_fc(x, *params["conv3"], *params["fc"], ksize=5)
    return feature, res


# ---------------------------------------------------------------------------
# Deterministic parameter construction
# ---------------------------------------------------------------------------
def init_params(key, n_classes=10):
    def conv_block(key, cin, cout, k):
        key, kw, kb, kg, kbt, km, kv = jax.random.split(key, 7)
        std = (2.0 / (k * k * cin)) ** 0.5
        w = jax.random.normal(kw, (k, k, cin, cout), jnp.float32) * std   # HWIO
        b = 0.01 * jax.random.normal(kb, (cout,), jnp.float32)
        gamma = 1.0 + 0.1 * jax.random.normal(kg, (cout,), jnp.float32)
        beta = 0.1 * jax.random.normal(kbt, (cout,), jnp.float32)
        mean = 0.1 * jax.random.normal(km, (cout,), jnp.float32)
        var = jax.random.uniform(kv, (cout,), jnp.float32, minval=0.5, maxval=1.5)
        return key, (w, b, gamma, beta, mean, var)

    key, conv1 = conv_block(key, 1, 64, 7)
    key, conv2 = conv_block(key, 64, 128, 5)
    key, conv3 = conv_block(key, 128, 256, 5)

    feat_dim = 256
    key, kw, kb = jax.random.split(key, 3)
    # NOTE: stored as (feat_dim, n_classes) == torch Linear weight transposed;
    # any state_dict import must transpose accordingly.
    w_fc = jax.random.normal(kw, (feat_dim, n_classes), jnp.float32) / feat_dim ** 0.5
    b_fc = 0.01 * jax.random.normal(kb, (n_classes,), jnp.float32)
    return {"conv1": conv1, "conv2": conv2, "conv3": conv3, "fc": (w_fc, b_fc)}


if __name__ == "__main__":
    key = jax.random.PRNGKey(0)
    key, kx = jax.random.split(key)

    B, n_classes = 2, 10
    # 1x32x32 input -> conv7/p1 -> 28 -> pool 14 -> conv5 -> 10 -> pool 5
    # -> conv5 -> 1x1x256 => feat_dim 256
    x = jax.random.normal(kx, (B, 1, 32, 32), jnp.float32)
    params = init_params(key, n_classes)

    fwd = jax.jit(lambda inp: mcnn_forward(inp, params))
    feature, res = fwd(x)
    jax.block_until_ready((feature, res))

    assert feature.shape == (B, 256), feature.shape
    assert res.shape == (B, n_classes), res.shape
    assert bool(jnp.all(jnp.isfinite(feature))) and bool(jnp.all(jnp.isfinite(res)))
    print("KERNEL_OK")
</pallas_src>

<mosaic_0001>
module attributes {stable_mosaic.version = 11 : i64} {
  func.func @_conv_bn_lrelu_pool_kernel(%arg0: i32, %arg1: memref<392x128xbf16, #tpu.memory_space<vmem>>, %arg2: memref<392x128xbf16, #tpu.memory_space<vmem>>, %arg3: memref<392x128xbf16, #tpu.memory_space<vmem>>, %arg4: memref<392x128xbf16, #tpu.memory_space<vmem>>, %arg5: memref<128x128xbf16, #tpu.memory_space<vmem>>, %arg6: memref<1x128xf32, #tpu.memory_space<vmem>>, %arg7: memref<392x128xbf16, #tpu.memory_space<vmem>>) attributes {dimension_semantics = [#tpu.dimension_semantics<parallel>], iteration_bounds = array<i64: 1>, scalar_prefetch = 0 : i64, scratch_operands = 0 : i64, tpu.core_type = #tpu.core_type<tc>, window_params = [{transform_indices = @transform_0, window_bounds = array<i64: 392, 128>}, {transform_indices = @transform_1, window_bounds = array<i64: 392, 128>}, {transform_indices = @transform_2, window_bounds = array<i64: 392, 128>}, {transform_indices = @transform_3, window_bounds = array<i64: 392, 128>}, {pipeline_mode = #tpu.pipeline_mode<synchronous>, transform_indices = @transform_4, window_bounds = array<i64: 128, 128>}, {pipeline_mode = #tpu.pipeline_mode<synchronous>, transform_indices = @transform_5, window_bounds = array<i64: 1, 128>}, {transform_indices = @transform_6, window_bounds = array<i64: 392, 128>}]} {
    %c0 = arith.constant 0 : index
    %c0_0 = arith.constant 0 : index
    %0 = vector.load %arg5[%c0, %c0_0] : memref<128x128xbf16, #tpu.memory_space<vmem>>, vector<128x128xbf16>
    %c0_1 = arith.constant 0 : index
    %c0_2 = arith.constant 0 : index
    %1 = vector.load %arg1[%c0_1, %c0_2] : memref<392x128xbf16, #tpu.memory_space<vmem>>, vector<392x128xbf16>
    %cst = arith.constant dense<0.000000e+00> : vector<392x128xf32>
    %2 = tpu.matmul %1, %0, %cst {dimension_numbers = #tpu.dot_dimension_numbers<[1], [0], [0], [1], [0, 0, 1, 1], [], []>} : vector<392x128xbf16>, vector<128x128xbf16>, vector<392x128xf32> -> vector<392x128xf32>
    %c0_3 = arith.constant 0 : index
    %c0_4 = arith.constant 0 : index
    %3 = vector.load %arg2[%c0_3, %c0_4] : memref<392x128xbf16, #tpu.memory_space<vmem>>, vector<392x128xbf16>
    %cst_5 = arith.constant dense<0.000000e+00> : vector<392x128xf32>
    %4 = tpu.matmul %3, %0, %cst_5 {dimension_numbers = #tpu.dot_dimension_numbers<[1], [0], [0], [1], [0, 0, 1, 1], [], []>} : vector<392x128xbf16>, vector<128x128xbf16>, vector<392x128xf32> -> vector<392x128xf32>
    %5 = arith.maximumf %2, %4 : vector<392x128xf32>
    %c0_6 = arith.constant 0 : index
    %c0_7 = arith.constant 0 : index
    %6 = vector.load %arg3[%c0_6, %c0_7] : memref<392x128xbf16, #tpu.memory_space<vmem>>, vector<392x128xbf16>
    %cst_8 = arith.constant dense<0.000000e+00> : vector<392x128xf32>
    %7 = tpu.matmul %6, %0, %cst_8 {dimension_numbers = #tpu.dot_dimension_numbers<[1], [0], [0], [1], [0, 0, 1, 1], [], []>} : vector<392x128xbf16>, vector<128x128xbf16>, vector<392x128xf32> -> vector<392x128xf32>
    %8 = arith.maximumf %5, %7 : vector<392x128xf32>
    %c0_9 = arith.constant 0 : index
    %c0_10 = arith.constant 0 : index
    %9 = vector.load %arg4[%c0_9, %c0_10] : memref<392x128xbf16, #tpu.memory_space<vmem>>, vector<392x128xbf16>
    %cst_11 = arith.constant dense<0.000000e+00> : vector<392x128xf32>
    %10 = tpu.matmul %9, %0, %cst_11 {dimension_numbers = #tpu.dot_dimension_numbers<[1], [0], [0], [1], [0, 0, 1, 1], [], []>} : vector<392x128xbf16>, vector<128x128xbf16>, vector<392x128xf32> -> vector<392x128xf32>
    %11 = arith.maximumf %8, %10 : vector<392x128xf32>
    %c0_12 = arith.constant 0 : index
    %c0_13 = arith.constant 0 : index
    %12 = vector.load %arg6[%c0_12, %c0_13] : memref<1x128xf32, #tpu.memory_space<vmem>>, vector<1x128xf32>
    %13 = vector.broadcast %12 : vector<1x128xf32> to vector<392x128xf32>
    %14 = arith.addf %11, %13 : vector<392x128xf32>
    %cst_14 = arith.constant 2.000000e-01 : f32
    %15 = vector.broadcast %cst_14 : f32 to vector<392x128xf32>
    %16 = arith.mulf %15, %14 : vector<392x128xf32>
    %17 = arith.maximumf %14, %16 : vector<392x128xf32>
    %18 = arith.truncf %17 : vector<392x128xf32> to vector<392x128xbf16>
    %c0_15 = arith.constant 0 : index
    %c0_16 = arith.constant 0 : index
    %19 = vector.load %arg7[%c0_15, %c0_16] : memref<392x128xbf16, #tpu.memory_space<vmem>>, vector<392x128xbf16>
    tpu.vector_store %arg7[%c0_15, %c0_16], %18 {strides = array<i32>} : memref<392x128xbf16, #tpu.memory_space<vmem>>, vector<392x128xbf16>,
    return
  }
  func.func @transform_0(%arg0: i32) -> (i32, i32) {
    %c0_i32 = arith.constant 0 : i32
    %c0_i32_0 = arith.constant 0 : i32
    return %arg0, %c0_i32 : i32, i32
  }
  func.func @transform_1(%arg0: i32) -> (i32, i32) {
    %c0_i32 = arith.constant 0 : i32
    %c0_i32_0 = arith.constant 0 : i32
    return %arg0, %c0_i32 : i32, i32
  }
  func.func @transform_2(%arg0: i32) -> (i32, i32) {
    %c0_i32 = arith.constant 0 : i32
    %c0_i32_0 = arith.constant 0 : i32
    return %arg0, %c0_i32 : i32, i32
  }
  func.func @transform_3(%arg0: i32) -> (i32, i32) {
    %c0_i32 = arith.constant 0 : i32
    %c0_i32_0 = arith.constant 0 : i32
    return %arg0, %c0_i32 : i32, i32
  }
  func.func @transform_4(%arg0: i32) -> (i32, i32) {
    %c0_i32 = arith.constant 0 : i32
    %c0_i32_0 = arith.constant 0 : i32
    %c0_i32_1 = arith.constant 0 : i32
    return %c0_i32, %c0_i32_0 : i32, i32
  }
  func.func @transform_5(%arg0: i32) -> (i32, i32) {
    %c0_i32 = arith.constant 0 : i32
    %c0_i32_0 = arith.constant 0 : i32
    %c0_i32_1 = arith.constant 0 : i32
    return %c0_i32, %c0_i32_0 : i32, i32
  }
  func.func @transform_6(%arg0: i32) -> (i32, i32) {
    %c0_i32 = arith.constant 0 : i32
    %c0_i32_0 = arith.constant 0 : i32
    return %arg0, %c0_i32 : i32, i32
  }
}

module attributes {stable_mosaic.version = 11 : i64} {
  func.func @_conv_bn_lrelu_pool_kernel(%arg0: i32, %arg1: memref<56x1600xbf16, #tpu.memory_space<vmem>>, %arg2: memref<56x1600xbf16, #tpu.memory_space<vmem>>, %arg3: memref<56x1600xbf16, #tpu.memory_space<vmem>>, %arg4: memref<56x1600xbf16, #tpu.memory_space<vmem>>, %arg5: memref<1600x128xbf16, #tpu.memory_space<vmem>>, %arg6: memref<1x128xf32, #tpu.memory_space<vmem>>, %arg7: memref<56x128xbf16, #tpu.memory_space<vmem>>) attributes {dimension_semantics = [#tpu.dimension_semantics<parallel>], iteration_bounds = array<i64: 1>, scalar_prefetch = 0 : i64, scratch_operands = 0 : i64, tpu.core_type = #tpu.core_type<tc>, window_params = [{transform_indices = @transform_0, window_bounds = array<i64: 56, 1600>}, {transform_indices = @transform_1, window_bounds = array<i64: 56, 1600>}, {transform_indices = @transform_2, window_bounds = array<i64: 56, 1600>}, {transform_indices = @transform_3, window_bounds = array<i64: 56, 1600>}, {pipeline_mode = #tpu.pipeline_mode<synchronous>, transform_indices = @transform_4, window_bounds = array<i64: 1600, 128>}, {pipeline_mode = #tpu.pipeline_mode<synchronous>, transform_indices = @transform_5, window_bounds = array<i64: 1, 128>}, {transform_indices = @transform_6, window_bounds = array<i64: 56, 128>}]} {
    %c0 = arith.constant 0 : index
    %c0_0 = arith.constant 0 : index
    %0 = vector.load %arg5[%c0, %c0_0] : memref<1600x128xbf16, #tpu.memory_space<vmem>>, vector<1600x128xbf16>
    %c0_1 = arith.constant 0 : index
    %c0_2 = arith.constant 0 : index
    %1 = vector.load %arg1[%c0_1, %c0_2] : memref<56x1600xbf16, #tpu.memory_space<vmem>>, vector<56x1600xbf16>
    %cst = arith.constant dense<0.000000e+00> : vector<56x128xf32>
    %2 = tpu.matmul %1, %0, %cst {dimension_numbers = #tpu.dot_dimension_numbers<[1], [0], [0], [1], [0, 0, 1, 1], [], []>} : vector<56x1600xbf16>, vector<1600x128xbf16>, vector<56x128xf32> -> vector<56x128xf32>
    %c0_3 = arith.constant 0 : index
    %c0_4 = arith.constant 0 : index
    %3 = vector.load %arg2[%c0_3, %c0_4] : memref<56x1600xbf16, #tpu.memory_space<vmem>>, vector<56x1600xbf16>
    %cst_5 = arith.constant dense<0.000000e+00> : vector<56x128xf32>
    %4 = tpu.matmul %3, %0, %cst_5 {dimension_numbers = #tpu.dot_dimension_numbers<[1], [0], [0], [1], [0, 0, 1, 1], [], []>} : vector<56x1600xbf16>, vector<1600x128xbf16>, vector<56x128xf32> -> vector<56x128xf32>
    %5 = arith.maximumf %2, %4 : vector<56x128xf32>
    %c0_6 = arith.constant 0 : index
    %c0_7 = arith.constant 0 : index
    %6 = vector.load %arg3[%c0_6, %c0_7] : memref<56x1600xbf16, #tpu.memory_space<vmem>>, vector<56x1600xbf16>
    %cst_8 = arith.constant dense<0.000000e+00> : vector<56x128xf32>
    %7 = tpu.matmul %6, %0, %cst_8 {dimension_numbers = #tpu.dot_dimension_numbers<[1], [0], [0], [1], [0, 0, 1, 1], [], []>} : vector<56x1600xbf16>, vector<1600x128xbf16>, vector<56x128xf32> -> vector<56x128xf32>
    %8 = arith.maximumf %5, %7 : vector<56x128xf32>
    %c0_9 = arith.constant 0 : index
    %c0_10 = arith.constant 0 : index
    %9 = vector.load %arg4[%c0_9, %c0_10] : memref<56x1600xbf16, #tpu.memory_space<vmem>>, vector<56x1600xbf16>
    %cst_11 = arith.constant dense<0.000000e+00> : vector<56x128xf32>
    %10 = tpu.matmul %9, %0, %cst_11 {dimension_numbers = #tpu.dot_dimension_numbers<[1], [0], [0], [1], [0, 0, 1, 1], [], []>} : vector<56x1600xbf16>, vector<1600x128xbf16>, vector<56x128xf32> -> vector<56x128xf32>
    %11 = arith.maximumf %8, %10 : vector<56x128xf32>
    %c0_12 = arith.constant 0 : index
    %c0_13 = arith.constant 0 : index
    %12 = vector.load %arg6[%c0_12, %c0_13] : memref<1x128xf32, #tpu.memory_space<vmem>>, vector<1x128xf32>
    %13 = vector.broadcast %12 : vector<1x128xf32> to vector<56x128xf32>
    %14 = arith.addf %11, %13 : vector<56x128xf32>
    %cst_14 = arith.constant 2.000000e-01 : f32
    %15 = vector.broadcast %cst_14 : f32 to vector<56x128xf32>
    %16 = arith.mulf %15, %14 : vector<56x128xf32>
    %17 = arith.maximumf %14, %16 : vector<56x128xf32>
    %18 = arith.truncf %17 : vector<56x128xf32> to vector<56x128xbf16>
    %c0_15 = arith.constant 0 : index
    %c0_16 = arith.constant 0 : index
    %19 = vector.load %arg7[%c0_15, %c0_16] : memref<56x128xbf16, #tpu.memory_space<vmem>>, vector<56x128xbf16>
    tpu.vector_store %arg7[%c0_15, %c0_16], %18 {strides = array<i32>} : memref<56x128xbf16, #tpu.memory_space<vmem>>, vector<56x128xbf16>,
    return
  }
  func.func @transform_0(%arg0: i32) -> (i32, i32) {
    %c0_i32 = arith.constant 0 : i32
    %c0_i32_0 = arith.constant 0 : i32
    return %arg0, %c0_i32 : i32, i32
  }
  func.func @transform_1(%arg0: i32) -> (i32, i32) {
    %c0_i32 = arith.constant 0 : i32
    %c0_i32_0 = arith.constant 0 : i32
    return %arg0, %c0_i32 : i32, i32
  }
  func.func @transform_2(%arg0: i32) -> (i32, i32) {
    %c0_i32 = arith.constant 0 : i32
    %c0_i32_0 = arith.constant 0 : i32
    return %arg0, %c0_i32 : i32, i32
  }
  func.func @transform_3(%arg0: i32) -> (i32, i32) {
    %c0_i32 = arith.constant 0 : i32
    %c0_i32_0 = arith.constant 0 : i32
    return %arg0, %c0_i32 : i32, i32
  }
  func.func @transform_4(%arg0: i32) -> (i32, i32) {
    %c0_i32 = arith.constant 0 : i32
    %c0_i32_0 = arith.constant 0 : i32
    %c0_i32_1 = arith.constant 0 : i32
    return %c0_i32, %c0_i32_0 : i32, i32
  }
  func.func @transform_5(%arg0: i32) -> (i32, i32) {
    %c0_i32 = arith.constant 0 : i32
    %c0_i32_0 = arith.constant 0 : i32
    %c0_i32_1 = arith.constant 0 : i32
    return %c0_i32, %c0_i32_0 : i32, i32
  }
  func.func @transform_6(%arg0: i32) -> (i32, i32) {
    %c0_i32 = arith.constant 0 : i32
    %c0_i32_0 = arith.constant 0 : i32
    return %arg0, %c0_i32 : i32, i32
  }
}

module attributes {stable_mosaic.version = 11 : i64} {
  func.func @_conv_fc_kernel(%arg0: i32, %arg1: memref<8x3200xbf16, #tpu.memory_space<vmem>>, %arg2: memref<3200x256xbf16, #tpu.memory_space<vmem>>, %arg3: memref<1x256xf32, #tpu.memory_space<vmem>>, %arg4: memref<256x10xf32, #tpu.memory_space<vmem>>, %arg5: memref<1x10xf32, #tpu.memory_space<vmem>>, %arg6: memref<8x256xf32, #tpu.memory_space<vmem>>, %arg7: memref<8x10xf32, #tpu.memory_space<vmem>>) attributes {dimension_semantics = [#tpu.dimension_semantics<arbitrary>], iteration_bounds = array<i64: 1>, scalar_prefetch = 0 : i64, scratch_operands = 0 : i64, tpu.core_type = #tpu.core_type<tc>, window_params = [{pipeline_mode = #tpu.pipeline_mode<synchronous>, transform_indices = @transform_0, window_bounds = array<i64: 8, 3200>}, {pipeline_mode = #tpu.pipeline_mode<synchronous>, transform_indices = @transform_1, window_bounds = array<i64: 3200, 256>}, {pipeline_mode = #tpu.pipeline_mode<synchronous>, transform_indices = @transform_2, window_bounds = array<i64: 1, 256>}, {pipeline_mode = #tpu.pipeline_mode<synchronous>, transform_indices = @transform_3, window_bounds = array<i64: 256, 10>}, {pipeline_mode = #tpu.pipeline_mode<synchronous>, transform_indices = @transform_4, window_bounds = array<i64: 1, 10>}, {pipeline_mode = #tpu.pipeline_mode<synchronous>, transform_indices = @transform_5, window_bounds = array<i64: 8, 256>}, {pipeline_mode = #tpu.pipeline_mode<synchronous>, transform_indices = @transform_6, window_bounds = array<i64: 8, 10>}]} {
    %c0 = arith.constant 0 : index
    %c0_0 = arith.constant 0 : index
    %0 = vector.load %arg1[%c0, %c0_0] : memref<8x3200xbf16, #tpu.memory_space<vmem>>, vector<8x3200xbf16>
    %c0_1 = arith.constant 0 : index
    %c0_2 = arith.constant 0 : index
    %1 = vector.load %arg2[%c0_1, %c0_2] : memref<3200x256xbf16, #tpu.memory_space<vmem>>, vector<3200x256xbf16>
    %cst = arith.constant dense<0.000000e+00> : vector<8x256xf32>
    %2 = tpu.matmul %0, %1, %cst {dimension_numbers = #tpu.dot_dimension_numbers<[1], [0], [0], [1], [0, 0, 1, 1], [], []>} : vector<8x3200xbf16>, vector<3200x256xbf16>, vector<8x256xf32> -> vector<8x256xf32>
    %c0_3 = arith.constant 0 : index
    %c0_4 = arith.constant 0 : index
    %3 = vector.load %arg3[%c0_3, %c0_4] : memref<1x256xf32, #tpu.memory_space<vmem>>, vector<1x256xf32>
    %4 = vector.broadcast %3 : vector<1x256xf32> to vector<8x256xf32>
    %5 = arith.addf %2, %4 : vector<8x256xf32>
    %cst_5 = arith.constant 2.000000e-01 : f32
    %6 = vector.broadcast %cst_5 : f32 to vector<8x256xf32>
    %7 = arith.mulf %6, %5 : vector<8x256xf32>
    %8 = arith.maximumf %5, %7 : vector<8x256xf32>
    %c0_6 = arith.constant 0 : index
    %c0_7 = arith.constant 0 : index
    %9 = vector.load %arg6[%c0_6, %c0_7] : memref<8x256xf32, #tpu.memory_space<vmem>>, vector<8x256xf32>
    tpu.vector_store %arg6[%c0_6, %c0_7], %8 {strides = array<i32>} : memref<8x256xf32, #tpu.memory_space<vmem>>, vector<8x256xf32>,
    %c0_8 = arith.constant 0 : index
    %c0_9 = arith.constant 0 : index
    %10 = vector.load %arg4[%c0_8, %c0_9] : memref<256x10xf32, #tpu.memory_space<vmem>>, vector<256x10xf32>
    %cst_10 = arith.constant dense<0.000000e+00> : vector<8x10xf32>
    %11 = tpu.matmul %8, %10, %cst_10 {dimension_numbers = #tpu.dot_dimension_numbers<[1], [0], [0], [1], [0, 0, 1, 1], [], []>} : vector<8x256xf32>, vector<256x10xf32>, vector<8x10xf32> -> vector<8x10xf32>
    %c0_11 = arith.constant 0 : index
    %c0_12 = arith.constant 0 : index
    %12 = vector.load %arg5[%c0_11, %c0_12] : memref<1x10xf32, #tpu.memory_space<vmem>>, vector<1x10xf32>
    %13 = vector.broadcast %12 : vector<1x10xf32> to vector<8x10xf32>
    %14 = arith.addf %11, %13 : vector<8x10xf32>
    %c0_13 = arith.constant 0 : index
    %c0_14 = arith.constant 0 : index
    %15 = vector.load %arg7[%c0_13, %c0_14] : memref<8x10xf32, #tpu.memory_space<vmem>>, vector<8x10xf32>
    tpu.vector_store %arg7[%c0_13, %c0_14], %14 {strides = array<i32>} : memref<8x10xf32, #tpu.memory_space<vmem>>, vector<8x10xf32>,
    return
  }
  func.func @transform_0(%arg0: i32) -> (i32, i32) {
    %c0_i32 = arith.constant 0 : i32
    %c0_i32_0 = arith.constant 0 : i32
    %c0_i32_1 = arith.constant 0 : i32
    return %c0_i32, %c0_i32_0 : i32, i32
  }
  func.func @transform_1(%arg0: i32) -> (i32, i32) {
    %c0_i32 = arith.constant 0 : i32
    %c0_i32_0 = arith.constant 0 : i32
    %c0_i32_1 = arith.constant 0 : i32
    return %c0_i32, %c0_i32_0 : i32, i32
  }
  func.func @transform_2(%arg0: i32) -> (i32, i32) {
    %c0_i32 = arith.constant 0 : i32
    %c0_i32_0 = arith.constant 0 : i32
    %c0_i32_1 = arith.constant 0 : i32
    return %c0_i32, %c0_i32_0 : i32, i32
  }
  func.func @transform_3(%arg0: i32) -> (i32, i32) {
    %c0_i32 = arith.constant 0 : i32
    %c0_i32_0 = arith.constant 0 : i32
    %c0_i32_1 = arith.constant 0 : i32
    return %c0_i32, %c0_i32_0 : i32, i32
  }
  func.func @transform_4(%arg0: i32) -> (i32, i32) {
    %c0_i32 = arith.constant 0 : i32
    %c0_i32_0 = arith.constant 0 : i32
    %c0_i32_1 = arith.constant 0 : i32
    return %c0_i32, %c0_i32_0 : i32, i32
  }
  func.func @transform_5(%arg0: i32) -> (i32, i32) {
    %c0_i32 = arith.constant 0 : i32
    %c0_i32_0 = arith.constant 0 : i32
    %c0_i32_1 = arith.constant 0 : i32
    return %c0_i32, %c0_i32_0 : i32, i32
  }
  func.func @transform_6(%arg0: i32) -> (i32, i32) {
    %c0_i32 = arith.constant 0 : i32
    %c0_i32_0 = arith.constant 0 : i32
    %c0_i32_1 = arith.constant 0 : i32
    return %c0_i32, %c0_i32_0 : i32, i32
  }
}

</mosaic_0001>

<bundles_post_ra>
// kernel: _lambda_.3
= control target key start
LH: loop header
LB: loop body
LE: loop exit
PB: predicated region body
PF: predicated region fallthrough
CT: control target
= control target key end

     0   :  { %s2965_s4 = inlined_call_operand.vmem [shape: bf16[128,128], index: 4, kind: input, shape index: {}]   ;;  %s2966_s0 = inlined_call_operand.vmem [shape: bf16[392,128], index: 0, kind: input, shape index: {}]   ;;  %s2967_s1 = inlined_call_operand.vmem [shape: bf16[392,128], index: 1, kind: input, shape index: {}]   ;;  %s2968_s2 = inlined_call_operand.vmem [shape: bf16[392,128], index: 2, kind: input, shape index: {}]   ;;  %s2969_s3 = inlined_call_operand.vmem [shape: bf16[392,128], index: 3, kind: input, shape index: {}]   ;;  %s2970_s5 = inlined_call_operand.vmem [shape: f32[1,128], index: 5, kind: input, shape index: {}]   ;;  %s2971_s6 = inlined_call_operand.vmem [shape: bf16[392,128], index: 6, kind: output, shape index: {}]  }
   0x1   :  { %v2230_v0 = vld [vmem:[%s2965_s4 + $0x38] sm:$0xff]  ;;  %v2229_v1 = vld [vmem:[%s2965_s4 + $0x30] sm:$0xff]  ;;  %v2228_v2 = vld [vmem:[%s2965_s4 + $0x28] sm:$0xff] }
   0x2   :  { %284 = vmatpush.bf16.msra.mxu0 %v2230_v0  ;;  %614 = vmatpush.bf16.msra.mxu1 %v2230_v0  ;;  %v2227_v3 = vld [vmem:[%s2965_s4 + $0x20] sm:$0xff]  ;;  %v2226_v4 = vld [vmem:[%s2965_s4 + $0x18] sm:$0xff]  ;;  %v2225_v5 = vld [vmem:[%s2965_s4 + $0x10] sm:$0xff] }
   0x3   :  { %993 = vmatpush.bf16.msra.mxu2 %v2230_v0  ;;  %1372 = vmatpush.bf16.msra.mxu3 %v2230_v0  ;;  %v2224_v6 = vld [vmem:[%s2965_s4 + $0x8] sm:$0xff]  ;;  %v2223_v7 = vld [vmem:[%s2965_s4] sm:$0xff]  ;;  %v2233_v16 = vld [vmem:[%s2966_s0 + $0x10] sm:$0xff] }
   0x4   :  { %v2231_v8 = vld [vmem:[%s2966_s0] sm:$0xff]  ;;  %v2232_v12 = vld [vmem:[%s2966_s0 + $0x8] sm:$0xff]  ;;  %v2257_v17 = vld [vmem:[%s2967_s1 + $0x10] sm:$0xff] }
   0x5   :  { %v2255_v9 = vld [vmem:[%s2967_s1] sm:$0xff]  ;;  %v2256_v13 = vld [vmem:[%s2967_s1 + $0x8] sm:$0xff]  ;;  %v2281_v18 = vld [vmem:[%s2968_s2 + $0x10] sm:$0xff] }
   0x6   :  { %285 = vmatpush.bf16.msra.mxu0 %v2229_v1  ;;  %615 = vmatpush.bf16.msra.mxu1 %v2229_v1  ;;  %v2279_v10 = vld [vmem:[%s2968_s2] sm:$0xff]  ;;  %v2280_v14 = vld [vmem:[%s2968_s2 + $0x8] sm:$0xff]  ;;  %v2305_v19 = vld [vmem:[%s2969_s3 + $0x10] sm:$0xff] }
   0x7   :  { %994 = vmatpush.bf16.msra.mxu2 %v2229_v1  ;;  %1373 = vmatpush.bf16.msra.mxu3 %v2229_v1  ;;  %v2303_v11 = vld [vmem:[%s2969_s3] sm:$0xff]  ;;  %v2304_v15 = vld [vmem:[%s2969_s3 + $0x8] sm:$0xff]  ;;  %v2234_v20 = vld [vmem:[%s2966_s0 + $0x18] sm:$0xff] }
   0x8   :  { %v2258_v21 = vld [vmem:[%s2967_s1 + $0x18] sm:$0xff]  ;;  %v2235_v24 = vld [vmem:[%s2966_s0 + $0x20] sm:$0xff]  ;;  %v2236_v28 = vld [vmem:[%s2966_s0 + $0x28] sm:$0xff] }
   0x9   :  { %v2282_v22 = vld [vmem:[%s2968_s2 + $0x18] sm:$0xff]  ;;  %v2259_v25 = vld [vmem:[%s2967_s1 + $0x20] sm:$0xff]  ;;  %v2260_v29 = vld [vmem:[%s2967_s1 + $0x28] sm:$0xff] }
   0xa   :  { %286 = vmatpush.bf16.msra.mxu0 %v2228_v2  ;;  %616 = vmatpush.bf16.msra.mxu1 %v2228_v2  ;;  %v2306_v23 = vld [vmem:[%s2969_s3 + $0x18] sm:$0xff]  ;;  %v2283_v26 = vld [vmem:[%s2968_s2 + $0x20] sm:$0xff]  ;;  %v2284_v30 = vld [vmem:[%s2968_s2 + $0x28] sm:$0xff] }
   0xb   :  { %995 = vmatpush.bf16.msra.mxu2 %v2228_v2  ;;  %1374 = vmatpush.bf16.msra.mxu3 %v2228_v2  ;;  %v2307_v27 = vld [vmem:[%s2969_s3 + $0x20] sm:$0xff]  ;;  %v2308_v31 = vld [vmem:[%s2969_s3 + $0x28] sm:$0xff]  ;;  %v2237_v32 = vld [vmem:[%s2966_s0 + $0x30] sm:$0xff] }
   0xc   :  { %v2261_v33 = vld [vmem:[%s2967_s1 + $0x30] sm:$0xff]  ;;  %v2238_v36 = vld [vmem:[%s2966_s0 + $0x38] sm:$0xff]  ;;  %v2239_v40 = vld [vmem:[%s2966_s0 + $0x40] sm:$0xff] }
   0xd   :  { %v2285_v34 = vld [vmem:[%s2968_s2 + $0x30] sm:$0xff]  ;;  %v2262_v37 = vld [vmem:[%s2967_s1 + $0x38] sm:$0xff]  ;;  %v2263_v41 = vld [vmem:[%s2967_s1 + $0x40] sm:$0xff] }
   0xe   :  { %287 = vmatpush.bf16.msra.mxu0 %v2227_v3  ;;  %617 = vmatpush.bf16.msra.mxu1 %v2227_v3  ;;  %v2309_v35 = vld [vmem:[%s2969_s3 + $0x30] sm:$0xff]  ;;  %v2286_v38 = vld [vmem:[%s2968_s2 + $0x38] sm:$0xff]  ;;  %v2287_v44 = vld [vmem:[%s2968_s2 + $0x40] sm:$0xff] }
   0xf   :  { %996 = vmatpush.bf16.msra.mxu2 %v2227_v3  ;;  %1375 = vmatpush.bf16.msra.mxu3 %v2227_v3  ;;  %v2310_v39 = vld [vmem:[%s2969_s3 + $0x38] sm:$0xff]  ;;  %v2311_v45 = vld [vmem:[%s2969_s3 + $0x40] sm:$0xff]  ;;  %v2240_v57 = vld [vmem:[%s2966_s0 + $0x48] sm:$0xff] }
  0x10   :  { %v2642_v53 = vld [vmem:[%s2970_s5] ss:$0 sm:$0xff]  ;;  %v2264_v58 = vld [vmem:[%s2967_s1 + $0x48] sm:$0xff] }
  0x11   :  { %v2288_v63 = vld [vmem:[%s2968_s2 + $0x48] sm:$0xff] }
  0x12   :  { %288 = vmatpush.bf16.msra.mxu0 %v2226_v4  ;;  %618 = vmatpush.bf16.msra.mxu1 %v2226_v4  ;;  %v2312_v0 = vld [vmem:[%s2969_s3 + $0x48] sm:$0xff] }
  0x13   :  { %997 = vmatpush.bf16.msra.mxu2 %v2226_v4  ;;  %1376 = vmatpush.bf16.msra.mxu3 %v2226_v4 }
  0x16   :  { %289 = vmatpush.bf16.msra.mxu0 %v2225_v5  ;;  %619 = vmatpush.bf16.msra.mxu1 %v2225_v5 }
  0x17   :  { %998 = vmatpush.bf16.msra.mxu2 %v2225_v5  ;;  %1377 = vmatpush.bf16.msra.mxu3 %v2225_v5 }
  0x1a   :  { %290 = vmatpush.bf16.msra.mxu0 %v2224_v6  ;;  %620 = vmatpush.bf16.msra.mxu1 %v2224_v6 }
  0x1b   :  { %999 = vmatpush.bf16.msra.mxu2 %v2224_v6  ;;  %1378 = vmatpush.bf16.msra.mxu3 %v2224_v6 }
  0x1e   :  { %291 = vmatpush.bf16.msra.mxu0 %v2223_v7  ;;  %621 = vmatpush.bf16.msra.mxu1 %v2223_v7 }
  0x1f   :  { %1000 = vmatpush.bf16.msra.mxu2 %v2223_v7  ;;  %1379 = vmatpush.bf16.msra.mxu3 %v2223_v7 }
  0x21   :  { %292 = vmatmul.bf16.vlgmr.msra.gmra.mxu0 %v2231_v8  ;;  %622 = vmatmul.bf16.vlgmr.msra.gmra.mxu1 %v2255_v9 }
  0x22   :  { %1001 = vmatmul.bf16.vlgmr.msra.gmra.mxu2 %v2279_v10  ;;  %1380 = vmatmul.bf16.vlgmr.msra.gmra.mxu3 %v2303_v11 }
  0x31   :  { %297 = vmatmul.bf16.gmra.mxu0 %v2232_v12  ;;  %627 = vmatmul.bf16.gmra.mxu1 %v2256_v13 }
  0x32   :  { %1006 = vmatmul.bf16.gmra.mxu2 %v2280_v14  ;;  %1385 = vmatmul.bf16.gmra.mxu3 %v2304_v15 }
  0x41   :  { %302 = vmatmul.bf16.gmra.mxu0 %v2233_v16  ;;  %632 = vmatmul.bf16.gmra.mxu1 %v2257_v17 }
  0x42   :  { %1011 = vmatmul.bf16.gmra.mxu2 %v2281_v18  ;;  %1390 = vmatmul.bf16.gmra.mxu3 %v2305_v19  ;;  %v2241_v18 = vld [vmem:[%s2966_s0 + $0x50] sm:$0xff] }
  0x43   :  { %v2265_v19 = vld [vmem:[%s2967_s1 + $0x50] sm:$0xff] }
  0x51   :  { %307 = vmatmul.bf16.gmra.mxu0 %v2234_v20  ;;  %637 = vmatmul.bf16.gmra.mxu1 %v2258_v21 }
  0x52   :  { %1016 = vmatmul.bf16.gmra.mxu2 %v2282_v22  ;;  %1395 = vmatmul.bf16.gmra.mxu3 %v2306_v23 }
  0x61   :  { %312 = vmatmul.bf16.gmra.mxu0 %v2235_v24  ;;  %642 = vmatmul.bf16.gmra.mxu1 %v2259_v25  ;;  %v2289_v24 = vld [vmem:[%s2968_s2 + $0x50] sm:$0xff] }
  0x62   :  { %1021 = vmatmul.bf16.gmra.mxu2 %v2283_v26  ;;  %1400 = vmatmul.bf16.gmra.mxu3 %v2307_v27  ;;  %v2313_v25 = vld [vmem:[%s2969_s3 + $0x50] sm:$0xff] }
  0x71   :  { %317 = vmatmul.bf16.gmra.mxu0 %v2236_v28  ;;  %647 = vmatmul.bf16.gmra.mxu1 %v2260_v29 }
  0x72   :  { %1026 = vmatmul.bf16.gmra.mxu2 %v2284_v30  ;;  %1405 = vmatmul.bf16.gmra.mxu3 %v2308_v31 }
  0x81   :  { %322 = vmatmul.bf16.gmra.mxu0 %v2237_v32  ;;  %652 = vmatmul.bf16.gmra.mxu1 %v2261_v33 }
  0x82   :  { %1031 = vmatmul.bf16.gmra.mxu2 %v2285_v34  ;;  %1410 = vmatmul.bf16.gmra.mxu3 %v2309_v35 }
  0x91   :  { %327 = vmatmul.bf16.gmra.mxu0 %v2238_v36  ;;  %657 = vmatmul.bf16.gmra.mxu1 %v2262_v37 }
  0x92   :  { %1036 = vmatmul.bf16.gmra.mxu2 %v2286_v38  ;;  %1415 = vmatmul.bf16.gmra.mxu3 %v2310_v39 }
  0x9e   :  { %v293_v42 = vpop.f32.mrf.mxu0  ;;  %v623_v43 = vpop.f32.mrf.mxu1 }
  0x9f   :  { %v747_v46 = vmax.f32 %v293_v42, %v623_v43  ;;  %v2242_v43 = vld [vmem:[%s2966_s0 + $0x58] sm:$0xff] }
  0xa1   :  { %332 = vmatmul.bf16.gmra.mxu0 %v2239_v40  ;;  %662 = vmatmul.bf16.gmra.mxu1 %v2263_v41 }
  0xa2   :  { %1041 = vmatmul.bf16.gmra.mxu2 %v2287_v44  ;;  %1420 = vmatmul.bf16.gmra.mxu3 %v2311_v45  ;;  %v2266_v44 = vld [vmem:[%s2967_s1 + $0x58] sm:$0xff] }
  0xa5   :  { %v1002_v47 = vpop.f32.mrf.mxu2  ;;  %v1381_v48 = vpop.f32.mrf.mxu3 }
  0xa6   :  { %v1126_v49 = vmax.f32 %v747_v46, %v1002_v47  ;;  %v295_v50 = vpop.f32.mrf.mxu0  ;;  %v625_v51 = vpop.f32.mrf.mxu1 }
  0xa7   :  { %v748_v54 = vmax.f32 %v295_v50, %v625_v51  ;;  %v2314_v50 = vld [vmem:[%s2969_s3 + $0x58] sm:$0xff] }
  0xa8   :  { %v1505_v52 = vmax.f32 %v1126_v49, %v1381_v48  ;;  %v2290_v49 = vld [vmem:[%s2968_s2 + $0x58] sm:$0xff] }
  0xaa   :  { %v1558_v59 = vadd.f32 %v2642_v53, %v1505_v52 }
  0xac   :  { %v1607_v2 = vmul.f32 0.2, %v1558_v59 }
  0xad   :  { %v1004_v55 = vpop.f32.mrf.mxu2  ;;  %v1383_v56 = vpop.f32.mrf.mxu3 }
  0xae   :  { %v1127_v60 = vmax.f32 %v748_v54, %v1004_v55  ;;  %v298_v61 = vpop.f32.mrf.mxu0  ;;  %v628_v62 = vpop.f32.mrf.mxu1  ;;  %v1656_v8 = vmax.f32 %v1558_v59, %v1607_v2 }
  0xaf   :  { %v749_v4 = vmax.f32 %v298_v61, %v628_v62 }
  0xb0   :  { %v1506_v1 = vmax.f32 %v1127_v60, %v1383_v56 }
  0xb1   :  { %337 = vmatmul.bf16.gmra.mxu0 %v2240_v57  ;;  %667 = vmatmul.bf16.gmra.mxu1 %v2264_v58 }
  0xb2   :  { %v1559_v3 = vadd.f32 %v2642_v53, %v1506_v1  ;;  %1046 = vmatmul.bf16.gmra.mxu2 %v2288_v63  ;;  %1425 = vmatmul.bf16.gmra.mxu3 %v2312_v0 }
  0xb4   :  { %v1608_v5 = vmul.f32 0.2, %v1559_v3 }
  0xb5   :  { %v1007_v6 = vpop.f32.mrf.mxu2  ;;  %v1386_v7 = vpop.f32.mrf.mxu3 }
  0xb6   :  { %v1657_v9 = vmax.f32 %v1559_v3, %v1608_v5  ;;  %v1128_v10 = vmax.f32 %v749_v4, %v1007_v6  ;;  %v300_v11 = vpop.f32.mrf.mxu0  ;;  %v630_v12 = vpop.f32.mrf.mxu1  ;;  %v2243_v5 = vld [vmem:[%s2966_s0 + $0x60] sm:$0xff] }
  0xb7   :  { %v750_v15 = vmax.f32 %v300_v11, %v630_v12  ;;  %v2267_v6 = vld [vmem:[%s2967_s1 + $0x60] sm:$0xff] }
  0xb8   :  { %v2330_v13 = vpack.c.bf16 %v1657_v9, %v1656_v8  ;;  %v1507_v14 = vmax.f32 %v1128_v10, %v1386_v7  ;;  %v2291_v11 = vld [vmem:[%s2968_s2 + $0x60] sm:$0xff] }
  0xb9   :  { %v2315_v12 = vld [vmem:[%s2969_s3 + $0x60] sm:$0xff] }
  0xba   :  { %2331 = vst [vmem:[%s2971_s6] sm:$0xff] %v2330_v13   ;;  %v1560_v20 = vadd.f32 %v2642_v53, %v1507_v14 }
  0xbc   :  { %v1609_v27 = vmul.f32 0.2, %v1560_v20 }
  0xbd   :  { %v1009_v16 = vpop.f32.mrf.mxu2  ;;  %v1388_v17 = vpop.f32.mrf.mxu3 }
  0xbe   :  { %v1129_v21 = vmax.f32 %v750_v15, %v1009_v16  ;;  %v303_v22 = vpop.f32.mrf.mxu0  ;;  %v633_v23 = vpop.f32.mrf.mxu1  ;;  %v1658_v33 = vmax.f32 %v1560_v20, %v1609_v27 }
  0xbf   :  { %v751_v29 = vmax.f32 %v303_v22, %v633_v23 }
  0xc0   :  { %v1508_v26 = vmax.f32 %v1129_v21, %v1388_v17 }
  0xc1   :  { %342 = vmatmul.bf16.gmra.mxu0 %v2241_v18  ;;  %672 = vmatmul.bf16.gmra.mxu1 %v2265_v19 }
  0xc2   :  { %v1561_v28 = vadd.f32 %v2642_v53, %v1508_v26  ;;  %1051 = vmatmul.bf16.gmra.mxu2 %v2289_v24  ;;  %1430 = vmatmul.bf16.gmra.mxu3 %v2313_v25 }
  0xc4   :  { %v1610_v30 = vmul.f32 0.2, %v1561_v28 }
  0xc5   :  { %v1012_v31 = vpop.f32.mrf.mxu2  ;;  %v1391_v32 = vpop.f32.mrf.mxu3 }
  0xc6   :  { %v1659_v34 = vmax.f32 %v1561_v28, %v1610_v30  ;;  %v1130_v35 = vmax.f32 %v751_v29, %v1012_v31  ;;  %v305_v36 = vpop.f32.mrf.mxu0  ;;  %v635_v37 = vpop.f32.mrf.mxu1  ;;  %v2244_v30 = vld [vmem:[%s2966_s0 + $0x68] sm:$0xff] }
  0xc7   :  { %v752_v40 = vmax.f32 %v305_v36, %v635_v37  ;;  %v2268_v31 = vld [vmem:[%s2967_s1 + $0x68] sm:$0xff] }
  0xc8   :  { %v2335_v38 = vpack.c.bf16 %v1659_v34, %v1658_v33  ;;  %v1509_v39 = vmax.f32 %v1130_v35, %v1391_v32  ;;  %v2292_v36 = vld [vmem:[%s2968_s2 + $0x68] sm:$0xff] }
  0xc9   :  { %v2316_v37 = vld [vmem:[%s2969_s3 + $0x68] sm:$0xff] }
  0xca   :  { %2447 = vst [vmem:[%s2971_s6 + $0x8] sm:$0xff] %v2335_v38   ;;  %v1562_v45 = vadd.f32 %v2642_v53, %v1509_v39 }
  0xcc   :  { %v1611_v52 = vmul.f32 0.2, %v1562_v45 }
  0xcd   :  { %v1014_v41 = vpop.f32.mrf.mxu2  ;;  %v1393_v42 = vpop.f32.mrf.mxu3 }
  0xce   :  { %v1131_v46 = vmax.f32 %v752_v40, %v1014_v41  ;;  %v308_v47 = vpop.f32.mrf.mxu0  ;;  %v638_v48 = vpop.f32.mrf.mxu1  ;;  %v1660_v59 = vmax.f32 %v1562_v45, %v1611_v52 }
  0xcf   :  { %v753_v55 = vmax.f32 %v308_v47, %v638_v48 }
  0xd0   :  { %v1510_v51 = vmax.f32 %v1131_v46, %v1393_v42 }
  0xd1   :  { %347 = vmatmul.bf16.gmra.mxu0 %v2242_v43  ;;  %677 = vmatmul.bf16.gmra.mxu1 %v2266_v44 }
  0xd2   :  { %v1563_v54 = vadd.f32 %v2642_v53, %v1510_v51  ;;  %1056 = vmatmul.bf16.gmra.mxu2 %v2290_v49  ;;  %1435 = vmatmul.bf16.gmra.mxu3 %v2314_v50 }
  0xd4   :  { %v1612_v56 = vmul.f32 0.2, %v1563_v54 }
  0xd5   :  { %v1017_v57 = vpop.f32.mrf.mxu2  ;;  %v1396_v58 = vpop.f32.mrf.mxu3 }
  0xd6   :  { %v1661_v60 = vmax.f32 %v1563_v54, %v1612_v56  ;;  %v1132_v61 = vmax.f32 %v753_v55, %v1017_v57  ;;  %v310_v62 = vpop.f32.mrf.mxu0  ;;  %v640_v63 = vpop.f32.mrf.mxu1  ;;  %v2245_v56 = vld [vmem:[%s2966_s0 + $0x70] sm:$0xff] }
  0xd7   :  { %v754_v2 = vmax.f32 %v310_v62, %v640_v63  ;;  %v2269_v57 = vld [vmem:[%s2967_s1 + $0x70] sm:$0xff] }
  0xd8   :  { %v2340_v0 = vpack.c.bf16 %v1661_v60, %v1660_v59  ;;  %v1511_v1 = vmax.f32 %v1132_v61, %v1396_v58  ;;  %v2293_v62 = vld [vmem:[%s2968_s2 + $0x70] sm:$0xff] }
  0xd9   :  { %v2317_v63 = vld [vmem:[%s2969_s3 + $0x70] sm:$0xff] }
  0xda   :  { %2448 = vst [vmem:[%s2971_s6 + $0x10] sm:$0xff] %v2340_v0   ;;  %v1564_v7 = vadd.f32 %v2642_v53, %v1511_v1 }
  0xdc   :  { %v1613_v14 = vmul.f32 0.2, %v1564_v7 }
  0xdd   :  { %v1019_v3 = vpop.f32.mrf.mxu2  ;;  %v1398_v4 = vpop.f32.mrf.mxu3 }
  0xde   :  { %v1133_v8 = vmax.f32 %v754_v2, %v1019_v3  ;;  %v313_v9 = vpop.f32.mrf.mxu0  ;;  %v643_v10 = vpop.f32.mrf.mxu1  ;;  %v1662_v20 = vmax.f32 %v1564_v7, %v1613_v14 }
  0xdf   :  { %v755_v16 = vmax.f32 %v313_v9, %v643_v10 }
  0xe0   :  { %v1512_v13 = vmax.f32 %v1133_v8, %v1398_v4 }
  0xe1   :  { %352 = vmatmul.bf16.gmra.mxu0 %v2243_v5  ;;  %682 = vmatmul.bf16.gmra.mxu1 %v2267_v6 }
  0xe2   :  { %v1565_v15 = vadd.f32 %v2642_v53, %v1512_v13  ;;  %1061 = vmatmul.bf16.gmra.mxu2 %v2291_v11  ;;  %1440 = vmatmul.bf16.gmra.mxu3 %v2315_v12 }
  0xe4   :  { %v1614_v17 = vmul.f32 0.2, %v1565_v15 }
  0xe5   :  { %v1022_v18 = vpop.f32.mrf.mxu2  ;;  %v1401_v19 = vpop.f32.mrf.mxu3 }
  0xe6   :  { %v1663_v21 = vmax.f32 %v1565_v15, %v1614_v17  ;;  %v1134_v22 = vmax.f32 %v755_v16, %v1022_v18  ;;  %v315_v23 = vpop.f32.mrf.mxu0  ;;  %v645_v24 = vpop.f32.mrf.mxu1  ;;  %v2246_v17 = vld [vmem:[%s2966_s0 + $0x78] sm:$0xff] }
  0xe7   :  { %v756_v27 = vmax.f32 %v315_v23, %v645_v24  ;;  %v2270_v18 = vld [vmem:[%s2967_s1 + $0x78] sm:$0xff] }
  0xe8   :  { %v2345_v25 = vpack.c.bf16 %v1663_v21, %v1662_v20  ;;  %v1513_v26 = vmax.f32 %v1134_v22, %v1401_v19  ;;  %v2294_v23 = vld [vmem:[%s2968_s2 + $0x78] sm:$0xff] }
  0xe9   :  { %v2318_v24 = vld [vmem:[%s2969_s3 + $0x78] sm:$0xff] }
  0xea   :  { %2449 = vst [vmem:[%s2971_s6 + $0x18] sm:$0xff] %v2345_v25   ;;  %v1566_v32 = vadd.f32 %v2642_v53, %v1513_v26 }
  0xec   :  { %v1615_v39 = vmul.f32 0.2, %v1566_v32 }
  0xed   :  { %v1024_v28 = vpop.f32.mrf.mxu2  ;;  %v1403_v29 = vpop.f32.mrf.mxu3 }
  0xee   :  { %v1135_v33 = vmax.f32 %v756_v27, %v1024_v28  ;;  %v318_v34 = vpop.f32.mrf.mxu0  ;;  %v648_v35 = vpop.f32.mrf.mxu1  ;;  %v1664_v45 = vmax.f32 %v1566_v32, %v1615_v39 }
  0xef   :  { %v757_v41 = vmax.f32 %v318_v34, %v648_v35 }
  0xf0   :  { %v1514_v38 = vmax.f32 %v1135_v33, %v1403_v29 }
  0xf1   :  { %357 = vmatmul.bf16.gmra.mxu0 %v2244_v30  ;;  %687 = vmatmul.bf16.gmra.mxu1 %v2268_v31 }
  0xf2   :  { %v1567_v40 = vadd.f32 %v2642_v53, %v1514_v38  ;;  %1066 = vmatmul.bf16.gmra.mxu2 %v2292_v36  ;;  %1445 = vmatmul.bf16.gmra.mxu3 %v2316_v37 }
  0xf4   :  { %v1616_v42 = vmul.f32 0.2, %v1567_v40 }
  0xf5   :  { %v1027_v43 = vpop.f32.mrf.mxu2  ;;  %v1406_v44 = vpop.f32.mrf.mxu3 }
  0xf6   :  { %v1665_v46 = vmax.f32 %v1567_v40, %v1616_v42  ;;  %v1136_v47 = vmax.f32 %v757_v41, %v1027_v43  ;;  %v320_v48 = vpop.f32.mrf.mxu0  ;;  %v650_v49 = vpop.f32.mrf.mxu1  ;;  %v2247_v42 = vld [vmem:[%s2966_s0 + $0x80] sm:$0xff] }
  0xf7   :  { %v758_v52 = vmax.f32 %v320_v48, %v650_v49  ;;  %v2271_v43 = vld [vmem:[%s2967_s1 + $0x80] sm:$0xff] }
  0xf8   :  { %v2350_v50 = vpack.c.bf16 %v1665_v46, %v1664_v45  ;;  %v1515_v51 = vmax.f32 %v1136_v47, %v1406_v44  ;;  %v2295_v48 = vld [vmem:[%s2968_s2 + $0x80] sm:$0xff] }
  0xf9   :  { %v2319_v49 = vld [vmem:[%s2969_s3 + $0x80] sm:$0xff] }
  0xfa   :  { %2450 = vst [vmem:[%s2971_s6 + $0x20] sm:$0xff] %v2350_v50   ;;  %v1568_v58 = vadd.f32 %v2642_v53, %v1515_v51 }
  0xfc   :  { %v1617_v1 = vmul.f32 0.2, %v1568_v58 }
  0xfd   :  { %v1029_v54 = vpop.f32.mrf.mxu2  ;;  %v1408_v55 = vpop.f32.mrf.mxu3 }
  0xfe   :  { %v1137_v59 = vmax.f32 %v758_v52, %v1029_v54  ;;  %v323_v60 = vpop.f32.mrf.mxu0  ;;  %v653_v61 = vpop.f32.mrf.mxu1  ;;  %v1666_v7 = vmax.f32 %v1568_v58, %v1617_v1 }
  0xff   :  { %v759_v3 = vmax.f32 %v323_v60, %v653_v61 }
 0x100   :  { %v1516_v0 = vmax.f32 %v1137_v59, %v1408_v55 }
 0x101   :  { %362 = vmatmul.bf16.gmra.mxu0 %v2245_v56  ;;  %692 = vmatmul.bf16.gmra.mxu1 %v2269_v57 }
 0x102   :  { %v1569_v2 = vadd.f32 %v2642_v53, %v1516_v0  ;;  %1071 = vmatmul.bf16.gmra.mxu2 %v2293_v62  ;;  %1450 = vmatmul.bf16.gmra.mxu3 %v2317_v63 }
 0x104   :  { %v1618_v4 = vmul.f32 0.2, %v1569_v2 }
 0x105   :  { %v1032_v5 = vpop.f32.mrf.mxu2  ;;  %v1411_v6 = vpop.f32.mrf.mxu3 }
 0x106   :  { %v1667_v8 = vmax.f32 %v1569_v2, %v1618_v4  ;;  %v1138_v9 = vmax.f32 %v759_v3, %v1032_v5  ;;  %v325_v10 = vpop.f32.mrf.mxu0  ;;  %v655_v11 = vpop.f32.mrf.mxu1  ;;  %v2248_v4 = vld [vmem:[%s2966_s0 + $0x88] sm:$0xff] }
 0x107   :  { %v760_v14 = vmax.f32 %v325_v10, %v655_v11  ;;  %v2272_v5 = vld [vmem:[%s2967_s1 + $0x88] sm:$0xff] }
 0x108   :  { %v2355_v12 = vpack.c.bf16 %v1667_v8, %v1666_v7  ;;  %v1517_v13 = vmax.f32 %v1138_v9, %v1411_v6  ;;  %v2296_v10 = vld [vmem:[%s2968_s2 + $0x88] sm:$0xff] }
 0x109   :  { %v2320_v11 = vld [vmem:[%s2969_s3 + $0x88] sm:$0xff] }
 0x10a   :  { %2451 = vst [vmem:[%s2971_s6 + $0x28] sm:$0xff] %v2355_v12   ;;  %v1570_v19 = vadd.f32 %v2642_v53, %v1517_v13 }
 0x10c   :  { %v1619_v26 = vmul.f32 0.2, %v1570_v19 }
 0x10d   :  { %v1034_v15 = vpop.f32.mrf.mxu2  ;;  %v1413_v16 = vpop.f32.mrf.mxu3 }
 0x10e   :  { %v1139_v20 = vmax.f32 %v760_v14, %v1034_v15  ;;  %v328_v21 = vpop.f32.mrf.mxu0  ;;  %v658_v22 = vpop.f32.mrf.mxu1  ;;  %v1668_v32 = vmax.f32 %v1570_v19, %v1619_v26 }
 0x10f   :  { %v761_v28 = vmax.f32 %v328_v21, %v658_v22 }
 0x110   :  { %v1518_v25 = vmax.f32 %v1139_v20, %v1413_v16 }
 0x111   :  { %367 = vmatmul.bf16.gmra.mxu0 %v2246_v17  ;;  %697 = vmatmul.bf16.gmra.mxu1 %v2270_v18 }
 0x112   :  { %v1571_v27 = vadd.f32 %v2642_v53, %v1518_v25  ;;  %1076 = vmatmul.bf16.gmra.mxu2 %v2294_v23  ;;  %1455 = vmatmul.bf16.gmra.mxu3 %v2318_v24 }
 0x114   :  { %v1620_v29 = vmul.f32 0.2, %v1571_v27 }
 0x115   :  { %v1037_v30 = vpop.f32.mrf.mxu2  ;;  %v1416_v31 = vpop.f32.mrf.mxu3 }
 0x116   :  { %v1669_v33 = vmax.f32 %v1571_v27, %v1620_v29  ;;  %v1140_v34 = vmax.f32 %v761_v28, %v1037_v30  ;;  %v330_v35 = vpop.f32.mrf.mxu0  ;;  %v660_v36 = vpop.f32.mrf.mxu1  ;;  %v2249_v29 = vld [vmem:[%s2966_s0 + $0x90] sm:$0xff] }
 0x117   :  { %v762_v39 = vmax.f32 %v330_v35, %v660_v36  ;;  %v2273_v30 = vld [vmem:[%s2967_s1 + $0x90] sm:$0xff] }
 0x118   :  { %v2360_v37 = vpack.c.bf16 %v1669_v33, %v1668_v32  ;;  %v1519_v38 = vmax.f32 %v1140_v34, %v1416_v31  ;;  %v2297_v35 = vld [vmem:[%s2968_s2 + $0x90] sm:$0xff] }
 0x119   :  { %v2321_v36 = vld [vmem:[%s2969_s3 + $0x90] sm:$0xff] }
 0x11a   :  { %2452 = vst [vmem:[%s2971_s6 + $0x30] sm:$0xff] %v2360_v37   ;;  %v1572_v44 = vadd.f32 %v2642_v53, %v1519_v38 }
 0x11c   :  { %v1621_v51 = vmul.f32 0.2, %v1572_v44 }
 0x11d   :  { %v1039_v40 = vpop.f32.mrf.mxu2  ;;  %v1418_v41 = vpop.f32.mrf.mxu3 }
 0x11e   :  { %v1141_v45 = vmax.f32 %v762_v39, %v1039_v40  ;;  %v333_v46 = vpop.f32.mrf.mxu0  ;;  %v663_v47 = vpop.f32.mrf.mxu1  ;;  %v1670_v58 = vmax.f32 %v1572_v44, %v1621_v51 }
 0x11f   :  { %v763_v54 = vmax.f32 %v333_v46, %v663_v47 }
 0x120   :  { %v1520_v50 = vmax.f32 %v1141_v45, %v1418_v41 }
 0x121   :  { %372 = vmatmul.bf16.gmra.mxu0 %v2247_v42  ;;  %702 = vmatmul.bf16.gmra.mxu1 %v2271_v43 }
 0x122   :  { %v1573_v52 = vadd.f32 %v2642_v53, %v1520_v50  ;;  %1081 = vmatmul.bf16.gmra.mxu2 %v2295_v48  ;;  %1460 = vmatmul.bf16.gmra.mxu3 %v2319_v49 }
 0x124   :  { %v1622_v55 = vmul.f32 0.2, %v1573_v52 }
 0x125   :  { %v1042_v56 = vpop.f32.mrf.mxu2  ;;  %v1421_v57 = vpop.f32.mrf.mxu3 }
 0x126   :  { %v1671_v59 = vmax.f32 %v1573_v52, %v1622_v55  ;;  %v1142_v60 = vmax.f32 %v763_v54, %v1042_v56  ;;  %v335_v61 = vpop.f32.mrf.mxu0  ;;  %v665_v62 = vpop.f32.mrf.mxu1  ;;  %v2250_v55 = vld [vmem:[%s2966_s0 + $0x98] sm:$0xff] }
 0x127   :  { %v764_v1 = vmax.f32 %v335_v61, %v665_v62  ;;  %v2274_v56 = vld [vmem:[%s2967_s1 + $0x98] sm:$0xff] }
 0x128   :  { %v2365_v63 = vpack.c.bf16 %v1671_v59, %v1670_v58  ;;  %v1521_v0 = vmax.f32 %v1142_v60, %v1421_v57  ;;  %v2298_v61 = vld [vmem:[%s2968_s2 + $0x98] sm:$0xff] }
 0x129   :  { %v2322_v62 = vld [vmem:[%s2969_s3 + $0x98] sm:$0xff] }
 0x12a   :  { %2453 = vst [vmem:[%s2971_s6 + $0x38] sm:$0xff] %v2365_v63   ;;  %v1574_v6 = vadd.f32 %v2642_v53, %v1521_v0 }
 0x12c   :  { %v1623_v13 = vmul.f32 0.2, %v1574_v6 }
 0x12d   :  { %v1044_v2 = vpop.f32.mrf.mxu2  ;;  %v1423_v3 = vpop.f32.mrf.mxu3 }
 0x12e   :  { %v1143_v7 = vmax.f32 %v764_v1, %v1044_v2  ;;  %v338_v8 = vpop.f32.mrf.mxu0  ;;  %v668_v9 = vpop.f32.mrf.mxu1  ;;  %v1672_v19 = vmax.f32 %v1574_v6, %v1623_v13 }
 0x12f   :  { %v765_v15 = vmax.f32 %v338_v8, %v668_v9 }
 0x130   :  { %v1522_v12 = vmax.f32 %v1143_v7, %v1423_v3 }
 0x131   :  { %377 = vmatmul.bf16.gmra.mxu0 %v2248_v4  ;;  %707 = vmatmul.bf16.gmra.mxu1 %v2272_v5 }
 0x132   :  { %v1575_v14 = vadd.f32 %v2642_v53, %v1522_v12  ;;  %1086 = vmatmul.bf16.gmra.mxu2 %v2296_v10  ;;  %1465 = vmatmul.bf16.gmra.mxu3 %v2320_v11 }
 0x134   :  { %v1624_v16 = vmul.f32 0.2, %v1575_v14 }
 0x135   :  { %v1047_v17 = vpop.f32.mrf.mxu2  ;;  %v1426_v18 = vpop.f32.mrf.mxu3 }
 0x136   :  { %v1673_v20 = vmax.f32 %v1575_v14, %v1624_v16  ;;  %v1144_v21 = vmax.f32 %v765_v15, %v1047_v17  ;;  %v340_v22 = vpop.f32.mrf.mxu0  ;;  %v670_v23 = vpop.f32.mrf.mxu1  ;;  %v2251_v16 = vld [vmem:[%s2966_s0 + $0xa0] sm:$0xff] }
 0x137   :  { %v766_v26 = vmax.f32 %v340_v22, %v670_v23  ;;  %v2275_v17 = vld [vmem:[%s2967_s1 + $0xa0] sm:$0xff] }
 0x138   :  { %v2370_v24 = vpack.c.bf16 %v1673_v20, %v1672_v19  ;;  %v1523_v25 = vmax.f32 %v1144_v21, %v1426_v18  ;;  %v2299_v22 = vld [vmem:[%s2968_s2 + $0xa0] sm:$0xff] }
 0x139   :  { %v2323_v23 = vld [vmem:[%s2969_s3 + $0xa0] sm:$0xff] }
 0x13a   :  { %2454 = vst [vmem:[%s2971_s6 + $0x40] sm:$0xff] %v2370_v24   ;;  %v1576_v31 = vadd.f32 %v2642_v53, %v1523_v25 }
 0x13c   :  { %v1625_v38 = vmul.f32 0.2, %v1576_v31 }
 0x13d   :  { %v1049_v27 = vpop.f32.mrf.mxu2  ;;  %v1428_v28 = vpop.f32.mrf.mxu3 }
 0x13e   :  { %v1145_v32 = vmax.f32 %v766_v26, %v1049_v27  ;;  %v343_v33 = vpop.f32.mrf.mxu0  ;;  %v673_v34 = vpop.f32.mrf.mxu1  ;;  %v1674_v44 = vmax.f32 %v1576_v31, %v1625_v38 }
 0x13f   :  { %v767_v40 = vmax.f32 %v343_v33, %v673_v34 }
 0x140   :  { %v1524_v37 = vmax.f32 %v1145_v32, %v1428_v28 }
 0x141   :  { %382 = vmatmul.bf16.gmra.mxu0 %v2249_v29  ;;  %712 = vmatmul.bf16.gmra.mxu1 %v2273_v30 }
 0x142   :  { %v1577_v39 = vadd.f32 %v2642_v53, %v1524_v37  ;;  %1091 = vmatmul.bf16.gmra.mxu2 %v2297_v35  ;;  %1470 = vmatmul.bf16.gmra.mxu3 %v2321_v36 }
 0x144   :  { %v1626_v41 = vmul.f32 0.2, %v1577_v39 }
 0x145   :  { %v1052_v42 = vpop.f32.mrf.mxu2  ;;  %v1431_v43 = vpop.f32.mrf.mxu3 }
 0x146   :  { %v1675_v45 = vmax.f32 %v1577_v39, %v1626_v41  ;;  %v1146_v46 = vmax.f32 %v767_v40, %v1052_v42  ;;  %v345_v47 = vpop.f32.mrf.mxu0  ;;  %v675_v48 = vpop.f32.mrf.mxu1  ;;  %v2252_v41 = vld [vmem:[%s2966_s0 + $0xa8] sm:$0xff] }
 0x147   :  { %v768_v51 = vmax.f32 %v345_v47, %v675_v48  ;;  %v2276_v42 = vld [vmem:[%s2967_s1 + $0xa8] sm:$0xff] }
 0x148   :  { %v2375_v49 = vpack.c.bf16 %v1675_v45, %v1674_v44  ;;  %v1525_v50 = vmax.f32 %v1146_v46, %v1431_v43  ;;  %v2300_v47 = vld [vmem:[%s2968_s2 + $0xa8] sm:$0xff] }
 0x149   :  { %v2324_v48 = vld [vmem:[%s2969_s3 + $0xa8] sm:$0xff] }
 0x14a   :  { %2455 = vst [vmem:[%s2971_s6 + $0x48] sm:$0xff] %v2375_v49   ;;  %v1578_v57 = vadd.f32 %v2642_v53, %v1525_v50 }
 0x14c   :  { %v1627_v0 = vmul.f32 0.2, %v1578_v57 }
 0x14d   :  { %v1054_v52 = vpop.f32.mrf.mxu2  ;;  %v1433_v54 = vpop.f32.mrf.mxu3 }
 0x14e   :  { %v1147_v58 = vmax.f32 %v768_v51, %v1054_v52  ;;  %v348_v59 = vpop.f32.mrf.mxu0  ;;  %v678_v60 = vpop.f32.mrf.mxu1  ;;  %v1676_v6 = vmax.f32 %v1578_v57, %v1627_v0 }
 0x14f   :  { %v769_v2 = vmax.f32 %v348_v59, %v678_v60 }
 0x150   :  { %v1526_v63 = vmax.f32 %v1147_v58, %v1433_v54 }
 0x151   :  { %387 = vmatmul.bf16.gmra.mxu0 %v2250_v55  ;;  %717 = vmatmul.bf16.gmra.mxu1 %v2274_v56 }
 0x152   :  { %v1579_v1 = vadd.f32 %v2642_v53, %v1526_v63  ;;  %1096 = vmatmul.bf16.gmra.mxu2 %v2298_v61  ;;  %1475 = vmatmul.bf16.gmra.mxu3 %v2322_v62 }
 0x154   :  { %v1628_v3 = vmul.f32 0.2, %v1579_v1 }
 0x155   :  { %v1057_v4 = vpop.f32.mrf.mxu2  ;;  %v1436_v5 = vpop.f32.mrf.mxu3 }
 0x156   :  { %v1677_v7 = vmax.f32 %v1579_v1, %v1628_v3  ;;  %v1148_v8 = vmax.f32 %v769_v2, %v1057_v4  ;;  %v350_v9 = vpop.f32.mrf.mxu0  ;;  %v680_v10 = vpop.f32.mrf.mxu1  ;;  %v2253_v3 = vld [vmem:[%s2966_s0 + $0xb0] sm:$0xff] }
 0x157   :  { %v770_v13 = vmax.f32 %v350_v9, %v680_v10  ;;  %v2277_v4 = vld [vmem:[%s2967_s1 + $0xb0] sm:$0xff] }
 0x158   :  { %v2380_v11 = vpack.c.bf16 %v1677_v7, %v1676_v6  ;;  %v1527_v12 = vmax.f32 %v1148_v8, %v1436_v5  ;;  %v2301_v9 = vld [vmem:[%s2968_s2 + $0xb0] sm:$0xff] }
 0x159   :  { %v2325_v10 = vld [vmem:[%s2969_s3 + $0xb0] sm:$0xff] }
 0x15a   :  { %2456 = vst [vmem:[%s2971_s6 + $0x50] sm:$0xff] %v2380_v11   ;;  %v1580_v18 = vadd.f32 %v2642_v53, %v1527_v12 }
 0x15c   :  { %v1629_v25 = vmul.f32 0.2, %v1580_v18 }
 0x15d   :  { %v1059_v14 = vpop.f32.mrf.mxu2  ;;  %v1438_v15 = vpop.f32.mrf.mxu3 }
 0x15e   :  { %v1149_v19 = vmax.f32 %v770_v13, %v1059_v14  ;;  %v353_v20 = vpop.f32.mrf.mxu0  ;;  %v683_v21 = vpop.f32.mrf.mxu1  ;;  %v1678_v31 = vmax.f32 %v1580_v18, %v1629_v25 }
 0x15f   :  { %v771_v27 = vmax.f32 %v353_v20, %v683_v21 }
 0x160   :  { %v1528_v24 = vmax.f32 %v1149_v19, %v1438_v15 }
 0x161   :  { %392 = vmatmul.bf16.gmra.mxu0 %v2251_v16  ;;  %722 = vmatmul.bf16.gmra.mxu1 %v2275_v17 }
 0x162   :  { %v1581_v26 = vadd.f32 %v2642_v53, %v1528_v24  ;;  %1101 = vmatmul.bf16.gmra.mxu2 %v2299_v22  ;;  %1480 = vmatmul.bf16.gmra.mxu3 %v2323_v23 }
 0x164   :  { %v1630_v28 = vmul.f32 0.2, %v1581_v26 }
 0x165   :  { %v1062_v29 = vpop.f32.mrf.mxu2  ;;  %v1441_v30 = vpop.f32.mrf.mxu3 }
 0x166   :  { %v1679_v32 = vmax.f32 %v1581_v26, %v1630_v28  ;;  %v1150_v33 = vmax.f32 %v771_v27, %v1062_v29  ;;  %v355_v34 = vpop.f32.mrf.mxu0  ;;  %v685_v35 = vpop.f32.mrf.mxu1  ;;  %v2254_v28 = vld [vmem:[%s2966_s0 + $0xb8] sm:$0xff] }
 0x167   :  { %v772_v38 = vmax.f32 %v355_v34, %v685_v35  ;;  %v2278_v29 = vld [vmem:[%s2967_s1 + $0xb8] sm:$0xff] }
 0x168   :  { %v2385_v36 = vpack.c.bf16 %v1679_v32, %v1678_v31  ;;  %v1529_v37 = vmax.f32 %v1150_v33, %v1441_v30  ;;  %v2302_v34 = vld [vmem:[%s2968_s2 + $0xb8] sm:$0xff] }
 0x169   :  { %v2326_v35 = vld [vmem:[%s2969_s3 + $0xb8] sm:$0xff] }
 0x16a   :  { %2457 = vst [vmem:[%s2971_s6 + $0x58] sm:$0xff] %v2385_v36   ;;  %v1582_v43 = vadd.f32 %v2642_v53, %v1529_v37 }
 0x16c   :  { %v1631_v50 = vmul.f32 0.2, %v1582_v43 }
 0x16d   :  { %v1064_v39 = vpop.f32.mrf.mxu2  ;;  %v1443_v40 = vpop.f32.mrf.mxu3 }
 0x16e   :  { %v1151_v44 = vmax.f32 %v772_v38, %v1064_v39  ;;  %v358_v45 = vpop.f32.mrf.mxu0  ;;  %v688_v46 = vpop.f32.mrf.mxu1  ;;  %v1680_v57 = vmax.f32 %v1582_v43, %v1631_v50  ;;  %v844_v50 = vld [vmem:[%s2968_s2 + $0xc0] sm:$0xf] }
 0x16f   :  { %v773_v52 = vmax.f32 %v358_v45, %v688_v46 }
 0x170   :  { %v1530_v49 = vmax.f32 %v1151_v44, %v1443_v40 }
 0x171   :  { %397 = vmatmul.bf16.gmra.mxu0 %v2252_v41  ;;  %727 = vmatmul.bf16.gmra.mxu1 %v2276_v42 }
 0x172   :  { %v1583_v51 = vadd.f32 %v2642_v53, %v1530_v49  ;;  %1106 = vmatmul.bf16.gmra.mxu2 %v2300_v47  ;;  %1485 = vmatmul.bf16.gmra.mxu3 %v2324_v48  ;;  %v87_v48 = vld [vmem:[%s2966_s0 + $0xc0] sm:$0xf] }
 0x173   :  { %v465_v49 = vld [vmem:[%s2967_s1 + $0xc0] sm:$0xf] }
 0x174   :  { %v1632_v54 = vmul.f32 0.2, %v1583_v51 }
 0x175   :  { %v1067_v55 = vpop.f32.mrf.mxu2  ;;  %v1446_v56 = vpop.f32.mrf.mxu3 }
 0x176   :  { %v1681_v58 = vmax.f32 %v1583_v51, %v1632_v54  ;;  %v1152_v59 = vmax.f32 %v773_v52, %v1067_v55  ;;  %v360_v60 = vpop.f32.mrf.mxu0  ;;  %v690_v61 = vpop.f32.mrf.mxu1  ;;  %v1223_v51 = vld [vmem:[%s2969_s3 + $0xc0] sm:$0xf]  ;;  %v185_v54 = vunpack.c.l.b16 %v87_v48  ;;  %v563_v55 = vunpack.c.l.b16 %v465_v49 }
 0x177   :  { %v774_v0 = vmax.f32 %v360_v60, %v690_v61 }
 0x178   :  { %v2390_v62 = vpack.c.bf16 %v1681_v58, %v1680_v57  ;;  %v1531_v63 = vmax.f32 %v1152_v59, %v1446_v56  ;;  %v942_v57 = vunpack.c.l.b16 %v844_v50  ;;  %v1321_v58 = vunpack.c.l.b16 %v1223_v51 }
 0x17a   :  { %2458 = vst [vmem:[%s2971_s6 + $0x60] sm:$0xff] %v2390_v62   ;;  %v1584_v5 = vadd.f32 %v2642_v53, %v1531_v63  ;;  %v210_v62 = vpack.c.b16 %v185_v54, %v185_v54  ;;  %v588_v63 = vpack.c.b16 %v563_v55, %v563_v55 }
 0x17c   :  { %v1633_v12 = vmul.f32 0.2, %v1584_v5 }
 0x17d   :  { %v1069_v1 = vpop.f32.mrf.mxu2  ;;  %v1448_v2 = vpop.f32.mrf.mxu3 }
 0x17e   :  { %v1153_v6 = vmax.f32 %v774_v0, %v1069_v1  ;;  %v363_v7 = vpop.f32.mrf.mxu0  ;;  %v693_v8 = vpop.f32.mrf.mxu1  ;;  %v1682_v18 = vmax.f32 %v1584_v5, %v1633_v12  ;;  %v1346_v5 = vpack.c.b16 %v1321_v58, %v1321_v58 }
 0x17f   :  { %v775_v14 = vmax.f32 %v363_v7, %v693_v8 }
 0x180   :  { %v1532_v11 = vmax.f32 %v1153_v6, %v1448_v2 }
 0x181   :  { %402 = vmatmul.bf16.gmra.mxu0 %v2253_v3  ;;  %732 = vmatmul.bf16.gmra.mxu1 %v2277_v4  ;;  %v967_v4 = vpack.c.b16 %v942_v57, %v942_v57 }
 0x182   :  { %v1585_v13 = vadd.f32 %v2642_v53, %v1532_v11  ;;  %1111 = vmatmul.bf16.gmra.mxu2 %v2301_v9  ;;  %1490 = vmatmul.bf16.gmra.mxu3 %v2325_v10 }
 0x184   :  { %v1634_v15 = vmul.f32 0.2, %v1585_v13 }
 0x185   :  { %v1072_v16 = vpop.f32.mrf.mxu2  ;;  %v1451_v17 = vpop.f32.mrf.mxu3 }
 0x186   :  { %v1683_v19 = vmax.f32 %v1585_v13, %v1634_v15  ;;  %v1154_v20 = vmax.f32 %v775_v14, %v1072_v16  ;;  %v365_v21 = vpop.f32.mrf.mxu0  ;;  %v695_v22 = vpop.f32.mrf.mxu1 }
 0x187   :  { %v776_v25 = vmax.f32 %v365_v21, %v695_v22 }
 0x188   :  { %v2395_v23 = vpack.c.bf16 %v1683_v19, %v1682_v18  ;;  %v1533_v24 = vmax.f32 %v1154_v20, %v1451_v17 }
 0x18a   :  { %2459 = vst [vmem:[%s2971_s6 + $0x68] sm:$0xff] %v2395_v23   ;;  %v1586_v30 = vadd.f32 %v2642_v53, %v1533_v24 }
 0x18c   :  { %v1635_v37 = vmul.f32 0.2, %v1586_v30 }
 0x18d   :  { %v1074_v26 = vpop.f32.mrf.mxu2  ;;  %v1453_v27 = vpop.f32.mrf.mxu3 }
 0x18e   :  { %v1155_v31 = vmax.f32 %v776_v25, %v1074_v26  ;;  %v368_v32 = vpop.f32.mrf.mxu0  ;;  %v698_v33 = vpop.f32.mrf.mxu1  ;;  %v1684_v43 = vmax.f32 %v1586_v30, %v1635_v37 }
 0x18f   :  { %v777_v39 = vmax.f32 %v368_v32, %v698_v33 }
 0x190   :  { %v1534_v36 = vmax.f32 %v1155_v31, %v1453_v27 }
 0x191   :  { %407 = vmatmul.bf16.gmra.mxu0 %v2254_v28  ;;  %737 = vmatmul.bf16.gmra.mxu1 %v2278_v29 }
 0x192   :  { %v1587_v38 = vadd.f32 %v2642_v53, %v1534_v36  ;;  %1116 = vmatmul.bf16.gmra.mxu2 %v2302_v34  ;;  %1495 = vmatmul.bf16.gmra.mxu3 %v2326_v35 }
 0x194   :  { %v1636_v40 = vmul.f32 0.2, %v1587_v38 }
 0x195   :  { %v1077_v41 = vpop.f32.mrf.mxu2  ;;  %v1456_v42 = vpop.f32.mrf.mxu3 }
 0x196   :  { %v1685_v44 = vmax.f32 %v1587_v38, %v1636_v40  ;;  %v1156_v45 = vmax.f32 %v777_v39, %v1077_v41  ;;  %v370_v46 = vpop.f32.mrf.mxu0  ;;  %v700_v47 = vpop.f32.mrf.mxu1 }
 0x197   :  { %v778_v59 = vmax.f32 %v370_v46, %v700_v47 }
 0x198   :  { %v2400_v52 = vpack.c.bf16 %v1685_v44, %v1684_v43  ;;  %v1535_v56 = vmax.f32 %v1156_v45, %v1456_v42 }
 0x19a   :  { %2460 = vst [vmem:[%s2971_s6 + $0x70] sm:$0xff] %v2400_v52   ;;  %v1588_v0 = vadd.f32 %v2642_v53, %v1535_v56 }
 0x19c   :  { %v1637_v7 = vmul.f32 0.2, %v1588_v0 }
 0x19d   :  { %v1079_v60 = vpop.f32.mrf.mxu2  ;;  %v1458_v61 = vpop.f32.mrf.mxu3 }
 0x19e   :  { %v1157_v1 = vmax.f32 %v778_v59, %v1079_v60  ;;  %v373_v2 = vpop.f32.mrf.mxu0  ;;  %v703_v3 = vpop.f32.mrf.mxu1  ;;  %v1686_v13 = vmax.f32 %v1588_v0, %v1637_v7 }
 0x19f   :  { %v779_v9 = vmax.f32 %v373_v2, %v703_v3 }
 0x1a0   :  { %v1536_v6 = vmax.f32 %v1157_v1, %v1458_v61 }
 0x1a1   :  { %412 = vmatmul.bf16.gmra.mxu0 %v210_v62  ;;  %742 = vmatmul.bf16.gmra.mxu1 %v588_v63 }
 0x1a2   :  { %v1589_v8 = vadd.f32 %v2642_v53, %v1536_v6  ;;  %1121 = vmatmul.bf16.gmra.mxu2 %v967_v4  ;;  %1500 = vmatmul.bf16.gmra.mxu3 %v1346_v5 }
 0x1a4   :  { %v1638_v10 = vmul.f32 0.2, %v1589_v8 }
 0x1a5   :  { %v1082_v11 = vpop.f32.mrf.mxu2  ;;  %v1461_v12 = vpop.f32.mrf.mxu3 }
 0x1a6   :  { %v1687_v14 = vmax.f32 %v1589_v8, %v1638_v10  ;;  %v1158_v15 = vmax.f32 %v779_v9, %v1082_v11  ;;  %v375_v16 = vpop.f32.mrf.mxu0  ;;  %v705_v17 = vpop.f32.mrf.mxu1 }
 0x1a7   :  { %v780_v20 = vmax.f32 %v375_v16, %v705_v17 }
 0x1a8   :  { %v2405_v18 = vpack.c.bf16 %v1687_v14, %v1686_v13  ;;  %v1537_v19 = vmax.f32 %v1158_v15, %v1461_v12 }
 0x1aa   :  { %2461 = vst [vmem:[%s2971_s6 + $0x78] sm:$0xff] %v2405_v18   ;;  %v1590_v23 = vadd.f32 %v2642_v53, %v1537_v19 }
 0x1ac   :  { %v1639_v28 = vmul.f32 0.2, %v1590_v23 }
 0x1ad   :  { %v1084_v21 = vpop.f32.mrf.mxu2  ;;  %v1463_v22 = vpop.f32.mrf.mxu3 }
 0x1ae   :  { %v1159_v24 = vmax.f32 %v780_v20, %v1084_v21  ;;  %v378_v25 = vpop.f32.mrf.mxu0  ;;  %v708_v26 = vpop.f32.mrf.mxu1  ;;  %v1688_v34 = vmax.f32 %v1590_v23, %v1639_v28 }
 0x1af   :  { %v781_v30 = vmax.f32 %v378_v25, %v708_v26 }
 0x1b0   :  { %v1538_v27 = vmax.f32 %v1159_v24, %v1463_v22 }
 0x1b2   :  { %v1591_v29 = vadd.f32 %v2642_v53, %v1538_v27  ;;  %v2924_v53 = vld [vmem:[%s2970_s5] ss:$0 sm:$0xff] }
 0x1b4   :  { %v1640_v31 = vmul.f32 0.2, %v1591_v29 }
 0x1b5   :  { %v1087_v32 = vpop.f32.mrf.mxu2  ;;  %v1466_v33 = vpop.f32.mrf.mxu3 }
 0x1b6   :  { %v1689_v35 = vmax.f32 %v1591_v29, %v1640_v31  ;;  %v1160_v36 = vmax.f32 %v781_v30, %v1087_v32  ;;  %v380_v37 = vpop.f32.mrf.mxu0  ;;  %v710_v38 = vpop.f32.mrf.mxu1 }
 0x1b7   :  { %v782_v41 = vmax.f32 %v380_v37, %v710_v38 }
 0x1b8   :  { %v2410_v39 = vpack.c.bf16 %v1689_v35, %v1688_v34  ;;  %v1539_v40 = vmax.f32 %v1160_v36, %v1466_v33 }
 0x1ba   :  { %2462 = vst [vmem:[%s2971_s6 + $0x80] sm:$0xff] %v2410_v39   ;;  %v1592_v44 = vadd.f32 %v2924_v53, %v1539_v40 }
 0x1bc   :  { %v1641_v49 = vmul.f32 0.2, %v1592_v44 }
 0x1bd   :  { %v1089_v42 = vpop.f32.mrf.mxu2  ;;  %v1468_v43 = vpop.f32.mrf.mxu3 }
 0x1be   :  { %v1161_v45 = vmax.f32 %v782_v41, %v1089_v42  ;;  %v383_v46 = vpop.f32.mrf.mxu0  ;;  %v713_v47 = vpop.f32.mrf.mxu1  ;;  %v1690_v56 = vmax.f32 %v1592_v44, %v1641_v49 }
 0x1bf   :  { %v783_v51 = vmax.f32 %v383_v46, %v713_v47 }
 0x1c0   :  { %v1540_v48 = vmax.f32 %v1161_v45, %v1468_v43 }
 0x1c2   :  { %v1593_v50 = vadd.f32 %v2924_v53, %v1540_v48 }
 0x1c4   :  { %v1642_v52 = vmul.f32 0.2, %v1593_v50 }
 0x1c5   :  { %v1092_v54 = vpop.f32.mrf.mxu2  ;;  %v1471_v55 = vpop.f32.mrf.mxu3 }
 0x1c6   :  { %v1691_v57 = vmax.f32 %v1593_v50, %v1642_v52  ;;  %v1162_v58 = vmax.f32 %v783_v51, %v1092_v54  ;;  %v385_v59 = vpop.f32.mrf.mxu0  ;;  %v715_v60 = vpop.f32.mrf.mxu1 }
 0x1c7   :  { %v784_v63 = vmax.f32 %v385_v59, %v715_v60 }
 0x1c8   :  { %v2415_v61 = vpack.c.bf16 %v1691_v57, %v1690_v56  ;;  %v1541_v62 = vmax.f32 %v1162_v58, %v1471_v55 }
 0x1ca   :  { %2463 = vst [vmem:[%s2971_s6 + $0x88] sm:$0xff] %v2415_v61   ;;  %v1594_v2 = vadd.f32 %v2924_v53, %v1541_v62 }
 0x1cc   :  { %v1643_v7 = vmul.f32 0.2, %v1594_v2 }
 0x1cd   :  { %v1094_v0 = vpop.f32.mrf.mxu2  ;;  %v1473_v1 = vpop.f32.mrf.mxu3 }
 0x1ce   :  { %v1163_v3 = vmax.f32 %v784_v63, %v1094_v0  ;;  %v388_v4 = vpop.f32.mrf.mxu0  ;;  %v718_v5 = vpop.f32.mrf.mxu1  ;;  %v1692_v13 = vmax.f32 %v1594_v2, %v1643_v7 }
 0x1cf   :  { %v785_v9 = vmax.f32 %v388_v4, %v718_v5 }
 0x1d0   :  { %v1542_v6 = vmax.f32 %v1163_v3, %v1473_v1 }
 0x1d2   :  { %v1595_v8 = vadd.f32 %v2924_v53, %v1542_v6 }
 0x1d4   :  { %v1644_v10 = vmul.f32 0.2, %v1595_v8 }
 0x1d5   :  { %v1097_v11 = vpop.f32.mrf.mxu2  ;;  %v1476_v12 = vpop.f32.mrf.mxu3 }
 0x1d6   :  { %v1693_v14 = vmax.f32 %v1595_v8, %v1644_v10  ;;  %v1164_v15 = vmax.f32 %v785_v9, %v1097_v11  ;;  %v390_v16 = vpop.f32.mrf.mxu0  ;;  %v720_v17 = vpop.f32.mrf.mxu1 }
 0x1d7   :  { %v786_v20 = vmax.f32 %v390_v16, %v720_v17 }
 0x1d8   :  { %v2420_v18 = vpack.c.bf16 %v1693_v14, %v1692_v13  ;;  %v1543_v19 = vmax.f32 %v1164_v15, %v1476_v12 }
 0x1da   :  { %2464 = vst [vmem:[%s2971_s6 + $0x90] sm:$0xff] %v2420_v18   ;;  %v1596_v23 = vadd.f32 %v2924_v53, %v1543_v19 }
 0x1dc   :  { %v1645_v28 = vmul.f32 0.2, %v1596_v23 }
 0x1dd   :  { %v1099_v21 = vpop.f32.mrf.mxu2  ;;  %v1478_v22 = vpop.f32.mrf.mxu3 }
 0x1de   :  { %v1165_v24 = vmax.f32 %v786_v20, %v1099_v21  ;;  %v393_v25 = vpop.f32.mrf.mxu0  ;;  %v723_v26 = vpop.f32.mrf.mxu1  ;;  %v1694_v34 = vmax.f32 %v1596_v23, %v1645_v28 }
 0x1df   :  { %v787_v30 = vmax.f32 %v393_v25, %v723_v26 }
 0x1e0   :  { %v1544_v27 = vmax.f32 %v1165_v24, %v1478_v22 }
 0x1e2   :  { %v1597_v29 = vadd.f32 %v2924_v53, %v1544_v27 }
 0x1e4   :  { %v1646_v31 = vmul.f32 0.2, %v1597_v29 }
 0x1e5   :  { %v1102_v32 = vpop.f32.mrf.mxu2  ;;  %v1481_v33 = vpop.f32.mrf.mxu3 }
 0x1e6   :  { %v1695_v35 = vmax.f32 %v1597_v29, %v1646_v31  ;;  %v1166_v36 = vmax.f32 %v787_v30, %v1102_v32  ;;  %v395_v37 = vpop.f32.mrf.mxu0  ;;  %v725_v38 = vpop.f32.mrf.mxu1 }
 0x1e7   :  { %v788_v41 = vmax.f32 %v395_v37, %v725_v38 }
 0x1e8   :  { %v2425_v39 = vpack.c.bf16 %v1695_v35, %v1694_v34  ;;  %v1545_v40 = vmax.f32 %v1166_v36, %v1481_v33 }
 0x1ea   :  { %2465 = vst [vmem:[%s2971_s6 + $0x98] sm:$0xff] %v2425_v39   ;;  %v1598_v44 = vadd.f32 %v2924_v53, %v1545_v40 }
 0x1ec   :  { %v1647_v49 = vmul.f32 0.2, %v1598_v44 }
 0x1ed   :  { %v1104_v42 = vpop.f32.mrf.mxu2  ;;  %v1483_v43 = vpop.f32.mrf.mxu3 }
 0x1ee   :  { %v1167_v45 = vmax.f32 %v788_v41, %v1104_v42  ;;  %v398_v46 = vpop.f32.mrf.mxu0  ;;  %v728_v47 = vpop.f32.mrf.mxu1  ;;  %v1696_v56 = vmax.f32 %v1598_v44, %v1647_v49 }
 0x1ef   :  { %v789_v51 = vmax.f32 %v398_v46, %v728_v47 }
 0x1f0   :  { %v1546_v48 = vmax.f32 %v1167_v45, %v1483_v43 }
 0x1f2   :  { %v1599_v50 = vadd.f32 %v2924_v53, %v1546_v48 }
 0x1f4   :  { %v1648_v52 = vmul.f32 0.2, %v1599_v50 }
 0x1f5   :  { %v1107_v54 = vpop.f32.mrf.mxu2  ;;  %v1486_v55 = vpop.f32.mrf.mxu3 }
 0x1f6   :  { %v1697_v57 = vmax.f32 %v1599_v50, %v1648_v52  ;;  %v1168_v58 = vmax.f32 %v789_v51, %v1107_v54  ;;  %v400_v59 = vpop.f32.mrf.mxu0  ;;  %v730_v60 = vpop.f32.mrf.mxu1 }
 0x1f7   :  { %v790_v63 = vmax.f32 %v400_v59, %v730_v60 }
 0x1f8   :  { %v2430_v61 = vpack.c.bf16 %v1697_v57, %v1696_v56  ;;  %v1547_v62 = vmax.f32 %v1168_v58, %v1486_v55 }
 0x1fa   :  { %2466 = vst [vmem:[%s2971_s6 + $0xa0] sm:$0xff] %v2430_v61   ;;  %v1600_v2 = vadd.f32 %v2924_v53, %v1547_v62 }
 0x1fc   :  { %v1649_v7 = vmul.f32 0.2, %v1600_v2 }
 0x1fd   :  { %v1109_v0 = vpop.f32.mrf.mxu2  ;;  %v1488_v1 = vpop.f32.mrf.mxu3 }
 0x1fe   :  { %v1169_v3 = vmax.f32 %v790_v63, %v1109_v0  ;;  %v403_v4 = vpop.f32.mrf.mxu0  ;;  %v733_v5 = vpop.f32.mrf.mxu1  ;;  %v1698_v13 = vmax.f32 %v1600_v2, %v1649_v7 }
 0x1ff   :  { %v791_v9 = vmax.f32 %v403_v4, %v733_v5 }
 0x200   :  { %v1548_v6 = vmax.f32 %v1169_v3, %v1488_v1 }
 0x202   :  { %v1601_v8 = vadd.f32 %v2924_v53, %v1548_v6 }
 0x204   :  { %v1650_v10 = vmul.f32 0.2, %v1601_v8 }
 0x205   :  { %v1112_v11 = vpop.f32.mrf.mxu2  ;;  %v1491_v12 = vpop.f32.mrf.mxu3 }
 0x206   :  { %v1699_v14 = vmax.f32 %v1601_v8, %v1650_v10  ;;  %v1170_v15 = vmax.f32 %v791_v9, %v1112_v11  ;;  %v405_v16 = vpop.f32.mrf.mxu0  ;;  %v735_v17 = vpop.f32.mrf.mxu1 }
 0x207   :  { %v792_v20 = vmax.f32 %v405_v16, %v735_v17 }
 0x208   :  { %v2435_v18 = vpack.c.bf16 %v1699_v14, %v1698_v13  ;;  %v1549_v19 = vmax.f32 %v1170_v15, %v1491_v12 }
 0x20a   :  { %2467 = vst [vmem:[%s2971_s6 + $0xa8] sm:$0xff] %v2435_v18   ;;  %v1602_v23 = vadd.f32 %v2924_v53, %v1549_v19 }
 0x20c   :  { %v1651_v28 = vmul.f32 0.2, %v1602_v23 }
 0x20d   :  { %v1114_v21 = vpop.f32.mrf.mxu2  ;;  %v1493_v22 = vpop.f32.mrf.mxu3 }
 0x20e   :  { %v1171_v24 = vmax.f32 %v792_v20, %v1114_v21  ;;  %v408_v25 = vpop.f32.mrf.mxu0  ;;  %v738_v26 = vpop.f32.mrf.mxu1  ;;  %v1700_v34 = vmax.f32 %v1602_v23, %v1651_v28 }
 0x20f   :  { %v793_v30 = vmax.f32 %v408_v25, %v738_v26 }
 0x210   :  { %v1550_v27 = vmax.f32 %v1171_v24, %v1493_v22 }
 0x212   :  { %v1603_v29 = vadd.f32 %v2924_v53, %v1550_v27 }
 0x214   :  { %v1652_v31 = vmul.f32 0.2, %v1603_v29 }
 0x215   :  { %v1117_v32 = vpop.f32.mrf.mxu2  ;;  %v1496_v33 = vpop.f32.mrf.mxu3 }
 0x216   :  { %v1701_v35 = vmax.f32 %v1603_v29, %v1652_v31  ;;  %v1172_v36 = vmax.f32 %v793_v30, %v1117_v32  ;;  %v410_v37 = vpop.f32.mrf.mxu0  ;;  %v740_v38 = vpop.f32.mrf.mxu1 }
 0x217   :  { %v794_v41 = vmax.f32 %v410_v37, %v740_v38 }
 0x218   :  { %v2440_v39 = vpack.c.bf16 %v1701_v35, %v1700_v34  ;;  %v1551_v40 = vmax.f32 %v1172_v36, %v1496_v33 }
 0x21a   :  { %2468 = vst [vmem:[%s2971_s6 + $0xb0] sm:$0xff] %v2440_v39   ;;  %v1604_v44 = vadd.f32 %v2924_v53, %v1551_v40 }
 0x21c   :  { %v1653_v49 = vmul.f32 0.2, %v1604_v44 }
 0x21d   :  { %v1119_v42 = vpop.f32.mrf.mxu2  ;;  %v1498_v43 = vpop.f32.mrf.mxu3 }
 0x21e   :  { %v1173_v45 = vmax.f32 %v794_v41, %v1119_v42  ;;  %v413_v46 = vpop.f32.mrf.mxu0  ;;  %v743_v47 = vpop.f32.mrf.mxu1  ;;  %v1702_v56 = vmax.f32 %v1604_v44, %v1653_v49 }
 0x21f   :  { %v795_v51 = vmax.f32 %v413_v46, %v743_v47 }
 0x220   :  { %v1552_v48 = vmax.f32 %v1173_v45, %v1498_v43 }
 0x222   :  { %v1605_v50 = vadd.f32 %v2924_v53, %v1552_v48 }
 0x224   :  { %v1654_v52 = vmul.f32 0.2, %v1605_v50 }
 0x225   :  { %v1122_v54 = vpop.f32.mrf.mxu2  ;;  %v1501_v55 = vpop.f32.mrf.mxu3 }
 0x226   :  { %v1703_v57 = vmax.f32 %v1605_v50, %v1654_v52  ;;  %v1174_v58 = vmax.f32 %v795_v51, %v1122_v54  ;;  %v415_v59 = vpop.f32.mrf.mxu0  ;;  %v745_v60 = vpop.f32.mrf.mxu1 }
 0x228   :  { %v2445_v61 = vpack.c.bf16 %v1703_v57, %v1702_v56  ;;  %v1553_v62 = vmax.f32 %v1174_v58, %v1501_v55 }
 0x22a   :  { %2469 = vst [vmem:[%s2971_s6 + $0xb8] sm:$0xff] %v2445_v61   ;;  %v1606_v63 = vadd.f32 %v2924_v53, %v1553_v62 }
 0x22c   :  { %v1655_v0 = vmul.f32 0.2, %v1606_v63 }
 0x22d   :  { %v1124_v1 = vpop.f32.mrf.mxu2  ;;  %v1503_v2 = vpop.f32.mrf.mxu3 }
 0x22e   :  { %v1704_v3 = vmax.f32 %v1606_v63, %v1655_v0 }
 0x230   :  { %v1753_v4 = vpack.c.bf16 %v1704_v3, %v1704_v3 }
 0x232   :  { %1802 = vst [vmem:[%s2971_s6 + $0xc0] sm:$0xf] %v1753_v4 }

// kernel: _lambda_.4
= control target key start
LH: loop header
LB: loop body
LE: loop exit
PB: predicated region body
PF: predicated region fallthrough
CT: control target
= control target key end

     0   :  { %vm1113_vm0 = vcmask 523264   ;;  %s7818_s4 = inlined_call_operand.vmem [shape: bf16[1600,128], index: 4, kind: input, shape index: {}]   ;;  %s7819_s0 = inlined_call_operand.vmem [shape: bf16[56,1600], index: 0, kind: input, shape index: {}]   ;;  %s7820_s1 = inlined_call_operand.vmem [shape: bf16[56,1600], index: 1, kind: input, shape index: {}]   ;;  %s7821_s2 = inlined_call_operand.vmem [shape: bf16[56,1600], index: 2, kind: input, shape index: {}]   ;;  %s7822_s3 = inlined_call_operand.vmem [shape: bf16[56,1600], index: 3, kind: input, shape index: {}]   ;;  %s7823_s5 = inlined_call_operand.vmem [shape: f32[1,128], index: 5, kind: input, shape index: {}]   ;;  %s7824_s6 = inlined_call_operand.vmem [shape: bf16[56,128], index: 6, kind: output, shape index: {}]  }
   0x1   :  { %v5025_v0 = vld [vmem:[%s7818_s4 + $0x38] sm:$0xff]  ;;  %v5047_v4 = vld [vmem:[%s7818_s4 + $0x30] sm:$0xff]  ;;  %v5071_v8 = vld [vmem:[%s7818_s4 + $0x28] sm:$0xff] }
   0x2   :  { %v5030_v1 = vld [vmem:[%s7818_s4 + $0x78] sm:$0xff]  ;;  %1126 = vmatpush.bf16.msra.mxu0 %v5025_v0  ;;  %v5052_v5 = vld [vmem:[%s7818_s4 + $0x70] sm:$0xff]  ;;  %v5076_v9 = vld [vmem:[%s7818_s4 + $0x68] sm:$0xff] }
   0x3   :  { %v5035_v2 = vld [vmem:[%s7818_s4 + $0xb8] sm:$0xff]  ;;  %1154 = vmatpush.bf16.msra.mxu1 %v5030_v1  ;;  %v5059_v6 = vld [vmem:[%s7818_s4 + $0xb0] sm:$0xff]  ;;  %v5083_v10 = vld [vmem:[%s7818_s4 + $0xa8] sm:$0xff] }
   0x4   :  { %v5040_v3 = vld [vmem:[%s7818_s4 + $0xf8] sm:$0xff]  ;;  %1182 = vmatpush.bf16.msra.mxu2 %v5035_v2  ;;  %v5064_v7 = vld [vmem:[%s7818_s4 + $0xf0] sm:$0xff]  ;;  %v5088_v11 = vld [vmem:[%s7818_s4 + $0xe8] sm:$0xff] }
   0x5   :  { %1210 = vmatpush.bf16.msra.mxu3 %v5040_v3  ;;  %7907 = vst [vmem:[#allocation2_spill] sm:$0xff] %v5088_v11  ;;  %v5095_v12 = vld [vmem:[%s7818_s4 + $0x20] sm:$0xff]  ;;  %v5119_v16 = vld [vmem:[%s7818_s4 + $0x18] sm:$0xff]  ;;  %v5143_v20 = vld [vmem:[%s7818_s4 + $0x10] sm:$0xff] }
   0x6   :  { %1127 = vmatpush.bf16.msra.mxu0 %v5047_v4  ;;  %v5100_v13 = vld [vmem:[%s7818_s4 + $0x60] sm:$0xff]  ;;  %v5124_v17 = vld [vmem:[%s7818_s4 + $0x58] sm:$0xff]  ;;  %v5148_v21 = vld [vmem:[%s7818_s4 + $0x50] sm:$0xff] }
   0x7   :  { %1155 = vmatpush.bf16.msra.mxu1 %v5052_v5  ;;  %v5107_v14 = vld [vmem:[%s7818_s4 + $0xa0] sm:$0xff]  ;;  %v5131_v18 = vld [vmem:[%s7818_s4 + $0x98] sm:$0xff]  ;;  %v5155_v22 = vld [vmem:[%s7818_s4 + $0x90] sm:$0xff] }
   0x8   :  { %1183 = vmatpush.bf16.msra.mxu2 %v5059_v6  ;;  %v5112_v15 = vld [vmem:[%s7818_s4 + $0xe0] sm:$0xff]  ;;  %v5136_v19 = vld [vmem:[%s7818_s4 + $0xd8] sm:$0xff]  ;;  %v5160_v23 = vld [vmem:[%s7818_s4 + $0xd0] sm:$0xff] }
   0x9   :  { %1211 = vmatpush.bf16.msra.mxu3 %v5064_v7  ;;  %7908 = vst [vmem:[#allocation3_spill] sm:$0xff] %v5112_v15  ;;  %v5167_v24 = vld [vmem:[%s7818_s4 + $0x8] sm:$0xff]  ;;  %v5189_v28 = vld [vmem:[%s7818_s4] sm:$0xff]  ;;  %v4695_v33 = vld [vmem:[%s7819_s0 + $0x30] sm:$0xf0] }
   0xa   :  { %1128 = vmatpush.bf16.msra.mxu0 %v5071_v8  ;;  %7909 = vst [vmem:[#allocation4_spill] sm:$0xff] %v5136_v19  ;;  %v5172_v25 = vld [vmem:[%s7818_s4 + $0x48] sm:$0xff]  ;;  %v5194_v29 = vld [vmem:[%s7818_s4 + $0x40] sm:$0xff]  ;;  %v3553_v35 = vld [vmem:[%s7819_s0 + $0x34] sm:$0xf0] }
   0xb   :  { %1156 = vmatpush.bf16.msra.mxu1 %v5076_v9  ;;  %7910 = vst [vmem:[#allocation5_spill] sm:$0xff] %v5160_v23  ;;  %v5179_v26 = vld [vmem:[%s7818_s4 + $0x88] sm:$0xff]  ;;  %v5199_v30 = vld [vmem:[%s7818_s4 + $0x80] sm:$0xff]  ;;  %v4696_v37 = vld [vmem:[%s7819_s0 + $0x38] sm:$0xf0] }
   0xc   :  { %1184 = vmatpush.bf16.msra.mxu2 %v5083_v10  ;;  %v5184_v27 = vld [vmem:[%s7818_s4 + $0xc8] sm:$0xff]  ;;  %v5204_v31 = vld [vmem:[%s7818_s4 + $0xc0] sm:$0xff]  ;;  %v5237_v40 = vld [vmem:[%s7818_s4 + $0x1b8] sm:$0xff] }
   0xd   :  { %1212 = vmatpush.bf16.msra.mxu3 %v5088_v11  ;;  %7911 = vst [vmem:[#allocation6_spill] sm:$0xff] %v5184_v27  ;;  %v3551_v32 = vld [vmem:[%s7819_s0] sm:$0xf]  ;;  %v4689_v34 = vld [vmem:[%s7819_s0 + $0x4] sm:$0xf]  ;;  %v5242_v41 = vld [vmem:[%s7818_s4 + $0x138] sm:$0xff] }
   0xe   :  { %1129 = vmatpush.bf16.msra.mxu0 %v5095_v12  ;;  %7912 = vst [vmem:[#allocation7_spill] sm:$0xff] %v5204_v31  ;;  %v3559_v36 = vld [vmem:[%s7819_s0 + $0x8] sm:$0xf]  ;;  %v4690_v38 = vld [vmem:[%s7819_s0 + $0xc] sm:$0xf]  ;;  %v3552_v42 = vor.u32 %v4695_v33, %v3551_v32  ;;  %v3556_v43 = vor.u32 %v4689_v34, %v3553_v35  ;;  %v5251_v46 = vld [vmem:[%s7818_s4 + $0x1f8] sm:$0xff] }
   0xf   :  { %1157 = vmatpush.bf16.msra.mxu1 %v5100_v13  ;;  %v3561_v39 = vld [vmem:[%s7819_s0 + $0x3c] sm:$0xf0]  ;;  %v3560_v44 = vor.u32 %v4696_v37, %v3559_v36  ;;  %7913 = vst [vmem:[#allocation8_spill] sm:$0xff] %v5251_v46  ;;  %v5256_v47 = vld [vmem:[%s7818_s4 + $0x178] sm:$0xff]  ;;  %v5263_v48 = vld [vmem:[%s7818_s4 + $0x1b0] sm:$0xff] }
  0x10   :  { %1185 = vmatpush.bf16.msra.mxu2 %v5107_v14  ;;  %v3564_v45 = vor.u32 %v4690_v38, %v3561_v39  ;;  %v5268_v49 = vld [vmem:[%s7818_s4 + $0x130] sm:$0xff]  ;;  %v5287_v52 = vld [vmem:[%s7818_s4 + $0x1a8] sm:$0xff]  ;;  %v5314_v57 = vld [vmem:[%s7818_s4 + $0x1a0] sm:$0xff] }
  0x11   :  { %1213 = vmatpush.bf16.msra.mxu3 %v5112_v15  ;;  %v5275_v50 = vld [vmem:[%s7818_s4 + $0x1f0] sm:$0xff]  ;;  %v5292_v53 = vld [vmem:[%s7818_s4 + $0x128] sm:$0xff]  ;;  %v5319_v58 = vld [vmem:[%s7818_s4 + $0x120] sm:$0xff] }
  0x12   :  { %1130 = vmatpush.bf16.msra.mxu0 %v5119_v16  ;;  %7914 = vst [vmem:[#allocation9_spill] sm:$0xff] %v5275_v50  ;;  %v5280_v51 = vld [vmem:[%s7818_s4 + $0x170] sm:$0xff]  ;;  %v5299_v54 = vld [vmem:[%s7818_s4 + $0x1e8] sm:$0xff]  ;;  %v4708_v59 = vld [vmem:[%s7819_s0 + $0x98] sm:$0xf0] }
  0x13   :  { %1158 = vmatpush.bf16.msra.mxu1 %v5124_v17  ;;  %7915 = vst [vmem:[#allocation10_spill] sm:$0xff] %v5299_v54  ;;  %v5304_v55 = vld [vmem:[%s7818_s4 + $0x168] sm:$0xff]  ;;  %v3605_v61 = vld [vmem:[%s7819_s0 + $0x9c] sm:$0xf0]  ;;  %v3611_v62 = vld [vmem:[%s7819_s0 + $0x70] sm:$0xf] }
  0x14   :  { %1186 = vmatpush.bf16.msra.mxu2 %v5131_v18  ;;  %v3603_v56 = vld [vmem:[%s7819_s0 + $0x68] sm:$0xf]  ;;  %v4702_v60 = vld [vmem:[%s7819_s0 + $0x6c] sm:$0xf]  ;;  %v4709_v63 = vld [vmem:[%s7819_s0 + $0xa0] sm:$0xf0] }
  0x15   :  { %1214 = vmatpush.bf16.msra.mxu3 %v5136_v19  ;;  %v4703_v32 = vld [vmem:[%s7819_s0 + $0x74] sm:$0xf]  ;;  %v3613_v33 = vld [vmem:[%s7819_s0 + $0xa4] sm:$0xf0]  ;;  %v5347_v34 = vld [vmem:[%s7818_s4 + $0x1e0] sm:$0xff]  ;;  %v3604_v38 = vor.u32 %v4708_v59, %v3603_v56  ;;  %v3608_v39 = vor.u32 %v4702_v60, %v3605_v61 }
  0x16   :  { %1131 = vmatpush.bf16.msra.mxu0 %v5143_v20  ;;  %7916 = vst [vmem:[#allocation11_spill] sm:$0xff] %v5347_v34  ;;  %v5352_v35 = vld [vmem:[%s7818_s4 + $0x160] sm:$0xff]  ;;  %v5359_v36 = vld [vmem:[%s7818_s4 + $0x198] sm:$0xff]  ;;  %v5383_v56 = vld [vmem:[%s7818_s4 + $0x190] sm:$0xff] }
  0x17   :  { %1159 = vmatpush.bf16.msra.mxu1 %v5148_v21  ;;  %v5364_v37 = vld [vmem:[%s7818_s4 + $0x118] sm:$0xff]  ;;  %v5388_v59 = vld [vmem:[%s7818_s4 + $0x110] sm:$0xff] }
  0x18   :  { %1187 = vmatpush.bf16.msra.mxu2 %v5155_v22  ;;  %v5395_v60 = vld [vmem:[%s7818_s4 + $0x1d0] sm:$0xff]  ;;  %v5481_v11 = vld [vmem:[%s7818_s4 + $0x2b8] sm:$0xff] }
  0x19   :  { %1215 = vmatpush.bf16.msra.mxu3 %v5160_v23  ;;  %7918 = vst [vmem:[#allocation13_spill] sm:$0xff] %v5395_v60  ;;  %v5400_v61 = vld [vmem:[%s7818_s4 + $0x150] sm:$0xff] }
  0x1a   :  { %1132 = vmatpush.bf16.msra.mxu0 %v5167_v24  ;;  %7921 = vst [vmem:[#allocation16_spill] sm:$0xff] %v5481_v11 }
  0x1b   :  { %1160 = vmatpush.bf16.msra.mxu1 %v5172_v25 }
  0x1c   :  { %1188 = vmatpush.bf16.msra.mxu2 %v5179_v26 }
  0x1d   :  { %1216 = vmatpush.bf16.msra.mxu3 %v5184_v27  ;;  %v5472_v27 = vld [vmem:[%s7818_s4 + $0x140] sm:$0xff] }
  0x1e   :  { %1133 = vmatpush.bf16.msra.mxu0 %v5189_v28 }
  0x1f   :  { %1161 = vmatpush.bf16.msra.mxu1 %v5194_v29 }
  0x20   :  { %1189 = vmatpush.bf16.msra.mxu2 %v5199_v30 }
  0x21   :  { %1217 = vmatpush.bf16.msra.mxu3 %v5204_v31  ;;  %1134 = vmatmul.bf16.vlgmr.msra.gmra.mxu0 %v3552_v42  ;;  %v3612_v42 = vor.u32 %v4709_v63, %v3611_v62  ;;  %v5407_v62 = vld [vmem:[%s7818_s4 + $0x188] sm:$0xff]  ;;  %v5467_v31 = vld [vmem:[%s7818_s4 + $0x1c0] sm:$0xff] }
  0x22   :  { %1238 = vmatpush.bf16.msrb.mxu0 %v5242_v41  ;;  %1162 = vmatmul.bf16.vlgmr.msra.gmra.mxu1 %v3556_v43  ;;  %v3616_v43 = vor.u32 %v4703_v32, %v3613_v33  ;;  %v5412_v63 = vld [vmem:[%s7818_s4 + $0x108] sm:$0xff]  ;;  %7920 = vst [vmem:[#allocation15_spill] sm:$0xff] %v5467_v31 }
  0x23   :  { %1190 = vmatmul.bf16.vlgmr.msra.gmra.mxu2 %v3560_v44  ;;  %1266 = vmatpush.bf16.msrb.mxu1 %v5256_v47  ;;  %v5371_v44 = vld [vmem:[%s7818_s4 + $0x1d8] sm:$0xff]  ;;  %v5419_v32 = vld [vmem:[%s7818_s4 + $0x1c8] sm:$0xff] }
  0x24   :  { %1294 = vmatpush.bf16.msrb.mxu2 %v5237_v40  ;;  %1218 = vmatmul.bf16.vlgmr.msra.gmra.mxu3 %v3564_v45  ;;  %7917 = vst [vmem:[#allocation12_spill] sm:$0xff] %v5371_v44  ;;  %v5376_v45 = vld [vmem:[%s7818_s4 + $0x158] sm:$0xff]  ;;  %v5424_v33 = vld [vmem:[%s7818_s4 + $0x148] sm:$0xff] }
  0x25   :  { %1322 = vmatpush.bf16.msrb.mxu3 %v5251_v46  ;;  %7919 = vst [vmem:[#allocation14_spill] sm:$0xff] %v5419_v32  ;;  %v3665_v46 = vld [vmem:[%s7819_s0 + $0x10c] sm:$0xf0] }
  0x26   :  { %1239 = vmatpush.bf16.msrb.mxu0 %v5268_v49 }
  0x27   :  { %1267 = vmatpush.bf16.msrb.mxu1 %v5280_v51 }
  0x28   :  { %1295 = vmatpush.bf16.msrb.mxu2 %v5263_v48 }
  0x29   :  { %1323 = vmatpush.bf16.msrb.mxu3 %v5275_v50  ;;  %v4716_v50 = vld [vmem:[%s7819_s0 + $0xdc] sm:$0xf] }
  0x2a   :  { %1240 = vmatpush.bf16.msrb.mxu0 %v5292_v53 }
  0x2b   :  { %1268 = vmatpush.bf16.msrb.mxu1 %v5304_v55 }
  0x2c   :  { %1296 = vmatpush.bf16.msrb.mxu2 %v5287_v52 }
  0x2d   :  { %1324 = vmatpush.bf16.msrb.mxu3 %v5299_v54  ;;  %v4722_v54 = vld [vmem:[%s7819_s0 + $0x108] sm:$0xf0] }
  0x2e   :  { %1241 = vmatpush.bf16.msrb.mxu0 %v5319_v58 }
  0x2f   :  { %1269 = vmatpush.bf16.msrb.mxu1 %v5352_v35 }
  0x30   :  { %1297 = vmatpush.bf16.msrb.mxu2 %v5314_v57 }
  0x31   :  { %1325 = vmatpush.bf16.msrb.mxu3 %v5347_v34  ;;  %1139 = vmatmul.bf16.gmra.mxu0 %v3604_v38  ;;  %v3655_v38 = vld [vmem:[%s7819_s0 + $0xd0] sm:$0xf]  ;;  %v3663_v34 = vld [vmem:[%s7819_s0 + $0xd8] sm:$0xf] }
  0x32   :  { %1242 = vmatpush.bf16.msrb.mxu0 %v5364_v37  ;;  %1167 = vmatmul.bf16.gmra.mxu1 %v3608_v39  ;;  %v5434_v39 = vld [vmem:[%s7818_s4 + $0x180] sm:$0xff]  ;;  %v3664_v15 = vor.u32 %v4722_v54, %v3663_v34  ;;  %v5520_v54 = vld [vmem:[%s7818_s4 + $0x270] sm:$0xff]  ;;  %v266_v34 = vld [vmem:[%s7819_s0 + $0x138] sm:$0xff] }
  0x33   :  { %1195 = vmatmul.bf16.gmra.mxu2 %v3612_v42  ;;  %1270 = vmatpush.bf16.msrb.mxu1 %v5376_v45  ;;  %v5439_v42 = vld [vmem:[%s7818_s4 + $0x100] sm:$0xff]  ;;  %7928 = vst [vmem:[#allocation23_spill] sm:$0xff] %v5520_v54 }
  0x34   :  { %1298 = vmatpush.bf16.msrb.mxu2 %v5359_v36  ;;  %1223 = vmatmul.bf16.gmra.mxu3 %v3616_v43  ;;  %v4721_v43 = vld [vmem:[%s7819_s0 + $0x100] sm:$0xf0] }
  0x35   :  { %1326 = vmatpush.bf16.msrb.mxu3 %v5371_v44  ;;  %v3657_v44 = vld [vmem:[%s7819_s0 + $0x104] sm:$0xf0]  ;;  %v3656_v23 = vor.u32 %v4721_v43, %v3655_v38  ;;  %v5486_v38 = vld [vmem:[%s7818_s4 + $0x238] sm:$0xff] }
  0x36   :  { %1243 = vmatpush.bf16.msrb.mxu0 %v5388_v59  ;;  %7922 = vst [vmem:[#allocation17_spill] sm:$0xff] %v5486_v38 }
  0x37   :  { %1271 = vmatpush.bf16.msrb.mxu1 %v5400_v61 }
  0x38   :  { %1299 = vmatpush.bf16.msrb.mxu2 %v5383_v56 }
  0x39   :  { %1327 = vmatpush.bf16.msrb.mxu3 %v5395_v60  ;;  %v4715_v60 = vld [vmem:[%s7819_s0 + $0xd4] sm:$0xf] }
  0x3a   :  { %1244 = vmatpush.bf16.msrb.mxu0 %v5412_v63  ;;  %v3660_v19 = vor.u32 %v4715_v60, %v3657_v44  ;;  %v267_v44 = vld [vmem:[%s7819_s0 + $0x140] sm:$0xff]  ;;  %v400_v60 = vunpack.c.l.b16 %v266_v34 }
  0x3b   :  { %1272 = vmatpush.bf16.msrb.mxu1 %v5424_v33  ;;  %v402_v43 = vunpack.c.l.b16 %v267_v44 }
  0x3c   :  { %1300 = vmatpush.bf16.msrb.mxu2 %v5407_v62 }
  0x3d   :  { %1328 = vmatpush.bf16.msrb.mxu3 %v5419_v32  ;;  %v3668_v32 = vor.u32 %v4716_v50, %v3665_v46  ;;  %v5491_v46 = vld [vmem:[%s7818_s4 + $0x2f8] sm:$0xff]  ;;  %v5515_v50 = vld [vmem:[%s7818_s4 + $0x2f0] sm:$0xff] }
  0x3e   :  { %1245 = vmatpush.bf16.msrb.mxu0 %v5439_v42  ;;  %7923 = vst [vmem:[#allocation18_spill] sm:$0xff] %v5491_v46 }
  0x3f   :  { %1273 = vmatpush.bf16.msrb.mxu1 %v5472_v27  ;;  %7927 = vst [vmem:[#allocation22_spill] sm:$0xff] %v5515_v50 }
  0x40   :  { %1301 = vmatpush.bf16.msrb.mxu2 %v5434_v39 }
  0x41   :  { %1329 = vmatpush.bf16.msrb.mxu3 %v5467_v31  ;;  %1144 = vmatmul.bf16.gmra.mxu0 %v3656_v23  ;;  %v5508_v23 = vld [vmem:[%s7818_s4 + $0x230] sm:$0xff]  ;;  %v452_v31 = vpack.c.b16 %v400_v60, %v400_v60 }
  0x42   :  { %1172 = vmatmul.bf16.gmra.mxu1 %v3660_v19  ;;  %1350 = vmatpush.bf16.msra.mxu0 %v5486_v38  ;;  %v5503_v19 = vld [vmem:[%s7818_s4 + $0x2b0] sm:$0xff]  ;;  %7926 = vst [vmem:[#allocation21_spill] sm:$0xff] %v5508_v23 }
  0x43   :  { %1200 = vmatmul.bf16.gmra.mxu2 %v3664_v15  ;;  %v5496_v15 = vld [vmem:[%s7818_s4 + $0x278] sm:$0xff]  ;;  %7925 = vst [vmem:[#allocation20_spill] sm:$0xff] %v5503_v19  ;;  %v3567_v60 = vld [vmem:[%s7819_s0 + $0x10] sm:$0xf] }
  0x44   :  { %1228 = vmatmul.bf16.gmra.mxu3 %v3668_v32  ;;  %7924 = vst [vmem:[#allocation19_spill] sm:$0xff] %v5496_v15  ;;  %1406 = vmatpush.bf16.msra.mxu2 %v5481_v11  ;;  %v401_v32 = vunpack.c.h.b16 %v266_v34  ;;  %v454_v11 = vpack.c.b16 %v402_v43, %v402_v43  ;;  %v5540_v34 = vld [vmem:[%s7818_s4 + $0x228] sm:$0xff]  ;;  %v4691_v43 = vld [vmem:[%s7819_s0 + $0x14] sm:$0xf] }
  0x45   :  { %1434 = vmatpush.bf16.msra.mxu3 %v5491_v46  ;;  %1378 = vmatpush.bf16.msra.mxu1 %v5496_v15  ;;  %v403_v46 = vunpack.c.h.b16 %v267_v44  ;;  %7930 = vst [vmem:[#allocation25_spill] sm:$0xff] %v5540_v34  ;;  %v5545_v44 = vld [vmem:[%s7818_s4 + $0x2e8] sm:$0xff] }
  0x46   :  { %1351 = vmatpush.bf16.msra.mxu0 %v5508_v23  ;;  %v453_v38 = vpack.c.b16 %v401_v32, %v401_v32  ;;  %v5535_v23 = vld [vmem:[%s7818_s4 + $0x2a8] sm:$0xff]  ;;  %7931 = vst [vmem:[#allocation26_spill] sm:$0xff] %v5545_v44  ;;  %v4697_v32 = vld [vmem:[%s7819_s0 + $0x40] sm:$0xf0] }
  0x47   :  { %v455_v15 = vpack.c.b16 %v403_v46, %v403_v46  ;;  %7929 = vst [vmem:[#allocation24_spill] sm:$0xff] %v5535_v23  ;;  %v5569_v46 = vld [vmem:[%s7818_s4 + $0x2e0] sm:$0xff] }
  0x48   :  { %1407 = vmatpush.bf16.msra.mxu2 %v5503_v19  ;;  %7935 = vst [vmem:[#allocation30_spill] sm:$0xff] %v5569_v46  ;;  %v5607_v19 = vld [vmem:[%s7818_s4 + $0x298] sm:$0xff] }
  0x49   :  { %1435 = vmatpush.bf16.msra.mxu3 %v5515_v50  ;;  %1379 = vmatpush.bf16.msra.mxu1 %v5520_v54  ;;  %v3575_v50 = vld [vmem:[%s7819_s0 + $0x18] sm:$0xf]  ;;  %7937 = vst [vmem:[#allocation32_spill] sm:$0xff] %v5607_v19 }
  0x4a   :  { %1352 = vmatpush.bf16.msra.mxu0 %v5540_v34  ;;  %v5612_v54 = vld [vmem:[%s7818_s4 + $0x218] sm:$0xff] }
  0x4b   :  { %7938 = vst [vmem:[#allocation33_spill] sm:$0xff] %v5612_v54 }
  0x4c   :  { %1408 = vmatpush.bf16.msra.mxu2 %v5535_v23 }
  0x4d   :  { %1436 = vmatpush.bf16.msra.mxu3 %v5545_v44  ;;  %v3569_v44 = vld [vmem:[%s7819_s0 + $0x44] sm:$0xf0] }
  0x4e   :  { %v3572_v34 = vor.u32 %v4691_v43, %v3569_v44  ;;  %v5617_v44 = vld [vmem:[%s7818_s4 + $0x2d8] sm:$0xff]  ;;  %v4711_v43 = vld [vmem:[%s7819_s0 + $0xb0] sm:$0xf0] }
  0x4f   :  { %7939 = vst [vmem:[#allocation34_spill] sm:$0xff] %v5617_v44 }
  0x51   :  { %1149 = vmatmul.bf16.gmra.mxu0 %v452_v31  ;;  %v5557_v31 = vld [vmem:[%s7818_s4 + $0x2a0] sm:$0xff]  ;;  %1437 = vmatpush.bf16.msra.mxu3 %v5569_v46  ;;  %v4692_v46 = vld [vmem:[%s7819_s0 + $0x1c] sm:$0xf] }
  0x52   :  { %1177 = vmatmul.bf16.gmra.mxu1 %v453_v38  ;;  %7933 = vst [vmem:[#allocation28_spill] sm:$0xff] %v5557_v31  ;;  %v5562_v38 = vld [vmem:[%s7818_s4 + $0x220] sm:$0xff]  ;;  %1409 = vmatpush.bf16.msra.mxu2 %v5557_v31  ;;  %v3577_v31 = vld [vmem:[%s7819_s0 + $0x4c] sm:$0xf0] }
  0x53   :  { %1205 = vmatmul.bf16.gmra.mxu2 %v454_v11  ;;  %v5550_v11 = vld [vmem:[%s7818_s4 + $0x268] sm:$0xff]  ;;  %7934 = vst [vmem:[#allocation29_spill] sm:$0xff] %v5562_v38  ;;  %1353 = vmatpush.bf16.msra.mxu0 %v5562_v38 }
  0x54   :  { %1233 = vmatmul.bf16.gmra.mxu3 %v455_v15  ;;  %7932 = vst [vmem:[#allocation27_spill] sm:$0xff] %v5550_v11  ;;  %1380 = vmatpush.bf16.msra.mxu1 %v5550_v11  ;;  %v5574_v15 = vld [vmem:[%s7818_s4 + $0x260] sm:$0xff]  ;;  %v4698_v38 = vld [vmem:[%s7819_s0 + $0x48] sm:$0xf0]  ;;  %v3580_v11 = vor.u32 %v4692_v46, %v3577_v31  ;;  %v5646_v31 = vld [vmem:[%s7818_s4 + $0x250] sm:$0xff] }
  0x55   :  { %7936 = vst [vmem:[#allocation31_spill] sm:$0xff] %v5574_v15  ;;  %v3576_v23 = vor.u32 %v4698_v38, %v3575_v50  ;;  %v5629_v50 = vld [vmem:[%s7818_s4 + $0x290] sm:$0xff]  ;;  %1438 = vmatpush.bf16.msra.mxu3 %v5617_v44  ;;  %v3619_v38 = vld [vmem:[%s7819_s0 + $0x78] sm:$0xf]  ;;  %v4710_v46 = vld [vmem:[%s7819_s0 + $0xa8] sm:$0xf0] }
  0x56   :  { %1410 = vmatpush.bf16.msra.mxu2 %v5607_v19  ;;  %7941 = vst [vmem:[#allocation36_spill] sm:$0xff] %v5629_v50  ;;  %v3629_v44 = vld [vmem:[%s7819_s0 + $0xb4] sm:$0xf0]  ;;  %v5679_v19 = vld [vmem:[%s7818_s4 + $0x288] sm:$0xff] }
  0x57   :  { %1354 = vmatpush.bf16.msra.mxu0 %v5612_v54  ;;  %7944 = vst [vmem:[#allocation39_spill] sm:$0xff] %v5646_v31 }
  0x58   :  { %1381 = vmatpush.bf16.msra.mxu1 %v5574_v15  ;;  %v3568_v15 = vor.u32 %v4697_v32, %v3567_v60  ;;  %v3621_v60 = vld [vmem:[%s7819_s0 + $0xac] sm:$0xf0]  ;;  %v3627_v32 = vld [vmem:[%s7819_s0 + $0x80] sm:$0xf] }
  0x5a   :  { %1411 = vmatpush.bf16.msra.mxu2 %v5629_v50 }
  0x5e   :  { %1412 = vmatpush.bf16.msra.mxu2 %v5679_v19 }
  0x61   :  { %1246 = vmatmul.bf16.vlgmr.msrb.gmra.mxu0 %v3568_v15  ;;  %v4704_v15 = vld [vmem:[%s7819_s0 + $0x7c] sm:$0xf] }
  0x62   :  { %1274 = vmatmul.bf16.vlgmr.msrb.gmra.mxu1 %v3572_v34  ;;  %v5634_v34 = vld [vmem:[%s7818_s4 + $0x210] sm:$0xff]  ;;  %v3624_v50 = vor.u32 %v4704_v15, %v3621_v60  ;;  %v4717_v15 = vld [vmem:[%s7819_s0 + $0xe4] sm:$0xf]  ;;  %v3673_v60 = vld [vmem:[%s7819_s0 + $0x114] sm:$0xf0] }
  0x63   :  { %1302 = vmatmul.bf16.vlgmr.msrb.gmra.mxu2 %v3576_v23  ;;  %v5622_v23 = vld [vmem:[%s7818_s4 + $0x258] sm:$0xff]  ;;  %7942 = vst [vmem:[#allocation37_spill] sm:$0xff] %v5634_v34  ;;  %1355 = vmatpush.bf16.msra.mxu0 %v5634_v34  ;;  %v3620_v34 = vor.u32 %v4710_v46, %v3619_v38  ;;  %v5689_v38 = vld [vmem:[%s7818_s4 + $0x2c8] sm:$0xff]  ;;  %v4723_v46 = vld [vmem:[%s7819_s0 + $0x110] sm:$0xf0] }
  0x64   :  { %1330 = vmatmul.bf16.vlgmr.msrb.gmra.mxu3 %v3580_v11  ;;  %7940 = vst [vmem:[#allocation35_spill] sm:$0xff] %v5622_v23  ;;  %1382 = vmatpush.bf16.msra.mxu1 %v5622_v23  ;;  %v5641_v11 = vld [vmem:[%s7818_s4 + $0x2d0] sm:$0xff]  ;;  %v5684_v23 = vld [vmem:[%s7818_s4 + $0x208] sm:$0xff] }
  0x65   :  { %7943 = vst [vmem:[#allocation38_spill] sm:$0xff] %v5641_v11  ;;  %1439 = vmatpush.bf16.msra.mxu3 %v5641_v11  ;;  %v4705_v11 = vld [vmem:[%s7819_s0 + $0x84] sm:$0xf] }
  0x66   :  { %v3632_v54 = vor.u32 %v4705_v11, %v3629_v44  ;;  %7945 = vst [vmem:[#allocation40_spill] sm:$0xff] %v5689_v38  ;;  %v5694_v44 = vld [vmem:[%s7818_s4 + $0x248] sm:$0xff]  ;;  %v5718_v11 = vld [vmem:[%s7818_s4 + $0x240] sm:$0xff] }
  0x67   :  { %1356 = vmatpush.bf16.msra.mxu0 %v5684_v23  ;;  %7949 = vst [vmem:[#allocation44_spill] sm:$0xff] %v5718_v11 }
  0x68   :  { %1383 = vmatpush.bf16.msra.mxu1 %v5646_v31  ;;  %v3628_v31 = vor.u32 %v4711_v43, %v3627_v32  ;;  %v3679_v32 = vld [vmem:[%s7819_s0 + $0xe8] sm:$0xf]  ;;  %v4724_v43 = vld [vmem:[%s7819_s0 + $0x118] sm:$0xf0] }
  0x69   :  { %1440 = vmatpush.bf16.msra.mxu3 %v5689_v38  ;;  %v3681_v38 = vld [vmem:[%s7819_s0 + $0x11c] sm:$0xf0] }
  0x6c   :  { %1384 = vmatpush.bf16.msra.mxu1 %v5694_v44 }
  0x70   :  { %1385 = vmatpush.bf16.msra.mxu1 %v5718_v11  ;;  %v3680_v11 = vor.u32 %v4724_v43, %v3679_v32 }
  0x71   :  { %1251 = vmatmul.bf16.gmra.mxu0 %v3620_v34  ;;  %v5713_v34 = vld [vmem:[%s7818_s4 + $0x2c0] sm:$0xff] }
  0x72   :  { %1279 = vmatmul.bf16.gmra.mxu1 %v3624_v50  ;;  %v5706_v50 = vld [vmem:[%s7818_s4 + $0x200] sm:$0xff]  ;;  %7948 = vst [vmem:[#allocation43_spill] sm:$0xff] %v5713_v34  ;;  %1441 = vmatpush.bf16.msra.mxu3 %v5713_v34  ;;  %v4718_v34 = vld [vmem:[%s7819_s0 + $0xec] sm:$0xf] }
  0x73   :  { %1307 = vmatmul.bf16.gmra.mxu2 %v3628_v31  ;;  %7947 = vst [vmem:[#allocation42_spill] sm:$0xff] %v5706_v50  ;;  %1357 = vmatpush.bf16.msra.mxu0 %v5706_v50  ;;  %v3671_v31 = vld [vmem:[%s7819_s0 + $0xe0] sm:$0xf] }
  0x74   :  { %1335 = vmatmul.bf16.gmra.mxu3 %v3632_v54  ;;  %v5701_v54 = vld [vmem:[%s7818_s4 + $0x280] sm:$0xff]  ;;  %1791 = vmatpush.bf16.msrb.mxu1 %v5025_v0  ;;  %v3672_v50 = vor.u32 %v4723_v46, %v3671_v31  ;;  %v268_v0 = vld [vmem:[%s7819_s0 + $0x148] sm:$0xff] }
  0x75   :  { %7946 = vst [vmem:[#allocation41_spill] sm:$0xff] %v5701_v54  ;;  %1413 = vmatpush.bf16.msra.mxu2 %v5701_v54  ;;  %v3676_v54 = vor.u32 %v4717_v15, %v3673_v60 }
  0x76   :  { %1847 = vmatpush.bf16.msrb.mxu3 %v5035_v2  ;;  %v5757_v2 = vld [vmem:[%s7818_s4 + $0x318] sm:$0xff] }
  0x77   :  { %1466 = vmatpush.bf16.msrb.mxu0 %v5757_v2 }
  0x78   :  { %1792 = vmatpush.bf16.msrb.mxu1 %v5047_v4  ;;  %v269_v4 = vld [vmem:[%s7819_s0 + $0x150] sm:$0xff] }
  0x79   :  { %1819 = vmatpush.bf16.msrb.mxu2 %v5030_v1  ;;  %v3684_v1 = vor.u32 %v4718_v34, %v3681_v38 }
  0x7a   :  { %1848 = vmatpush.bf16.msrb.mxu3 %v5059_v6  ;;  %v405_v6 = vunpack.c.h.b16 %v268_v0 }
  0x7c   :  { %1793 = vmatpush.bf16.msrb.mxu1 %v5071_v8  ;;  %v457_v38 = vpack.c.b16 %v405_v6, %v405_v6 }
  0x7d   :  { %1820 = vmatpush.bf16.msrb.mxu2 %v5052_v5  ;;  %v404_v5 = vunpack.c.l.b16 %v268_v0  ;;  %v4707_v0 = vld [vmem:[%s7819_s0 + $0x94] sm:$0xf] }
  0x7e   :  { %1849 = vmatpush.bf16.msrb.mxu3 %v5083_v10  ;;  %v407_v10 = vunpack.c.h.b16 %v269_v4 }
  0x7f   :  { %v456_v8 = vpack.c.b16 %v404_v5, %v404_v5 }
  0x80   :  { %1794 = vmatpush.bf16.msrb.mxu1 %v5095_v12  ;;  %v5781_v12 = vld [vmem:[%s7818_s4 + $0x310] sm:$0xff] }
  0x81   :  { %1256 = vmatmul.bf16.gmra.mxu0 %v3672_v50  ;;  %1821 = vmatpush.bf16.msrb.mxu2 %v5076_v9  ;;  %v406_v9 = vunpack.c.l.b16 %v269_v4  ;;  %v459_v50 = vpack.c.b16 %v407_v10, %v407_v10  ;;  %v3645_v4 = vld [vmem:[%s7819_s0 + $0xc4] sm:$0xf0] }
  0x82   :  { %1284 = vmatmul.bf16.gmra.mxu1 %v3676_v54  ;;  %1850 = vmatpush.bf16.msrb.mxu3 %v5107_v14  ;;  %v4699_v14 = vld [vmem:[%s7819_s0 + $0x50] sm:$0xf0] }
  0x83   :  { %1312 = vmatmul.bf16.gmra.mxu2 %v3680_v11  ;;  %v458_v54 = vpack.c.b16 %v406_v9, %v406_v9  ;;  %1467 = vmatpush.bf16.msrb.mxu0 %v5781_v12  ;;  %v5817_v11 = vld [vmem:[%s7818_s4 + $0x308] sm:$0xff] }
  0x84   :  { %1340 = vmatmul.bf16.gmra.mxu3 %v3684_v1  ;;  %1795 = vmatpush.bf16.msrb.mxu1 %v5119_v16  ;;  %v4693_v16 = vld [vmem:[%s7819_s0 + $0x24] sm:$0xf] }
  0x85   :  { %1822 = vmatpush.bf16.msrb.mxu2 %v5100_v13  ;;  %v3583_v13 = vld [vmem:[%s7819_s0 + $0x20] sm:$0xf] }
  0x86   :  { %1851 = vmatpush.bf16.msrb.mxu3 %v5131_v18  ;;  %v3591_v18 = vld [vmem:[%s7819_s0 + $0x28] sm:$0xf] }
  0x87   :  { %1468 = vmatpush.bf16.msrb.mxu0 %v5817_v11 }
  0x88   :  { %1796 = vmatpush.bf16.msrb.mxu1 %v5143_v20  ;;  %v4700_v20 = vld [vmem:[%s7819_s0 + $0x58] sm:$0xf0] }
  0x89   :  { %1823 = vmatpush.bf16.msrb.mxu2 %v5124_v17  ;;  %v3585_v17 = vld [vmem:[%s7819_s0 + $0x54] sm:$0xf0] }
  0x8a   :  { %1852 = vmatpush.bf16.msrb.mxu3 %v5155_v22  ;;  %v3593_v22 = vld [vmem:[%s7819_s0 + $0x5c] sm:$0xf0] }
  0x8c   :  { %1797 = vmatpush.bf16.msrb.mxu1 %v5167_v24  ;;  %v3584_v24 = vor.u32 %v4699_v14, %v3583_v13  ;;  %v3648_v13 = vor.u32 %v4707_v0, %v3645_v4 }
  0x8d   :  { %1824 = vmatpush.bf16.msrb.mxu2 %v5148_v21  ;;  %v4694_v21 = vld [vmem:[%s7819_s0 + $0x2c] sm:$0xf] }
  0x8e   :  { %1853 = vmatpush.bf16.msrb.mxu3 %v5179_v26 }
  0x90   :  { %1798 = vmatpush.bf16.msrb.mxu1 %v5189_v28 }
  0x91   :  { %1261 = vmatmul.bf16.gmra.mxu0 %v456_v8  ;;  %1825 = vmatpush.bf16.msrb.mxu2 %v5172_v25  ;;  %v3588_v25 = vor.u32 %v4693_v16, %v3585_v17 }
  0x92   :  { %1289 = vmatmul.bf16.gmra.mxu1 %v457_v38  ;;  %1854 = vmatpush.bf16.msrb.mxu3 %v5199_v30  ;;  %v3596_v30 = vor.u32 %v4694_v21, %v3593_v22 }
  0x93   :  { %1317 = vmatmul.bf16.gmra.mxu2 %v458_v54 }
  0x94   :  { %1345 = vmatmul.bf16.gmra.mxu3 %v459_v50 }
  0x95   :  { %1826 = vmatpush.bf16.msrb.mxu2 %v5194_v29  ;;  %v3592_v29 = vor.u32 %v4700_v20, %v3591_v18 }
  0x9e   :  { %v1135_v26 = vpop.f32.mrf.mxu0 }
  0x9f   :  { %v1163_v28 = vpop.f32.mrf.mxu1 }
  0xa0   :  { %v1164_v34 = vadd.f32 %v1163_v28, %v1135_v26 }
  0xa1   :  { %1358 = vmatmul.bf16.vlgmr.msra.gmra.mxu0 %v3584_v24 }
  0xa2   :  { %1386 = vmatmul.bf16.vlgmr.msra.gmra.mxu1 %v3588_v25  ;;  %v7950_v25 = vld [vmem:[#allocation2_spill] sm:$0xff] }
  0xa3   :  { %1414 = vmatmul.bf16.vlgmr.msra.gmra.mxu2 %v3592_v29  ;;  %1903 = vmatpush.bf16.msra.mxu1 %v5242_v41  ;;  %v4712_v41 = vld [vmem:[%s7819_s0 + $0xb8] sm:$0xf0] }
  0xa4   :  { %1442 = vmatmul.bf16.vlgmr.msra.gmra.mxu3 %v3596_v30  ;;  %1931 = vmatpush.bf16.msra.mxu2 %v5256_v47  ;;  %v4706_v47 = vld [vmem:[%s7819_s0 + $0x8c] sm:$0xf] }
  0xa5   :  { %1959 = vmatpush.bf16.msra.mxu3 %v5237_v40  ;;  %v3635_v40 = vld [vmem:[%s7819_s0 + $0x88] sm:$0xf] }
  0xa6   :  { %v1191_v31 = vpop.f32.mrf.mxu2  ;;  %v1137_v60 = vpop.f32.mrf.mxu0  ;;  %v3636_v9 = vor.u32 %v4712_v41, %v3635_v40 }
  0xa7   :  { %v1219_v46 = vpop.f32.mrf.mxu3  ;;  %v1192_v15 = vadd.f32 %v1191_v31, %v1164_v34  ;;  %v1165_v32 = vpop.f32.mrf.mxu1  ;;  %1904 = vmatpush.bf16.msra.mxu1 %v5268_v49  ;;  %v3643_v49 = vld [vmem:[%s7819_s0 + $0x90] sm:$0xf] }
  0xa8   :  { %v1166_v43 = vadd.f32 %v1165_v32, %v1137_v60  ;;  %1932 = vmatpush.bf16.msra.mxu2 %v5280_v51  ;;  %v4713_v51 = vld [vmem:[%s7819_s0 + $0xc0] sm:$0xf0] }
  0xa9   :  { %1960 = vmatpush.bf16.msra.mxu3 %v5263_v48  ;;  %v5825_v1 = vadd.f32 %v1219_v46, %v1192_v15  ;;  %v3637_v48 = vld [vmem:[%s7819_s0 + $0xbc] sm:$0xf0]  ;;  %v3644_v50 = vor.u32 %v4713_v51, %v3643_v49  ;;  %v7953_v51 = vld [vmem:[#allocation5_spill] sm:$0xff] }
  0xaa   :  { %v3640_v10 = vor.u32 %v4706_v47, %v3637_v48 }
  0xab   :  { %1905 = vmatpush.bf16.msra.mxu1 %v5292_v53 }
  0xac   :  { %1933 = vmatpush.bf16.msra.mxu2 %v5304_v55 }
  0xad   :  { %1961 = vmatpush.bf16.msra.mxu3 %v5287_v52  ;;  %v5863_v52 = vld [vmem:[%s7818_s4 + $0x300] sm:$0xff] }
  0xae   :  { %v1193_v5 = vpop.f32.mrf.mxu2  ;;  %v1140_v38 = vpop.f32.mrf.mxu0  ;;  %1469 = vmatpush.bf16.msrb.mxu0 %v5863_v52 }
  0xaf   :  { %v1221_v6 = vpop.f32.mrf.mxu3  ;;  %v1194_v8 = vadd.f32 %v1193_v5, %v1166_v43  ;;  %v1168_v54 = vpop.f32.mrf.mxu1  ;;  %1906 = vmatpush.bf16.msra.mxu1 %v5319_v58  ;;  %v7952_v43 = vld [vmem:[#allocation4_spill] sm:$0xff] }
  0xb0   :  { %v1169_v14 = vadd.f32 %v1168_v54, %v1140_v38  ;;  %1934 = vmatpush.bf16.msra.mxu2 %v5352_v35 }
  0xb1   :  { %1962 = vmatpush.bf16.msra.mxu3 %v5314_v57  ;;  %v5857_v16 = vadd.f32 %v1221_v6, %v1194_v8  ;;  %1363 = vmatmul.bf16.gmra.mxu0 %v3636_v9 }
  0xb2   :  { %1391 = vmatmul.bf16.gmra.mxu1 %v3640_v10  ;;  %1875 = vmatpush.bf16.msra.mxu0 %v5040_v3  ;;  %v4725_v3 = vld [vmem:[%s7819_s0 + $0x120] sm:$0xf0] }
  0xb3   :  { %1419 = vmatmul.bf16.gmra.mxu2 %v3644_v50  ;;  %1907 = vmatpush.bf16.msra.mxu1 %v5364_v37  ;;  %v4719_v37 = vld [vmem:[%s7819_s0 + $0xf4] sm:$0xf] }
  0xb4   :  { %1447 = vmatmul.bf16.gmra.mxu3 %v3648_v13  ;;  %1935 = vmatpush.bf16.msra.mxu2 %v5376_v45  ;;  %v3689_v45 = vld [vmem:[%s7819_s0 + $0x124] sm:$0xf0]  ;;  %v7954_v13 = vld [vmem:[#allocation6_spill] sm:$0xff] }
  0xb5   :  { %1963 = vmatpush.bf16.msra.mxu3 %v5359_v36  ;;  %v3687_v36 = vld [vmem:[%s7819_s0 + $0xf0] sm:$0xf]  ;;  %v3692_v24 = vor.u32 %v4719_v37, %v3689_v45  ;;  %v4701_v37 = vld [vmem:[%s7819_s0 + $0x60] sm:$0xf0]  ;;  %v4111_v45 = vld [vmem:[%s7820_s1] sm:$0xf] }
  0xb6   :  { %v1196_v53 = vpop.f32.mrf.mxu2  ;;  %v1142_v58 = vpop.f32.mrf.mxu0  ;;  %1876 = vmatpush.bf16.msra.mxu0 %v5064_v7  ;;  %v4720_v7 = vld [vmem:[%s7819_s0 + $0xfc] sm:$0xf]  ;;  %v3688_v22 = vor.u32 %v4725_v3, %v3687_v36  ;;  %v3599_v3 = vld [vmem:[%s7819_s0 + $0x30] sm:$0xf] }
  0xb7   :  { %v1224_v55 = vpop.f32.mrf.mxu3  ;;  %v1197_v57 = vadd.f32 %v1196_v53, %v1169_v14  ;;  %v1170_v35 = vpop.f32.mrf.mxu1  ;;  %1908 = vmatpush.bf16.msra.mxu1 %v5388_v59  ;;  %v4726_v59 = vld [vmem:[%s7819_s0 + $0x128] sm:$0xf0] }
  0xb8   :  { %v1171_v17 = vadd.f32 %v1170_v35, %v1142_v58  ;;  %1936 = vmatpush.bf16.msra.mxu2 %v5400_v61  ;;  %v3697_v61 = vld [vmem:[%s7819_s0 + $0x12c] sm:$0xf0]  ;;  %v7955_v53 = vld [vmem:[#allocation7_spill] sm:$0xff] }
  0xb9   :  { %1964 = vmatpush.bf16.msra.mxu3 %v5383_v56  ;;  %v5872_v18 = vadd.f32 %v1224_v55, %v1197_v57  ;;  %v3695_v56 = vld [vmem:[%s7819_s0 + $0xf8] sm:$0xf]  ;;  %v3700_v34 = vor.u32 %v4720_v7, %v3697_v61  ;;  %v4119_v61 = vld [vmem:[%s7820_s1 + $0x8] sm:$0xf] }
  0xba   :  { %1877 = vmatpush.bf16.msra.mxu0 %v7950_v25  ;;  %v3696_v30 = vor.u32 %v4726_v59, %v3695_v56  ;;  %v4734_v56 = vld [vmem:[%s7820_s1 + $0x30] sm:$0xf0]  ;;  %v4728_v59 = vld [vmem:[%s7820_s1 + $0x4] sm:$0xf]  ;;  %v4113_v7 = vld [vmem:[%s7820_s1 + $0x34] sm:$0xf0] }
  0xbb   :  { %1909 = vmatpush.bf16.msra.mxu1 %v5412_v63  ;;  %v4112_v25 = vor.u32 %v4734_v56, %v4111_v45 }
  0xbc   :  { %1937 = vmatpush.bf16.msra.mxu2 %v5424_v33 }
  0xbd   :  { %1965 = vmatpush.bf16.msra.mxu3 %v5407_v62  ;;  %v7951_v62 = vld [vmem:[#allocation3_spill] sm:$0xff] }
  0xbe   :  { %v1198_v20 = vpop.f32.mrf.mxu2  ;;  %v1145_v28 = vpop.f32.mrf.mxu0  ;;  %1878 = vmatpush.bf16.msra.mxu0 %v7951_v62  ;;  %v7956_v62 = vld [vmem:[#allocation19_spill] sm:$0xff] }
  0xbf   :  { %v1226_v21 = vpop.f32.mrf.mxu3  ;;  %v1199_v26 = vadd.f32 %v1198_v20, %v1171_v17  ;;  %v1173_v29 = vpop.f32.mrf.mxu1  ;;  %1910 = vmatpush.bf16.msra.mxu1 %v5439_v42  ;;  %v271_v42 = vld [vmem:[%s7819_s0 + $0x160] sm:$0xff]  ;;  %v4735_v20 = vld [vmem:[%s7820_s1 + $0x38] sm:$0xf0] }
  0xc0   :  { %v1174_v31 = vadd.f32 %v1173_v29, %v1145_v28  ;;  %1938 = vmatpush.bf16.msra.mxu2 %v5472_v27  ;;  %v270_v27 = vld [vmem:[%s7819_s0 + $0x158] sm:$0xff]  ;;  %v410_v48 = vunpack.c.l.b16 %v271_v42  ;;  %v411_v49 = vunpack.c.h.b16 %v271_v42  ;;  %v4116_v29 = vor.u32 %v4728_v59, %v4113_v7  ;;  %v7968_v59 = vld [vmem:[#allocation31_spill] sm:$0xff] }
  0xc1   :  { %1966 = vmatpush.bf16.msra.mxu3 %v5434_v39  ;;  %v5906_v33 = vadd.f32 %v1226_v21, %v1199_v26  ;;  %1368 = vmatmul.bf16.gmra.mxu0 %v3688_v22  ;;  %v408_v41 = vunpack.c.l.b16 %v270_v27  ;;  %v409_v47 = vunpack.c.h.b16 %v270_v27  ;;  %v7969_v7 = vld [vmem:[#allocation11_spill] sm:$0xff] }
  0xc2   :  { %1396 = vmatmul.bf16.gmra.mxu1 %v3692_v24  ;;  %1879 = vmatpush.bf16.msra.mxu0 %v7952_v43  ;;  %v462_v38 = vpack.c.b16 %v410_v48, %v410_v48  ;;  %v463_v54 = vpack.c.b16 %v411_v49, %v411_v49  ;;  %v3600_v24 = vor.u32 %v4701_v37, %v3599_v3  ;;  %v7960_v43 = vld [vmem:[#allocation23_spill] sm:$0xff]  ;;  %v7962_v48 = vld [vmem:[#allocation20_spill] sm:$0xff]  ;;  %v7963_v49 = vld [vmem:[#allocation21_spill] sm:$0xff] }
  0xc3   :  { %1424 = vmatmul.bf16.gmra.mxu2 %v3696_v30  ;;  %v460_v5 = vpack.c.b16 %v408_v41, %v408_v41  ;;  %v461_v6 = vpack.c.b16 %v409_v47, %v409_v47  ;;  %v4120_v30 = vor.u32 %v4735_v20, %v4119_v61  ;;  %v7961_v41 = vld [vmem:[#allocation9_spill] sm:$0xff]  ;;  %v7970_v20 = vld [vmem:[#allocation28_spill] sm:$0xff] }
  0xc4   :  { %1452 = vmatmul.bf16.gmra.mxu3 %v3700_v34 }
  0xc6   :  { %v1201_v63 = vpop.f32.mrf.mxu2  ;;  %v1147_v60 = vpop.f32.mrf.mxu0  ;;  %1880 = vmatpush.bf16.msra.mxu0 %v7953_v51 }
  0xc7   :  { %v1229_v46 = vpop.f32.mrf.mxu3  ;;  %v1202_v15 = vadd.f32 %v1201_v63, %v1174_v31  ;;  %v1175_v32 = vpop.f32.mrf.mxu1  ;;  %v7957_v63 = vld [vmem:[#allocation8_spill] sm:$0xff] }
  0xc8   :  { %v1176_v39 = vadd.f32 %v1175_v32, %v1147_v60 }
  0xc9   :  { %v5917_v40 = vadd.f32 %v1229_v46, %v1202_v15  ;;  %v7958_v46 = vld [vmem:[#allocation16_spill] sm:$0xff]  ;;  %v7959_v15 = vld [vmem:[#allocation17_spill] sm:$0xff] }
  0xca   :  { %1881 = vmatpush.bf16.msra.mxu0 %v7954_v13  ;;  %v7967_v13 = vld [vmem:[#allocation25_spill] sm:$0xff] }
  0xce   :  { %v1203_v0 = vpop.f32.mrf.mxu2  ;;  %v1150_v10 = vpop.f32.mrf.mxu0  ;;  %1882 = vmatpush.bf16.msra.mxu0 %v7955_v53 }
  0xcf   :  { %v1231_v4 = vpop.f32.mrf.mxu3  ;;  %v1204_v9 = vadd.f32 %v1203_v0, %v1176_v39  ;;  %v1178_v8 = vpop.f32.mrf.mxu1  ;;  %v3651_v0 = vld [vmem:[%s7819_s0 + $0x98] sm:$0xf] }
  0xd0   :  { %v1179_v50 = vadd.f32 %v1178_v8, %v1150_v10  ;;  %v4171_v10 = vld [vmem:[%s7820_s1 + $0x70] sm:$0xf]  ;;  %v4748_v8 = vld [vmem:[%s7820_s1 + $0xa0] sm:$0xf0] }
  0xd1   :  { %v5921_v14 = vadd.f32 %v1231_v4, %v1204_v9  ;;  %1373 = vmatmul.bf16.gmra.mxu0 %v460_v5  ;;  %v4714_v4 = vld [vmem:[%s7819_s0 + $0xc8] sm:$0xf0]  ;;  %v4747_v5 = vld [vmem:[%s7820_s1 + $0x98] sm:$0xf0]  ;;  %v4165_v9 = vld [vmem:[%s7820_s1 + $0x9c] sm:$0xf0]  ;;  %v4172_v45 = vor.u32 %v4748_v8, %v4171_v10 }
  0xd2   :  { %1401 = vmatmul.bf16.gmra.mxu1 %v461_v6  ;;  %v4741_v6 = vld [vmem:[%s7820_s1 + $0x6c] sm:$0xf] }
  0xd3   :  { %1429 = vmatmul.bf16.gmra.mxu2 %v462_v38  ;;  %v7964_v38 = vld [vmem:[#allocation27_spill] sm:$0xff]  ;;  %v4168_v37 = vor.u32 %v4741_v6, %v4165_v9 }
  0xd4   :  { %1457 = vmatmul.bf16.gmra.mxu3 %v463_v54  ;;  %v7965_v54 = vld [vmem:[#allocation10_spill] sm:$0xff] }
  0xd6   :  { %v1206_v55 = vpop.f32.mrf.mxu2  ;;  %v1152_v35 = vpop.f32.mrf.mxu0 }
  0xd7   :  { %v1234_v57 = vpop.f32.mrf.mxu3  ;;  %v1207_v58 = vadd.f32 %v1206_v55, %v1179_v50  ;;  %v1180_v17 = vpop.f32.mrf.mxu1  ;;  %v7966_v50 = vld [vmem:[#allocation24_spill] sm:$0xff] }
  0xd9   :  { %v5924_v36 = vadd.f32 %v1234_v57, %v1207_v58  ;;  %v3652_v57 = vor.u32 %v4714_v4, %v3651_v0 }
  0xde   :  { %v1208_v21 = vpop.f32.mrf.mxu2  ;;  %v1247_v26 = vpop.f32.mrf.mxu0 }
  0xdf   :  { %v1236_v22 = vpop.f32.mrf.mxu3  ;;  %v1275_v28 = vpop.f32.mrf.mxu1  ;;  %v1248_v34 = vadd.f32 %v1247_v26, %v5825_v1 }
  0xe0   :  { %v7971_v22 = vld [vmem:[#allocation29_spill] sm:$0xff] }
  0xe1   :  { %v1276_v31 = vadd.f32 %v1275_v28, %v1248_v34  ;;  %4105 = vmatmul.msk.bf16.vlgmr.msrb.gmra.mxu0 %vm1113_vm0, %v3600_v24  ;;  %v7972_v24 = vld [vmem:[#allocation35_spill] sm:$0xff] }
  0xe2   :  { %1799 = vmatmul.bf16.vlgmr.msrb.gmra.mxu1 %v4112_v25  ;;  %1987 = vmatpush.bf16.msrb.mxu0 %v7957_v63  ;;  %v7973_v25 = vld [vmem:[#allocation12_spill] sm:$0xff]  ;;  %v7976_v63 = vld [vmem:[#allocation39_spill] sm:$0xff] }
  0xe3   :  { %1827 = vmatmul.bf16.vlgmr.msrb.gmra.mxu2 %v4116_v29  ;;  %2015 = vmatpush.bf16.msrb.mxu1 %v7959_v15  ;;  %v7977_v15 = vld [vmem:[#allocation13_spill] sm:$0xff] }
  0xe4   :  { %1855 = vmatmul.bf16.vlgmr.msrb.gmra.mxu3 %v4120_v30  ;;  %2043 = vmatpush.bf16.msrb.mxu2 %v7956_v62  ;;  %v7975_v62 = vld [vmem:[#allocation33_spill] sm:$0xff] }
  0xe5   :  { %2071 = vmatpush.bf16.msrb.mxu3 %v7958_v46 }
  0xe6   :  { %v1303_v60 = vpop.f32.mrf.mxu2  ;;  %v1249_v39 = vpop.f32.mrf.mxu0  ;;  %1988 = vmatpush.bf16.msrb.mxu0 %v7961_v41  ;;  %v4223_v41 = vld [vmem:[%s7820_s1 + $0xd8] sm:$0xf] }
  0xe7   :  { %v1331_v32 = vpop.f32.mrf.mxu3  ;;  %v1304_v27 = vadd.f32 %v1303_v60, %v1276_v31  ;;  %v1277_v42 = vpop.f32.mrf.mxu1  ;;  %v1250_v1 = vadd.f32 %v1249_v39, %v5857_v16  ;;  %2016 = vmatpush.bf16.msrb.mxu1 %v7963_v49  ;;  %v4163_v16 = vld [vmem:[%s7820_s1 + $0x68] sm:$0xf]  ;;  %v7978_v60 = vld [vmem:[#allocation36_spill] sm:$0xff]  ;;  %v7979_v49 = vld [vmem:[#allocation37_spill] sm:$0xff] }
  0xe8   :  { %2044 = vmatpush.bf16.msrb.mxu2 %v7960_v43  ;;  %v4164_v58 = vor.u32 %v4747_v5, %v4163_v16  ;;  %v4727_v39 = vld [vmem:[%s7819_s0 + $0x130] sm:$0xf0]  ;;  %v4217_v43 = vld [vmem:[%s7820_s1 + $0x104] sm:$0xf0] }
  0xe9   :  { %v5959_v47 = vadd.f32 %v1331_v32, %v1304_v27  ;;  %2072 = vmatpush.bf16.msrb.mxu3 %v7962_v48  ;;  %v1278_v51 = vadd.f32 %v1277_v42, %v1250_v1  ;;  %v3703_v27 = vld [vmem:[%s7819_s0 + $0x100] sm:$0xf]  ;;  %v4760_v42 = vld [vmem:[%s7820_s1 + $0x100] sm:$0xf0]  ;;  %v4754_v1 = vld [vmem:[%s7820_s1 + $0xd4] sm:$0xf] }
  0xea   :  { %1989 = vmatpush.bf16.msrb.mxu0 %v7965_v54  ;;  %v4761_v48 = vld [vmem:[%s7820_s1 + $0x108] sm:$0xf0]  ;;  %v3704_v16 = vor.u32 %v4727_v39, %v3703_v27  ;;  %v4220_v8 = vor.u32 %v4754_v1, %v4217_v43  ;;  %v4127_v1 = vld [vmem:[%s7820_s1 + $0x10] sm:$0xf]  ;;  %v4736_v43 = vld [vmem:[%s7820_s1 + $0x40] sm:$0xf0] }
  0xeb   :  { %2017 = vmatpush.bf16.msrb.mxu1 %v7967_v13  ;;  %v7982_v13 = vld [vmem:[#allocation15_spill] sm:$0xff] }
  0xec   :  { %2045 = vmatpush.bf16.msrb.mxu2 %v7964_v38  ;;  %v4224_v38 = vor.u32 %v4761_v48, %v4223_v41  ;;  %v4730_v41 = vld [vmem:[%s7820_s1 + $0x14] sm:$0xf]  ;;  %v4129_v48 = vld [vmem:[%s7820_s1 + $0x44] sm:$0xf0] }
  0xed   :  { %2073 = vmatpush.bf16.msrb.mxu3 %v7966_v50  ;;  %v7981_v50 = vld [vmem:[#allocation44_spill] sm:$0xff] }
  0xee   :  { %v1305_v53 = vpop.f32.mrf.mxu2  ;;  %v1252_v17 = vpop.f32.mrf.mxu0  ;;  %1990 = vmatpush.bf16.msrb.mxu0 %v7969_v7 }
  0xef   :  { %v1333_v55 = vpop.f32.mrf.mxu3  ;;  %v1306_v35 = vadd.f32 %v1305_v53, %v1278_v51  ;;  %v1280_v3 = vpop.f32.mrf.mxu1  ;;  %v1253_v56 = vadd.f32 %v1252_v17, %v5872_v18  ;;  %2018 = vmatpush.bf16.msrb.mxu1 %v7971_v22  ;;  %v7974_v18 = vld [vmem:[#allocation32_spill] sm:$0xff]  ;;  %v7980_v51 = vld [vmem:[#allocation14_spill] sm:$0xff]  ;;  %v272_v17 = vld [vmem:[%s7819_s0 + $0x168] sm:$0xf] }
  0xf0   :  { %2046 = vmatpush.bf16.msrb.mxu2 %v7968_v59  ;;  %v412_v7 = vunpack.c.l.b16 %v272_v17 }
  0xf1   :  { %v5994_v61 = vadd.f32 %v1333_v55, %v1306_v35  ;;  %2074 = vmatpush.bf16.msrb.mxu3 %v7970_v20  ;;  %v1281_v21 = vadd.f32 %v1280_v3, %v1253_v56  ;;  %4106 = vmatmul.msk.bf16.gmra.mxu0 %vm1113_vm0, %v3652_v57  ;;  %v7984_v55 = vld [vmem:[#allocation42_spill] sm:$0xff]  ;;  %v1532_v3 = vld [vmem:[%s7820_s1 + $0x138] sm:$0xff] }
  0xf2   :  { %1804 = vmatmul.bf16.gmra.mxu1 %v4164_v58  ;;  %1991 = vmatpush.bf16.msrb.mxu0 %v7973_v25  ;;  %v1666_v20 = vunpack.c.l.b16 %v1532_v3 }
  0xf3   :  { %1832 = vmatmul.bf16.gmra.mxu2 %v4168_v37  ;;  %2019 = vmatpush.bf16.msrb.mxu1 %v7975_v62 }
  0xf4   :  { %1860 = vmatmul.bf16.gmra.mxu3 %v4172_v45  ;;  %2047 = vmatpush.bf16.msrb.mxu2 %v7972_v24  ;;  %v6056_v45 = vld [vmem:[%s7820_s1 + $0x140] sm:$0xff] }
  0xf5   :  { %2075 = vmatpush.bf16.msrb.mxu3 %v7974_v18  ;;  %v1668_v22 = vunpack.c.l.b16 %v6056_v45  ;;  %v464_v18 = vpack.c.b16 %v412_v7, %v412_v7  ;;  %v4749_v7 = vld [vmem:[%s7820_s1 + $0xa8] sm:$0xf0] }
  0xf6   :  { %v1308_v26 = vpop.f32.mrf.mxu2  ;;  %v1254_v30 = vpop.f32.mrf.mxu0  ;;  %1992 = vmatpush.bf16.msrb.mxu0 %v7977_v15 }
  0xf7   :  { %v1336_v28 = vpop.f32.mrf.mxu3  ;;  %v1309_v29 = vadd.f32 %v1308_v26, %v1281_v21  ;;  %v1282_v34 = vpop.f32.mrf.mxu1  ;;  %v1255_v31 = vadd.f32 %v1254_v30, %v5906_v33  ;;  %v4215_v33 = vld [vmem:[%s7820_s1 + $0xd0] sm:$0xf]  ;;  %2020 = vmatpush.bf16.msrb.mxu1 %v7979_v49  ;;  %v1667_v21 = vunpack.c.h.b16 %v1532_v3  ;;  %v1718_v26 = vpack.c.b16 %v1666_v20, %v1666_v20  ;;  %v4135_v49 = vld [vmem:[%s7820_s1 + $0x18] sm:$0xf] }
  0xf8   :  { %2048 = vmatpush.bf16.msrb.mxu2 %v7976_v63  ;;  %v4216_v5 = vor.u32 %v4760_v42, %v4215_v33  ;;  %v4729_v42 = vld [vmem:[%s7820_s1 + $0xc] sm:$0xf]  ;;  %v4181_v20 = vld [vmem:[%s7820_s1 + $0xac] sm:$0xf0] }
  0xf9   :  { %v6005_v46 = vadd.f32 %v1336_v28, %v1309_v29  ;;  %2076 = vmatpush.bf16.msrb.mxu3 %v7978_v60  ;;  %v1283_v32 = vadd.f32 %v1282_v34, %v1255_v31  ;;  %v1719_v30 = vpack.c.b16 %v1667_v21, %v1667_v21  ;;  %v1720_v34 = vpack.c.b16 %v1668_v22, %v1668_v22  ;;  %v4187_v21 = vld [vmem:[%s7820_s1 + $0x80] sm:$0xf]  ;;  %v4750_v22 = vld [vmem:[%s7820_s1 + $0xb0] sm:$0xf0] }
  0xfa   :  { %1993 = vmatpush.bf16.msrb.mxu0 %v7980_v51  ;;  %v4737_v51 = vld [vmem:[%s7820_s1 + $0x48] sm:$0xf0] }
  0xfb   :  { %2021 = vmatpush.bf16.msrb.mxu1 %v5684_v23 }
  0xfc   :  { %2049 = vmatpush.bf16.msrb.mxu2 %v5694_v44 }
  0xfd   :  { %2077 = vmatpush.bf16.msrb.mxu3 %v5679_v19  ;;  %v7983_v19 = vld [vmem:[#allocation41_spill] sm:$0xff] }
  0xfe   :  { %v1310_v0 = vpop.f32.mrf.mxu2  ;;  %v1257_v9 = vpop.f32.mrf.mxu0  ;;  %1994 = vmatpush.bf16.msrb.mxu0 %v7982_v13  ;;  %v7985_v13 = vld [vmem:[#allocation18_spill] sm:$0xff] }
  0xff   :  { %v1338_v4 = vpop.f32.mrf.mxu3  ;;  %v1311_v6 = vadd.f32 %v1310_v0, %v1283_v32  ;;  %v1285_v10 = vpop.f32.mrf.mxu1  ;;  %v1258_v54 = vadd.f32 %v1257_v9, %v5917_v40  ;;  %2022 = vmatpush.bf16.msrb.mxu1 %v7984_v55 }
 0x100   :  { %2050 = vmatpush.bf16.msrb.mxu2 %v7981_v50  ;;  %v6095_v50 = vld [vmem:[%s7818_s4 + $0x38] sm:$0xff] }
 0x101   :  { %v6040_v44 = vadd.f32 %v1338_v4, %v1311_v6  ;;  %2078 = vmatpush.bf16.msrb.mxu3 %v7983_v19  ;;  %v1286_v53 = vadd.f32 %v1285_v10, %v1258_v54  ;;  %4107 = vmatmul.msk.bf16.gmra.mxu0 %vm1113_vm0, %v3704_v16  ;;  %v4132_v10 = vor.u32 %v4730_v41, %v4129_v48  ;;  %v4864_v19 = vld [vmem:[%s7818_s4 + $0x78] sm:$0xff] }
 0x102   :  { %1809 = vmatmul.bf16.gmra.mxu1 %v4216_v5  ;;  %v4128_v5 = vor.u32 %v4736_v43, %v4127_v1  ;;  %v4872_v1 = vld [vmem:[%s7818_s4 + $0x58] sm:$0xff] }
 0x103   :  { %1837 = vmatmul.bf16.gmra.mxu2 %v4220_v8  ;;  %v4136_v8 = vor.u32 %v4737_v51, %v4135_v49 }
 0x104   :  { %1865 = vmatmul.bf16.gmra.mxu3 %v4224_v38 }
 0x106   :  { %v1313_v57 = vpop.f32.mrf.mxu2  ;;  %v1259_v23 = vpop.f32.mrf.mxu0 }
 0x107   :  { %v1341_v40 = vpop.f32.mrf.mxu3  ;;  %v1314_v58 = vadd.f32 %v1313_v57, %v1286_v53  ;;  %v1287_v35 = vpop.f32.mrf.mxu1  ;;  %v1260_v37 = vadd.f32 %v1259_v23, %v5921_v14  ;;  %v6107_v23 = vld [vmem:[%s7818_s4 + $0x30] sm:$0xff] }
 0x109   :  { %v6058_v56 = vadd.f32 %v1341_v40, %v1314_v58  ;;  %v1288_v59 = vadd.f32 %v1287_v35, %v1260_v37  ;;  %v7986_v35 = vld [vmem:[#allocation22_spill] sm:$0xff]  ;;  %v4173_v37 = vld [vmem:[%s7820_s1 + $0xa4] sm:$0xf0] }
 0x10e   :  { %v1315_v24 = vpop.f32.mrf.mxu2  ;;  %v1262_v29 = vpop.f32.mrf.mxu0 }
 0x10f   :  { %v1343_v25 = vpop.f32.mrf.mxu3  ;;  %v1316_v28 = vadd.f32 %v1315_v24, %v1288_v59  ;;  %v1290_v14 = vpop.f32.mrf.mxu1  ;;  %v1263_v31 = vadd.f32 %v1262_v29, %v5924_v36  ;;  %v4121_v36 = vld [vmem:[%s7820_s1 + $0x3c] sm:$0xf0]  ;;  %v4179_v59 = vld [vmem:[%s7820_s1 + $0x78] sm:$0xf]  ;;  %v6144_v24 = vld [vmem:[%s7818_s4 + $0x28] sm:$0xff] }
 0x110   :  { %v4124_v16 = vor.u32 %v4729_v42, %v4121_v36  ;;  %v7989_v36 = vld [vmem:[#allocation34_spill] sm:$0xff] }
 0x111   :  { %v6062_v62 = vadd.f32 %v1343_v25, %v1316_v28  ;;  %v1291_v63 = vadd.f32 %v1290_v14, %v1263_v31  ;;  %4108 = vmatmul.msk.bf16.gmra.mxu0 %vm1113_vm0, %v464_v18  ;;  %v7987_v25 = vld [vmem:[#allocation26_spill] sm:$0xff]  ;;  %v4868_v18 = vld [vmem:[%s7818_s4 + $0x68] sm:$0xff]  ;;  %v4180_v14 = vor.u32 %v4749_v7, %v4179_v59 }
 0x112   :  { %1814 = vmatmul.bf16.gmra.mxu1 %v1718_v26 }
 0x113   :  { %1842 = vmatmul.bf16.gmra.mxu2 %v1719_v30 }
 0x114   :  { %1870 = vmatmul.bf16.gmra.mxu3 %v1720_v34 }
 0x116   :  { %v1318_v15 = vpop.f32.mrf.mxu2  ;;  %v1264_v27 = vpop.f32.mrf.mxu0 }
 0x117   :  { %v1346_v60 = vpop.f32.mrf.mxu3  ;;  %v1319_v32 = vadd.f32 %v1318_v15, %v1291_v63  ;;  %v1292_v39 = vpop.f32.mrf.mxu1  ;;  %v4188_v15 = vor.u32 %v4750_v22, %v4187_v21  ;;  %v7988_v27 = vld [vmem:[#allocation30_spill] sm:$0xff] }
 0x118   :  { %v4870_v39 = vld [vmem:[%s7818_s4 + $0x60] sm:$0xff] }
 0x119   :  { %v6065_v33 = vadd.f32 %v1346_v60, %v1319_v32  ;;  %v6156_v32 = vld [vmem:[%s7818_s4 + $0x20] sm:$0xff] }
 0x11a   :  { %v4878_v22 = vld [vmem:[%s7818_s4 + $0x40] sm:$0xff] }
 0x11e   :  { %v1320_v0 = vpop.f32.mrf.mxu2  ;;  %v1359_v6 = vpop.f32.mrf.mxu0 }
 0x11f   :  { %v1348_v4 = vpop.f32.mrf.mxu3  ;;  %v1387_v9 = vpop.f32.mrf.mxu1  ;;  %v1360_v38 = vadd.f32 %v1359_v6, %v5959_v47 }
 0x120   :  { %v6180_v4 = vld [vmem:[%s7818_s4 + $0x10] sm:$0xff] }
 0x121   :  { %v1388_v54 = vadd.f32 %v1387_v9, %v1360_v38  ;;  %1883 = vmatmul.bf16.vlgmr.msra.gmra.mxu0 %v4124_v16  ;;  %v7990_v16 = vld [vmem:[#allocation38_spill] sm:$0xff]  ;;  %v4225_v9 = vld [vmem:[%s7820_s1 + $0x10c] sm:$0xf0] }
 0x122   :  { %1911 = vmatmul.bf16.vlgmr.msra.gmra.mxu1 %v4128_v5  ;;  %2099 = vmatpush.bf16.msra.mxu0 %v7985_v13  ;;  %v4756_v38 = vld [vmem:[%s7820_s1 + $0xe4] sm:$0xf]  ;;  %v4239_v13 = vld [vmem:[%s7820_s1 + $0xe8] sm:$0xf] }
 0x123   :  { %1939 = vmatmul.bf16.vlgmr.msra.gmra.mxu2 %v4132_v10  ;;  %2131 = vmatpush.bf16.msra.mxu1 %v5757_v2  ;;  %v4866_v2 = vld [vmem:[%s7818_s4 + $0x70] sm:$0xff]  ;;  %v4231_v10 = vld [vmem:[%s7820_s1 + $0xe0] sm:$0xf] }
 0x124   :  { %1967 = vmatmul.bf16.vlgmr.msra.gmra.mxu3 %v4136_v8  ;;  %2463 = vmatpush.bf16.msra.mxu2 %v6095_v50  ;;  %v4762_v8 = vld [vmem:[%s7820_s1 + $0x110] sm:$0xf0] }
 0x125   :  { %2491 = vmatpush.bf16.msra.mxu3 %v4864_v19  ;;  %v4763_v19 = vld [vmem:[%s7820_s1 + $0x118] sm:$0xf0] }
 0x126   :  { %v1415_v47 = vpop.f32.mrf.mxu2  ;;  %v1361_v57 = vpop.f32.mrf.mxu0  ;;  %2100 = vmatpush.bf16.msra.mxu0 %v7986_v35  ;;  %v4232_v35 = vor.u32 %v4762_v8, %v4231_v10  ;;  %v4240_v59 = vor.u32 %v4763_v19, %v4239_v13  ;;  %v4738_v13 = vld [vmem:[%s7820_s1 + $0x50] sm:$0xf0]  ;;  %v4732_v19 = vld [vmem:[%s7820_s1 + $0x24] sm:$0xf] }
 0x127   :  { %v1443_v53 = vpop.f32.mrf.mxu3  ;;  %v1416_v55 = vadd.f32 %v1415_v47, %v1388_v54  ;;  %v1389_v40 = vpop.f32.mrf.mxu1  ;;  %v1362_v58 = vadd.f32 %v1361_v57, %v5994_v61  ;;  %2132 = vmatpush.bf16.msra.mxu1 %v5781_v12  ;;  %v4742_v61 = vld [vmem:[%s7820_s1 + $0x74] sm:$0xf]  ;;  %v4743_v12 = vld [vmem:[%s7820_s1 + $0x7c] sm:$0xf]  ;;  %v4233_v54 = vld [vmem:[%s7820_s1 + $0x114] sm:$0xf0] }
 0x128   :  { %2464 = vmatpush.bf16.msra.mxu2 %v6107_v23  ;;  %v4176_v29 = vor.u32 %v4742_v61, %v4173_v37  ;;  %v4184_v63 = vor.u32 %v4743_v12, %v4181_v20  ;;  %v6216_v47 = vld [vmem:[%s7818_s4 + $0x8] sm:$0xff]  ;;  %v4236_v37 = vor.u32 %v4756_v38, %v4233_v54  ;;  %v6227_v12 = vld [vmem:[%s7818_s4] sm:$0xff]  ;;  %v4731_v38 = vld [vmem:[%s7820_s1 + $0x1c] sm:$0xf] }
 0x129   :  { %v6111_v17 = vadd.f32 %v1443_v53, %v1416_v55  ;;  %2492 = vmatpush.bf16.msra.mxu3 %v4866_v2  ;;  %v1390_v3 = vadd.f32 %v1389_v40, %v1362_v58  ;;  %v7991_v53 = vld [vmem:[#allocation40_spill] sm:$0xff]  ;;  %v4876_v55 = vld [vmem:[%s7818_s4 + $0x48] sm:$0xff]  ;;  %v4143_v54 = vld [vmem:[%s7820_s1 + $0x20] sm:$0xf] }
 0x12a   :  { %2101 = vmatpush.bf16.msra.mxu0 %v7987_v25  ;;  %v7992_v20 = vld [vmem:[#allocation43_spill] sm:$0xff] }
 0x12b   :  { %2133 = vmatpush.bf16.msra.mxu1 %v5817_v11 }
 0x12c   :  { %2465 = vmatpush.bf16.msra.mxu2 %v6144_v24 }
 0x12d   :  { %2493 = vmatpush.bf16.msra.mxu3 %v4868_v18 }
 0x12e   :  { %v1417_v26 = vpop.f32.mrf.mxu2  ;;  %v1364_v34 = vpop.f32.mrf.mxu0  ;;  %2102 = vmatpush.bf16.msra.mxu0 %v7988_v27 }
 0x12f   :  { %v1445_v28 = vpop.f32.mrf.mxu3  ;;  %v1418_v30 = vadd.f32 %v1417_v26, %v1390_v3  ;;  %v1392_v31 = vpop.f32.mrf.mxu1  ;;  %v1365_v60 = vadd.f32 %v1364_v34, %v6005_v46  ;;  %v6168_v46 = vld [vmem:[%s7818_s4 + $0x18] sm:$0xff]  ;;  %2134 = vmatpush.bf16.msra.mxu1 %v5863_v52  ;;  %v4874_v52 = vld [vmem:[%s7818_s4 + $0x50] sm:$0xff] }
 0x130   :  { %2466 = vmatpush.bf16.msra.mxu2 %v6156_v32  ;;  %v6243_v34 = vld [vmem:[%s7820_s1 + $0x150] sm:$0xff] }
 0x131   :  { %v6160_v11 = vadd.f32 %v1445_v28, %v1418_v30  ;;  %2494 = vmatpush.bf16.msra.mxu3 %v4870_v39  ;;  %v1393_v42 = vadd.f32 %v1392_v31, %v1365_v60  ;;  %1888 = vmatmul.bf16.gmra.mxu0 %v4176_v29  ;;  %v1672_v39 = vunpack.c.l.b16 %v6243_v34 }
 0x132   :  { %1916 = vmatmul.bf16.gmra.mxu1 %v4180_v14  ;;  %2103 = vmatpush.bf16.msra.mxu0 %v7989_v36  ;;  %v1534_v14 = vld [vmem:[%s7820_s1 + $0x148] sm:$0xff] }
 0x133   :  { %1944 = vmatmul.bf16.gmra.mxu2 %v4184_v63  ;;  %v1670_v60 = vunpack.c.l.b16 %v1534_v14  ;;  %v1671_v27 = vunpack.c.h.b16 %v1534_v14 }
 0x134   :  { %1972 = vmatmul.bf16.gmra.mxu3 %v4188_v15  ;;  %2467 = vmatpush.bf16.msra.mxu2 %v6168_v46  ;;  %v1669_v15 = vunpack.c.h.b16 %v6056_v45 }
 0x135   :  { %2495 = vmatpush.bf16.msra.mxu3 %v4872_v1 }
 0x136   :  { %v1420_v43 = vpop.f32.mrf.mxu2  ;;  %v1366_v49 = vpop.f32.mrf.mxu0  ;;  %2104 = vmatpush.bf16.msra.mxu0 %v7990_v16  ;;  %v1721_v1 = vpack.c.b16 %v1669_v15, %v1669_v15 }
 0x137   :  { %v1448_v41 = vpop.f32.mrf.mxu3  ;;  %v1421_v48 = vadd.f32 %v1420_v43, %v1393_v42  ;;  %v1394_v51 = vpop.f32.mrf.mxu1  ;;  %v1367_v0 = vadd.f32 %v1366_v49, %v6040_v44  ;;  %v4755_v44 = vld [vmem:[%s7820_s1 + $0xdc] sm:$0xf]  ;;  %v1722_v43 = vpack.c.b16 %v1670_v60, %v1670_v60  ;;  %v1723_v49 = vpack.c.b16 %v1671_v27, %v1671_v27  ;;  %v6325_v60 = vld [vmem:[%s7818_s4 + $0xf0] sm:$0xff]  ;;  %v4744_v27 = vld [vmem:[%s7820_s1 + $0x84] sm:$0xf] }
 0x138   :  { %2468 = vmatpush.bf16.msra.mxu2 %v6180_v4  ;;  %v4228_v58 = vor.u32 %v4755_v44, %v4225_v9 }
 0x139   :  { %v6184_v5 = vadd.f32 %v1448_v41, %v1421_v48  ;;  %2496 = vmatpush.bf16.msra.mxu3 %v4874_v52  ;;  %v1395_v6 = vadd.f32 %v1394_v51, %v1367_v0  ;;  %v1724_v51 = vpack.c.b16 %v1672_v39, %v1672_v39  ;;  %v4189_v39 = vld [vmem:[%s7820_s1 + $0xb4] sm:$0xf0] }
 0x13a   :  { %2105 = vmatpush.bf16.msra.mxu0 %v7991_v53  ;;  %v4145_v53 = vld [vmem:[%s7820_s1 + $0x54] sm:$0xf0] }
 0x13c   :  { %2469 = vmatpush.bf16.msra.mxu2 %v6216_v47 }
 0x13d   :  { %2497 = vmatpush.bf16.msra.mxu3 %v4876_v55  ;;  %v4151_v55 = vld [vmem:[%s7820_s1 + $0x28] sm:$0xf] }
 0x13e   :  { %v1422_v57 = vpop.f32.mrf.mxu2  ;;  %v1369_v3 = vpop.f32.mrf.mxu0  ;;  %2106 = vmatpush.bf16.msra.mxu0 %v7992_v20  ;;  %v6284_v20 = vld [vmem:[%s7818_s4 + $0x138] sm:$0xff] }
 0x13f   :  { %v1450_v40 = vpop.f32.mrf.mxu3  ;;  %v1423_v2 = vadd.f32 %v1422_v57, %v1395_v6  ;;  %v1397_v61 = vpop.f32.mrf.mxu1  ;;  %v1370_v7 = vadd.f32 %v1369_v3, %v6058_v56  ;;  %v4739_v57 = vld [vmem:[%s7820_s1 + $0x58] sm:$0xf0] }
 0x140   :  { %2470 = vmatpush.bf16.msra.mxu2 %v6227_v12 }
 0x141   :  { %v6231_v21 = vadd.f32 %v1450_v40, %v1423_v2  ;;  %2498 = vmatpush.bf16.msra.mxu3 %v4878_v22  ;;  %v1398_v25 = vadd.f32 %v1397_v61, %v1370_v7  ;;  %1893 = vmatmul.bf16.gmra.mxu0 %v4228_v58  ;;  %v4144_v2 = vor.u32 %v4738_v13, %v4143_v54  ;;  %v6290_v22 = vld [vmem:[%s7818_s4 + $0xb8] sm:$0xff] }
 0x142   :  { %1921 = vmatmul.bf16.gmra.mxu1 %v4232_v35 }
 0x143   :  { %1949 = vmatmul.bf16.gmra.mxu2 %v4236_v37  ;;  %v4148_v37 = vor.u32 %v4732_v19, %v4145_v53  ;;  %v6379_v19 = vld [vmem:[%s7818_s4 + $0x120] sm:$0xff] }
 0x144   :  { %1977 = vmatmul.bf16.gmra.mxu3 %v4240_v59  ;;  %v4152_v59 = vor.u32 %v4739_v57, %v4151_v55  ;;  %v6385_v53 = vld [vmem:[%s7818_s4 + $0xa0] sm:$0xff] }
 0x145   :  { %v6396_v57 = vld [vmem:[%s7818_s4 + $0xe0] sm:$0xff] }
 0x146   :  { %v1425_v56 = vpop.f32.mrf.mxu2  ;;  %v1371_v28 = vpop.f32.mrf.mxu0 }
 0x147   :  { %v1453_v18 = vpop.f32.mrf.mxu3  ;;  %v1426_v26 = vadd.f32 %v1425_v56, %v1398_v25  ;;  %v1399_v29 = vpop.f32.mrf.mxu1  ;;  %v1372_v30 = vadd.f32 %v1371_v28, %v6062_v62  ;;  %v6299_v25 = vld [vmem:[%s7818_s4 + $0xf8] sm:$0xff] }
 0x149   :  { %v6245_v31 = vadd.f32 %v1453_v18, %v1426_v26  ;;  %v1400_v63 = vadd.f32 %v1399_v29, %v1372_v30  ;;  %v6308_v30 = vld [vmem:[%s7818_s4 + $0x130] sm:$0xff] }
 0x14e   :  { %v1427_v42 = vpop.f32.mrf.mxu2  ;;  %v1374_v62 = vpop.f32.mrf.mxu0 }
 0x14f   :  { %v1455_v36 = vpop.f32.mrf.mxu3  ;;  %v1428_v41 = vadd.f32 %v1427_v42, %v1400_v63  ;;  %v1402_v48 = vpop.f32.mrf.mxu1  ;;  %v1375_v0 = vadd.f32 %v1374_v62, %v6065_v33  ;;  %v4137_v33 = vld [vmem:[%s7820_s1 + $0x4c] sm:$0xf0]  ;;  %v4195_v42 = vld [vmem:[%s7820_s1 + $0x88] sm:$0xf]  ;;  %v4752_v62 = vld [vmem:[%s7820_s1 + $0xc0] sm:$0xf0] }
 0x150   :  { %v4140_v35 = vor.u32 %v4731_v38, %v4137_v33  ;;  %v6314_v63 = vld [vmem:[%s7818_s4 + $0xb0] sm:$0xff] }
 0x151   :  { %v6250_v16 = vadd.f32 %v1455_v36, %v1428_v41  ;;  %v1403_v52 = vadd.f32 %v1402_v48, %v1375_v0  ;;  %1898 = vmatmul.bf16.gmra.mxu0 %v1721_v1  ;;  %v4751_v36 = vld [vmem:[%s7820_s1 + $0xb8] sm:$0xf0]  ;;  %v4745_v1 = vld [vmem:[%s7820_s1 + $0x8c] sm:$0xf]  ;;  %v4203_v41 = vld [vmem:[%s7820_s1 + $0x90] sm:$0xf] }
 0x152   :  { %1926 = vmatmul.bf16.gmra.mxu1 %v1722_v43  ;;  %v4197_v43 = vld [vmem:[%s7820_s1 + $0xbc] sm:$0xf0]  ;;  %v6355_v48 = vld [vmem:[%s7818_s4 + $0x128] sm:$0xff]  ;;  %v4204_v54 = vor.u32 %v4752_v62, %v4203_v41  ;;  %v6467_v41 = vld [vmem:[%s7818_s4 + $0xd0] sm:$0xff] }
 0x153   :  { %1954 = vmatmul.bf16.gmra.mxu2 %v1723_v49  ;;  %v6361_v49 = vld [vmem:[%s7818_s4 + $0xa8] sm:$0xff]  ;;  %v4200_v33 = vor.u32 %v4745_v1, %v4197_v43  ;;  %v4255_v1 = vld [vmem:[%s7820_s1 + $0xf8] sm:$0xf] }
 0x154   :  { %1982 = vmatmul.bf16.gmra.mxu3 %v1724_v51  ;;  %v4889_v51 = vld [vmem:[%s7818_s4 + $0x168] sm:$0xff] }
 0x155   :  { %v6370_v0 = vld [vmem:[%s7818_s4 + $0xe8] sm:$0xff] }
 0x156   :  { %v1430_v45 = vpop.f32.mrf.mxu2  ;;  %v1376_v9 = vpop.f32.mrf.mxu0  ;;  %v4765_v43 = vld [vmem:[%s7820_s1 + $0x128] sm:$0xf0] }
 0x157   :  { %v1458_v6 = vpop.f32.mrf.mxu3  ;;  %v1431_v44 = vadd.f32 %v1430_v45, %v1403_v52  ;;  %v1404_v10 = vpop.f32.mrf.mxu1  ;;  %v6473_v62 = vld [vmem:[%s7818_s4 + $0x108] sm:$0xff] }
 0x159   :  { %v6252_v8 = vadd.f32 %v1458_v6, %v1431_v44  ;;  %v4192_v6 = vor.u32 %v4744_v27, %v4189_v39  ;;  %v4196_v44 = vor.u32 %v4751_v36, %v4195_v42  ;;  %v4247_v27 = vld [vmem:[%s7820_s1 + $0xf0] sm:$0xf]  ;;  %v4764_v39 = vld [vmem:[%s7820_s1 + $0x120] sm:$0xf0]  ;;  %v4758_v42 = vld [vmem:[%s7820_s1 + $0xf4] sm:$0xf] }
 0x15a   :  { %v4249_v36 = vld [vmem:[%s7820_s1 + $0x124] sm:$0xf0] }
 0x15e   :  { %v1432_v40 = vpop.f32.mrf.mxu2  ;;  %v1471_v3 = vpop.f32.mrf.mxu0 }
 0x15f   :  { %v1460_v58 = vpop.f32.mrf.mxu3  ;;  %v1800_v61 = vpop.f32.mrf.mxu1  ;;  %v6279_v7 = vadd.f32 %v1471_v3, %v6111_v17  ;;  %v4881_v17 = vld [vmem:[%s7818_s4 + $0x178] sm:$0xff] }
 0x160   :  { %v6402_v40 = vld [vmem:[%s7818_s4 + $0x118] sm:$0xff] }
 0x161   :  { %1995 = vmatmul.bf16.vlgmr.msrb.gmra.mxu0 %v4140_v35  ;;  %v6408_v58 = vld [vmem:[%s7818_s4 + $0x98] sm:$0xff] }
 0x162   :  { %2023 = vmatmul.bf16.vlgmr.msrb.gmra.mxu1 %v4144_v2  ;;  %2519 = vmatpush.bf16.msrb.mxu0 %v6290_v22  ;;  %v4897_v35 = vld [vmem:[%s7818_s4 + $0x158] sm:$0xff] }
 0x163   :  { %2051 = vmatmul.bf16.vlgmr.msrb.gmra.mxu2 %v4148_v37  ;;  %2547 = vmatpush.bf16.msrb.mxu1 %v6299_v25 }
 0x164   :  { %2079 = vmatmul.bf16.vlgmr.msrb.gmra.mxu3 %v4152_v59  ;;  %2575 = vmatpush.bf16.msrb.mxu2 %v6284_v20 }
 0x165   :  { %2603 = vmatpush.bf16.msrb.mxu3 %v4881_v17 }
 0x166   :  { %v1828_v56 = vpop.f32.mrf.mxu2  ;;  %v1473_v28 = vpop.f32.mrf.mxu0  ;;  %2520 = vmatpush.bf16.msrb.mxu0 %v6314_v63 }
 0x167   :  { %v1856_v18 = vpop.f32.mrf.mxu3  ;;  %v1829_v26 = vadd.f32 %v1828_v56, %v1800_v61  ;;  %v1802_v29 = vpop.f32.mrf.mxu1  ;;  %v6303_v14 = vadd.f32 %v1473_v28, %v6160_v11  ;;  %v4885_v11 = vld [vmem:[%s7818_s4 + $0x170] sm:$0xff]  ;;  %2548 = vmatpush.bf16.msrb.mxu1 %v6325_v60  ;;  %v6420_v56 = vld [vmem:[%s7818_s4 + $0xd8] sm:$0xff] }
 0x168   :  { %2576 = vmatpush.bf16.msrb.mxu2 %v6308_v30  ;;  %v4901_v28 = vld [vmem:[%s7818_s4 + $0x150] sm:$0xff] }
 0x169   :  { %v6317_v15 = vadd.f32 %v1856_v18, %v1829_v26  ;;  %2604 = vmatpush.bf16.msrb.mxu3 %v4885_v11  ;;  %v6426_v18 = vld [vmem:[%s7818_s4 + $0x110] sm:$0xff]  ;;  %v4241_v11 = vld [vmem:[%s7820_s1 + $0x11c] sm:$0xf0] }
 0x16a   :  { %2521 = vmatpush.bf16.msrb.mxu0 %v6361_v49 }
 0x16b   :  { %2549 = vmatpush.bf16.msrb.mxu1 %v6370_v0 }
 0x16c   :  { %2577 = vmatpush.bf16.msrb.mxu2 %v6355_v48 }
 0x16d   :  { %2605 = vmatpush.bf16.msrb.mxu3 %v4889_v51  ;;  %v6479_v51 = vld [vmem:[%s7818_s4 + $0x88] sm:$0xff] }
 0x16e   :  { %v1830_v52 = vpop.f32.mrf.mxu2  ;;  %v1476_v10 = vpop.f32.mrf.mxu0  ;;  %2522 = vmatpush.bf16.msrb.mxu0 %v6385_v53 }
 0x16f   :  { %v1858_v45 = vpop.f32.mrf.mxu3  ;;  %v1831_v9 = vadd.f32 %v1830_v52, %v1802_v29  ;;  %v1805_v38 = vpop.f32.mrf.mxu1  ;;  %v6374_v13 = vadd.f32 %v1476_v10, %v6184_v5  ;;  %v4893_v5 = vld [vmem:[%s7818_s4 + $0x160] sm:$0xff]  ;;  %2550 = vmatpush.bf16.msrb.mxu1 %v6396_v57  ;;  %v4757_v29 = vld [vmem:[%s7820_s1 + $0xec] sm:$0xf] }
 0x170   :  { %2578 = vmatpush.bf16.msrb.mxu2 %v6379_v19  ;;  %v4905_v52 = vld [vmem:[%s7818_s4 + $0x148] sm:$0xff] }
 0x171   :  { %v6388_v55 = vadd.f32 %v1858_v45, %v1831_v9  ;;  %2606 = vmatpush.bf16.msrb.mxu3 %v4893_v5  ;;  %2000 = vmatmul.bf16.gmra.mxu0 %v4192_v6  ;;  %v4248_v9 = vor.u32 %v4764_v39, %v4247_v27  ;;  %v4256_v5 = vor.u32 %v4765_v43, %v4255_v1  ;;  %v6526_v1 = vld [vmem:[%s7820_s1 + $0x160] sm:$0xff] }
 0x172   :  { %2028 = vmatmul.bf16.gmra.mxu1 %v4196_v44  ;;  %2523 = vmatpush.bf16.msrb.mxu0 %v6408_v58  ;;  %v4244_v44 = vor.u32 %v4757_v29, %v4241_v11 }
 0x173   :  { %2056 = vmatmul.bf16.gmra.mxu2 %v4200_v33  ;;  %2551 = vmatpush.bf16.msrb.mxu1 %v6420_v56 }
 0x174   :  { %2084 = vmatmul.bf16.gmra.mxu3 %v4204_v54  ;;  %2579 = vmatpush.bf16.msrb.mxu2 %v6402_v40  ;;  %v4252_v54 = vor.u32 %v4758_v42, %v4249_v36  ;;  %v1536_v42 = vld [vmem:[%s7820_s1 + $0x158] sm:$0xff] }
 0x175   :  { %2607 = vmatpush.bf16.msrb.mxu3 %v4897_v35 }
 0x176   :  { %v1833_v2 = vpop.f32.mrf.mxu2  ;;  %v1478_v37 = vpop.f32.mrf.mxu0 }
 0x177   :  { %v1861_v3 = vpop.f32.mrf.mxu3  ;;  %v1834_v61 = vadd.f32 %v1833_v2, %v1805_v38  ;;  %v1807_v59 = vpop.f32.mrf.mxu1  ;;  %v6415_v17 = vadd.f32 %v1478_v37, %v6231_v21  ;;  %v6434_v21 = vld [vmem:[%s7818_s4 + $0x90] sm:$0xff]  ;;  %2552 = vmatpush.bf16.msrb.mxu1 %v6467_v41  ;;  %v6491_v2 = vld [vmem:[%s7818_s4 + $0xc8] sm:$0xff]  ;;  %v4909_v37 = vld [vmem:[%s7818_s4 + $0x140] sm:$0xff] }
 0x178   :  { %2580 = vmatpush.bf16.msrb.mxu2 %v6426_v18  ;;  %2524 = vmatpush.bf16.msrb.mxu0 %v6434_v21 }
 0x179   :  { %v6429_v26 = vadd.f32 %v1861_v3, %v1834_v61  ;;  %2608 = vmatpush.bf16.msrb.mxu3 %v4901_v28  ;;  %v6497_v3 = vld [vmem:[%s7818_s4 + $0x100] sm:$0xff] }
 0x17b   :  { %2553 = vmatpush.bf16.msrb.mxu1 %v6491_v2 }
 0x17c   :  { %2581 = vmatpush.bf16.msrb.mxu2 %v6473_v62  ;;  %2525 = vmatpush.bf16.msrb.mxu0 %v6479_v51 }
 0x17d   :  { %2609 = vmatpush.bf16.msrb.mxu3 %v4905_v52  ;;  %v1673_v52 = vunpack.c.h.b16 %v6243_v34 }
 0x17e   :  { %v1835_v45 = vpop.f32.mrf.mxu2  ;;  %v1481_v38 = vpop.f32.mrf.mxu0 }
 0x17f   :  { %v1863_v6 = vpop.f32.mrf.mxu3  ;;  %v1836_v10 = vadd.f32 %v1835_v45, %v1807_v59  ;;  %v1810_v33 = vpop.f32.mrf.mxu1  ;;  %v6486_v35 = vadd.f32 %v1481_v38, %v6245_v31  ;;  %v6505_v31 = vld [vmem:[%s7818_s4 + $0x80] sm:$0xff]  ;;  %v1674_v45 = vunpack.c.l.b16 %v1536_v42  ;;  %v1725_v38 = vpack.c.b16 %v1673_v52, %v1673_v52 }
 0x180   :  { %2582 = vmatpush.bf16.msrb.mxu2 %v6497_v3  ;;  %7994 = vst [vmem:[#allocation3_spill] sm:$0xff] %v6505_v31  ;;  %2526 = vmatpush.bf16.msrb.mxu0 %v6505_v31  ;;  %v6514_v59 = vld [vmem:[%s7818_s4 + $0xc0] sm:$0xff] }
 0x181   :  { %7993 = vst [vmem:[#allocation2_spill] sm:$0xff] %v6486_v35  ;;  %v6500_v61 = vadd.f32 %v1863_v6, %v1836_v10  ;;  %2610 = vmatpush.bf16.msrb.mxu3 %v4909_v37  ;;  %2005 = vmatmul.bf16.gmra.mxu0 %v4244_v44  ;;  %v1675_v6 = vunpack.c.h.b16 %v1536_v42  ;;  %v1676_v44 = vunpack.c.l.b16 %v6526_v1 }
 0x182   :  { %2033 = vmatmul.bf16.gmra.mxu1 %v4248_v9 }
 0x183   :  { %2061 = vmatmul.bf16.gmra.mxu2 %v4252_v54  ;;  %2554 = vmatpush.bf16.msrb.mxu1 %v6514_v59  ;;  %v1727_v37 = vpack.c.b16 %v1675_v6, %v1675_v6  ;;  %v4159_v6 = vld [vmem:[%s7820_s1 + $0x30] sm:$0xf] }
 0x184   :  { %2089 = vmatmul.bf16.gmra.mxu3 %v4256_v5 }
 0x186   :  { %v1838_v28 = vpop.f32.mrf.mxu2  ;;  %v1483_v27 = vpop.f32.mrf.mxu0 }
 0x187   :  { %v1866_v29 = vpop.f32.mrf.mxu3  ;;  %v1839_v11 = vadd.f32 %v1838_v28, %v1810_v33  ;;  %v1812_v39 = vpop.f32.mrf.mxu1  ;;  %v6521_v36 = vadd.f32 %v1483_v27, %v6250_v16  ;;  %v1726_v33 = vpack.c.b16 %v1674_v45, %v1674_v45  ;;  %v1728_v28 = vpack.c.b16 %v1676_v44, %v1676_v44  ;;  %v4740_v44 = vld [vmem:[%s7820_s1 + $0x60] sm:$0xf0] }
 0x189   :  { %7995 = vst [vmem:[#allocation4_spill] sm:$0xff] %v6521_v36  ;;  %v6528_v43 = vadd.f32 %v1866_v29, %v1839_v11 }
 0x18e   :  { %v1840_v9 = vpop.f32.mrf.mxu2  ;;  %v1486_v16 = vpop.f32.mrf.mxu0 }
 0x18f   :  { %v1868_v10 = vpop.f32.mrf.mxu3  ;;  %v1841_v54 = vadd.f32 %v1840_v9, %v1812_v39  ;;  %v1815_v5 = vpop.f32.mrf.mxu1  ;;  %v6533_v27 = vadd.f32 %v1486_v16, %v6252_v8  ;;  %v4733_v39 = vld [vmem:[%s7820_s1 + $0x2c] sm:$0xf]  ;;  %v4153_v8 = vld [vmem:[%s7820_s1 + $0x5c] sm:$0xf0]  ;;  %v4773_v9 = vld [vmem:[%s7821_s2 + $0x30] sm:$0xf0] }
 0x190   :  { %v4156_v16 = vor.u32 %v4733_v39, %v4153_v8  ;;  %v6574_v39 = vld [vmem:[%s7818_s4 + $0x1b8] sm:$0xff] }
 0x191   :  { %7996 = vst [vmem:[#allocation5_spill] sm:$0xff] %v6533_v27  ;;  %v6535_v29 = vadd.f32 %v1868_v10, %v1841_v54  ;;  %2010 = vmatmul.bf16.gmra.mxu0 %v1725_v38  ;;  %v4767_v10 = vld [vmem:[%s7821_s2 + $0x4] sm:$0xf]  ;;  %v4273_v38 = vld [vmem:[%s7821_s2 + $0x34] sm:$0xf0] }
 0x192   :  { %2038 = vmatmul.bf16.gmra.mxu1 %v1726_v33  ;;  %v6568_v27 = vld [vmem:[%s7818_s4 + $0x238] sm:$0xff]  ;;  %7998 = vst [vmem:[#allocation7_spill] sm:$0xff] %v6574_v39 }
 0x193   :  { %2066 = vmatmul.bf16.gmra.mxu2 %v1727_v37  ;;  %7997 = vst [vmem:[#allocation6_spill] sm:$0xff] %v6568_v27  ;;  %v6583_v8 = vld [vmem:[%s7818_s4 + $0x1f8] sm:$0xff] }
 0x194   :  { %2094 = vmatmul.bf16.gmra.mxu3 %v1728_v28  ;;  %7999 = vst [vmem:[#allocation19_spill] sm:$0xff] %v6583_v8 }
 0x196   :  { %v1843_v34 = vpop.f32.mrf.mxu2  ;;  %v1488_v36 = vpop.f32.mrf.mxu0 }
 0x197   :  { %v1871_v11 = vpop.f32.mrf.mxu3  ;;  %v1844_v42 = vadd.f32 %v1843_v34, %v1815_v5  ;;  %v1817_v52 = vpop.f32.mrf.mxu1  ;;  %v4271_v36 = vld [vmem:[%s7821_s2] sm:$0xf]  ;;  %v4160_v5 = vor.u32 %v4740_v44, %v4159_v6 }
 0x198   :  { %v4272_v34 = vor.u32 %v4773_v9, %v4271_v36 }
 0x199   :  { %v6537_v45 = vadd.f32 %v1871_v11, %v1844_v42  ;;  %v4276_v11 = vor.u32 %v4767_v10, %v4273_v38 }
 0x19e   :  { %v1845_v33 = vpop.f32.mrf.mxu2  ;;  %v1884_v37 = vpop.f32.mrf.mxu0 }
 0x19f   :  { %v1873_v54 = vpop.f32.mrf.mxu3  ;;  %v1912_v28 = vpop.f32.mrf.mxu1  ;;  %v1885_v42 = vadd.f32 %v1884_v37, %v6317_v15  ;;  %v4913_v15 = vld [vmem:[%s7818_s4 + $0x278] sm:$0xff]  ;;  %v6590_v33 = vld [vmem:[%s7818_s4 + $0x230] sm:$0xff] }
 0x1a0   :  { %8000 = vst [vmem:[#allocation8_spill] sm:$0xff] %v6590_v33  ;;  %v6596_v54 = vld [vmem:[%s7818_s4 + $0x1b0] sm:$0xff] }
 0x1a1   :  { %v1913_v52 = vadd.f32 %v1912_v28, %v1885_v42  ;;  %2107 = vmatmul.bf16.vlgmr.msra.gmra.mxu0 %v4156_v16  ;;  %8001 = vst [vmem:[#allocation16_spill] sm:$0xff] %v6596_v54  ;;  %v4746_v28 = vld [vmem:[%s7820_s1 + $0x94] sm:$0xf]  ;;  %v4753_v42 = vld [vmem:[%s7820_s1 + $0xc8] sm:$0xf0] }
 0x1a2   :  { %4265 = vmatmul.msk.bf16.vlgmr.msra.gmra.mxu1 %vm1113_vm0, %v4160_v5  ;;  %2631 = vmatpush.bf16.msra.mxu0 %v6574_v39  ;;  %v6607_v5 = vld [vmem:[%s7818_s4 + $0x1f0] sm:$0xff] }
 0x1a3   :  { %2471 = vmatmul.bf16.vlgmr.msra.gmra.mxu2 %v4272_v34  ;;  %2659 = vmatpush.bf16.msra.mxu1 %v6583_v8  ;;  %8002 = vst [vmem:[#allocation17_spill] sm:$0xff] %v6607_v5  ;;  %v4205_v34 = vld [vmem:[%s7820_s1 + $0xc4] sm:$0xf0] }
 0x1a4   :  { %2499 = vmatmul.bf16.vlgmr.msra.gmra.mxu3 %v4276_v11  ;;  %2687 = vmatpush.bf16.msra.mxu2 %v6568_v27  ;;  %v4211_v11 = vld [vmem:[%s7820_s1 + $0x98] sm:$0xf] }
 0x1a5   :  { %2715 = vmatpush.bf16.msra.mxu3 %v4913_v15  ;;  %v4786_v15 = vld [vmem:[%s7821_s2 + $0x98] sm:$0xf0] }
 0x1a6   :  { %v1940_v6 = vpop.f32.mrf.mxu2  ;;  %v1886_v9 = vpop.f32.mrf.mxu0  ;;  %2632 = vmatpush.bf16.msra.mxu0 %v6596_v54  ;;  %v4208_v54 = vor.u32 %v4746_v28, %v4205_v34  ;;  %v6677_v28 = vld [vmem:[%s7818_s4 + $0x1e0] sm:$0xff] }
 0x1a7   :  { %v1968_v44 = vpop.f32.mrf.mxu3  ;;  %v1941_v36 = vadd.f32 %v1940_v6, %v1913_v52  ;;  %v1914_v10 = vpop.f32.mrf.mxu1  ;;  %v1887_v38 = vadd.f32 %v1886_v9, %v6388_v55  ;;  %v4917_v55 = vld [vmem:[%s7818_s4 + $0x270] sm:$0xff]  ;;  %2660 = vmatpush.bf16.msra.mxu1 %v6607_v5  ;;  %v4323_v52 = vld [vmem:[%s7821_s2 + $0x68] sm:$0xf]  ;;  %v4780_v6 = vld [vmem:[%s7821_s2 + $0x6c] sm:$0xf]  ;;  %8008 = vst [vmem:[#allocation10_spill] sm:$0xff] %v6677_v28 }
 0x1a8   :  { %2688 = vmatpush.bf16.msra.mxu2 %v6590_v33  ;;  %v6643_v9 = vld [vmem:[%s7818_s4 + $0x1a8] sm:$0xff]  ;;  %v4212_v33 = vor.u32 %v4753_v42, %v4211_v11 }
 0x1a9   :  { %v6599_v16 = vadd.f32 %v1968_v44, %v1941_v36  ;;  %2716 = vmatpush.bf16.msra.mxu3 %v4917_v55  ;;  %v1915_v37 = vadd.f32 %v1914_v10, %v1887_v38  ;;  %v4325_v44 = vld [vmem:[%s7821_s2 + $0x9c] sm:$0xf0]  ;;  %v6637_v36 = vld [vmem:[%s7818_s4 + $0x228] sm:$0xff]  ;;  %8004 = vst [vmem:[#allocation9_spill] sm:$0xff] %v6643_v9 }
 0x1aa   :  { %8003 = vst [vmem:[#allocation23_spill] sm:$0xff] %v6637_v36  ;;  %2633 = vmatpush.bf16.msra.mxu0 %v6643_v9  ;;  %v4921_v10 = vld [vmem:[%s7818_s4 + $0x268] sm:$0xff]  ;;  %v4324_v9 = vor.u32 %v4786_v15, %v4323_v52  ;;  %v4328_v8 = vor.u32 %v4780_v6, %v4325_v44  ;;  %v6699_v52 = vld [vmem:[%s7818_s4 + $0x1d8] sm:$0xff]  ;;  %v6705_v15 = vld [vmem:[%s7818_s4 + $0x210] sm:$0xff] }
 0x1ab   :  { %v6652_v38 = vld [vmem:[%s7818_s4 + $0x1e8] sm:$0xff]  ;;  %8011 = vst [vmem:[#allocation31_spill] sm:$0xff] %v6699_v52  ;;  %v4933_v44 = vld [vmem:[%s7818_s4 + $0x250] sm:$0xff] }
 0x1ac   :  { %2689 = vmatpush.bf16.msra.mxu2 %v6637_v36  ;;  %8005 = vst [vmem:[#allocation20_spill] sm:$0xff] %v6652_v38  ;;  %2661 = vmatpush.bf16.msra.mxu1 %v6652_v38  ;;  %v6665_v38 = vld [vmem:[%s7818_s4 + $0x1a0] sm:$0xff] }
 0x1ad   :  { %2717 = vmatpush.bf16.msra.mxu3 %v4921_v10  ;;  %v6659_v10 = vld [vmem:[%s7818_s4 + $0x220] sm:$0xff]  ;;  %8007 = vst [vmem:[#allocation27_spill] sm:$0xff] %v6665_v38 }
 0x1ae   :  { %v1942_v55 = vpop.f32.mrf.mxu2  ;;  %v1889_v39 = vpop.f32.mrf.mxu0  ;;  %8006 = vst [vmem:[#allocation21_spill] sm:$0xff] %v6659_v10  ;;  %2634 = vmatpush.bf16.msra.mxu0 %v6665_v38 }
 0x1af   :  { %v1970_v36 = vpop.f32.mrf.mxu3  ;;  %v1943_v5 = vadd.f32 %v1942_v55, %v1915_v37  ;;  %v1917_v27 = vpop.f32.mrf.mxu1  ;;  %v1890_v35 = vadd.f32 %v1889_v39, %v6429_v26  ;;  %v4925_v26 = vld [vmem:[%s7818_s4 + $0x260] sm:$0xff]  ;;  %8012 = vst [vmem:[#allocation11_spill] sm:$0xff] %v6705_v15  ;;  %v4257_v55 = vld [vmem:[%s7820_s1 + $0x12c] sm:$0xf0] }
 0x1b0   :  { %2690 = vmatpush.bf16.msra.mxu2 %v6659_v10  ;;  %2662 = vmatpush.bf16.msra.mxu1 %v6677_v28 }
 0x1b1   :  { %v6668_v37 = vadd.f32 %v1970_v36, %v1943_v5  ;;  %2718 = vmatpush.bf16.msra.mxu3 %v4925_v26  ;;  %v1918_v39 = vadd.f32 %v1917_v27, %v1890_v35  ;;  %2112 = vmatmul.bf16.gmra.mxu0 %v4208_v54  ;;  %v6683_v5 = vld [vmem:[%s7818_s4 + $0x218] sm:$0xff]  ;;  %v4263_v26 = vld [vmem:[%s7820_s1 + $0x100] sm:$0xf] }
 0x1b2   :  { %4266 = vmatmul.msk.bf16.gmra.mxu1 %vm1113_vm0, %v4212_v33  ;;  %8009 = vst [vmem:[#allocation24_spill] sm:$0xff] %v6683_v5  ;;  %v6689_v35 = vld [vmem:[%s7818_s4 + $0x198] sm:$0xff] }
 0x1b3   :  { %2476 = vmatmul.bf16.gmra.mxu2 %v4324_v9  ;;  %8010 = vst [vmem:[#allocation25_spill] sm:$0xff] %v6689_v35  ;;  %2635 = vmatpush.bf16.msra.mxu0 %v6689_v35  ;;  %v4929_v27 = vld [vmem:[%s7818_s4 + $0x258] sm:$0xff] }
 0x1b4   :  { %2504 = vmatmul.bf16.gmra.mxu3 %v4328_v8  ;;  %2691 = vmatpush.bf16.msra.mxu2 %v6683_v5  ;;  %v4759_v9 = vld [vmem:[%s7820_s1 + $0xfc] sm:$0xf] }
 0x1b5   :  { %2719 = vmatpush.bf16.msra.mxu3 %v4929_v27  ;;  %2663 = vmatpush.bf16.msra.mxu1 %v6699_v52  ;;  %v4375_v27 = vld [vmem:[%s7821_s2 + $0xd0] sm:$0xf] }
 0x1b6   :  { %v1945_v8 = vpop.f32.mrf.mxu2  ;;  %v1891_v34 = vpop.f32.mrf.mxu0 }
 0x1b7   :  { %v1973_v33 = vpop.f32.mrf.mxu3  ;;  %v1946_v54 = vadd.f32 %v1945_v8, %v1918_v39  ;;  %v1919_v11 = vpop.f32.mrf.mxu1  ;;  %v1892_v42 = vadd.f32 %v1891_v34, %v6500_v61  ;;  %v6713_v61 = vld [vmem:[%s7818_s4 + $0x190] sm:$0xff]  ;;  %v4799_v8 = vld [vmem:[%s7821_s2 + $0x100] sm:$0xf0] }
 0x1b8   :  { %2692 = vmatpush.bf16.msra.mxu2 %v6705_v15  ;;  %8013 = vst [vmem:[#allocation28_spill] sm:$0xff] %v6713_v61  ;;  %2636 = vmatpush.bf16.msra.mxu0 %v6713_v61  ;;  %v4766_v39 = vld [vmem:[%s7820_s1 + $0x130] sm:$0xf0] }
 0x1b9   :  { %v6708_v6 = vadd.f32 %v1973_v33, %v1946_v54  ;;  %2720 = vmatpush.bf16.msra.mxu3 %v4933_v44  ;;  %v1920_v36 = vadd.f32 %v1919_v11, %v1892_v42  ;;  %v4793_v33 = vld [vmem:[%s7821_s2 + $0xd4] sm:$0xf]  ;;  %v4377_v54 = vld [vmem:[%s7821_s2 + $0x104] sm:$0xf0]  ;;  %v4264_v35 = vor.u32 %v4766_v39, %v4263_v26 }
 0x1ba   :  { %v6746_v34 = vld [vmem:[%s7818_s4 + $0x1d0] sm:$0xff]  ;;  %v6752_v11 = vld [vmem:[%s7818_s4 + $0x208] sm:$0xff]  ;;  %v4380_v10 = vor.u32 %v4793_v33, %v4377_v54 }
 0x1bb   :  { %8014 = vst [vmem:[#allocation29_spill] sm:$0xff] %v6746_v34  ;;  %2664 = vmatpush.bf16.msra.mxu1 %v6746_v34  ;;  %v6758_v42 = vld [vmem:[%s7818_s4 + $0x188] sm:$0xff]  ;;  %v4260_v34 = vor.u32 %v4759_v9, %v4257_v55 }
 0x1bc   :  { %8015 = vst [vmem:[#allocation35_spill] sm:$0xff] %v6752_v11  ;;  %2693 = vmatpush.bf16.msra.mxu2 %v6752_v11  ;;  %2637 = vmatpush.bf16.msra.mxu0 %v6758_v42  ;;  %v4937_v44 = vld [vmem:[%s7818_s4 + $0x248] sm:$0xff]  ;;  %v4376_v11 = vor.u32 %v4799_v8, %v4375_v27  ;;  %v1677_v8 = vunpack.c.h.b16 %v6526_v1 }
 0x1bd   :  { %8016 = vst [vmem:[#allocation12_spill] sm:$0xff] %v6758_v42  ;;  %2721 = vmatpush.bf16.msra.mxu3 %v4937_v44  ;;  %v6768_v42 = vld [vmem:[%s7818_s4 + $0x1c8] sm:$0xff]  ;;  %v6774_v44 = vld [vmem:[%s7818_s4 + $0x200] sm:$0xff] }
 0x1be   :  { %v1947_v61 = vpop.f32.mrf.mxu2  ;;  %v1894_v52 = vpop.f32.mrf.mxu0  ;;  %8017 = vst [vmem:[#allocation32_spill] sm:$0xff] %v6768_v42 }
 0x1bf   :  { %v1975_v15 = vpop.f32.mrf.mxu3  ;;  %v1948_v5 = vadd.f32 %v1947_v61, %v1920_v36  ;;  %v1922_v38 = vpop.f32.mrf.mxu1  ;;  %v1895_v28 = vadd.f32 %v1894_v52, %v6528_v43  ;;  %2665 = vmatpush.bf16.msra.mxu1 %v6768_v42  ;;  %8018 = vst [vmem:[#allocation33_spill] sm:$0xff] %v6774_v44  ;;  %v6782_v43 = vld [vmem:[%s7818_s4 + $0x180] sm:$0xff] }
 0x1c0   :  { %2694 = vmatpush.bf16.msra.mxu2 %v6774_v44  ;;  %8019 = vst [vmem:[#allocation39_spill] sm:$0xff] %v6782_v43  ;;  %2638 = vmatpush.bf16.msra.mxu0 %v6782_v43  ;;  %v4941_v52 = vld [vmem:[%s7818_s4 + $0x240] sm:$0xff] }
 0x1c1   :  { %v6777_v61 = vadd.f32 %v1975_v15, %v1948_v5  ;;  %2722 = vmatpush.bf16.msra.mxu3 %v4941_v52  ;;  %v1923_v36 = vadd.f32 %v1922_v38, %v1895_v28  ;;  %2117 = vmatmul.bf16.gmra.mxu0 %v4260_v34  ;;  %v6792_v5 = vld [vmem:[%s7818_s4 + $0x1c0] sm:$0xff]  ;;  %v1538_v38 = vld [vmem:[%s7820_s1 + $0x168] sm:$0xf] }
 0x1c2   :  { %4267 = vmatmul.msk.bf16.gmra.mxu1 %vm1113_vm0, %v4264_v35  ;;  %8020 = vst [vmem:[#allocation13_spill] sm:$0xff] %v6792_v5  ;;  %v1678_v33 = vunpack.c.l.b16 %v1538_v38 }
 0x1c3   :  { %2481 = vmatmul.bf16.gmra.mxu2 %v4376_v11  ;;  %2666 = vmatpush.bf16.msra.mxu1 %v6792_v5 }
 0x1c4   :  { %2509 = vmatmul.bf16.gmra.mxu3 %v4380_v10  ;;  %v2204_v10 = vld [vmem:[%s7821_s2 + $0x138] sm:$0xff] }
 0x1c5   :  { %v2338_v54 = vunpack.c.l.b16 %v2204_v10  ;;  %v2339_v34 = vunpack.c.h.b16 %v2204_v10 }
 0x1c6   :  { %v1950_v15 = vpop.f32.mrf.mxu2  ;;  %v1896_v26 = vpop.f32.mrf.mxu0 }
 0x1c7   :  { %v1978_v9 = vpop.f32.mrf.mxu3  ;;  %v1951_v55 = vadd.f32 %v1950_v15, %v1923_v36  ;;  %v1924_v39 = vpop.f32.mrf.mxu1  ;;  %v1897_v28 = vadd.f32 %v1896_v26, %v6535_v29  ;;  %v1729_v36 = vpack.c.b16 %v1677_v8, %v1677_v8  ;;  %v1730_v15 = vpack.c.b16 %v1678_v33, %v1678_v33  ;;  %v4769_v8 = vld [vmem:[%s7821_s2 + $0x14] sm:$0xf]  ;;  %v4289_v33 = vld [vmem:[%s7821_s2 + $0x44] sm:$0xf0] }
 0x1c8   :  { %v2390_v29 = vpack.c.b16 %v2338_v54, %v2338_v54  ;;  %v2391_v26 = vpack.c.b16 %v2339_v34, %v2339_v34 }
 0x1c9   :  { %v6802_v35 = vadd.f32 %v1978_v9, %v1951_v55  ;;  %v1925_v27 = vadd.f32 %v1924_v39, %v1897_v28 }
 0x1ce   :  { %v1952_v11 = vpop.f32.mrf.mxu2  ;;  %v1899_v44 = vpop.f32.mrf.mxu0 }
 0x1cf   :  { %v1980_v52 = vpop.f32.mrf.mxu3  ;;  %v1953_v43 = vadd.f32 %v1952_v11, %v1925_v27  ;;  %v1927_v5 = vpop.f32.mrf.mxu1  ;;  %v1900_v42 = vadd.f32 %v1899_v44, %v6537_v45  ;;  %v4279_v27 = vld [vmem:[%s7821_s2 + $0x8] sm:$0xf]  ;;  %v4774_v45 = vld [vmem:[%s7821_s2 + $0x38] sm:$0xf0]  ;;  %v4281_v44 = vld [vmem:[%s7821_s2 + $0x3c] sm:$0xf0] }
 0x1d0   :  { %v4280_v11 = vor.u32 %v4774_v45, %v4279_v27 }
 0x1d1   :  { %v6806_v31 = vadd.f32 %v1980_v52, %v1953_v43  ;;  %v1928_v9 = vadd.f32 %v1927_v5, %v1900_v42  ;;  %2122 = vmatmul.bf16.gmra.mxu0 %v1729_v36  ;;  %v4768_v42 = vld [vmem:[%s7821_s2 + $0xc] sm:$0xf]  ;;  %v4287_v43 = vld [vmem:[%s7821_s2 + $0x10] sm:$0xf]  ;;  %v4775_v5 = vld [vmem:[%s7821_s2 + $0x40] sm:$0xf0] }
 0x1d2   :  { %4268 = vmatmul.msk.bf16.gmra.mxu1 %vm1113_vm0, %v1730_v15  ;;  %v4284_v52 = vor.u32 %v4768_v42, %v4281_v44 }
 0x1d3   :  { %2486 = vmatmul.bf16.gmra.mxu2 %v2390_v29  ;;  %v4288_v29 = vor.u32 %v4775_v5, %v4287_v43  ;;  %v6859_v43 = vld [vmem:[%s7818_s4 + $0x2b0] sm:$0xff] }
 0x1d4   :  { %2514 = vmatmul.bf16.gmra.mxu3 %v2391_v26  ;;  %v4292_v26 = vor.u32 %v4769_v8, %v4289_v33  ;;  %v4331_v33 = vld [vmem:[%s7821_s2 + $0x70] sm:$0xf] }
 0x1d6   :  { %v1955_v1 = vpop.f32.mrf.mxu2  ;;  %v1901_v38 = vpop.f32.mrf.mxu0 }
 0x1d7   :  { %v1983_v55 = vpop.f32.mrf.mxu3  ;;  %v1956_v39 = vadd.f32 %v1955_v1, %v1928_v9  ;;  %v1929_v28 = vpop.f32.mrf.mxu1 }
 0x1d9   :  { %v6809_v10 = vadd.f32 %v1983_v55, %v1956_v39  ;;  %v6839_v55 = vld [vmem:[%s7818_s4 + $0x318] sm:$0xff] }
 0x1da   :  { %v6845_v39 = vld [vmem:[%s7818_s4 + $0x2b8] sm:$0xff] }
 0x1de   :  { %v1957_v54 = vpop.f32.mrf.mxu2  ;;  %v1996_v36 = vpop.f32.mrf.mxu0 }
 0x1df   :  { %v1985_v34 = vpop.f32.mrf.mxu3  ;;  %v2024_v15 = vpop.f32.mrf.mxu1  ;;  %v1997_v9 = vadd.f32 %v1996_v36, %v6599_v16  ;;  %v6852_v16 = vld [vmem:[%s7818_s4 + $0x2f8] sm:$0xff]  ;;  %v4787_v54 = vld [vmem:[%s7821_s2 + $0xa0] sm:$0xf0] }
 0x1e0   :  { %v4333_v34 = vld [vmem:[%s7821_s2 + $0xa4] sm:$0xf0]  ;;  %v4782_v36 = vld [vmem:[%s7821_s2 + $0x7c] sm:$0xf] }
 0x1e1   :  { %v2025_v1 = vadd.f32 %v2024_v15, %v1997_v9  ;;  %2527 = vmatmul.bf16.vlgmr.msrb.gmra.mxu0 %v4280_v11  ;;  %v4339_v11 = vld [vmem:[%s7821_s2 + $0x78] sm:$0xf]  ;;  %v4341_v15 = vld [vmem:[%s7821_s2 + $0xac] sm:$0xf0]  ;;  %v6917_v9 = vld [vmem:[%s7818_s4 + $0x2e8] sm:$0xff] }
 0x1e2   :  { %2555 = vmatmul.bf16.vlgmr.msrb.gmra.mxu1 %v4284_v52  ;;  %2743 = vmatpush.bf16.msrb.mxu0 %v6845_v39  ;;  %v4788_v52 = vld [vmem:[%s7821_s2 + $0xa8] sm:$0xf0]  ;;  %8024 = vst [vmem:[#allocation44_spill] sm:$0xff] %v6917_v9 }
 0x1e3   :  { %2583 = vmatmul.bf16.vlgmr.msrb.gmra.mxu2 %v4288_v29  ;;  %2771 = vmatpush.bf16.msrb.mxu1 %v6852_v16  ;;  %v6904_v29 = vld [vmem:[%s7818_s4 + $0x2a8] sm:$0xff] }
 0x1e4   :  { %2611 = vmatmul.bf16.vlgmr.msrb.gmra.mxu3 %v4292_v26  ;;  %2803 = vmatpush.bf16.msrb.mxu2 %v6839_v55  ;;  %8022 = vst [vmem:[#allocation37_spill] sm:$0xff] %v6904_v29  ;;  %v6910_v26 = vld [vmem:[%s7818_s4 + $0x308] sm:$0xff] }
 0x1e5   :  { %3135 = vmatpush.bf16.msrb.mxu3 %v6095_v50  ;;  %v6865_v50 = vld [vmem:[%s7818_s4 + $0x310] sm:$0xff]  ;;  %8023 = vst [vmem:[#allocation14_spill] sm:$0xff] %v6910_v26 }
 0x1e6   :  { %v2052_v38 = vpop.f32.mrf.mxu2  ;;  %v1998_v45 = vpop.f32.mrf.mxu0  ;;  %2744 = vmatpush.bf16.msrb.mxu0 %v6859_v43  ;;  %8021 = vst [vmem:[#allocation36_spill] sm:$0xff] %v6865_v50 }
 0x1e7   :  { %v2080_v28 = vpop.f32.mrf.mxu3  ;;  %v2053_v27 = vadd.f32 %v2052_v38, %v2025_v1  ;;  %v2026_v42 = vpop.f32.mrf.mxu1  ;;  %v1999_v44 = vadd.f32 %v1998_v45, %v6668_v37  ;;  %v6874_v37 = vld [vmem:[%s7818_s4 + $0x2f0] sm:$0xff] }
 0x1e8   :  { %2804 = vmatpush.bf16.msrb.mxu2 %v6865_v50  ;;  %2772 = vmatpush.bf16.msrb.mxu1 %v6874_v37  ;;  %v4344_v50 = vor.u32 %v4782_v36, %v4341_v15  ;;  %v6953_v36 = vld [vmem:[%s7818_s4 + $0x2d8] sm:$0xff]  ;;  %v6959_v15 = vld [vmem:[%s7818_s4 + $0x290] sm:$0xff] }
 0x1e9   :  { %v6868_v5 = vadd.f32 %v2080_v28, %v2053_v27  ;;  %3136 = vmatpush.bf16.msrb.mxu3 %v6107_v23  ;;  %v2027_v8 = vadd.f32 %v2026_v42, %v1999_v44  ;;  %v4781_v23 = vld [vmem:[%s7821_s2 + $0x74] sm:$0xf]  ;;  %v4332_v28 = vor.u32 %v4787_v54, %v4331_v33  ;;  %v6945_v54 = vld [vmem:[%s7818_s4 + $0x298] sm:$0xff]  ;;  %8027 = vst [vmem:[#allocation42_spill] sm:$0xff] %v6959_v15 }
 0x1ea   :  { %2745 = vmatpush.bf16.msrb.mxu0 %v6904_v29  ;;  %v4336_v27 = vor.u32 %v4781_v23, %v4333_v34  ;;  %v4340_v29 = vor.u32 %v4788_v52, %v4339_v11  ;;  %8026 = vst [vmem:[#allocation41_spill] sm:$0xff] %v6945_v54 }
 0x1ec   :  { %2805 = vmatpush.bf16.msrb.mxu2 %v6910_v26  ;;  %2773 = vmatpush.bf16.msrb.mxu1 %v6917_v9  ;;  %v6930_v9 = vld [vmem:[%s7818_s4 + $0x300] sm:$0xff] }
 0x1ed   :  { %3137 = vmatpush.bf16.msrb.mxu3 %v6144_v24  ;;  %v6924_v24 = vld [vmem:[%s7818_s4 + $0x2a0] sm:$0xff]  ;;  %8025 = vst [vmem:[#allocation15_spill] sm:$0xff] %v6930_v9 }
 0x1ee   :  { %v2054_v1 = vpop.f32.mrf.mxu2  ;;  %v2001_v42 = vpop.f32.mrf.mxu0  ;;  %2746 = vmatpush.bf16.msrb.mxu0 %v6924_v24 }
 0x1ef   :  { %v2082_v38 = vpop.f32.mrf.mxu3  ;;  %v2055_v45 = vadd.f32 %v2054_v1, %v2027_v8  ;;  %v2029_v44 = vpop.f32.mrf.mxu1  ;;  %v2002_v26 = vadd.f32 %v2001_v42, %v6708_v6  ;;  %v6939_v6 = vld [vmem:[%s7818_s4 + $0x2e0] sm:$0xff]  ;;  %v4794_v1 = vld [vmem:[%s7821_s2 + $0xdc] sm:$0xf]  ;;  %v6992_v42 = vld [vmem:[%s7818_s4 + $0x2d0] sm:$0xff] }
 0x1f0   :  { %2806 = vmatpush.bf16.msrb.mxu2 %v6930_v9  ;;  %2774 = vmatpush.bf16.msrb.mxu1 %v6939_v6  ;;  %8028 = vst [vmem:[#allocation18_spill] sm:$0xff] %v6992_v42 }
 0x1f1   :  { %v6933_v8 = vadd.f32 %v2082_v38, %v2055_v45  ;;  %3138 = vmatpush.bf16.msrb.mxu3 %v6156_v32  ;;  %v2030_v33 = vadd.f32 %v2029_v44, %v2002_v26  ;;  %2532 = vmatmul.bf16.gmra.mxu0 %v4332_v28  ;;  %v4800_v26 = vld [vmem:[%s7821_s2 + $0x108] sm:$0xf0]  ;;  %v4385_v38 = vld [vmem:[%s7821_s2 + $0x10c] sm:$0xf0]  ;;  %v4801_v28 = vld [vmem:[%s7821_s2 + $0x110] sm:$0xf0] }
 0x1f2   :  { %2560 = vmatmul.bf16.gmra.mxu1 %v4336_v27  ;;  %2747 = vmatpush.bf16.msrb.mxu0 %v6945_v54  ;;  %v4795_v27 = vld [vmem:[%s7821_s2 + $0xe4] sm:$0xf]  ;;  %v4393_v45 = vld [vmem:[%s7821_s2 + $0x114] sm:$0xf0]  ;;  %v6998_v44 = vld [vmem:[%s7818_s4 + $0x288] sm:$0xff] }
 0x1f3   :  { %2588 = vmatmul.bf16.gmra.mxu2 %v4340_v29  ;;  %8029 = vst [vmem:[#allocation22_spill] sm:$0xff] %v6998_v44  ;;  %v4396_v9 = vor.u32 %v4795_v27, %v4393_v45  ;;  %v7006_v54 = vld [vmem:[%s7818_s4 + $0x2c8] sm:$0xff] }
 0x1f4   :  { %2616 = vmatmul.bf16.gmra.mxu3 %v4344_v50  ;;  %2775 = vmatpush.bf16.msrb.mxu1 %v6953_v36 }
 0x1f5   :  { %3139 = vmatpush.bf16.msrb.mxu3 %v6168_v46 }
 0x1f6   :  { %v2057_v32 = vpop.f32.mrf.mxu2  ;;  %v2003_v50 = vpop.f32.mrf.mxu0  ;;  %2748 = vmatpush.bf16.msrb.mxu0 %v6959_v15 }
 0x1f7   :  { %v2085_v23 = vpop.f32.mrf.mxu3  ;;  %v2058_v34 = vadd.f32 %v2057_v32, %v2030_v33  ;;  %v2031_v11 = vpop.f32.mrf.mxu1  ;;  %v2004_v52 = vadd.f32 %v2003_v50, %v6777_v61  ;;  %v4383_v61 = vld [vmem:[%s7821_s2 + $0xd8] sm:$0xf] }
 0x1f8   :  { %2776 = vmatpush.bf16.msrb.mxu1 %v6992_v42 }
 0x1f9   :  { %v6962_v46 = vadd.f32 %v2085_v23, %v2058_v34  ;;  %3140 = vmatpush.bf16.msrb.mxu3 %v6180_v4  ;;  %v2032_v29 = vadd.f32 %v2031_v11, %v2004_v52  ;;  %v4391_v4 = vld [vmem:[%s7821_s2 + $0xe0] sm:$0xf]  ;;  %v4384_v23 = vor.u32 %v4800_v26, %v4383_v61  ;;  %v4388_v34 = vor.u32 %v4794_v1, %v4385_v38 }
 0x1fa   :  { %2749 = vmatpush.bf16.msrb.mxu0 %v6998_v44  ;;  %v4392_v15 = vor.u32 %v4801_v28, %v4391_v4 }
 0x1fc   :  { %2777 = vmatpush.bf16.msrb.mxu1 %v7006_v54 }
 0x1fd   :  { %3141 = vmatpush.bf16.msrb.mxu3 %v6216_v47  ;;  %v7012_v47 = vld [vmem:[%s7818_s4 + $0x280] sm:$0xff] }
 0x1fe   :  { %v2059_v33 = vpop.f32.mrf.mxu2  ;;  %v2006_v11 = vpop.f32.mrf.mxu0  ;;  %8030 = vst [vmem:[#allocation26_spill] sm:$0xff] %v7012_v47  ;;  %2750 = vmatpush.bf16.msrb.mxu0 %v7012_v47 }
 0x1ff   :  { %v2087_v32 = vpop.f32.mrf.mxu3  ;;  %v2060_v50 = vadd.f32 %v2059_v33, %v2032_v29  ;;  %v2034_v52 = vpop.f32.mrf.mxu1  ;;  %v2007_v42 = vadd.f32 %v2006_v11, %v6802_v35  ;;  %v7021_v35 = vld [vmem:[%s7818_s4 + $0x2c0] sm:$0xff] }
 0x200   :  { %8031 = vst [vmem:[#allocation30_spill] sm:$0xff] %v7021_v35  ;;  %2778 = vmatpush.bf16.msrb.mxu1 %v7021_v35 }
 0x201   :  { %v7015_v29 = vadd.f32 %v2087_v32, %v2060_v50  ;;  %3142 = vmatpush.bf16.msrb.mxu3 %v6227_v12  ;;  %v2035_v61 = vadd.f32 %v2034_v52, %v2007_v42  ;;  %2537 = vmatmul.bf16.gmra.mxu0 %v4384_v23  ;;  %v2205_v12 = vld [vmem:[%s7821_s2 + $0x140] sm:$0xff] }
 0x202   :  { %2565 = vmatmul.bf16.gmra.mxu1 %v4388_v34  ;;  %v2340_v42 = vunpack.c.l.b16 %v2205_v12  ;;  %v2341_v33 = vunpack.c.h.b16 %v2205_v12 }
 0x203   :  { %2593 = vmatmul.bf16.gmra.mxu2 %v4392_v15 }
 0x204   :  { %2621 = vmatmul.bf16.gmra.mxu3 %v4396_v9  ;;  %v2206_v9 = vld [vmem:[%s7821_s2 + $0x148] sm:$0xff]  ;;  %v2392_v11 = vpack.c.b16 %v2340_v42, %v2340_v42  ;;  %v2393_v52 = vpack.c.b16 %v2341_v33, %v2341_v33  ;;  %v4303_v33 = vld [vmem:[%s7821_s2 + $0x20] sm:$0xf] }
 0x205   :  { %v2342_v32 = vunpack.c.l.b16 %v2206_v9  ;;  %v2343_v23 = vunpack.c.h.b16 %v2206_v9 }
 0x206   :  { %v2062_v26 = vpop.f32.mrf.mxu2  ;;  %v2008_v4 = vpop.f32.mrf.mxu0 }
 0x207   :  { %v2090_v1 = vpop.f32.mrf.mxu3  ;;  %v2063_v38 = vadd.f32 %v2062_v26, %v2035_v61  ;;  %v2036_v28 = vpop.f32.mrf.mxu1  ;;  %v2009_v27 = vadd.f32 %v2008_v4, %v6806_v31  ;;  %v2394_v35 = vpack.c.b16 %v2342_v32, %v2342_v32  ;;  %v2395_v31 = vpack.c.b16 %v2343_v23, %v2343_v23  ;;  %v4777_v32 = vld [vmem:[%s7821_s2 + $0x50] sm:$0xf0]  ;;  %v4771_v23 = vld [vmem:[%s7821_s2 + $0x24] sm:$0xf] }
 0x209   :  { %v7031_v15 = vadd.f32 %v2090_v1, %v2063_v38  ;;  %v2037_v45 = vadd.f32 %v2036_v28, %v2009_v27 }
 0x20e   :  { %v2064_v34 = vpop.f32.mrf.mxu2  ;;  %v2011_v26 = vpop.f32.mrf.mxu0 }
 0x20f   :  { %v2092_v50 = vpop.f32.mrf.mxu3  ;;  %v2065_v61 = vadd.f32 %v2064_v34, %v2037_v45  ;;  %v2039_v47 = vpop.f32.mrf.mxu1  ;;  %v2012_v4 = vadd.f32 %v2011_v26, %v6809_v10  ;;  %v4295_v45 = vld [vmem:[%s7821_s2 + $0x18] sm:$0xf]  ;;  %v4776_v10 = vld [vmem:[%s7821_s2 + $0x48] sm:$0xf0] }
 0x210   :  { %v4305_v34 = vld [vmem:[%s7821_s2 + $0x54] sm:$0xf0] }
 0x211   :  { %v7034_v44 = vadd.f32 %v2092_v50, %v2065_v61  ;;  %v2040_v1 = vadd.f32 %v2039_v47, %v2012_v4  ;;  %2542 = vmatmul.bf16.gmra.mxu0 %v2392_v11  ;;  %v4770_v47 = vld [vmem:[%s7821_s2 + $0x1c] sm:$0xf]  ;;  %v4304_v4 = vor.u32 %v4777_v32, %v4303_v33 }
 0x212   :  { %2570 = vmatmul.bf16.gmra.mxu1 %v2393_v52  ;;  %v4296_v52 = vor.u32 %v4776_v10, %v4295_v45  ;;  %v4790_v32 = vld [vmem:[%s7821_s2 + $0xb8] sm:$0xf0] }
 0x213   :  { %2598 = vmatmul.bf16.gmra.mxu2 %v2394_v35  ;;  %v4297_v35 = vld [vmem:[%s7821_s2 + $0x4c] sm:$0xf0] }
 0x214   :  { %2626 = vmatmul.bf16.gmra.mxu3 %v2395_v31  ;;  %v4300_v61 = vor.u32 %v4770_v47, %v4297_v35 }
 0x216   :  { %v2067_v38 = vpop.f32.mrf.mxu2  ;;  %v2013_v27 = vpop.f32.mrf.mxu0 }
 0x217   :  { %v2095_v28 = vpop.f32.mrf.mxu3  ;;  %v2068_v12 = vadd.f32 %v2067_v38, %v2040_v1  ;;  %v2041_v9 = vpop.f32.mrf.mxu1  ;;  %v4308_v1 = vor.u32 %v4771_v23, %v4305_v34  ;;  %v4963_v27 = vld [vmem:[%s7818_s4 + $0x78] sm:$0xff]  ;;  %v4784_v23 = vld [vmem:[%s7821_s2 + $0x8c] sm:$0xf]  ;;  %v4357_v34 = vld [vmem:[%s7821_s2 + $0xbc] sm:$0xf0] }
 0x219   :  { %v7036_v42 = vadd.f32 %v2095_v28, %v2068_v12 }
 0x21e   :  { %v2069_v50 = vpop.f32.mrf.mxu2  ;;  %v2108_v26 = vpop.f32.mrf.mxu0 }
 0x21f   :  { %v2097_v11 = vpop.f32.mrf.mxu3  ;;  %v2136_v31 = vpop.f32.mrf.mxu1  ;;  %v2109_v38 = vadd.f32 %v2108_v26, %v6868_v5  ;;  %v4965_v50 = vld [vmem:[%s7818_s4 + $0x68] sm:$0xff] }
 0x221   :  { %v7063_v28 = vadd.f32 %v2136_v31, %v2109_v38  ;;  %2639 = vmatmul.bf16.vlgmr.msra.gmra.mxu0 %v4296_v52 }
 0x222   :  { %2667 = vmatmul.bf16.vlgmr.msra.gmra.mxu1 %v4300_v61  ;;  %3163 = vmatpush.bf16.msra.mxu0 %v4963_v27  ;;  %v4360_v27 = vor.u32 %v4784_v23, %v4357_v34 }
 0x223   :  { %2695 = vmatmul.bf16.vlgmr.msra.gmra.mxu2 %v4304_v4  ;;  %v2155_v12 = vmax.f32 %v6279_v7, %v7063_v28  ;;  %3191 = vmatpush.bf16.msra.mxu1 %v6290_v22  ;;  %v4347_v22 = vld [vmem:[%s7821_s2 + $0x80] sm:$0xf]  ;;  %v4822_v7 = vld [vmem:[%s7822_s3 + $0x84] sm:$0xf]  ;;  %v4509_v28 = vld [vmem:[%s7822_s3 + $0xb4] sm:$0xf0] }
 0x224   :  { %2723 = vmatmul.bf16.vlgmr.msra.gmra.mxu3 %v4308_v1  ;;  %3219 = vmatpush.bf16.msra.mxu2 %v6299_v25  ;;  %v4964_v25 = vld [vmem:[%s7818_s4 + $0x70] sm:$0xff] }
 0x225   :  { %3247 = vmatpush.bf16.msra.mxu3 %v6284_v20 }
 0x226   :  { %v2472_v5 = vpop.f32.mrf.mxu2  ;;  %v2110_v10 = vpop.f32.mrf.mxu0  ;;  %3164 = vmatpush.bf16.msra.mxu0 %v4964_v25  ;;  %v4803_v25 = vld [vmem:[%s7821_s2 + $0x120] sm:$0xf0] }
 0x227   :  { %v2500_v9 = vpop.f32.mrf.mxu3  ;;  %v2138_v47 = vpop.f32.mrf.mxu1  ;;  %v2111_v35 = vadd.f32 %v2110_v10, %v6933_v8  ;;  %3192 = vmatpush.bf16.msra.mxu1 %v6314_v63  ;;  %v4789_v8 = vld [vmem:[%s7821_s2 + $0xb0] sm:$0xf0]  ;;  %v4355_v63 = vld [vmem:[%s7821_s2 + $0x88] sm:$0xf] }
 0x228   :  { %v7073_v45 = vadd.f32 %v2500_v9, %v2472_v5  ;;  %3220 = vmatpush.bf16.msra.mxu2 %v6325_v60  ;;  %v4783_v60 = vld [vmem:[%s7821_s2 + $0x84] sm:$0xf]  ;;  %v4348_v61 = vor.u32 %v4789_v8, %v4347_v22  ;;  %v4356_v38 = vor.u32 %v4790_v32, %v4355_v63  ;;  %v4797_v22 = vld [vmem:[%s7821_s2 + $0xf4] sm:$0xf]  ;;  %v4409_v8 = vld [vmem:[%s7821_s2 + $0x124] sm:$0xf0] }
 0x229   :  { %3248 = vmatpush.bf16.msra.mxu3 %v6308_v30  ;;  %v7082_v20 = vadd.f32 %v2138_v47, %v2111_v35  ;;  %v4349_v30 = vld [vmem:[%s7821_s2 + $0xb4] sm:$0xf0] }
 0x22a   :  { %3165 = vmatpush.bf16.msra.mxu0 %v4965_v50  ;;  %v4352_v26 = vor.u32 %v4783_v60, %v4349_v30  ;;  %v4969_v60 = vld [vmem:[%s7818_s4 + $0x48] sm:$0xff] }
 0x22b   :  { %v2156_v33 = vmax.f32 %v6303_v14, %v7082_v20  ;;  %3193 = vmatpush.bf16.msra.mxu1 %v6361_v49  ;;  %v4834_v20 = vld [vmem:[%s7822_s3 + $0xe4] sm:$0xf] }
 0x22c   :  { %3221 = vmatpush.bf16.msra.mxu2 %v6370_v0 }
 0x22d   :  { %3249 = vmatpush.bf16.msra.mxu3 %v6355_v48  ;;  %v4966_v48 = vld [vmem:[%s7818_s4 + $0x60] sm:$0xff] }
 0x22e   :  { %v2474_v11 = vpop.f32.mrf.mxu2  ;;  %v2113_v4 = vpop.f32.mrf.mxu0  ;;  %3166 = vmatpush.bf16.msra.mxu0 %v4966_v48 }
 0x22f   :  { %v2502_v52 = vpop.f32.mrf.mxu3  ;;  %v2141_v1 = vpop.f32.mrf.mxu1  ;;  %v2114_v0 = vadd.f32 %v2113_v4, %v6962_v46  ;;  %3194 = vmatpush.bf16.msra.mxu1 %v6385_v53  ;;  %v8033_v4 = vld [vmem:[#allocation2_spill] sm:$0xff] }
 0x230   :  { %v7116_v31 = vadd.f32 %v2502_v52, %v2474_v11  ;;  %3222 = vmatpush.bf16.msra.mxu2 %v6396_v57  ;;  %v4967_v57 = vld [vmem:[%s7818_s4 + $0x58] sm:$0xff] }
 0x231   :  { %3250 = vmatpush.bf16.msra.mxu3 %v6379_v19  ;;  %v7125_v49 = vadd.f32 %v2141_v1, %v2114_v0  ;;  %2644 = vmatmul.bf16.gmra.mxu0 %v4348_v61  ;;  %v4412_v61 = vor.u32 %v4797_v22, %v4409_v8 }
 0x232   :  { %2672 = vmatmul.bf16.gmra.mxu1 %v4352_v26  ;;  %3167 = vmatpush.bf16.msra.mxu0 %v4967_v57  ;;  %v2208_v57 = vld [vmem:[%s7821_s2 + $0x158] sm:$0xff] }
 0x233   :  { %2700 = vmatmul.bf16.gmra.mxu2 %v4356_v38  ;;  %v2157_v46 = vmax.f32 %v6374_v13, %v7125_v49  ;;  %3195 = vmatpush.bf16.msra.mxu1 %v6408_v58  ;;  %v4399_v58 = vld [vmem:[%s7821_s2 + $0xe8] sm:$0xf]  ;;  %v4835_v13 = vld [vmem:[%s7822_s3 + $0xec] sm:$0xf]  ;;  %v4561_v49 = vld [vmem:[%s7822_s3 + $0x11c] sm:$0xf0] }
 0x234   :  { %2728 = vmatmul.bf16.gmra.mxu3 %v4360_v27  ;;  %3223 = vmatpush.bf16.msra.mxu2 %v6420_v56  ;;  %v4968_v56 = vld [vmem:[%s7818_s4 + $0x50] sm:$0xff] }
 0x235   :  { %3251 = vmatpush.bf16.msra.mxu3 %v6402_v40 }
 0x236   :  { %v2477_v19 = vpop.f32.mrf.mxu2  ;;  %v2115_v9 = vpop.f32.mrf.mxu0  ;;  %3168 = vmatpush.bf16.msra.mxu0 %v4968_v56  ;;  %v8034_v56 = vld [vmem:[#allocation4_spill] sm:$0xff] }
 0x237   :  { %v2505_v53 = vpop.f32.mrf.mxu3  ;;  %v2143_v10 = vpop.f32.mrf.mxu1  ;;  %v2116_v47 = vadd.f32 %v2115_v9, %v7015_v29  ;;  %3196 = vmatpush.bf16.msra.mxu1 %v6434_v21  ;;  %v4802_v29 = vld [vmem:[%s7821_s2 + $0x118] sm:$0xf0]  ;;  %v4407_v21 = vld [vmem:[%s7821_s2 + $0xf0] sm:$0xf] }
 0x238   :  { %v7135_v5 = vadd.f32 %v2505_v53, %v2477_v19  ;;  %3224 = vmatpush.bf16.msra.mxu2 %v6467_v41  ;;  %v4796_v41 = vld [vmem:[%s7821_s2 + $0xec] sm:$0xf]  ;;  %v4400_v32 = vor.u32 %v4802_v29, %v4399_v58  ;;  %v4408_v52 = vor.u32 %v4803_v25, %v4407_v21 }
 0x239   :  { %3252 = vmatpush.bf16.msra.mxu3 %v6426_v18  ;;  %v7144_v40 = vadd.f32 %v2143_v10, %v2116_v47  ;;  %v4401_v18 = vld [vmem:[%s7821_s2 + $0x11c] sm:$0xf0]  ;;  %v2346_v10 = vunpack.c.l.b16 %v2208_v57  ;;  %v2347_v47 = vunpack.c.h.b16 %v2208_v57 }
 0x23a   :  { %3169 = vmatpush.bf16.msra.mxu0 %v4969_v60  ;;  %v4404_v23 = vor.u32 %v4796_v41, %v4401_v18 }
 0x23b   :  { %v2158_v35 = vmax.f32 %v6415_v17, %v7144_v40  ;;  %3197 = vmatpush.bf16.msra.mxu1 %v6479_v51  ;;  %v8032_v51 = vld [vmem:[#allocation3_spill] sm:$0xff]  ;;  %v2398_v8 = vpack.c.b16 %v2346_v10, %v2346_v10  ;;  %v2399_v60 = vpack.c.b16 %v2347_v47, %v2347_v47  ;;  %v7631_v17 = vld [vmem:[%s7822_s3 + $0x158] sm:$0xff] }
 0x23c   :  { %3225 = vmatpush.bf16.msra.mxu2 %v6491_v2 }
 0x23d   :  { %3253 = vmatpush.bf16.msra.mxu3 %v6473_v62  ;;  %v4970_v62 = vld [vmem:[%s7818_s4 + $0x40] sm:$0xff] }
 0x23e   :  { %v2479_v30 = vpop.f32.mrf.mxu2  ;;  %v2118_v50 = vpop.f32.mrf.mxu0  ;;  %3170 = vmatpush.bf16.msra.mxu0 %v4970_v62  ;;  %v4311_v62 = vld [vmem:[%s7821_s2 + $0x28] sm:$0xf] }
 0x23f   :  { %v2507_v63 = vpop.f32.mrf.mxu3  ;;  %v2146_v11 = vpop.f32.mrf.mxu1  ;;  %v2119_v2 = vadd.f32 %v2118_v50, %v7031_v15  ;;  %3198 = vmatpush.bf16.msra.mxu1 %v8032_v51  ;;  %v4772_v51 = vld [vmem:[%s7821_s2 + $0x2c] sm:$0xf] }
 0x240   :  { %v7178_v34 = vadd.f32 %v2507_v63, %v2479_v30  ;;  %3226 = vmatpush.bf16.msra.mxu2 %v6514_v59 }
 0x241   :  { %3254 = vmatpush.bf16.msra.mxu3 %v6497_v3  ;;  %v7187_v26 = vadd.f32 %v2146_v11, %v2119_v2  ;;  %2649 = vmatmul.bf16.gmra.mxu0 %v4400_v32  ;;  %v2207_v3 = vld [vmem:[%s7821_s2 + $0x150] sm:$0xff]  ;;  %v8035_v32 = vld [vmem:[#allocation5_spill] sm:$0xff] }
 0x242   :  { %2677 = vmatmul.bf16.gmra.mxu1 %v4404_v23  ;;  %v2344_v53 = vunpack.c.l.b16 %v2207_v3  ;;  %v2345_v9 = vunpack.c.h.b16 %v2207_v3  ;;  %v4812_v3 = vld [vmem:[%s7822_s3 + $0x30] sm:$0xf0] }
 0x243   :  { %2705 = vmatmul.bf16.gmra.mxu2 %v4408_v52  ;;  %v2159_v15 = vmax.f32 %v8033_v4, %v7187_v26 }
 0x244   :  { %2733 = vmatmul.bf16.gmra.mxu3 %v4412_v61  ;;  %v2396_v18 = vpack.c.b16 %v2344_v53, %v2344_v53  ;;  %v2397_v21 = vpack.c.b16 %v2345_v9, %v2345_v9 }
 0x246   :  { %v2482_v1 = vpop.f32.mrf.mxu2  ;;  %v2120_v27 = vpop.f32.mrf.mxu0 }
 0x247   :  { %v2510_v59 = vpop.f32.mrf.mxu3  ;;  %v2148_v0 = vpop.f32.mrf.mxu1  ;;  %v2121_v48 = vadd.f32 %v2120_v27, %v7034_v44  ;;  %v4779_v27 = vld [vmem:[%s7821_s2 + $0x60] sm:$0xf0] }
 0x248   :  { %v7191_v38 = vadd.f32 %v2510_v59, %v2482_v1  ;;  %v4313_v1 = vld [vmem:[%s7821_s2 + $0x5c] sm:$0xf0]  ;;  %v4319_v59 = vld [vmem:[%s7821_s2 + $0x30] sm:$0xf] }
 0x249   :  { %v7200_v19 = vadd.f32 %v2148_v0, %v2121_v48  ;;  %v4431_v0 = vld [vmem:[%s7822_s3] sm:$0xf]  ;;  %v4316_v9 = vor.u32 %v4772_v51, %v4313_v1  ;;  %v8040_v1 = vld [vmem:[#allocation8_spill] sm:$0xff] }
 0x24b   :  { %v2160_v58 = vmax.f32 %v8034_v56, %v7200_v19  ;;  %v4810_v19 = vld [vmem:[%s7822_s3 + $0x24] sm:$0xf]  ;;  %v4465_v56 = vld [vmem:[%s7822_s3 + $0x54] sm:$0xf0] }
 0x24e   :  { %v2484_v29 = vpop.f32.mrf.mxu2  ;;  %v2123_v44 = vpop.f32.mrf.mxu0 }
 0x24f   :  { %v2512_v41 = vpop.f32.mrf.mxu3  ;;  %v2151_v22 = vpop.f32.mrf.mxu1  ;;  %v2124_v30 = vadd.f32 %v2123_v44, %v7036_v42  ;;  %v4778_v42 = vld [vmem:[%s7821_s2 + $0x58] sm:$0xf0]  ;;  %v8036_v44 = vld [vmem:[#allocation19_spill] sm:$0xff] }
 0x250   :  { %v7204_v25 = vadd.f32 %v2512_v41, %v2484_v29  ;;  %v4312_v53 = vor.u32 %v4778_v42, %v4311_v62  ;;  %v4320_v29 = vor.u32 %v4779_v27, %v4319_v59  ;;  %v4432_v41 = vor.u32 %v4812_v3, %v4431_v0  ;;  %v8039_v62 = vld [vmem:[#allocation17_spill] sm:$0xff]  ;;  %v4972_v42 = vld [vmem:[%s7818_s4 + $0x170] sm:$0xff] }
 0x251   :  { %v7207_v63 = vadd.f32 %v2151_v22, %v2124_v30  ;;  %2654 = vmatmul.bf16.gmra.mxu0 %v2396_v18  ;;  %v4971_v22 = vld [vmem:[%s7818_s4 + $0x178] sm:$0xff]  ;;  %v8041_v59 = vld [vmem:[#allocation16_spill] sm:$0xff] }
 0x252   :  { %2682 = vmatmul.bf16.gmra.mxu1 %v2397_v21  ;;  %v4363_v0 = vld [vmem:[%s7821_s2 + $0x90] sm:$0xf]  ;;  %v4785_v3 = vld [vmem:[%s7821_s2 + $0x94] sm:$0xf] }
 0x253   :  { %2710 = vmatmul.bf16.gmra.mxu2 %v2398_v8  ;;  %v2161_v23 = vmax.f32 %v8035_v32, %v7207_v63  ;;  %v8037_v8 = vld [vmem:[#allocation6_spill] sm:$0xff]  ;;  %v4811_v63 = vld [vmem:[%s7822_s3 + $0x2c] sm:$0xf] }
 0x254   :  { %2738 = vmatmul.bf16.gmra.mxu3 %v2399_v60  ;;  %v8038_v60 = vld [vmem:[#allocation7_spill] sm:$0xff]  ;;  %v4473_v32 = vld [vmem:[%s7822_s3 + $0x5c] sm:$0xf0] }
 0x256   :  { %v2487_v50 = vpop.f32.mrf.mxu2  ;;  %v2125_v61 = vpop.f32.mrf.mxu0 }
 0x257   :  { %v2515_v11 = vpop.f32.mrf.mxu3  ;;  %v2153_v2 = vpop.f32.mrf.mxu1 }
 0x258   :  { %v7211_v52 = vadd.f32 %v2515_v11, %v2487_v50 }
 0x25e   :  { %v2489_v48 = vpop.f32.mrf.mxu2  ;;  %v2528_v10 = vpop.f32.mrf.mxu0 }
 0x25f   :  { %v2517_v57 = vpop.f32.mrf.mxu3  ;;  %v2556_v47 = vpop.f32.mrf.mxu1  ;;  %v2529_v18 = vadd.f32 %v2528_v10, %v7073_v45  ;;  %v4365_v48 = vld [vmem:[%s7821_s2 + $0xc4] sm:$0xf0]  ;;  %v4825_v10 = vld [vmem:[%s7822_s3 + $0x98] sm:$0xf0] }
 0x260   :  { %v4371_v57 = vld [vmem:[%s7821_s2 + $0x98] sm:$0xf] }
 0x261   :  { %v2557_v21 = vadd.f32 %v2556_v47, %v2529_v18  ;;  %2751 = vmatmul.bf16.vlgmr.msrb.gmra.mxu0 %v4312_v53  ;;  %v4792_v53 = vld [vmem:[%s7821_s2 + $0xc8] sm:$0xf0]  ;;  %v8042_v47 = vld [vmem:[#allocation20_spill] sm:$0xff]  ;;  %v8044_v18 = vld [vmem:[#allocation9_spill] sm:$0xff] }
 0x262   :  { %2779 = vmatmul.bf16.vlgmr.msrb.gmra.mxu1 %v4316_v9  ;;  %3275 = vmatpush.bf16.msrb.mxu0 %v4971_v22  ;;  %v4483_v9 = vld [vmem:[%s7822_s3 + $0x68] sm:$0xf] }
 0x263   :  { %4425 = vmatmul.msk.bf16.vlgmr.msrb.gmra.mxu2 %vm1113_vm0, %v4320_v29  ;;  %3303 = vmatpush.bf16.msrb.mxu1 %v8038_v60  ;;  %v4973_v29 = vld [vmem:[%s7818_s4 + $0x168] sm:$0xff] }
 0x264   :  { %3143 = vmatmul.bf16.vlgmr.msrb.gmra.mxu3 %v4432_v41  ;;  %3331 = vmatpush.bf16.msrb.mxu2 %v8036_v44  ;;  %v8043_v41 = vld [vmem:[#allocation23_spill] sm:$0xff] }
 0x265   :  { %3359 = vmatpush.bf16.msrb.mxu3 %v8037_v8  ;;  %v4368_v8 = vor.u32 %v4785_v3, %v4365_v48 }
 0x266   :  { %v2584_v30 = vpop.f32.mrf.mxu2  ;;  %v2530_v11 = vpop.f32.mrf.mxu0  ;;  %3276 = vmatpush.bf16.msrb.mxu0 %v4972_v42 }
 0x267   :  { %v2612_v50 = vpop.f32.mrf.mxu3  ;;  %v2585_v45 = vadd.f32 %v2584_v30, %v2557_v21  ;;  %v2558_v61 = vpop.f32.mrf.mxu1  ;;  %v2531_v2 = vadd.f32 %v2530_v11, %v7116_v31  ;;  %3304 = vmatpush.bf16.msrb.mxu1 %v8041_v59  ;;  %v4791_v31 = vld [vmem:[%s7821_s2 + $0xc0] sm:$0xf0]  ;;  %v4484_v11 = vor.u32 %v4825_v10, %v4483_v9 }
 0x268   :  { %3332 = vmatpush.bf16.msrb.mxu2 %v8039_v62  ;;  %v4364_v22 = vor.u32 %v4791_v31, %v4363_v0  ;;  %v4974_v62 = vld [vmem:[%s7818_s4 + $0x160] sm:$0xff]  ;;  %v4975_v0 = vld [vmem:[%s7818_s4 + $0x158] sm:$0xff]  ;;  %v8049_v31 = vld [vmem:[#allocation24_spill] sm:$0xff] }
 0x269   :  { %v7250_v51 = vadd.f32 %v2612_v50, %v2585_v45  ;;  %3360 = vmatpush.bf16.msrb.mxu3 %v8040_v1  ;;  %v2559_v27 = vadd.f32 %v2558_v61, %v2531_v2  ;;  %v4372_v45 = vor.u32 %v4792_v53, %v4371_v57  ;;  %v8045_v2 = vld [vmem:[#allocation10_spill] sm:$0xff]  ;;  %v8046_v1 = vld [vmem:[#allocation21_spill] sm:$0xff] }
 0x26a   :  { %3277 = vmatpush.bf16.msrb.mxu0 %v4973_v29  ;;  %v8051_v29 = vld [vmem:[#allocation29_spill] sm:$0xff] }
 0x26b   :  { %3305 = vmatpush.bf16.msrb.mxu1 %v8044_v18  ;;  %v4976_v18 = vld [vmem:[%s7818_s4 + $0x150] sm:$0xff] }
 0x26c   :  { %3333 = vmatpush.bf16.msrb.mxu2 %v8042_v47  ;;  %v8050_v47 = vld [vmem:[#allocation25_spill] sm:$0xff] }
 0x26d   :  { %3361 = vmatpush.bf16.msrb.mxu3 %v8043_v41 }
 0x26e   :  { %v2586_v21 = vpop.f32.mrf.mxu2  ;;  %v2533_v30 = vpop.f32.mrf.mxu0  ;;  %3278 = vmatpush.bf16.msrb.mxu0 %v4974_v62  ;;  %v4977_v62 = vld [vmem:[%s7818_s4 + $0x148] sm:$0xff] }
 0x26f   :  { %v2614_v44 = vpop.f32.mrf.mxu3  ;;  %v2587_v60 = vadd.f32 %v2586_v21, %v2559_v27  ;;  %v2561_v50 = vpop.f32.mrf.mxu1  ;;  %v2534_v61 = vadd.f32 %v2533_v30, %v7135_v5  ;;  %v8047_v27 = vld [vmem:[#allocation27_spill] sm:$0xff]  ;;  %v4423_v30 = vld [vmem:[%s7821_s2 + $0x100] sm:$0xf] }
 0x270   :  { %3334 = vmatpush.bf16.msrb.mxu2 %v8045_v2  ;;  %3306 = vmatpush.bf16.msrb.mxu1 %v8047_v27  ;;  %v8048_v5 = vld [vmem:[#allocation31_spill] sm:$0xff]  ;;  %v8054_v2 = vld [vmem:[#allocation32_spill] sm:$0xff] }
 0x271   :  { %v7289_v42 = vadd.f32 %v2614_v44, %v2587_v60  ;;  %3362 = vmatpush.bf16.msrb.mxu3 %v8046_v1  ;;  %v2562_v59 = vadd.f32 %v2561_v50, %v2534_v61  ;;  %2756 = vmatmul.bf16.gmra.mxu0 %v4364_v22  ;;  %v8052_v21 = vld [vmem:[#allocation11_spill] sm:$0xff]  ;;  %v4415_v22 = vld [vmem:[%s7821_s2 + $0xf8] sm:$0xf]  ;;  %v4417_v60 = vld [vmem:[%s7821_s2 + $0x12c] sm:$0xf0] }
 0x272   :  { %2784 = vmatmul.bf16.gmra.mxu1 %v4368_v8  ;;  %3279 = vmatpush.bf16.msrb.mxu0 %v4975_v0  ;;  %v4798_v8 = vld [vmem:[%s7821_s2 + $0xfc] sm:$0xf]  ;;  %v4805_v50 = vld [vmem:[%s7821_s2 + $0x130] sm:$0xf0]  ;;  %v8055_v1 = vld [vmem:[#allocation35_spill] sm:$0xff] }
 0x273   :  { %4426 = vmatmul.msk.bf16.gmra.mxu2 %vm1113_vm0, %v4372_v45  ;;  %v4535_v45 = vld [vmem:[%s7822_s3 + $0xd0] sm:$0xf]  ;;  %v4420_v0 = vor.u32 %v4798_v8, %v4417_v60 }
 0x274   :  { %3148 = vmatmul.bf16.gmra.mxu3 %v4484_v11  ;;  %3335 = vmatpush.bf16.msrb.mxu2 %v8048_v5  ;;  %v4838_v11 = vld [vmem:[%s7822_s3 + $0x100] sm:$0xf0]  ;;  %v8053_v61 = vld [vmem:[#allocation28_spill] sm:$0xff] }
 0x275   :  { %3363 = vmatpush.bf16.msrb.mxu3 %v8049_v31  ;;  %3307 = vmatpush.bf16.msrb.mxu1 %v8050_v47  ;;  %v8057_v47 = vld [vmem:[#allocation13_spill] sm:$0xff] }
 0x276   :  { %v2589_v3 = vpop.f32.mrf.mxu2  ;;  %v2535_v53 = vpop.f32.mrf.mxu0  ;;  %3280 = vmatpush.bf16.msrb.mxu0 %v4976_v18  ;;  %v4978_v18 = vld [vmem:[%s7818_s4 + $0x140] sm:$0xff] }
 0x277   :  { %v2617_v48 = vpop.f32.mrf.mxu3  ;;  %v2590_v57 = vadd.f32 %v2589_v3, %v2562_v59  ;;  %v2563_v9 = vpop.f32.mrf.mxu1  ;;  %v2536_v10 = vadd.f32 %v2535_v53, %v7178_v34  ;;  %v4804_v34 = vld [vmem:[%s7821_s2 + $0x128] sm:$0xf0]  ;;  %v4536_v53 = vor.u32 %v4838_v11, %v4535_v45  ;;  %v2210_v11 = vld [vmem:[%s7821_s2 + $0x168] sm:$0xf] }
 0x278   :  { %3336 = vmatpush.bf16.msrb.mxu2 %v8051_v29  ;;  %v4416_v5 = vor.u32 %v4804_v34, %v4415_v22 }
 0x279   :  { %v7302_v41 = vadd.f32 %v2617_v48, %v2590_v57  ;;  %3364 = vmatpush.bf16.msrb.mxu3 %v8052_v21  ;;  %v2564_v44 = vadd.f32 %v2563_v9, %v2536_v10  ;;  %3308 = vmatpush.bf16.msrb.mxu1 %v8053_v61  ;;  %v4424_v57 = vor.u32 %v4805_v50, %v4423_v30  ;;  %v8056_v10 = vld [vmem:[#allocation12_spill] sm:$0xff]  ;;  %v8058_v21 = vld [vmem:[#allocation33_spill] sm:$0xff]  ;;  %v2209_v50 = vld [vmem:[%s7821_s2 + $0x160] sm:$0xff] }
 0x27a   :  { %3281 = vmatpush.bf16.msrb.mxu0 %v4977_v62  ;;  %v7359_v61 = vld [vmem:[%s7822_s3 + $0x138] sm:$0xff] }
 0x27c   :  { %3337 = vmatpush.bf16.msrb.mxu2 %v8054_v2 }
 0x27d   :  { %3365 = vmatpush.bf16.msrb.mxu3 %v8055_v1  ;;  %3309 = vmatpush.bf16.msrb.mxu1 %v8056_v10  ;;  %v2348_v1 = vunpack.c.l.b16 %v2209_v50 }
 0x27e   :  { %v2591_v59 = vpop.f32.mrf.mxu2  ;;  %v2538_v3 = vpop.f32.mrf.mxu0  ;;  %3282 = vmatpush.bf16.msrb.mxu0 %v4978_v18 }
 0x27f   :  { %v2619_v27 = vpop.f32.mrf.mxu3  ;;  %v2592_v31 = vadd.f32 %v2591_v59, %v2564_v44  ;;  %v2566_v48 = vpop.f32.mrf.mxu1  ;;  %v2539_v9 = vadd.f32 %v2538_v3, %v7191_v38  ;;  %v8059_v38 = vld [vmem:[#allocation39_spill] sm:$0xff]  ;;  %v2349_v59 = vunpack.c.h.b16 %v2209_v50 }
 0x280   :  { %3338 = vmatpush.bf16.msrb.mxu2 %v8057_v47  ;;  %v4439_v50 = vld [vmem:[%s7822_s3 + $0x8] sm:$0xf] }
 0x281   :  { %v7341_v29 = vadd.f32 %v2619_v27, %v2592_v31  ;;  %3366 = vmatpush.bf16.msrb.mxu3 %v8058_v21  ;;  %v2567_v44 = vadd.f32 %v2566_v48, %v2539_v9  ;;  %2761 = vmatmul.bf16.gmra.mxu0 %v4416_v5  ;;  %v2350_v27 = vunpack.c.l.b16 %v2210_v11  ;;  %v3010_v5 = vunpack.c.l.b16 %v7359_v61  ;;  %v4807_v11 = vld [vmem:[%s7822_s3 + $0xc] sm:$0xf] }
 0x282   :  { %2789 = vmatmul.bf16.gmra.mxu1 %v4420_v0  ;;  %v2401_v3 = vpack.c.b16 %v2349_v59, %v2349_v59  ;;  %v4814_v59 = vld [vmem:[%s7822_s3 + $0x40] sm:$0xf0] }
 0x283   :  { %4427 = vmatmul.msk.bf16.gmra.mxu2 %vm1113_vm0, %v4424_v57  ;;  %3310 = vmatpush.bf16.msrb.mxu1 %v8059_v38  ;;  %v2402_v9 = vpack.c.b16 %v2350_v27, %v2350_v27  ;;  %v3062_v10 = vpack.c.b16 %v3010_v5, %v3010_v5 }
 0x284   :  { %3153 = vmatmul.bf16.gmra.mxu3 %v4536_v53 }
 0x286   :  { %v2594_v22 = vpop.f32.mrf.mxu2  ;;  %v2540_v60 = vpop.f32.mrf.mxu0 }
 0x287   :  { %v2622_v34 = vpop.f32.mrf.mxu3  ;;  %v2595_v8 = vadd.f32 %v2594_v22, %v2567_v44  ;;  %v2568_v30 = vpop.f32.mrf.mxu1  ;;  %v2541_v45 = vadd.f32 %v2540_v60, %v7204_v25  ;;  %v2400_v25 = vpack.c.b16 %v2348_v1, %v2348_v1  ;;  %v4447_v1 = vld [vmem:[%s7822_s3 + $0x10] sm:$0xf] }
 0x289   :  { %v7361_v2 = vadd.f32 %v2622_v34, %v2595_v8  ;;  %v2569_v62 = vadd.f32 %v2568_v30, %v2541_v45  ;;  %v4806_v30 = vld [vmem:[%s7822_s3 + $0x4] sm:$0xf]  ;;  %v4813_v45 = vld [vmem:[%s7822_s3 + $0x38] sm:$0xf0] }
 0x28e   :  { %v2596_v0 = vpop.f32.mrf.mxu2  ;;  %v2543_v57 = vpop.f32.mrf.mxu0 }
 0x28f   :  { %v2624_v31 = vpop.f32.mrf.mxu3  ;;  %v2597_v48 = vadd.f32 %v2596_v0, %v2569_v62  ;;  %v2571_v53 = vpop.f32.mrf.mxu1  ;;  %v2544_v47 = vadd.f32 %v2543_v57, %v7211_v52  ;;  %v4433_v52 = vld [vmem:[%s7822_s3 + $0x34] sm:$0xf0]  ;;  %v4441_v62 = vld [vmem:[%s7822_s3 + $0x3c] sm:$0xf0]  ;;  %v4448_v57 = vor.u32 %v4814_v59, %v4447_v1 }
 0x290   :  { %v4436_v0 = vor.u32 %v4806_v30, %v4433_v52  ;;  %v4826_v30 = vld [vmem:[%s7822_s3 + $0xa0] sm:$0xf0]  ;;  %v4493_v52 = vld [vmem:[%s7822_s3 + $0xa4] sm:$0xf0]  ;;  %v8062_v1 = vld [vmem:[#allocation37_spill] sm:$0xff] }
 0x291   :  { %v7365_v18 = vadd.f32 %v2624_v31, %v2597_v48  ;;  %v2572_v21 = vadd.f32 %v2571_v53, %v2544_v47  ;;  %2766 = vmatmul.bf16.gmra.mxu0 %v2400_v25  ;;  %v4440_v31 = vor.u32 %v4813_v45, %v4439_v50  ;;  %v4444_v48 = vor.u32 %v4807_v11, %v4441_v62  ;;  %v4499_v50 = vld [vmem:[%s7822_s3 + $0x78] sm:$0xf]  ;;  %v4827_v45 = vld [vmem:[%s7822_s3 + $0xa8] sm:$0xf0]  ;;  %v8061_v11 = vld [vmem:[#allocation44_spill] sm:$0xff] }
 0x292   :  { %2794 = vmatmul.bf16.gmra.mxu1 %v2401_v3  ;;  %v4981_v62 = vld [vmem:[%s7818_s4 + $0x268] sm:$0xff]  ;;  %v8063_v59 = vld [vmem:[#allocation14_spill] sm:$0xff] }
 0x293   :  { %4428 = vmatmul.msk.bf16.gmra.mxu2 %vm1113_vm0, %v2402_v9 }
 0x294   :  { %3158 = vmatmul.bf16.gmra.mxu3 %v3062_v10  ;;  %v4979_v10 = vld [vmem:[%s7818_s4 + $0x278] sm:$0xff] }
 0x296   :  { %v2599_v44 = vpop.f32.mrf.mxu2  ;;  %v2545_v34 = vpop.f32.mrf.mxu0 }
 0x297   :  { %v2627_v38 = vpop.f32.mrf.mxu3  ;;  %v2600_v22 = vadd.f32 %v2599_v44, %v2572_v21  ;;  %v2573_v8 = vpop.f32.mrf.mxu1 }
 0x298   :  { %v4819_v8 = vld [vmem:[%s7822_s3 + $0x6c] sm:$0xf] }
 0x299   :  { %v7368_v60 = vadd.f32 %v2627_v38, %v2600_v22 }
 0x29e   :  { %v2601_v27 = vpop.f32.mrf.mxu2  ;;  %v2640_v25 = vpop.f32.mrf.mxu0 }
 0x29f   :  { %v2629_v5 = vpop.f32.mrf.mxu3  ;;  %v2668_v3 = vpop.f32.mrf.mxu1  ;;  %v2641_v53 = vadd.f32 %v2640_v25, %v7250_v51 }
 0x2a1   :  { %v2669_v9 = vadd.f32 %v2668_v3, %v2641_v53  ;;  %3171 = vmatmul.bf16.vlgmr.msra.gmra.mxu0 %v4436_v0  ;;  %v4500_v53 = vor.u32 %v4827_v45, %v4499_v50  ;;  %v4833_v50 = vld [vmem:[%s7822_s3 + $0xdc] sm:$0xf]  ;;  %v4545_v45 = vld [vmem:[%s7822_s3 + $0x10c] sm:$0xf0] }
 0x2a2   :  { %3199 = vmatmul.bf16.vlgmr.msra.gmra.mxu1 %v4440_v31  ;;  %3387 = vmatpush.bf16.msra.mxu0 %v4979_v10  ;;  %v4982_v10 = vld [vmem:[%s7818_s4 + $0x260] sm:$0xff] }
 0x2a3   :  { %3227 = vmatmul.bf16.vlgmr.msra.gmra.mxu2 %v4444_v48  ;;  %3415 = vmatpush.bf16.msra.mxu1 %v6845_v39 }
 0x2a4   :  { %3255 = vmatmul.bf16.vlgmr.msra.gmra.mxu3 %v4448_v57  ;;  %3443 = vmatpush.bf16.msra.mxu2 %v6852_v16  ;;  %v4980_v16 = vld [vmem:[%s7818_s4 + $0x270] sm:$0xff] }
 0x2a5   :  { %3475 = vmatpush.bf16.msra.mxu3 %v6839_v55  ;;  %v8060_v55 = vld [vmem:[#allocation36_spill] sm:$0xff] }
 0x2a6   :  { %v2696_v47 = vpop.f32.mrf.mxu2  ;;  %v2642_v51 = vpop.f32.mrf.mxu0  ;;  %3388 = vmatpush.bf16.msra.mxu0 %v4980_v16 }
 0x2a7   :  { %v2724_v21 = vpop.f32.mrf.mxu3  ;;  %v2697_v44 = vadd.f32 %v2696_v47, %v2669_v9  ;;  %v2670_v38 = vpop.f32.mrf.mxu1  ;;  %v2643_v22 = vadd.f32 %v2642_v51, %v7289_v42  ;;  %3416 = vmatpush.bf16.msra.mxu1 %v6859_v43  ;;  %v4491_v42 = vld [vmem:[%s7822_s3 + $0x70] sm:$0xf]  ;;  %v4820_v43 = vld [vmem:[%s7822_s3 + $0x74] sm:$0xf] }
 0x2a8   :  { %3444 = vmatpush.bf16.msra.mxu2 %v6874_v37  ;;  %v4485_v37 = vld [vmem:[%s7822_s3 + $0x9c] sm:$0xf0]  ;;  %v4492_v31 = vor.u32 %v4826_v30, %v4491_v42  ;;  %v4496_v57 = vor.u32 %v4820_v43, %v4493_v52  ;;  %v4832_v30 = vld [vmem:[%s7822_s3 + $0xd4] sm:$0xf]  ;;  %v4543_v43 = vld [vmem:[%s7822_s3 + $0xd8] sm:$0xf] }
 0x2a9   :  { %v7406_v34 = vadd.f32 %v2724_v21, %v2697_v44  ;;  %3476 = vmatpush.bf16.msra.mxu3 %v8060_v55  ;;  %v2671_v39 = vadd.f32 %v2670_v38, %v2643_v22  ;;  %v4488_v0 = vor.u32 %v4819_v8, %v4485_v37  ;;  %v8065_v44 = vld [vmem:[#allocation15_spill] sm:$0xff]  ;;  %v8067_v37 = vld [vmem:[#allocation42_spill] sm:$0xff] }
 0x2aa   :  { %3389 = vmatpush.bf16.msra.mxu0 %v4981_v62  ;;  %v4839_v52 = vld [vmem:[%s7822_s3 + $0x108] sm:$0xf0]  ;;  %v4840_v62 = vld [vmem:[%s7822_s3 + $0x110] sm:$0xf0] }
 0x2ab   :  { %3417 = vmatpush.bf16.msra.mxu1 %v8062_v1  ;;  %v4985_v1 = vld [vmem:[%s7818_s4 + $0x248] sm:$0xff] }
 0x2ac   :  { %3445 = vmatpush.bf16.msra.mxu2 %v8061_v11  ;;  %v4551_v11 = vld [vmem:[%s7822_s3 + $0xe0] sm:$0xf] }
 0x2ad   :  { %3477 = vmatpush.bf16.msra.mxu3 %v8063_v59  ;;  %v8068_v59 = vld [vmem:[#allocation22_spill] sm:$0xff] }
 0x2ae   :  { %v2698_v27 = vpop.f32.mrf.mxu2  ;;  %v2645_v3 = vpop.f32.mrf.mxu0  ;;  %3390 = vmatpush.bf16.msra.mxu0 %v4982_v10  ;;  %v8069_v10 = vld [vmem:[#allocation30_spill] sm:$0xff] }
 0x2af   :  { %v2726_v5 = vpop.f32.mrf.mxu3  ;;  %v2699_v25 = vadd.f32 %v2698_v27, %v2671_v39  ;;  %v2673_v48 = vpop.f32.mrf.mxu1  ;;  %v2646_v9 = vadd.f32 %v2645_v3, %v7302_v41  ;;  %3418 = vmatpush.bf16.msra.mxu1 %v6924_v24  ;;  %v8064_v41 = vld [vmem:[#allocation41_spill] sm:$0xff]  ;;  %v8066_v39 = vld [vmem:[#allocation18_spill] sm:$0xff] }
 0x2b0   :  { %3446 = vmatpush.bf16.msra.mxu2 %v6939_v6  ;;  %v4983_v6 = vld [vmem:[%s7818_s4 + $0x258] sm:$0xff] }
 0x2b1   :  { %v7445_v47 = vadd.f32 %v2726_v5, %v2699_v25  ;;  %v2674_v21 = vadd.f32 %v2673_v48, %v2646_v9  ;;  %3176 = vmatmul.bf16.gmra.mxu0 %v4488_v0  ;;  %3478 = vmatpush.bf16.msra.mxu3 %v8065_v44 }
 0x2b2   :  { %3204 = vmatmul.bf16.gmra.mxu1 %v4492_v31  ;;  %3391 = vmatpush.bf16.msra.mxu0 %v4983_v6  ;;  %v4544_v31 = vor.u32 %v4839_v52, %v4543_v43  ;;  %v8070_v6 = vld [vmem:[#allocation26_spill] sm:$0xff] }
 0x2b3   :  { %3232 = vmatmul.bf16.gmra.mxu2 %v4496_v57  ;;  %3419 = vmatpush.bf16.msra.mxu1 %v8064_v41  ;;  %v4548_v57 = vor.u32 %v4833_v50, %v4545_v45 }
 0x2b4   :  { %3260 = vmatmul.bf16.gmra.mxu3 %v4500_v53  ;;  %3447 = vmatpush.bf16.msra.mxu2 %v6953_v36  ;;  %v4984_v36 = vld [vmem:[%s7818_s4 + $0x250] sm:$0xff]  ;;  %v4552_v53 = vor.u32 %v4840_v62, %v4551_v11 }
 0x2b6   :  { %v2701_v51 = vpop.f32.mrf.mxu2  ;;  %v2647_v24 = vpop.f32.mrf.mxu0  ;;  %3392 = vmatpush.bf16.msra.mxu0 %v4984_v36 }
 0x2b7   :  { %v2729_v38 = vpop.f32.mrf.mxu3  ;;  %v2702_v22 = vadd.f32 %v2701_v51, %v2674_v21  ;;  %v2675_v16 = vpop.f32.mrf.mxu1  ;;  %v2648_v55 = vadd.f32 %v2647_v24, %v7341_v29  ;;  %3420 = vmatpush.bf16.msra.mxu1 %v8067_v37  ;;  %v4537_v29 = vld [vmem:[%s7822_s3 + $0x104] sm:$0xf0]  ;;  %v2877_v24 = vld [vmem:[%s7822_s3 + $0x140] sm:$0xff]  ;;  %v3011_v37 = vunpack.c.h.b16 %v7359_v61 }
 0x2b8   :  { %3448 = vmatpush.bf16.msra.mxu2 %v8066_v39  ;;  %v4540_v0 = vor.u32 %v4832_v30, %v4537_v29  ;;  %v3013_v30 = vunpack.c.h.b16 %v2877_v24 }
 0x2b9   :  { %v7459_v8 = vadd.f32 %v2729_v38, %v2702_v22  ;;  %v2676_v42 = vadd.f32 %v2675_v16, %v2648_v55  ;;  %v7506_v55 = vld [vmem:[%s7822_s3 + $0x148] sm:$0xff]  ;;  %v3063_v50 = vpack.c.b16 %v3011_v37, %v3011_v37 }
 0x2ba   :  { %3393 = vmatpush.bf16.msra.mxu0 %v4985_v1  ;;  %v3014_v29 = vunpack.c.l.b16 %v7506_v55  ;;  %v3065_v1 = vpack.c.b16 %v3013_v30, %v3013_v30 }
 0x2bb   :  { %3421 = vmatpush.bf16.msra.mxu1 %v8068_v59 }
 0x2bc   :  { %3449 = vmatpush.bf16.msra.mxu2 %v7006_v54  ;;  %v4986_v54 = vld [vmem:[%s7818_s4 + $0x240] sm:$0xff]  ;;  %v3066_v59 = vpack.c.b16 %v3014_v29, %v3014_v29 }
 0x2be   :  { %v2703_v27 = vpop.f32.mrf.mxu2  ;;  %v2650_v3 = vpop.f32.mrf.mxu0  ;;  %3394 = vmatpush.bf16.msra.mxu0 %v4986_v54  ;;  %v4809_v54 = vld [vmem:[%s7822_s3 + $0x1c] sm:$0xf] }
 0x2bf   :  { %v2731_v5 = vpop.f32.mrf.mxu3  ;;  %v2704_v25 = vadd.f32 %v2703_v27, %v2676_v42  ;;  %v2678_v48 = vpop.f32.mrf.mxu1  ;;  %v2651_v9 = vadd.f32 %v2650_v3, %v7361_v2  ;;  %3422 = vmatpush.bf16.msra.mxu1 %v8070_v6  ;;  %v3012_v42 = vunpack.c.l.b16 %v2877_v24  ;;  %v4457_v6 = vld [vmem:[%s7822_s3 + $0x4c] sm:$0xf0] }
 0x2c0   :  { %3450 = vmatpush.bf16.msra.mxu2 %v8069_v10  ;;  %v4815_v10 = vld [vmem:[%s7822_s3 + $0x48] sm:$0xf0] }
 0x2c1   :  { %v7496_v21 = vadd.f32 %v2731_v5, %v2704_v25  ;;  %v2679_v41 = vadd.f32 %v2678_v48, %v2651_v9  ;;  %3181 = vmatmul.bf16.gmra.mxu0 %v4540_v0  ;;  %v3064_v45 = vpack.c.b16 %v3012_v42, %v3012_v42  ;;  %v4455_v9 = vld [vmem:[%s7822_s3 + $0x18] sm:$0xf] }
 0x2c2   :  { %3209 = vmatmul.bf16.gmra.mxu1 %v4544_v31 }
 0x2c3   :  { %3237 = vmatmul.bf16.gmra.mxu2 %v4548_v57 }
 0x2c4   :  { %3265 = vmatmul.bf16.gmra.mxu3 %v4552_v53  ;;  %v4808_v53 = vld [vmem:[%s7822_s3 + $0x14] sm:$0xf] }
 0x2c6   :  { %v2706_v44 = vpop.f32.mrf.mxu2  ;;  %v2652_v2 = vpop.f32.mrf.mxu0 }
 0x2c7   :  { %v2734_v51 = vpop.f32.mrf.mxu3  ;;  %v2707_v38 = vadd.f32 %v2706_v44, %v2679_v41  ;;  %v2680_v22 = vpop.f32.mrf.mxu1  ;;  %v2653_v16 = vadd.f32 %v2652_v2, %v7365_v18  ;;  %v4463_v41 = vld [vmem:[%s7822_s3 + $0x20] sm:$0xf]  ;;  %v4816_v44 = vld [vmem:[%s7822_s3 + $0x50] sm:$0xf0] }
 0x2c8   :  { %v4464_v37 = vor.u32 %v4816_v44, %v4463_v41 }
 0x2c9   :  { %v7508_v39 = vadd.f32 %v2734_v51, %v2707_v38  ;;  %v2681_v36 = vadd.f32 %v2680_v22, %v2653_v16  ;;  %v4456_v22 = vor.u32 %v4815_v10, %v4455_v9 }
 0x2ce   :  { %v2708_v43 = vpop.f32.mrf.mxu2  ;;  %v2655_v18 = vpop.f32.mrf.mxu0 }
 0x2cf   :  { %v2736_v52 = vpop.f32.mrf.mxu3  ;;  %v2709_v11 = vadd.f32 %v2708_v43, %v2681_v36  ;;  %v2683_v62 = vpop.f32.mrf.mxu1  ;;  %v2656_v27 = vadd.f32 %v2655_v18, %v7368_v60  ;;  %v4449_v60 = vld [vmem:[%s7822_s3 + $0x44] sm:$0xf0]  ;;  %v4460_v36 = vor.u32 %v4809_v54, %v4457_v6 }
 0x2d0   :  { %v4452_v2 = vor.u32 %v4808_v53, %v4449_v60  ;;  %v4512_v60 = vor.u32 %v4822_v7, %v4509_v28 }
 0x2d1   :  { %v7513_v5 = vadd.f32 %v2736_v52, %v2709_v11  ;;  %v2684_v0 = vadd.f32 %v2683_v62, %v2656_v27  ;;  %3186 = vmatmul.bf16.gmra.mxu0 %v3063_v50  ;;  %v4829_v27 = vld [vmem:[%s7822_s3 + $0xb8] sm:$0xf0] }
 0x2d2   :  { %3214 = vmatmul.bf16.gmra.mxu1 %v3064_v45 }
 0x2d3   :  { %3242 = vmatmul.bf16.gmra.mxu2 %v3065_v1  ;;  %v4501_v1 = vld [vmem:[%s7822_s3 + $0xac] sm:$0xf0] }
 0x2d4   :  { %3270 = vmatmul.bf16.gmra.mxu3 %v3066_v59  ;;  %v4507_v59 = vld [vmem:[%s7822_s3 + $0x80] sm:$0xf] }
 0x2d6   :  { %v2711_v61 = vpop.f32.mrf.mxu2  ;;  %v2657_v3 = vpop.f32.mrf.mxu0 }
 0x2d7   :  { %v2739_v31 = vpop.f32.mrf.mxu3  ;;  %v2712_v25 = vadd.f32 %v2711_v61, %v2684_v0  ;;  %v2685_v48 = vpop.f32.mrf.mxu1 }
 0x2d9   :  { %v7515_v57 = vadd.f32 %v2739_v31, %v2712_v25 }
 0x2de   :  { %v2713_v51 = vpop.f32.mrf.mxu2  ;;  %v2752_v24 = vpop.f32.mrf.mxu0 }
 0x2df   :  { %v2741_v38 = vpop.f32.mrf.mxu3  ;;  %v2780_v16 = vpop.f32.mrf.mxu1  ;;  %v2753_v42 = vadd.f32 %v2752_v24, %v7406_v34  ;;  %v4821_v34 = vld [vmem:[%s7822_s3 + $0x7c] sm:$0xf]  ;;  %v4559_v24 = vld [vmem:[%s7822_s3 + $0xe8] sm:$0xf] }
 0x2e0   :  { %v4504_v31 = vor.u32 %v4821_v34, %v4501_v1 }
 0x2e1   :  { %v2781_v30 = vadd.f32 %v2780_v16, %v2753_v42  ;;  %3283 = vmatmul.bf16.vlgmr.msrb.gmra.mxu0 %v4452_v2  ;;  %v4842_v16 = vld [vmem:[%s7822_s3 + $0x120] sm:$0xf0] }
 0x2e2   :  { %3311 = vmatmul.bf16.vlgmr.msrb.gmra.mxu1 %v4456_v22 }
 0x2e3   :  { %3339 = vmatmul.bf16.vlgmr.msrb.gmra.mxu2 %v4460_v36 }
 0x2e4   :  { %3367 = vmatmul.bf16.vlgmr.msrb.gmra.mxu3 %v4464_v37 }
 0x2e6   :  { %v2808_v29 = vpop.f32.mrf.mxu2  ;;  %v2754_v50 = vpop.f32.mrf.mxu0 }
 0x2e7   :  { %v7542_v43 = vpop.f32.mrf.mxu3  ;;  %v2809_v52 = vadd.f32 %v2808_v29, %v2781_v30  ;;  %v2782_v45 = vpop.f32.mrf.mxu1  ;;  %v2755_v11 = vadd.f32 %v2754_v50, %v7445_v47  ;;  %v4828_v47 = vld [vmem:[%s7822_s3 + $0xb0] sm:$0xf0] }
 0x2e8   :  { %v4508_v25 = vor.u32 %v4828_v47, %v4507_v59 }
 0x2e9   :  { %v7548_v18 = vmax.f32 %v2155_v12, %v2809_v52  ;;  %v2783_v62 = vadd.f32 %v2782_v45, %v2755_v11  ;;  %v4515_v12 = vld [vmem:[%s7822_s3 + $0x88] sm:$0xf]  ;;  %v4564_v45 = vor.u32 %v4835_v13, %v4561_v49  ;;  %v4468_v13 = vor.u32 %v4810_v19, %v4465_v56 }
 0x2ea   :  { %v4516_v9 = vor.u32 %v4829_v27, %v4515_v12 }
 0x2ee   :  { %v2810_v0 = vpop.f32.mrf.mxu2  ;;  %v2757_v48 = vpop.f32.mrf.mxu0 }
 0x2ef   :  { %v7574_v61 = vpop.f32.mrf.mxu3  ;;  %v2811_v3 = vadd.f32 %v2810_v0, %v2783_v62  ;;  %v2785_v53 = vpop.f32.mrf.mxu1  ;;  %v2758_v10 = vadd.f32 %v2757_v48, %v7459_v8  ;;  %v3015_v0 = vunpack.c.h.b16 %v7506_v55 }
 0x2f1   :  { %v7580_v54 = vmax.f32 %v2156_v33, %v2811_v3  ;;  %v2786_v6 = vadd.f32 %v2785_v53, %v2758_v10  ;;  %3288 = vmatmul.bf16.gmra.mxu0 %v4504_v31  ;;  %v4553_v33 = vld [vmem:[%s7822_s3 + $0x114] sm:$0xf0]  ;;  %v3018_v3 = vunpack.c.l.b16 %v7631_v17 }
 0x2f2   :  { %3316 = vmatmul.bf16.gmra.mxu1 %v4508_v25  ;;  %v4556_v42 = vor.u32 %v4834_v20, %v4553_v33  ;;  %v4817_v20 = vld [vmem:[%s7822_s3 + $0x58] sm:$0xf0]  ;;  %v4818_v33 = vld [vmem:[%s7822_s3 + $0x60] sm:$0xf0] }
 0x2f3   :  { %3344 = vmatmul.bf16.gmra.mxu2 %v4512_v60 }
 0x2f4   :  { %3372 = vmatmul.bf16.gmra.mxu3 %v4516_v9 }
 0x2f6   :  { %v2813_v41 = vpop.f32.mrf.mxu2  ;;  %v2759_v38 = vpop.f32.mrf.mxu0 }
 0x2f7   :  { %v7582_v44 = vpop.f32.mrf.mxu3  ;;  %v2814_v51 = vadd.f32 %v2813_v41, %v2786_v6  ;;  %v2787_v2 = vpop.f32.mrf.mxu1  ;;  %v2760_v22 = vadd.f32 %v2759_v38, %v7496_v21  ;;  %v4841_v21 = vld [vmem:[%s7822_s3 + $0x118] sm:$0xf0] }
 0x2f8   :  { %v4560_v30 = vor.u32 %v4841_v21, %v4559_v24 }
 0x2f9   :  { %v7588_v8 = vmax.f32 %v2157_v46, %v2814_v51  ;;  %v2788_v14 = vadd.f32 %v2787_v2, %v2760_v22  ;;  %v4567_v46 = vld [vmem:[%s7822_s3 + $0xf0] sm:$0xf]  ;;  %v3070_v51 = vpack.c.b16 %v3018_v3, %v3018_v3 }
 0x2fa   :  { %v4568_v11 = vor.u32 %v4842_v16, %v4567_v46 }
 0x2fe   :  { %v2815_v36 = vpop.f32.mrf.mxu2  ;;  %v2762_v52 = vpop.f32.mrf.mxu0 }
 0x2ff   :  { %v7614_v37 = vpop.f32.mrf.mxu3  ;;  %v2816_v29 = vadd.f32 %v2815_v36, %v2788_v14  ;;  %v2790_v50 = vpop.f32.mrf.mxu1  ;;  %v2763_v62 = vadd.f32 %v2762_v52, %v7508_v39  ;;  %v2879_v39 = vld [vmem:[%s7822_s3 + $0x150] sm:$0xff]  ;;  %v4476_v36 = vor.u32 %v4811_v63, %v4473_v32  ;;  %v4575_v63 = vld [vmem:[%s7822_s3 + $0xf8] sm:$0xf]  ;;  %v4843_v32 = vld [vmem:[%s7822_s3 + $0x128] sm:$0xf0] }
 0x300   :  { %v3016_v31 = vunpack.c.l.b16 %v2879_v39  ;;  %v3017_v25 = vunpack.c.h.b16 %v2879_v39  ;;  %v4830_v39 = vld [vmem:[%s7822_s3 + $0xc0] sm:$0xf0] }
 0x301   :  { %v7620_v34 = vmax.f32 %v2158_v35, %v2816_v29  ;;  %v2791_v1 = vadd.f32 %v2790_v50, %v2763_v62  ;;  %3293 = vmatmul.bf16.gmra.mxu0 %v4556_v42 }
 0x302   :  { %3321 = vmatmul.bf16.gmra.mxu1 %v4560_v30  ;;  %v3068_v60 = vpack.c.b16 %v3016_v31, %v3016_v31  ;;  %v3069_v41 = vpack.c.b16 %v3017_v25, %v3017_v25 }
 0x303   :  { %3349 = vmatmul.bf16.gmra.mxu2 %v4564_v45 }
 0x304   :  { %3377 = vmatmul.bf16.gmra.mxu3 %v4568_v11 }
 0x306   :  { %v2818_v59 = vpop.f32.mrf.mxu2  ;;  %v2764_v28 = vpop.f32.mrf.mxu0 }
 0x307   :  { %v7622_v47 = vpop.f32.mrf.mxu3  ;;  %v2819_v7 = vadd.f32 %v2818_v59, %v2791_v1  ;;  %v2792_v12 = vpop.f32.mrf.mxu1  ;;  %v2765_v27 = vadd.f32 %v2764_v28, %v7513_v5  ;;  %v3067_v5 = vpack.c.b16 %v3015_v0, %v3015_v0  ;;  %v4517_v28 = vld [vmem:[%s7822_s3 + $0xbc] sm:$0xf0]  ;;  %v4831_v0 = vld [vmem:[%s7822_s3 + $0xc8] sm:$0xf0] }
 0x309   :  { %v7636_v40 = vmax.f32 %v2159_v15, %v2819_v7  ;;  %v2793_v35 = vadd.f32 %v2792_v12, %v2765_v27  ;;  %v4523_v12 = vld [vmem:[%s7822_s3 + $0x90] sm:$0xf]  ;;  %v4525_v27 = vld [vmem:[%s7822_s3 + $0xc4] sm:$0xf0] }
 0x30e   :  { %v2820_v48 = vpop.f32.mrf.mxu2  ;;  %v2767_v10 = vpop.f32.mrf.mxu0 }
 0x30f   :  { %v7640_v53 = vpop.f32.mrf.mxu3  ;;  %v2821_v9 = vadd.f32 %v2820_v48, %v2793_v35  ;;  %v2795_v6 = vpop.f32.mrf.mxu1  ;;  %v2768_v26 = vadd.f32 %v2767_v10, %v7515_v57  ;;  %v4531_v35 = vld [vmem:[%s7822_s3 + $0x98] sm:$0xf]  ;;  %v4524_v48 = vor.u32 %v4830_v39, %v4523_v12 }
 0x311   :  { %v7646_v4 = vmax.f32 %v2160_v58, %v2821_v9  ;;  %v2796_v15 = vadd.f32 %v2795_v6, %v2768_v26  ;;  %3298 = vmatmul.bf16.gmra.mxu0 %v3067_v5  ;;  %v4471_v58 = vld [vmem:[%s7822_s3 + $0x28] sm:$0xf]  ;;  %v4532_v6 = vor.u32 %v4831_v0, %v4531_v35 }
 0x312   :  { %3326 = vmatmul.bf16.gmra.mxu1 %v3068_v60  ;;  %v4472_v49 = vor.u32 %v4817_v20, %v4471_v58  ;;  %v4569_v20 = vld [vmem:[%s7822_s3 + $0x124] sm:$0xf0] }
 0x313   :  { %3354 = vmatmul.bf16.gmra.mxu2 %v3069_v41 }
 0x314   :  { %3382 = vmatmul.bf16.gmra.mxu3 %v3070_v51 }
 0x316   :  { %v2823_v55 = vpop.f32.mrf.mxu2  ;;  %v2769_v22 = vpop.f32.mrf.mxu0 }
 0x317   :  { %v7648_v38 = vpop.f32.mrf.mxu3  ;;  %v2824_v2 = vadd.f32 %v2823_v55, %v2796_v15  ;;  %v2797_v14 = vpop.f32.mrf.mxu1 }
 0x319   :  { %v7653_v57 = vmax.f32 %v2161_v23, %v2824_v2  ;;  %v4479_v23 = vld [vmem:[%s7822_s3 + $0x30] sm:$0xf] }
 0x31a   :  { %v4480_v42 = vor.u32 %v4818_v33, %v4479_v23  ;;  %v4577_v23 = vld [vmem:[%s7822_s3 + $0x12c] sm:$0xf0]  ;;  %v4583_v33 = vld [vmem:[%s7822_s3 + $0x100] sm:$0xf] }
 0x31e   :  { %v2825_v24 = vpop.f32.mrf.mxu2  ;;  %v3172_v46 = vpop.f32.mrf.mxu0 }
 0x31f   :  { %v3161_v21 = vpop.f32.mrf.mxu3  ;;  %v3200_v16 = vpop.f32.mrf.mxu1  ;;  %v3173_v30 = vadd.f32 %v3172_v46, %v7542_v43  ;;  %v4823_v43 = vld [vmem:[%s7822_s3 + $0x8c] sm:$0xf]  ;;  %v4844_v24 = vld [vmem:[%s7822_s3 + $0x130] sm:$0xf0]  ;;  %v4576_v46 = vor.u32 %v4843_v32, %v4575_v63 }
 0x320   :  { %v4520_v3 = vor.u32 %v4823_v43, %v4517_v28  ;;  %v2881_v28 = vld [vmem:[%s7822_s3 + $0x160] sm:$0xff] }
 0x321   :  { %v3201_v29 = vadd.f32 %v3200_v16, %v3173_v30  ;;  %3395 = vmatmul.bf16.vlgmr.msra.gmra.mxu0 %v4468_v13  ;;  %v3020_v35 = vunpack.c.l.b16 %v2881_v28  ;;  %v3021_v0 = vunpack.c.h.b16 %v2881_v28 }
 0x322   :  { %3423 = vmatmul.bf16.vlgmr.msra.gmra.mxu1 %v4472_v49 }
 0x323   :  { %3451 = vmatmul.bf16.vlgmr.msra.gmra.mxu2 %v4476_v36 }
 0x324   :  { %4585 = vmatmul.msk.bf16.vlgmr.msra.gmra.mxu3 %vm1113_vm0, %v4480_v42 }
 0x326   :  { %v3228_v52 = vpop.f32.mrf.mxu2  ;;  %v3174_v11 = vpop.f32.mrf.mxu0 }
 0x327   :  { %v3256_v50 = vpop.f32.mrf.mxu3  ;;  %v3229_v45 = vadd.f32 %v3228_v52, %v3201_v29  ;;  %v3202_v62 = vpop.f32.mrf.mxu1  ;;  %v3175_v1 = vadd.f32 %v3174_v11, %v7574_v61  ;;  %v4824_v61 = vld [vmem:[%s7822_s3 + $0x94] sm:$0xf]  ;;  %v4584_v29 = vor.u32 %v4844_v24, %v4583_v33 }
 0x328   :  { %v4528_v10 = vor.u32 %v4824_v61, %v4525_v27  ;;  %v3019_v27 = vunpack.c.h.b16 %v7631_v17 }
 0x329   :  { %v7682_v59 = vadd.f32 %v3256_v50, %v3229_v45  ;;  %v3203_v7 = vadd.f32 %v3202_v62, %v3175_v1 }
 0x32e   :  { %v3230_v31 = vpop.f32.mrf.mxu2  ;;  %v3177_v60 = vpop.f32.mrf.mxu0 }
 0x32f   :  { %v3258_v25 = vpop.f32.mrf.mxu3  ;;  %v3231_v5 = vadd.f32 %v3230_v31, %v3203_v7  ;;  %v3205_v9 = vpop.f32.mrf.mxu1  ;;  %v3178_v41 = vadd.f32 %v3177_v60, %v7582_v44  ;;  %v4836_v44 = vld [vmem:[%s7822_s3 + $0xf4] sm:$0xf] }
 0x330   :  { %v4572_v49 = vor.u32 %v4836_v44, %v4569_v20 }
 0x331   :  { %v7709_v51 = vadd.f32 %v3258_v25, %v3231_v5  ;;  %v3206_v26 = vadd.f32 %v3205_v9, %v3178_v41  ;;  %3400 = vmatmul.bf16.gmra.mxu0 %v4520_v3  ;;  %v3072_v5 = vpack.c.b16 %v3020_v35, %v3020_v35 }
 0x332   :  { %3428 = vmatmul.bf16.gmra.mxu1 %v4524_v48  ;;  %v3071_v48 = vpack.c.b16 %v3019_v27, %v3019_v27 }
 0x333   :  { %3456 = vmatmul.bf16.gmra.mxu2 %v4528_v10 }
 0x334   :  { %4586 = vmatmul.msk.bf16.gmra.mxu3 %vm1113_vm0, %v4532_v6  ;;  %v3073_v6 = vpack.c.b16 %v3021_v0, %v3021_v0 }
 0x336   :  { %v3233_v15 = vpop.f32.mrf.mxu2  ;;  %v3179_v22 = vpop.f32.mrf.mxu0 }
 0x337   :  { %v3261_v55 = vpop.f32.mrf.mxu3  ;;  %v3234_v2 = vadd.f32 %v3233_v15, %v3206_v26  ;;  %v3207_v14 = vpop.f32.mrf.mxu1  ;;  %v3180_v19 = vadd.f32 %v3179_v22, %v7614_v37  ;;  %v4837_v37 = vld [vmem:[%s7822_s3 + $0xfc] sm:$0xf] }
 0x338   :  { %v4580_v30 = vor.u32 %v4837_v37, %v4577_v23 }
 0x339   :  { %v7713_v56 = vadd.f32 %v3261_v55, %v3234_v2  ;;  %v3208_v58 = vadd.f32 %v3207_v14, %v3180_v19 }
 0x33e   :  { %v3235_v21 = vpop.f32.mrf.mxu2  ;;  %v3182_v36 = vpop.f32.mrf.mxu0 }
 0x33f   :  { %v3263_v13 = vpop.f32.mrf.mxu3  ;;  %v3236_v16 = vadd.f32 %v3235_v21, %v3208_v58  ;;  %v3210_v42 = vpop.f32.mrf.mxu1  ;;  %v3183_v52 = vadd.f32 %v3182_v36, %v7622_v47  ;;  %v2882_v47 = vld [vmem:[%s7822_s3 + $0x168] sm:$0xf] }
 0x340   :  { %v3022_v31 = vunpack.c.l.b16 %v2882_v47 }
 0x341   :  { %v7740_v50 = vadd.f32 %v3263_v13, %v3236_v16  ;;  %v3211_v45 = vadd.f32 %v3210_v42, %v3183_v52  ;;  %3405 = vmatmul.bf16.gmra.mxu0 %v4572_v49 }
 0x342   :  { %3433 = vmatmul.bf16.gmra.mxu1 %v4576_v46 }
 0x343   :  { %3461 = vmatmul.bf16.gmra.mxu2 %v4580_v30 }
 0x344   :  { %4587 = vmatmul.msk.bf16.gmra.mxu3 %vm1113_vm0, %v4584_v29 }
 0x346   :  { %v3238_v11 = vpop.f32.mrf.mxu2  ;;  %v3184_v7 = vpop.f32.mrf.mxu0 }
 0x347   :  { %v3266_v62 = vpop.f32.mrf.mxu3  ;;  %v3239_v1 = vadd.f32 %v3238_v11, %v3211_v45  ;;  %v3212_v43 = vpop.f32.mrf.mxu1  ;;  %v3185_v12 = vadd.f32 %v3184_v7, %v7640_v53  ;;  %v3074_v53 = vpack.c.b16 %v3022_v31, %v3022_v31 }
 0x349   :  { %v3267_v39 = vadd.f32 %v3266_v62, %v3239_v1  ;;  %v3213_v61 = vadd.f32 %v3212_v43, %v3185_v12 }
 0x34e   :  { %v3240_v25 = vpop.f32.mrf.mxu2  ;;  %v3187_v9 = vpop.f32.mrf.mxu0 }
 0x34f   :  { %v3268_v3 = vpop.f32.mrf.mxu3  ;;  %v3241_v60 = vadd.f32 %v3240_v25, %v3213_v61  ;;  %v3215_v10 = vpop.f32.mrf.mxu1  ;;  %v3188_v41 = vadd.f32 %v3187_v9, %v7648_v38 }
 0x351   :  { %v7752_v26 = vadd.f32 %v3268_v3, %v3241_v60  ;;  %v3216_v15 = vadd.f32 %v3215_v10, %v3188_v41  ;;  %3410 = vmatmul.bf16.gmra.mxu0 %v3071_v48 }
 0x352   :  { %3438 = vmatmul.bf16.gmra.mxu1 %v3072_v5 }
 0x353   :  { %3466 = vmatmul.bf16.gmra.mxu2 %v3073_v6 }
 0x354   :  { %4588 = vmatmul.msk.bf16.gmra.mxu3 %vm1113_vm0, %v3074_v53 }
 0x356   :  { %v3243_v17 = vpop.f32.mrf.mxu2  ;;  %v3189_v22 = vpop.f32.mrf.mxu0 }
 0x357   :  { %v3271_v55 = vpop.f32.mrf.mxu3  ;;  %v3244_v2 = vadd.f32 %v3243_v17, %v3216_v15  ;;  %v3217_v14 = vpop.f32.mrf.mxu1 }
 0x359   :  { %v7755_v19 = vadd.f32 %v3271_v55, %v3244_v2 }
 0x35e   :  { %v3245_v58 = vpop.f32.mrf.mxu2  ;;  %v3284_v20 = vpop.f32.mrf.mxu0 }
 0x35f   :  { %v3273_v44 = vpop.f32.mrf.mxu3  ;;  %v3312_v63 = vpop.f32.mrf.mxu1  ;;  %v3285_v38 = vadd.f32 %v3284_v20, %v7682_v59 }
 0x361   :  { %v3313_v32 = vadd.f32 %v3312_v63, %v3285_v38 }
 0x366   :  { %v3340_v37 = vpop.f32.mrf.mxu2  ;;  %v3286_v24 = vpop.f32.mrf.mxu0 }
 0x367   :  { %v3368_v23 = vpop.f32.mrf.mxu3  ;;  %v3341_v33 = vadd.f32 %v3340_v37, %v3313_v32  ;;  %v3314_v21 = vpop.f32.mrf.mxu1  ;;  %v3287_v6 = vadd.f32 %v3286_v24, %v7709_v51  ;;  %v7781_v24 = vld [vmem:[%s7823_s5] ss:$0 sm:$0xff] }
 0x369   :  { %v3369_v13 = vadd.f32 %v3368_v23, %v3341_v33  ;;  %v3315_v55 = vadd.f32 %v3314_v21, %v3287_v6 }
 0x36e   :  { %v3342_v49 = vpop.f32.mrf.mxu2  ;;  %v3289_v16 = vpop.f32.mrf.mxu0 }
 0x36f   :  { %v3370_v46 = vpop.f32.mrf.mxu3  ;;  %v3317_v36 = vpop.f32.mrf.mxu1  ;;  %v3290_v42 = vadd.f32 %v3289_v16, %v7713_v56  ;;  %v3343_v22 = vadd.f32 %v3342_v49, %v3315_v55 }
 0x371   :  { %v3318_v30 = vadd.f32 %v3317_v36, %v3290_v42  ;;  %v3371_v20 = vadd.f32 %v3370_v46, %v3343_v22 }
 0x376   :  { %v3345_v29 = vpop.f32.mrf.mxu2  ;;  %v3291_v11 = vpop.f32.mrf.mxu0 }
 0x377   :  { %v3373_v52 = vpop.f32.mrf.mxu3  ;;  %v3346_v45 = vadd.f32 %v3345_v29, %v3318_v30  ;;  %v3319_v62 = vpop.f32.mrf.mxu1  ;;  %v3292_v51 = vadd.f32 %v3291_v11, %v7740_v50 }
 0x379   :  { %v3374_v59 = vadd.f32 %v3373_v52, %v3346_v45  ;;  %v3320_v42 = vadd.f32 %v3319_v62, %v3292_v51 }
 0x37e   :  { %v3347_v1 = vpop.f32.mrf.mxu2  ;;  %v3294_v43 = vpop.f32.mrf.mxu0 }
 0x37f   :  { %v3375_v7 = vpop.f32.mrf.mxu3  ;;  %v3322_v28 = vpop.f32.mrf.mxu1  ;;  %v3295_v12 = vadd.f32 %v3294_v43, %v3267_v39  ;;  %v3348_v45 = vadd.f32 %v3347_v1, %v3320_v42 }
 0x381   :  { %v3323_v47 = vadd.f32 %v3322_v28, %v3295_v12 }
 0x386   :  { %v3350_v61 = vpop.f32.mrf.mxu2  ;;  %v3296_v0 = vpop.f32.mrf.mxu0 }
 0x387   :  { %v3378_v27 = vpop.f32.mrf.mxu3  ;;  %v3351_v35 = vadd.f32 %v3350_v61, %v3323_v47  ;;  %v7759_v31 = vpop.f32.mrf.mxu1  ;;  %v3376_v47 = vadd.f32 %v3375_v7, %v3348_v45 }
 0x389   :  { %v7761_v56 = vadd.f32 %v3378_v27, %v3351_v35 }
 0x38e   :  { %v7763_v25 = vpop.f32.mrf.mxu2  ;;  %v7767_v48 = vpop.f32.mrf.mxu0 }
 0x38f   :  { %v7765_v3 = vpop.f32.mrf.mxu3  ;;  %v7769_v5 = vpop.f32.mrf.mxu1 }
 0x396   :  { %v7771_v60 = vpop.f32.mrf.mxu2  ;;  %v3301_v9 = vpop.f32.mrf.mxu0 }
 0x397   :  { %v7773_v39 = vpop.f32.mrf.mxu3  ;;  %v3329_v10 = vpop.f32.mrf.mxu1 }
 0x39e   :  { %v3357_v53 = vpop.f32.mrf.mxu2  ;;  %v3396_v15 = vpop.f32.mrf.mxu0 }
 0x39f   :  { %v3385_v41 = vpop.f32.mrf.mxu3  ;;  %v3424_v17 = vpop.f32.mrf.mxu1  ;;  %v3397_v2 = vadd.f32 %v3396_v15, %v3369_v13 }
 0x3a1   :  { %v3425_v14 = vadd.f32 %v3424_v17, %v3397_v2 }
 0x3a6   :  { %v3452_v58 = vpop.f32.mrf.mxu2  ;;  %v3398_v38 = vpop.f32.mrf.mxu0 }
 0x3a7   :  { %v3480_v44 = vpop.f32.mrf.mxu3  ;;  %v3453_v63 = vadd.f32 %v3452_v58, %v3425_v14  ;;  %v3426_v32 = vpop.f32.mrf.mxu1  ;;  %v3399_v23 = vadd.f32 %v3398_v38, %v3371_v20 }
 0x3a9   :  { %v3481_v37 = vadd.f32 %v3480_v44, %v3453_v63  ;;  %v3427_v21 = vadd.f32 %v3426_v32, %v3399_v23 }
 0x3ab   :  { %v3499_v33 = vmax.f32 %v7548_v18, %v3481_v37 }
 0x3ad   :  { %v3510_v30 = vadd.f32 %v7781_v24, %v3499_v33 }
 0x3ae   :  { %v3454_v13 = vpop.f32.mrf.mxu2  ;;  %v3401_v36 = vpop.f32.mrf.mxu0 }
 0x3af   :  { %v3482_v49 = vpop.f32.mrf.mxu3  ;;  %v3455_v16 = vadd.f32 %v3454_v13, %v3427_v21  ;;  %v3429_v46 = vpop.f32.mrf.mxu1  ;;  %v3402_v52 = vadd.f32 %v3401_v36, %v3374_v59  ;;  %v3517_v50 = vmul.f32 0.2, %v3510_v30 }
 0x3b1   :  { %v3483_v29 = vadd.f32 %v3482_v49, %v3455_v16  ;;  %v3430_v43 = vadd.f32 %v3429_v46, %v3402_v52  ;;  %v3524_v10 = vmax.f32 %v3510_v30, %v3517_v50 }
 0x3b3   :  { %v3500_v18 = vmax.f32 %v7580_v54, %v3483_v29  ;;  %v3297_v54 = vadd.f32 %v3296_v0, %v7752_v26  ;;  %v3300_v0 = vadd.f32 %v7767_v48, %v7755_v19 }
 0x3b5   :  { %v3511_v11 = vadd.f32 %v7781_v24, %v3500_v18  ;;  %v3325_v22 = vadd.f32 %v7759_v31, %v3297_v54 }
 0x3b6   :  { %v3457_v28 = vpop.f32.mrf.mxu2  ;;  %v3403_v35 = vpop.f32.mrf.mxu0 }
 0x3b7   :  { %v3485_v12 = vpop.f32.mrf.mxu3  ;;  %v3518_v61 = vmul.f32 0.2, %v3511_v11  ;;  %v3458_v27 = vadd.f32 %v3457_v28, %v3430_v43  ;;  %v3431_v9 = vpop.f32.mrf.mxu1  ;;  %v3404_v53 = vadd.f32 %v3403_v35, %v3376_v47 }
 0x3b9   :  { %v3525_v62 = vmax.f32 %v3511_v11, %v3518_v61  ;;  %v3486_v6 = vadd.f32 %v3485_v12, %v3458_v27  ;;  %v3432_v1 = vadd.f32 %v3431_v9, %v3404_v53 }
 0x3bb   :  { %v4848_v41 = vpack.c.bf16 %v3525_v62, %v3524_v10  ;;  %v3501_v59 = vmax.f32 %v7588_v8, %v3486_v6  ;;  %v3353_v8 = vadd.f32 %v7763_v25, %v3325_v22 }
 0x3bd   :  { %4849 = vst [vmem:[%s7824_s6] sm:$0xff] %v4848_v41   ;;  %v3512_v14 = vadd.f32 %v7781_v24, %v3501_v59  ;;  %v3381_v31 = vadd.f32 %v7765_v3, %v3353_v8 }
 0x3be   :  { %v3459_v15 = vpop.f32.mrf.mxu2  ;;  %v3406_v55 = vpop.f32.mrf.mxu0 }
 0x3bf   :  { %v3487_v7 = vpop.f32.mrf.mxu3  ;;  %v3460_v17 = vadd.f32 %v3459_v15, %v3432_v1  ;;  %v3434_v2 = vpop.f32.mrf.mxu1  ;;  %v3407_v44 = vadd.f32 %v3406_v55, %v7761_v56  ;;  %v3519_v20 = vmul.f32 0.2, %v3512_v14  ;;  %v3328_v56 = vadd.f32 %v7769_v5, %v3300_v0 }
 0x3c1   :  { %v3488_v58 = vadd.f32 %v3487_v7, %v3460_v17  ;;  %v3435_v38 = vadd.f32 %v3434_v2, %v3407_v44  ;;  %v3526_v25 = vmax.f32 %v3512_v14, %v3519_v20  ;;  %v3356_v19 = vadd.f32 %v7771_v60, %v3328_v56 }
 0x3c3   :  { %v3502_v26 = vmax.f32 %v7620_v34, %v3488_v58  ;;  %v3384_v42 = vadd.f32 %v7773_v39, %v3356_v19 }
 0x3c5   :  { %v3513_v63 = vadd.f32 %v7781_v24, %v3502_v26 }
 0x3c6   :  { %v3462_v32 = vpop.f32.mrf.mxu2  ;;  %v3408_v51 = vpop.f32.mrf.mxu0 }
 0x3c7   :  { %v3490_v37 = vpop.f32.mrf.mxu3  ;;  %v3520_v23 = vmul.f32 0.2, %v3513_v63  ;;  %v3463_v33 = vadd.f32 %v3462_v32, %v3435_v38  ;;  %v3436_v21 = vpop.f32.mrf.mxu1  ;;  %v3409_v49 = vadd.f32 %v3408_v51, %v3381_v31 }
 0x3c9   :  { %v3527_v13 = vmax.f32 %v3513_v63, %v3520_v23  ;;  %v3491_v34 = vadd.f32 %v3490_v37, %v3463_v33  ;;  %v3437_v3 = vadd.f32 %v3436_v21, %v3409_v49 }
 0x3cb   :  { %v4853_v48 = vpack.c.bf16 %v3527_v13, %v3526_v25  ;;  %v3503_v16 = vmax.f32 %v7636_v40, %v3491_v34 }
 0x3cd   :  { %4860 = vst [vmem:[%s7824_s6 + $0x8] sm:$0xff] %v4853_v48   ;;  %v3514_v52 = vadd.f32 %v7781_v24, %v3503_v16 }
 0x3ce   :  { %v3464_v36 = vpop.f32.mrf.mxu2  ;;  %v3411_v5 = vpop.f32.mrf.mxu0 }
 0x3cf   :  { %v3492_v46 = vpop.f32.mrf.mxu3  ;;  %v3465_v30 = vadd.f32 %v3464_v36, %v3437_v3  ;;  %v3439_v29 = vpop.f32.mrf.mxu1  ;;  %v3412_v18 = vadd.f32 %v3411_v5, %v3384_v42  ;;  %v3521_v50 = vmul.f32 0.2, %v3514_v52 }
 0x3d1   :  { %v3493_v45 = vadd.f32 %v3492_v46, %v3465_v30  ;;  %v3440_v11 = vadd.f32 %v3439_v29, %v3412_v18  ;;  %v3528_v39 = vmax.f32 %v3514_v52, %v3521_v50 }
 0x3d3   :  { %v3504_v60 = vmax.f32 %v7646_v4, %v3493_v45 }
 0x3d5   :  { %v3515_v40 = vadd.f32 %v7781_v24, %v3504_v60 }
 0x3d6   :  { %v3467_v43 = vpop.f32.mrf.mxu2  ;;  %v3413_v61 = vpop.f32.mrf.mxu0 }
 0x3d7   :  { %v3495_v28 = vpop.f32.mrf.mxu3  ;;  %v3522_v12 = vmul.f32 0.2, %v3515_v40  ;;  %v3468_v47 = vadd.f32 %v3467_v43, %v3440_v11  ;;  %v3441_v27 = vpop.f32.mrf.mxu1 }
 0x3d9   :  { %v3529_v35 = vmax.f32 %v3515_v40, %v3522_v12  ;;  %v3496_v9 = vadd.f32 %v3495_v28, %v3468_v47 }
 0x3db   :  { %v4858_v10 = vpack.c.bf16 %v3529_v35, %v3528_v39  ;;  %v3505_v62 = vmax.f32 %v7653_v57, %v3496_v9 }
 0x3dd   :  { %4861 = vst [vmem:[%s7824_s6 + $0x10] sm:$0xff] %v4858_v10   ;;  %v3516_v4 = vadd.f32 %v7781_v24, %v3505_v62 }
 0x3de   :  { %v3469_v6 = vpop.f32.mrf.mxu2 }
 0x3df   :  { %v3497_v53 = vpop.f32.mrf.mxu3  ;;  %v3523_v41 = vmul.f32 0.2, %v3516_v4 }
 0x3e1   :  { %v3530_v59 = vmax.f32 %v3516_v4, %v3523_v41 }
 0x3e3   :  { %v3537_v54 = vpack.c.bf16 %v3530_v59, %v3530_v59 }
 0x3e5   :  { %3544 = vst [vmem:[%s7824_s6 + $0x18] sm:$0xf] %v3537_v54 }

// kernel: _lambda_.5
= control target key start
LH: loop header
LB: loop body
LE: loop exit
PB: predicated region body
PF: predicated region fallthrough
CT: control target
= control target key end

     0   :  { %vm3261_vm0 = vcmask 80896   ;;  %s8010_s1 = inlined_call_operand.vmem [shape: bf16[3200,256], index: 1, kind: input, shape index: {}]   ;;  %s8011_s0 = inlined_call_operand.vmem [shape: bf16[8,3200], index: 0, kind: input, shape index: {}]   ;;  %s8012_s2 = inlined_call_operand.vmem [shape: f32[1,256], index: 2, kind: input, shape index: {}]   ;;  %s8013_s5 = inlined_call_operand.vmem [shape: f32[8,256], index: 5, kind: output, shape index: {0}]   ;;  %s8014_s3 = inlined_call_operand.vmem [shape: f32[256,10], index: 3, kind: input, shape index: {}]   ;;  %s8015_s4 = inlined_call_operand.vmem [shape: f32[1,10], index: 4, kind: input, shape index: {}]   ;;  %s8016_s6 = inlined_call_operand.vmem [shape: f32[8,10], index: 6, kind: output, shape index: {1}]  }
   0x1   :  { %v3329_v0 = vld [vmem:[%s8010_s1 + $0x70] sm:$0xf]  ;;  %v4886_v1 = vld [vmem:[%s8010_s1 + $0x74] sm:$0xf0]  ;;  %v3321_v11 = vld [vmem:[%s8010_s1 + $0x60] sm:$0xf] }
   0x2   :  { %v3393_v2 = vld [vmem:[%s8010_s1 + $0xf0] sm:$0xf]  ;;  %v3330_v3 = vor.u32 %v4886_v1, %v3329_v0  ;;  %v4902_v4 = vld [vmem:[%s8010_s1 + $0xf4] sm:$0xf0]  ;;  %v4884_v13 = vld [vmem:[%s8010_s1 + $0x64] sm:$0xf0] }
   0x3   :  { %v3457_v5 = vld [vmem:[%s8010_s1 + $0x170] sm:$0xf]  ;;  %v4918_v6 = vld [vmem:[%s8010_s1 + $0x174] sm:$0xf0]  ;;  %v3394_v7 = vor.u32 %v4902_v4, %v3393_v2  ;;  %v3385_v14 = vld [vmem:[%s8010_s1 + $0xe0] sm:$0xf]  ;;  %v3322_v16 = vor.u32 %v4884_v13, %v3321_v11 }
   0x4   :  { %v3458_v8 = vor.u32 %v4918_v6, %v3457_v5  ;;  %v3521_v9 = vld [vmem:[%s8010_s1 + $0x1f0] sm:$0xf]  ;;  %v4934_v10 = vld [vmem:[%s8010_s1 + $0x1f4] sm:$0xf0]  ;;  %2529 = vmatpush.bf16.msra.mxu0 %v3330_v3  ;;  %v4900_v15 = vld [vmem:[%s8010_s1 + $0xe4] sm:$0xf0] }
   0x5   :  { %v3522_v12 = vor.u32 %v4934_v10, %v3521_v9  ;;  %2542 = vmatpush.bf16.msra.mxu1 %v3394_v7  ;;  %v3386_v17 = vor.u32 %v4900_v15, %v3385_v14  ;;  %v3449_v18 = vld [vmem:[%s8010_s1 + $0x160] sm:$0xf]  ;;  %v4916_v19 = vld [vmem:[%s8010_s1 + $0x164] sm:$0xf0]  ;;  %v3313_v23 = vld [vmem:[%s8010_s1 + $0x50] sm:$0xf] }
   0x6   :  { %2555 = vmatpush.bf16.msra.mxu2 %v3458_v8  ;;  %v3513_v20 = vld [vmem:[%s8010_s1 + $0x1e0] sm:$0xf]  ;;  %v3450_v21 = vor.u32 %v4916_v19, %v3449_v18  ;;  %v4932_v22 = vld [vmem:[%s8010_s1 + $0x1e4] sm:$0xf0]  ;;  %v4882_v24 = vld [vmem:[%s8010_s1 + $0x54] sm:$0xf0] }
   0x7   :  { %2568 = vmatpush.bf16.msra.mxu3 %v3522_v12  ;;  %v3514_v25 = vor.u32 %v4932_v22, %v3513_v20  ;;  %v3377_v26 = vld [vmem:[%s8010_s1 + $0xd0] sm:$0xf]  ;;  %v4898_v27 = vld [vmem:[%s8010_s1 + $0xd4] sm:$0xf0]  ;;  %v3314_v29 = vor.u32 %v4882_v24, %v3313_v23  ;;  %v3305_v35 = vld [vmem:[%s8010_s1 + $0x40] sm:$0xf] }
   0x8   :  { %v3441_v28 = vld [vmem:[%s8010_s1 + $0x150] sm:$0xf]  ;;  %2530 = vmatpush.bf16.msra.mxu0 %v3322_v16  ;;  %v4914_v30 = vld [vmem:[%s8010_s1 + $0x154] sm:$0xf0]  ;;  %v3378_v33 = vor.u32 %v4898_v27, %v3377_v26  ;;  %v4880_v36 = vld [vmem:[%s8010_s1 + $0x44] sm:$0xf0] }
   0x9   :  { %v3505_v31 = vld [vmem:[%s8010_s1 + $0x1d0] sm:$0xf]  ;;  %v4930_v32 = vld [vmem:[%s8010_s1 + $0x1d4] sm:$0xf0]  ;;  %2543 = vmatpush.bf16.msra.mxu1 %v3386_v17  ;;  %v3442_v34 = vor.u32 %v4914_v30, %v3441_v28  ;;  %v3369_v37 = vld [vmem:[%s8010_s1 + $0xc0] sm:$0xf]  ;;  %v3306_v44 = vor.u32 %v4880_v36, %v3305_v35 }
   0xa   :  { %2556 = vmatpush.bf16.msra.mxu2 %v3450_v21  ;;  %v3506_v38 = vor.u32 %v4930_v32, %v3505_v31  ;;  %v4896_v39 = vld [vmem:[%s8010_s1 + $0xc4] sm:$0xf0]  ;;  %v3433_v40 = vld [vmem:[%s8010_s1 + $0x140] sm:$0xf]  ;;  %v3297_v47 = vld [vmem:[%s8010_s1 + $0x30] sm:$0xf] }
   0xb   :  { %2569 = vmatpush.bf16.msra.mxu3 %v3514_v25  ;;  %v4912_v41 = vld [vmem:[%s8010_s1 + $0x144] sm:$0xf0]  ;;  %v3497_v42 = vld [vmem:[%s8010_s1 + $0x1c0] sm:$0xf]  ;;  %v3370_v45 = vor.u32 %v4896_v39, %v3369_v37  ;;  %v4878_v48 = vld [vmem:[%s8010_s1 + $0x34] sm:$0xf0] }
   0xc   :  { %v4928_v43 = vld [vmem:[%s8010_s1 + $0x1c4] sm:$0xf0]  ;;  %2531 = vmatpush.bf16.msra.mxu0 %v3314_v29  ;;  %v3434_v46 = vor.u32 %v4912_v41, %v3433_v40  ;;  %v3361_v49 = vld [vmem:[%s8010_s1 + $0xb0] sm:$0xf]  ;;  %v4894_v51 = vld [vmem:[%s8010_s1 + $0xb4] sm:$0xf0]  ;;  %v3298_v56 = vor.u32 %v4878_v48, %v3297_v47 }
   0xd   :  { %2544 = vmatpush.bf16.msra.mxu1 %v3378_v33  ;;  %v3498_v50 = vor.u32 %v4928_v43, %v3497_v42  ;;  %v3425_v52 = vld [vmem:[%s8010_s1 + $0x130] sm:$0xf]  ;;  %v4910_v53 = vld [vmem:[%s8010_s1 + $0x134] sm:$0xf0]  ;;  %v3362_v57 = vor.u32 %v4894_v51, %v3361_v49  ;;  %v3289_v59 = vld [vmem:[%s8010_s1 + $0x20] sm:$0xf] }
   0xe   :  { %2557 = vmatpush.bf16.msra.mxu2 %v3442_v34  ;;  %v3489_v54 = vld [vmem:[%s8010_s1 + $0x1b0] sm:$0xf]  ;;  %v4926_v55 = vld [vmem:[%s8010_s1 + $0x1b4] sm:$0xf0]  ;;  %v3426_v58 = vor.u32 %v4910_v53, %v3425_v52  ;;  %v4876_v60 = vld [vmem:[%s8010_s1 + $0x24] sm:$0xf0] }
   0xf   :  { %2570 = vmatpush.bf16.msra.mxu3 %v3506_v38  ;;  %v3353_v61 = vld [vmem:[%s8010_s1 + $0xa0] sm:$0xf]  ;;  %v3490_v62 = vor.u32 %v4926_v55, %v3489_v54  ;;  %v4892_v63 = vld [vmem:[%s8010_s1 + $0xa4] sm:$0xf0]  ;;  %v3290_v4 = vor.u32 %v4876_v60, %v3289_v59  ;;  %v3281_v7 = vld [vmem:[%s8010_s1 + $0x10] sm:$0xf] }
  0x10   :  { %2532 = vmatpush.bf16.msra.mxu0 %v3306_v44  ;;  %v3417_v0 = vld [vmem:[%s8010_s1 + $0x120] sm:$0xf]  ;;  %v4908_v1 = vld [vmem:[%s8010_s1 + $0x124] sm:$0xf0]  ;;  %v3354_v5 = vor.u32 %v4892_v63, %v3353_v61  ;;  %v4874_v8 = vld [vmem:[%s8010_s1 + $0x14] sm:$0xf0] }
  0x11   :  { %2545 = vmatpush.bf16.msra.mxu1 %v3370_v45  ;;  %v3481_v2 = vld [vmem:[%s8010_s1 + $0x1a0] sm:$0xf]  ;;  %v4924_v3 = vld [vmem:[%s8010_s1 + $0x1a4] sm:$0xf0]  ;;  %v3418_v6 = vor.u32 %v4908_v1, %v3417_v0  ;;  %v3345_v9 = vld [vmem:[%s8010_s1 + $0x90] sm:$0xf]  ;;  %v3282_v16 = vor.u32 %v4874_v8, %v3281_v7 }
  0x12   :  { %2558 = vmatpush.bf16.msra.mxu2 %v3434_v46  ;;  %v3482_v10 = vor.u32 %v4924_v3, %v3481_v2  ;;  %v4890_v11 = vld [vmem:[%s8010_s1 + $0x94] sm:$0xf0]  ;;  %v3409_v12 = vld [vmem:[%s8010_s1 + $0x110] sm:$0xf]  ;;  %v3273_v17 = vld [vmem:[%s8010_s1] sm:$0xf] }
  0x13   :  { %2571 = vmatpush.bf16.msra.mxu3 %v3498_v50  ;;  %v4906_v13 = vld [vmem:[%s8010_s1 + $0x114] sm:$0xf0]  ;;  %v3473_v14 = vld [vmem:[%s8010_s1 + $0x190] sm:$0xf]  ;;  %v4872_v18 = vld [vmem:[%s8010_s1 + $0x4] sm:$0xf0]  ;;  %v3346_v19 = vor.u32 %v4890_v11, %v3345_v9 }
  0x14   :  { %2533 = vmatpush.bf16.msra.mxu0 %v3298_v56  ;;  %v4922_v15 = vld [vmem:[%s8010_s1 + $0x194] sm:$0xf0]  ;;  %v3410_v20 = vor.u32 %v4906_v13, %v3409_v12  ;;  %v3337_v21 = vld [vmem:[%s8010_s1 + $0x80] sm:$0xf]  ;;  %v4888_v22 = vld [vmem:[%s8010_s1 + $0x84] sm:$0xf0]  ;;  %v3274_v31 = vor.u32 %v4872_v18, %v3273_v17 }
  0x15   :  { %2546 = vmatpush.bf16.msra.mxu1 %v3362_v57  ;;  %v3401_v23 = vld [vmem:[%s8010_s1 + $0x100] sm:$0xf]  ;;  %v3474_v24 = vor.u32 %v4922_v15, %v3473_v14  ;;  %v4904_v25 = vld [vmem:[%s8010_s1 + $0x104] sm:$0xf0]  ;;  %v3585_v26 = vld [vmem:[%s8010_s1 + $0x270] sm:$0xf]  ;;  %v3338_v35 = vor.u32 %v4888_v22, %v3337_v21 }
  0x16   :  { %2559 = vmatpush.bf16.msra.mxu2 %v3426_v58  ;;  %v4950_v27 = vld [vmem:[%s8010_s1 + $0x274] sm:$0xf0]  ;;  %v3649_v28 = vld [vmem:[%s8010_s1 + $0x2f0] sm:$0xf]  ;;  %v3465_v33 = vld [vmem:[%s8010_s1 + $0x180] sm:$0xf]  ;;  %v3402_v36 = vor.u32 %v4904_v25, %v3401_v23 }
  0x17   :  { %2572 = vmatpush.bf16.msra.mxu3 %v3490_v62  ;;  %v4966_v29 = vld [vmem:[%s8010_s1 + $0x2f4] sm:$0xf0]  ;;  %v3713_v30 = vld [vmem:[%s8010_s1 + $0x370] sm:$0xf]  ;;  %v4920_v34 = vld [vmem:[%s8010_s1 + $0x184] sm:$0xf0]  ;;  %v3586_v39 = vor.u32 %v4950_v27, %v3585_v26 }
  0x18   :  { %2534 = vmatpush.bf16.msra.mxu0 %v3290_v4  ;;  %v4982_v32 = vld [vmem:[%s8010_s1 + $0x374] sm:$0xf0]  ;;  %v3777_v37 = vld [vmem:[%s8010_s1 + $0x3f0] sm:$0xf]  ;;  %v3650_v40 = vor.u32 %v4966_v29, %v3649_v28  ;;  %v3577_v41 = vld [vmem:[%s8010_s1 + $0x260] sm:$0xf]  ;;  %v3466_v43 = vor.u32 %v4920_v34, %v3465_v33 }
  0x19   :  { %2547 = vmatpush.bf16.msra.mxu1 %v3354_v5  ;;  %v4998_v38 = vld [vmem:[%s8010_s1 + $0x3f4] sm:$0xf0]  ;;  %v3714_v42 = vor.u32 %v4982_v32, %v3713_v30  ;;  %v4948_v44 = vld [vmem:[%s8010_s1 + $0x264] sm:$0xf0]  ;;  %v3641_v45 = vld [vmem:[%s8010_s1 + $0x2e0] sm:$0xf] }
  0x1a   :  { %2560 = vmatpush.bf16.msra.mxu2 %v3418_v6  ;;  %v4964_v46 = vld [vmem:[%s8010_s1 + $0x2e4] sm:$0xf0]  ;;  %v3778_v47 = vor.u32 %v4998_v38, %v3777_v37  ;;  %v3705_v48 = vld [vmem:[%s8010_s1 + $0x360] sm:$0xf]  ;;  %v3578_v52 = vor.u32 %v4948_v44, %v3577_v41  ;;  %v3569_v54 = vld [vmem:[%s8010_s1 + $0x250] sm:$0xf] }
  0x1b   :  { %2573 = vmatpush.bf16.msra.mxu3 %v3482_v10  ;;  %v4980_v49 = vld [vmem:[%s8010_s1 + $0x364] sm:$0xf0]  ;;  %v3769_v50 = vld [vmem:[%s8010_s1 + $0x3e0] sm:$0xf]  ;;  %v3642_v53 = vor.u32 %v4964_v46, %v3641_v45  ;;  %v4946_v55 = vld [vmem:[%s8010_s1 + $0x254] sm:$0xf0] }
  0x1c   :  { %2535 = vmatpush.bf16.msra.mxu0 %v3282_v16  ;;  %v4996_v51 = vld [vmem:[%s8010_s1 + $0x3e4] sm:$0xf0]  ;;  %v3706_v56 = vor.u32 %v4980_v49, %v3705_v48  ;;  %v3633_v57 = vld [vmem:[%s8010_s1 + $0x2d0] sm:$0xf]  ;;  %v4962_v58 = vld [vmem:[%s8010_s1 + $0x2d4] sm:$0xf0]  ;;  %v3570_v3 = vor.u32 %v4946_v55, %v3569_v54 }
  0x1d   :  { %2548 = vmatpush.bf16.msra.mxu1 %v3346_v19  ;;  %v23_v59 = vld [vmem:[%s8011_s0 + $0x8] sm:$0xff]  ;;  %v3770_v60 = vor.u32 %v4996_v51, %v3769_v50  ;;  %v3697_v61 = vld [vmem:[%s8010_s1 + $0x350] sm:$0xf]  ;;  %v4978_v62 = vld [vmem:[%s8010_s1 + $0x354] sm:$0xf0]  ;;  %v3634_v4 = vor.u32 %v4962_v58, %v3633_v57 }
  0x1e   :  { %2561 = vmatpush.bf16.msra.mxu2 %v3410_v20  ;;  %v456_v63 = vunpack.c.l.b16 %v23_v59  ;;  %v457_v0 = vunpack.c.h.b16 %v23_v59  ;;  %v3761_v1 = vld [vmem:[%s8010_s1 + $0x3d0] sm:$0xf]  ;;  %v4994_v2 = vld [vmem:[%s8010_s1 + $0x3d4] sm:$0xf0]  ;;  %v3561_v5 = vld [vmem:[%s8010_s1 + $0x240] sm:$0xf]  ;;  %v3698_v8 = vor.u32 %v4978_v62, %v3697_v61 }
  0x1f   :  { %2574 = vmatpush.bf16.msra.mxu3 %v3474_v24  ;;  %v22_v7 = vld [vmem:[%s8011_s0] sm:$0xff]  ;;  %v4944_v9 = vld [vmem:[%s8010_s1 + $0x244] sm:$0xf0]  ;;  %v3762_v15 = vor.u32 %v4994_v2, %v3761_v1  ;;  %v3553_v24 = vld [vmem:[%s8010_s1 + $0x230] sm:$0xf] }
  0x20   :  { %2536 = vmatpush.bf16.msra.mxu0 %v3274_v31  ;;  %v5578_v6 = vpack.c.b16 %v456_v63, %v456_v63  ;;  %v3625_v10 = vld [vmem:[%s8010_s1 + $0x2c0] sm:$0xf]  ;;  %v4960_v11 = vld [vmem:[%s8010_s1 + $0x2c4] sm:$0xf0]  ;;  %v454_v12 = vunpack.c.l.b16 %v22_v7  ;;  %v5592_v13 = vpack.c.b16 %v457_v0, %v457_v0  ;;  %v455_v14 = vunpack.c.h.b16 %v22_v7  ;;  %v4942_v26 = vld [vmem:[%s8010_s1 + $0x234] sm:$0xf0] }
  0x21   :  { %2549 = vmatpush.bf16.msra.mxu1 %v3338_v35  ;;  %v3689_v16 = vld [vmem:[%s8010_s1 + $0x340] sm:$0xf]  ;;  %v4976_v17 = vld [vmem:[%s8010_s1 + $0x344] sm:$0xf0]  ;;  %v3562_v22 = vor.u32 %v4944_v9, %v3561_v5  ;;  %v3626_v23 = vor.u32 %v4960_v11, %v3625_v10  ;;  %v3617_v27 = vld [vmem:[%s8010_s1 + $0x2b0] sm:$0xf]  ;;  %v3554_v34 = vor.u32 %v4942_v26, %v3553_v24 }
  0x22   :  { %2562 = vmatpush.bf16.msra.mxu2 %v3402_v36  ;;  %v3753_v18 = vld [vmem:[%s8010_s1 + $0x3c0] sm:$0xf]  ;;  %v4992_v19 = vld [vmem:[%s8010_s1 + $0x3c4] sm:$0xf0]  ;;  %v5607_v20 = vpack.c.b16 %v454_v12, %v454_v12  ;;  %v5610_v21 = vpack.c.b16 %v455_v14, %v455_v14  ;;  %v3690_v25 = vor.u32 %v4976_v17, %v3689_v16  ;;  %v4958_v28 = vld [vmem:[%s8010_s1 + $0x2b4] sm:$0xf0] }
  0x23   :  { %2575 = vmatpush.bf16.msra.mxu3 %v3466_v43  ;;  %v3754_v29 = vor.u32 %v4992_v19, %v3753_v18  ;;  %v3681_v30 = vld [vmem:[%s8010_s1 + $0x330] sm:$0xf]  ;;  %v4974_v31 = vld [vmem:[%s8010_s1 + $0x334] sm:$0xf0]  ;;  %v3618_v35 = vor.u32 %v4958_v28, %v3617_v27  ;;  %v3545_v36 = vld [vmem:[%s8010_s1 + $0x220] sm:$0xf] }
  0x24   :  { %2581 = vmatpush.bf16.msrb.mxu0 %v3586_v39  ;;  %2550 = vmatmul.bf16.vlgmr.msra.gmra.mxu1 %v5610_v21  ;;  %v3745_v32 = vld [vmem:[%s8010_s1 + $0x3b0] sm:$0xf]  ;;  %v4990_v33 = vld [vmem:[%s8010_s1 + $0x3b4] sm:$0xf0]  ;;  %v3682_v37 = vor.u32 %v4974_v31, %v3681_v30  ;;  %v4940_v38 = vld [vmem:[%s8010_s1 + $0x224] sm:$0xf0] }
  0x25   :  { %2594 = vmatpush.bf16.msrb.mxu1 %v3650_v40  ;;  %2563 = vmatmul.bf16.vlgmr.msra.gmra.mxu2 %v5578_v6  ;;  %v3609_v39 = vld [vmem:[%s8010_s1 + $0x2a0] sm:$0xf]  ;;  %v4956_v40 = vld [vmem:[%s8010_s1 + $0x2a4] sm:$0xf0]  ;;  %v3746_v41 = vor.u32 %v4990_v33, %v3745_v32  ;;  %v3546_v46 = vor.u32 %v4940_v38, %v3545_v36  ;;  %v3537_v48 = vld [vmem:[%s8010_s1 + $0x210] sm:$0xf] }
  0x26   :  { %2607 = vmatpush.bf16.msrb.mxu2 %v3714_v42  ;;  %2576 = vmatmul.bf16.vlgmr.msra.gmra.mxu3 %v5592_v13  ;;  %v3673_v42 = vld [vmem:[%s8010_s1 + $0x320] sm:$0xf]  ;;  %v4972_v43 = vld [vmem:[%s8010_s1 + $0x324] sm:$0xf0]  ;;  %v4938_v50 = vld [vmem:[%s8010_s1 + $0x214] sm:$0xf0] }
  0x27   :  { %2620 = vmatpush.bf16.msrb.mxu3 %v3778_v47  ;;  %2537 = vmatmul.bf16.vlgmr.msra.gmra.mxu0 %v5607_v20  ;;  %v3737_v44 = vld [vmem:[%s8010_s1 + $0x3a0] sm:$0xf]  ;;  %v4988_v45 = vld [vmem:[%s8010_s1 + $0x3a4] sm:$0xf0]  ;;  %v3610_v47 = vor.u32 %v4956_v40, %v3609_v39  ;;  %v3674_v49 = vor.u32 %v4972_v43, %v3673_v42  ;;  %v3601_v51 = vld [vmem:[%s8010_s1 + $0x290] sm:$0xf] }
  0x28   :  { %2582 = vmatpush.bf16.msrb.mxu0 %v3578_v52  ;;  %v4954_v52 = vld [vmem:[%s8010_s1 + $0x294] sm:$0xf0]  ;;  %v3665_v54 = vld [vmem:[%s8010_s1 + $0x310] sm:$0xf]  ;;  %v3529_v58 = vld [vmem:[%s8010_s1 + $0x200] sm:$0xf] }
  0x29   :  { %2595 = vmatpush.bf16.msrb.mxu1 %v3642_v53  ;;  %v3738_v53 = vor.u32 %v4988_v45, %v3737_v44  ;;  %v4970_v55 = vld [vmem:[%s8010_s1 + $0x314] sm:$0xf0]  ;;  %v4936_v59 = vld [vmem:[%s8010_s1 + $0x204] sm:$0xf0]  ;;  %v3602_v61 = vor.u32 %v4954_v52, %v3601_v51  ;;  %v3593_v62 = vld [vmem:[%s8010_s1 + $0x280] sm:$0xf] }
  0x2a   :  { %2608 = vmatpush.bf16.msrb.mxu2 %v3706_v56  ;;  %v3729_v56 = vld [vmem:[%s8010_s1 + $0x390] sm:$0xf]  ;;  %v4986_v57 = vld [vmem:[%s8010_s1 + $0x394] sm:$0xf0]  ;;  %v4952_v63 = vld [vmem:[%s8010_s1 + $0x284] sm:$0xf0]  ;;  %v3666_v1 = vor.u32 %v4970_v55, %v3665_v54 }
  0x2b   :  { %2621 = vmatpush.bf16.msrb.mxu3 %v3770_v60  ;;  %v3538_v60 = vor.u32 %v4938_v50, %v3537_v48  ;;  %v24_v0 = vld [vmem:[%s8011_s0 + $0x10] sm:$0xff]  ;;  %v3657_v2 = vld [vmem:[%s8010_s1 + $0x300] sm:$0xf]  ;;  %v3730_v5 = vor.u32 %v4986_v57, %v3729_v56  ;;  %v5030_v10 = vld [vmem:[%s8010_s1 + $0x4f4] sm:$0xf0]  ;;  %v3594_v16 = vor.u32 %v4952_v63, %v3593_v62 }
  0x2c   :  { %2583 = vmatpush.bf16.msrb.mxu0 %v3570_v3  ;;  %v4968_v3 = vld [vmem:[%s8010_s1 + $0x304] sm:$0xf0]  ;;  %v3841_v7 = vld [vmem:[%s8010_s1 + $0x470] sm:$0xf]  ;;  %v5046_v12 = vld [vmem:[%s8010_s1 + $0x574] sm:$0xf0]  ;;  %v458_v14 = vunpack.c.l.b16 %v24_v0  ;;  %v459_v26 = vunpack.c.h.b16 %v24_v0 }
  0x2d   :  { %2596 = vmatpush.bf16.msrb.mxu1 %v3634_v4  ;;  %v25_v4 = vld [vmem:[%s8011_s0 + $0x18] sm:$0xff]  ;;  %v3905_v9 = vld [vmem:[%s8010_s1 + $0x4f0] sm:$0xf]  ;;  %v3721_v17 = vld [vmem:[%s8010_s1 + $0x380] sm:$0xf] }
  0x2e   :  { %2609 = vmatpush.bf16.msrb.mxu2 %v3698_v8  ;;  %v5014_v8 = vld [vmem:[%s8010_s1 + $0x474] sm:$0xf0]  ;;  %v3969_v11 = vld [vmem:[%s8010_s1 + $0x570] sm:$0xf]  ;;  %v4984_v18 = vld [vmem:[%s8010_s1 + $0x384] sm:$0xf0]  ;;  %v460_v19 = vunpack.c.l.b16 %v25_v4  ;;  %v3906_v27 = vor.u32 %v5030_v10, %v3905_v9  ;;  %v5758_v36 = vpack.c.b16 %v458_v14, %v458_v14  ;;  %v5768_v43 = vpack.c.b16 %v459_v26, %v459_v26 }
  0x2f   :  { %2622 = vmatpush.bf16.msrb.mxu3 %v3762_v15  ;;  %v3530_v15 = vor.u32 %v4936_v59, %v3529_v58  ;;  %v4033_v24 = vld [vmem:[%s8010_s1 + $0x5f0] sm:$0xf]  ;;  %v3970_v28 = vor.u32 %v5046_v12, %v3969_v11  ;;  %v5012_v30 = vld [vmem:[%s8010_s1 + $0x464] sm:$0xf0]  ;;  %v3897_v31 = vld [vmem:[%s8010_s1 + $0x4e0] sm:$0xf]  ;;  %v3722_v32 = vor.u32 %v4984_v18, %v3721_v17 }
  0x30   :  { %2584 = vmatpush.bf16.msrb.mxu0 %v3562_v22  ;;  %v3658_v22 = vor.u32 %v4968_v3, %v3657_v2  ;;  %v5028_v33 = vld [vmem:[%s8010_s1 + $0x4e4] sm:$0xf0]  ;;  %v5760_v39 = vpack.c.b16 %v460_v19, %v460_v19  ;;  %v3889_v48 = vld [vmem:[%s8010_s1 + $0x4d0] sm:$0xf]  ;;  %v5026_v50 = vld [vmem:[%s8010_s1 + $0x4d4] sm:$0xf0] }
  0x31   :  { %2597 = vmatpush.bf16.msrb.mxu1 %v3626_v23  ;;  %v3842_v23 = vor.u32 %v5014_v8, %v3841_v7  ;;  %v5060_v42 = vld [vmem:[%s8010_s1 + $0x5e4] sm:$0xf0]  ;;  %v3898_v44 = vor.u32 %v5028_v33, %v3897_v31  ;;  %v3953_v51 = vld [vmem:[%s8010_s1 + $0x550] sm:$0xf]  ;;  %v5042_v52 = vld [vmem:[%s8010_s1 + $0x554] sm:$0xf0]  ;;  %v3890_v57 = vor.u32 %v5026_v50, %v3889_v48 }
  0x32   :  { %2610 = vmatpush.bf16.msrb.mxu2 %v3690_v25  ;;  %v5062_v25 = vld [vmem:[%s8010_s1 + $0x5f4] sm:$0xf0]  ;;  %v4017_v55 = vld [vmem:[%s8010_s1 + $0x5d0] sm:$0xf]  ;;  %v3954_v58 = vor.u32 %v5042_v52, %v3953_v51  ;;  %v3817_v59 = vld [vmem:[%s8010_s1 + $0x440] sm:$0xf] }
  0x33   :  { %2623 = vmatpush.bf16.msrb.mxu3 %v3754_v29  ;;  %v3833_v29 = vld [vmem:[%s8010_s1 + $0x460] sm:$0xf]  ;;  %v4034_v38 = vor.u32 %v5062_v25, %v4033_v24  ;;  %v5058_v56 = vld [vmem:[%s8010_s1 + $0x5d4] sm:$0xf0]  ;;  %v5024_v62 = vld [vmem:[%s8010_s1 + $0x4c4] sm:$0xf0] }
  0x34   :  { %2585 = vmatpush.bf16.msrb.mxu0 %v3554_v34  ;;  %v3961_v34 = vld [vmem:[%s8010_s1 + $0x560] sm:$0xf]  ;;  %v3834_v40 = vor.u32 %v5012_v30, %v3833_v29  ;;  %v5040_v0 = vld [vmem:[%s8010_s1 + $0x544] sm:$0xf0]  ;;  %v3809_v8 = vld [vmem:[%s8010_s1 + $0x430] sm:$0xf] }
  0x35   :  { %2598 = vmatpush.bf16.msrb.mxu1 %v3618_v35  ;;  %v5044_v35 = vld [vmem:[%s8010_s1 + $0x564] sm:$0xf0]  ;;  %v3945_v63 = vld [vmem:[%s8010_s1 + $0x540] sm:$0xf]  ;;  %v5006_v9 = vld [vmem:[%s8010_s1 + $0x434] sm:$0xf0] }
  0x36   :  { %2611 = vmatpush.bf16.msrb.mxu2 %v3682_v37  ;;  %v461_v37 = vunpack.c.h.b16 %v25_v4  ;;  %v3962_v45 = vor.u32 %v5044_v35, %v3961_v34  ;;  %v4009_v3 = vld [vmem:[%s8010_s1 + $0x5c0] sm:$0xf]  ;;  %v5056_v4 = vld [vmem:[%s8010_s1 + $0x5c4] sm:$0xf0]  ;;  %v3946_v7 = vor.u32 %v5040_v0, %v3945_v63  ;;  %v3873_v10 = vld [vmem:[%s8010_s1 + $0x4b0] sm:$0xf] }
  0x37   :  { %2624 = vmatpush.bf16.msrb.mxu3 %v3746_v41  ;;  %v4025_v41 = vld [vmem:[%s8010_s1 + $0x5e0] sm:$0xf]  ;;  %v5022_v11 = vld [vmem:[%s8010_s1 + $0x4b4] sm:$0xf0]  ;;  %v3937_v12 = vld [vmem:[%s8010_s1 + $0x530] sm:$0xf] }
  0x38   :  { %2586 = vmatpush.bf16.msrb.mxu0 %v3546_v46  ;;  %v3825_v46 = vld [vmem:[%s8010_s1 + $0x450] sm:$0xf]  ;;  %v5038_v14 = vld [vmem:[%s8010_s1 + $0x534] sm:$0xf0]  ;;  %v3874_v19 = vor.u32 %v5022_v11, %v3873_v10  ;;  %v5004_v24 = vld [vmem:[%s8010_s1 + $0x424] sm:$0xf0] }
  0x39   :  { %2599 = vmatpush.bf16.msrb.mxu1 %v3610_v47  ;;  %v5010_v47 = vld [vmem:[%s8010_s1 + $0x454] sm:$0xf0]  ;;  %v4001_v17 = vld [vmem:[%s8010_s1 + $0x5b0] sm:$0xf]  ;;  %v3865_v25 = vld [vmem:[%s8010_s1 + $0x4a0] sm:$0xf] }
  0x3a   :  { %2612 = vmatpush.bf16.msrb.mxu2 %v3674_v49  ;;  %v5780_v49 = vpack.c.b16 %v461_v37, %v461_v37  ;;  %v3826_v54 = vor.u32 %v5010_v47, %v3825_v46  ;;  %v5054_v18 = vld [vmem:[%s8010_s1 + $0x5b4] sm:$0xf0]  ;;  %v5020_v26 = vld [vmem:[%s8010_s1 + $0x4a4] sm:$0xf0]  ;;  %v3993_v31 = vld [vmem:[%s8010_s1 + $0x5a0] sm:$0xf] }
  0x3b   :  { %2625 = vmatpush.bf16.msrb.mxu3 %v3738_v53  ;;  %v4026_v53 = vor.u32 %v5060_v42, %v4025_v41  ;;  %v4002_v29 = vor.u32 %v5054_v18, %v4001_v17  ;;  %v3866_v33 = vor.u32 %v5020_v26, %v3865_v25  ;;  %v3793_v35 = vld [vmem:[%s8010_s1 + $0x410] sm:$0xf]  ;;  %v5002_v37 = vld [vmem:[%s8010_s1 + $0x414] sm:$0xf0]  ;;  %v3785_v47 = vld [vmem:[%s8010_s1 + $0x400] sm:$0xf] }
  0x3c   :  { %2587 = vmatpush.bf16.msrb.mxu0 %v3538_v60  ;;  %v5008_v60 = vld [vmem:[%s8010_s1 + $0x444] sm:$0xf0]  ;;  %v3921_v41 = vld [vmem:[%s8010_s1 + $0x510] sm:$0xf]  ;;  %v5034_v42 = vld [vmem:[%s8010_s1 + $0x514] sm:$0xf0]  ;;  %v3794_v48 = vor.u32 %v5002_v37, %v3793_v35 }
  0x3d   :  { %2600 = vmatpush.bf16.msrb.mxu1 %v3602_v61  ;;  %v3881_v61 = vld [vmem:[%s8010_s1 + $0x4c0] sm:$0xf]  ;;  %v3818_v2 = vor.u32 %v5008_v60, %v3817_v59  ;;  %v5050_v46 = vld [vmem:[%s8010_s1 + $0x594] sm:$0xf0]  ;;  %v5000_v50 = vld [vmem:[%s8010_s1 + $0x404] sm:$0xf0] }
  0x3e   :  { %2613 = vmatpush.bf16.msrb.mxu2 %v3666_v1  ;;  %v4018_v1 = vor.u32 %v5058_v56, %v4017_v55  ;;  %v3849_v51 = vld [vmem:[%s8010_s1 + $0x480] sm:$0xf]  ;;  %v5016_v52 = vld [vmem:[%s8010_s1 + $0x484] sm:$0xf0]  ;;  %v4097_v59 = vld [vmem:[%s8010_s1 + $0x670] sm:$0xf] }
  0x3f   :  { %2626 = vmatpush.bf16.msrb.mxu3 %v3730_v5  ;;  %v3882_v5 = vor.u32 %v5024_v62, %v3881_v61  ;;  %v3913_v55 = vld [vmem:[%s8010_s1 + $0x500] sm:$0xf]  ;;  %v5078_v60 = vld [vmem:[%s8010_s1 + $0x674] sm:$0xf0]  ;;  %v4161_v62 = vld [vmem:[%s8010_s1 + $0x6f0] sm:$0xf] }
  0x40   :  { %2588 = vmatpush.bf16.msrb.mxu0 %v3530_v15  ;;  %v4010_v15 = vor.u32 %v5056_v4, %v4009_v3  ;;  %v26_v56 = vld [vmem:[%s8011_s0 + $0x20] sm:$0xff]  ;;  %v5094_v63 = vld [vmem:[%s8010_s1 + $0x6f4] sm:$0xf0]  ;;  %v4225_v0 = vld [vmem:[%s8010_s1 + $0x770] sm:$0xf]  ;;  %v4098_v11 = vor.u32 %v5078_v60, %v4097_v59 }
  0x41   :  { %2601 = vmatpush.bf16.msrb.mxu1 %v3594_v16  ;;  %v3810_v16 = vor.u32 %v5006_v9, %v3809_v8  ;;  %v3977_v3 = vld [vmem:[%s8010_s1 + $0x580] sm:$0xf]  ;;  %v5048_v4 = vld [vmem:[%s8010_s1 + $0x584] sm:$0xf0]  ;;  %v3850_v8 = vor.u32 %v5016_v52, %v3849_v51  ;;  %v463_v10 = vunpack.c.h.b16 %v26_v56 }
  0x42   :  { %2614 = vmatpush.bf16.msrb.mxu2 %v3658_v22  ;;  %v3938_v22 = vor.u32 %v5038_v14, %v3937_v12  ;;  %v4162_v12 = vor.u32 %v5094_v63, %v4161_v62  ;;  %v4289_v14 = vld [vmem:[%s8010_s1 + $0x7f0] sm:$0xf]  ;;  %v3978_v18 = vor.u32 %v5048_v4, %v3977_v3  ;;  %v5092_v26 = vld [vmem:[%s8010_s1 + $0x6e4] sm:$0xf0]  ;;  %v5086_v4 = vld [vmem:[%s8010_s1 + $0x6b4] sm:$0xf0] }
  0x43   :  { %2627 = vmatpush.bf16.msrb.mxu3 %v3722_v32  ;;  %2589 = vmatmul.bf16.vlgmr.msrb.gmra.mxu0 %v5758_v36  ;;  %v5052_v32 = vld [vmem:[%s8010_s1 + $0x5a4] sm:$0xf0]  ;;  %v4129_v3 = vld [vmem:[%s8010_s1 + $0x6b0] sm:$0xf] }
  0x44   :  { %2633 = vmatpush.bf16.msra.mxu0 %v3842_v23  ;;  %2602 = vmatmul.bf16.vlgmr.msrb.gmra.mxu1 %v5768_v43  ;;  %v3801_v23 = vld [vmem:[%s8010_s1 + $0x420] sm:$0xf]  ;;  %v5120_v62 = vld [vmem:[%s8010_s1 + $0x7c4] sm:$0xf0] }
  0x45   :  { %2646 = vmatpush.bf16.msra.mxu1 %v3906_v27  ;;  %2615 = vmatmul.bf16.vlgmr.msrb.gmra.mxu2 %v5760_v39  ;;  %v3929_v27 = vld [vmem:[%s8010_s1 + $0x520] sm:$0xf]  ;;  %v3802_v30 = vor.u32 %v5004_v24, %v3801_v23 }
  0x46   :  { %2659 = vmatpush.bf16.msra.mxu2 %v3970_v28  ;;  %2628 = vmatmul.bf16.vlgmr.msrb.gmra.mxu3 %v5780_v49  ;;  %v5036_v28 = vld [vmem:[%s8010_s1 + $0x524] sm:$0xf0]  ;;  %v4153_v23 = vld [vmem:[%s8010_s1 + $0x6e0] sm:$0xf] }
  0x47   :  { %2672 = vmatpush.bf16.msra.mxu3 %v4034_v38  ;;  %v3930_v34 = vor.u32 %v5036_v28, %v3929_v27  ;;  %v3857_v38 = vld [vmem:[%s8010_s1 + $0x490] sm:$0xf]  ;;  %v4217_v27 = vld [vmem:[%s8010_s1 + $0x760] sm:$0xf]  ;;  %v5108_v28 = vld [vmem:[%s8010_s1 + $0x764] sm:$0xf0]  ;;  %v4154_v35 = vor.u32 %v5092_v26, %v4153_v23 }
  0x48   :  { %2634 = vmatpush.bf16.msra.mxu0 %v3834_v40  ;;  %v5018_v40 = vld [vmem:[%s8010_s1 + $0x494] sm:$0xf0]  ;;  %v4218_v37 = vor.u32 %v5108_v28, %v4217_v27  ;;  %v4249_v27 = vld [vmem:[%s8010_s1 + $0x7a0] sm:$0xf]  ;;  %v5116_v28 = vld [vmem:[%s8010_s1 + $0x7a4] sm:$0xf0] }
  0x49   :  { %2647 = vmatpush.bf16.msra.mxu1 %v3898_v44  ;;  %v3994_v44 = vor.u32 %v5052_v32, %v3993_v31 }
  0x4a   :  { %2660 = vmatpush.bf16.msra.mxu2 %v3962_v45  ;;  %v3985_v45 = vld [vmem:[%s8010_s1 + $0x590] sm:$0xf] }
  0x4b   :  { %2673 = vmatpush.bf16.msra.mxu3 %v4026_v53  ;;  %v3858_v53 = vor.u32 %v5018_v40, %v3857_v38  ;;  %v3986_v61 = vor.u32 %v5050_v46, %v3985_v45  ;;  %v4081_v38 = vld [vmem:[%s8010_s1 + $0x650] sm:$0xf]  ;;  %v5074_v40 = vld [vmem:[%s8010_s1 + $0x654] sm:$0xf0] }
  0x4c   :  { %2635 = vmatpush.bf16.msra.mxu0 %v3826_v54  ;;  %v3922_v54 = vor.u32 %v5034_v42, %v3921_v41  ;;  %v4145_v41 = vld [vmem:[%s8010_s1 + $0x6d0] sm:$0xf]  ;;  %v5090_v42 = vld [vmem:[%s8010_s1 + $0x6d4] sm:$0xf0] }
  0x4d   :  { %2648 = vmatpush.bf16.msra.mxu1 %v3890_v57  ;;  %v27_v57 = vld [vmem:[%s8011_s0 + $0x28] sm:$0xff]  ;;  %v5106_v45 = vld [vmem:[%s8010_s1 + $0x754] sm:$0xf0]  ;;  %v4146_v51 = vor.u32 %v5090_v42, %v4145_v41  ;;  %v4250_v41 = vor.u32 %v5116_v28, %v4249_v27  ;;  %v4241_v42 = vld [vmem:[%s8010_s1 + $0x790] sm:$0xf] }
  0x4e   :  { %2661 = vmatpush.bf16.msra.mxu2 %v3954_v58  ;;  %v5032_v58 = vld [vmem:[%s8010_s1 + $0x504] sm:$0xf0]  ;;  %v4473_v27 = vld [vmem:[%s8010_s1 + $0x960] sm:$0xf] }
  0x4f   :  { %2674 = vmatpush.bf16.msra.mxu3 %v4018_v1  ;;  %v3786_v1 = vor.u32 %v5000_v50, %v3785_v47  ;;  %v3914_v9 = vor.u32 %v5032_v58, %v3913_v55  ;;  %v4082_v47 = vor.u32 %v5074_v40, %v4081_v38  ;;  %v5122_v50 = vld [vmem:[%s8010_s1 + $0x7d4] sm:$0xf0]  ;;  %v4137_v55 = vld [vmem:[%s8010_s1 + $0x6c0] sm:$0xf]  ;;  %v5104_v58 = vld [vmem:[%s8010_s1 + $0x744] sm:$0xf0] }
  0x50   :  { %2636 = vmatpush.bf16.msra.mxu0 %v3818_v2  ;;  %v5110_v2 = vld [vmem:[%s8010_s1 + $0x774] sm:$0xf0]  ;;  %v4177_v38 = vld [vmem:[%s8010_s1 + $0x710] sm:$0xf]  ;;  %v5172_v28 = vld [vmem:[%s8010_s1 + $0x964] sm:$0xf0] }
  0x51   :  { %2649 = vmatpush.bf16.msra.mxu1 %v3882_v5  ;;  %v462_v5 = vunpack.c.l.b16 %v26_v56  ;;  %v4226_v17 = vor.u32 %v5110_v2, %v4225_v0  ;;  %v5088_v56 = vld [vmem:[%s8010_s1 + $0x6c4] sm:$0xf0]  ;;  %v5070_v2 = vld [vmem:[%s8010_s1 + $0x634] sm:$0xf0] }
  0x52   :  { %2662 = vmatpush.bf16.msra.mxu2 %v3946_v7  ;;  %v464_v7 = vunpack.c.l.b16 %v27_v57  ;;  %v4138_v63 = vor.u32 %v5088_v56, %v4137_v55  ;;  %v5098_v40 = vld [vmem:[%s8010_s1 + $0x714] sm:$0xf0]  ;;  %v5096_v56 = vld [vmem:[%s8010_s1 + $0x704] sm:$0xf0] }
  0x53   :  { %2675 = vmatpush.bf16.msra.mxu3 %v4010_v15  ;;  %v5126_v15 = vld [vmem:[%s8010_s1 + $0x7f4] sm:$0xf0]  ;;  %v5959_v24 = vpack.c.b16 %v462_v5, %v462_v5  ;;  %v4193_v5 = vld [vmem:[%s8010_s1 + $0x730] sm:$0xf] }
  0x54   :  { %2637 = vmatpush.bf16.msra.mxu0 %v3810_v16  ;;  %v465_v16 = vunpack.c.h.b16 %v27_v57  ;;  %v5961_v25 = vpack.c.b16 %v464_v7, %v464_v7  ;;  %v4201_v57 = vld [vmem:[%s8010_s1 + $0x740] sm:$0xf]  ;;  %v5102_v7 = vld [vmem:[%s8010_s1 + $0x734] sm:$0xf0] }
  0x55   :  { %2650 = vmatpush.bf16.msra.mxu1 %v3874_v19  ;;  %v4089_v19 = vld [vmem:[%s8010_s1 + $0x660] sm:$0xf]  ;;  %v4202_v0 = vor.u32 %v5104_v58, %v4201_v57  ;;  %v29_v55 = vld [vmem:[%s8011_s0 + $0x38] sm:$0xff]  ;;  %v4353_v57 = vld [vmem:[%s8010_s1 + $0x870] sm:$0xf] }
  0x56   :  { %2663 = vmatpush.bf16.msra.mxu2 %v3938_v22  ;;  %v5076_v22 = vld [vmem:[%s8010_s1 + $0x664] sm:$0xf0]  ;;  %v5974_v31 = vpack.c.b16 %v465_v16, %v465_v16  ;;  %v5142_v58 = vld [vmem:[%s8010_s1 + $0x874] sm:$0xf0] }
  0x57   :  { %2676 = vmatpush.bf16.msra.mxu3 %v4002_v29  ;;  %v4290_v29 = vor.u32 %v5126_v15, %v4289_v14  ;;  %v4090_v32 = vor.u32 %v5076_v22, %v4089_v19  ;;  %v4194_v14 = vor.u32 %v5102_v7, %v4193_v5  ;;  %v4057_v15 = vld [vmem:[%s8010_s1 + $0x620] sm:$0xf]  ;;  %v5068_v16 = vld [vmem:[%s8010_s1 + $0x624] sm:$0xf0] }
  0x58   :  { %2638 = vmatpush.bf16.msra.mxu0 %v3802_v30  ;;  %v5972_v30 = vpack.c.b16 %v463_v10, %v463_v10  ;;  %v4257_v10 = vld [vmem:[%s8010_s1 + $0x7b0] sm:$0xf]  ;;  %v4185_v19 = vld [vmem:[%s8010_s1 + $0x720] sm:$0xf]  ;;  %v5100_v22 = vld [vmem:[%s8010_s1 + $0x724] sm:$0xf0]  ;;  %v4058_v26 = vor.u32 %v5068_v16, %v4057_v15 }
  0x59   :  { %2651 = vmatpush.bf16.msra.mxu1 %v3866_v33  ;;  %v4281_v33 = vld [vmem:[%s8010_s1 + $0x7e0] sm:$0xf] }
  0x5a   :  { %2664 = vmatpush.bf16.msra.mxu2 %v3930_v34  ;;  %v5124_v34 = vld [vmem:[%s8010_s1 + $0x7e4] sm:$0xf0] }
  0x5b   :  { %2677 = vmatpush.bf16.msra.mxu3 %v3994_v44  ;;  %v4209_v44 = vld [vmem:[%s8010_s1 + $0x750] sm:$0xf]  ;;  %v4282_v46 = vor.u32 %v5124_v34, %v4281_v33  ;;  %v5066_v34 = vld [vmem:[%s8010_s1 + $0x614] sm:$0xf0] }
  0x5c   :  { %2639 = vmatpush.bf16.msra.mxu0 %v3794_v48  ;;  %v4273_v48 = vld [vmem:[%s8010_s1 + $0x7d0] sm:$0xf]  ;;  %v4210_v52 = vor.u32 %v5106_v45, %v4209_v44  ;;  %v5114_v44 = vld [vmem:[%s8010_s1 + $0x794] sm:$0xf0]  ;;  %v4041_v45 = vld [vmem:[%s8010_s1 + $0x600] sm:$0xf] }
  0x5d   :  { %2652 = vmatpush.bf16.msra.mxu1 %v3858_v53  ;;  %v4073_v53 = vld [vmem:[%s8010_s1 + $0x640] sm:$0xf]  ;;  %v4274_v59 = vor.u32 %v5122_v50, %v4273_v48  ;;  %v4049_v33 = vld [vmem:[%s8010_s1 + $0x610] sm:$0xf]  ;;  %v5080_v50 = vld [vmem:[%s8010_s1 + $0x684] sm:$0xf0] }
  0x5e   :  { %2665 = vmatpush.bf16.msra.mxu2 %v3922_v54  ;;  %v5072_v54 = vld [vmem:[%s8010_s1 + $0x644] sm:$0xf0]  ;;  %v4105_v48 = vld [vmem:[%s8010_s1 + $0x680] sm:$0xf] }
  0x5f   :  { %2678 = vmatpush.bf16.msra.mxu3 %v3986_v61  ;;  %v4074_v60 = vor.u32 %v5072_v54, %v4073_v53  ;;  %v4265_v61 = vld [vmem:[%s8010_s1 + $0x7c0] sm:$0xf]  ;;  %v28_v54 = vld [vmem:[%s8011_s0 + $0x30] sm:$0xff]  ;;  %v4106_v5 = vor.u32 %v5080_v50, %v4105_v48 }
  0x60   :  { %2640 = vmatpush.bf16.msra.mxu0 %v3786_v1  ;;  %v4065_v1 = vld [vmem:[%s8010_s1 + $0x630] sm:$0xf]  ;;  %v4169_v53 = vld [vmem:[%s8010_s1 + $0x700] sm:$0xf] }
  0x61   :  { %2653 = vmatpush.bf16.msra.mxu1 %v3850_v8  ;;  %v4266_v8 = vor.u32 %v5120_v62, %v4265_v61  ;;  %v5158_v61 = vld [vmem:[%s8010_s1 + $0x8f4] sm:$0xf0]  ;;  %v4481_v62 = vld [vmem:[%s8010_s1 + $0x970] sm:$0xf]  ;;  %v4170_v7 = vor.u32 %v5096_v56, %v4169_v53  ;;  %v5136_v56 = vld [vmem:[%s8010_s1 + $0x844] sm:$0xf0] }
  0x62   :  { %2666 = vmatpush.bf16.msra.mxu2 %v3914_v9  ;;  %v4066_v9 = vor.u32 %v5070_v2, %v4065_v1  ;;  %v4233_v1 = vld [vmem:[%s8010_s1 + $0x780] sm:$0xf]  ;;  %v5112_v2 = vld [vmem:[%s8010_s1 + $0x784] sm:$0xf0] }
  0x63   :  { %2679 = vmatpush.bf16.msra.mxu3 %v3978_v18  ;;  %2641 = vmatmul.bf16.vlgmr.msra.gmra.mxu0 %v5959_v24  ;;  %v5084_v18 = vld [vmem:[%s8010_s1 + $0x6a4] sm:$0xf0]  ;;  %v4234_v16 = vor.u32 %v5112_v2, %v4233_v1 }
  0x64   :  { %2685 = vmatpush.bf16.msrb.mxu0 %v4098_v11  ;;  %2654 = vmatmul.bf16.vlgmr.msra.gmra.mxu1 %v5972_v30  ;;  %v5118_v11 = vld [vmem:[%s8010_s1 + $0x7b4] sm:$0xf0] }
  0x65   :  { %2698 = vmatpush.bf16.msrb.mxu1 %v4162_v12  ;;  %2667 = vmatmul.bf16.vlgmr.msra.gmra.mxu2 %v5961_v25  ;;  %v4130_v12 = vor.u32 %v5086_v4, %v4129_v3  ;;  %v4258_v23 = vor.u32 %v5118_v11, %v4257_v10  ;;  %v466_v3 = vunpack.c.l.b16 %v28_v54  ;;  %v468_v4 = vunpack.c.l.b16 %v29_v55  ;;  %v4545_v11 = vld [vmem:[%s8010_s1 + $0x9f0] sm:$0xf] }
  0x66   :  { %2711 = vmatpush.bf16.msrb.mxu2 %v4226_v17  ;;  %2680 = vmatmul.bf16.vlgmr.msra.gmra.mxu3 %v5974_v31  ;;  %v4121_v17 = vld [vmem:[%s8010_s1 + $0x6a0] sm:$0xf] }
  0x67   :  { %2724 = vmatpush.bf16.msrb.mxu3 %v4290_v29  ;;  %v4122_v29 = vor.u32 %v5084_v18, %v4121_v17  ;;  %v4345_v17 = vld [vmem:[%s8010_s1 + $0x860] sm:$0xf]  ;;  %v5140_v18 = vld [vmem:[%s8010_s1 + $0x864] sm:$0xf0] }
  0x68   :  { %2686 = vmatpush.bf16.msrb.mxu0 %v4090_v32  ;;  %v4186_v32 = vor.u32 %v5100_v22, %v4185_v19  ;;  %v4409_v19 = vld [vmem:[%s8010_s1 + $0x8e0] sm:$0xf]  ;;  %v6169_v22 = vpack.c.b16 %v466_v3, %v466_v3  ;;  %v4321_v3 = vld [vmem:[%s8010_s1 + $0x830] sm:$0xf] }
  0x69   :  { %2699 = vmatpush.bf16.msrb.mxu1 %v4154_v35  ;;  %v4113_v35 = vld [vmem:[%s8010_s1 + $0x690] sm:$0xf] }
  0x6a   :  { %2712 = vmatpush.bf16.msrb.mxu2 %v4218_v37  ;;  %v5082_v37 = vld [vmem:[%s8010_s1 + $0x694] sm:$0xf0] }
  0x6b   :  { %2725 = vmatpush.bf16.msrb.mxu3 %v4282_v46  ;;  %v4050_v46 = vor.u32 %v5066_v34, %v4049_v33  ;;  %v4346_v34 = vor.u32 %v5140_v18, %v4345_v17  ;;  %v4313_v17 = vld [vmem:[%s8010_s1 + $0x820] sm:$0xf]  ;;  %v5132_v18 = vld [vmem:[%s8010_s1 + $0x824] sm:$0xf0] }
  0x6c   :  { %2687 = vmatpush.bf16.msrb.mxu0 %v4082_v47  ;;  %v5064_v47 = vld [vmem:[%s8010_s1 + $0x604] sm:$0xf0] }
  0x6d   :  { %2700 = vmatpush.bf16.msrb.mxu1 %v4146_v51  ;;  %v4114_v51 = vor.u32 %v5082_v37, %v4113_v35  ;;  %v4537_v35 = vld [vmem:[%s8010_s1 + $0x9e0] sm:$0xf]  ;;  %v5188_v37 = vld [vmem:[%s8010_s1 + $0x9e4] sm:$0xf0] }
  0x6e   :  { %2713 = vmatpush.bf16.msrb.mxu2 %v4210_v52  ;;  %v4178_v52 = vor.u32 %v5098_v40, %v4177_v38  ;;  %v4474_v40 = vor.u32 %v5172_v28, %v4473_v27  ;;  %v4538_v48 = vor.u32 %v5188_v37, %v4537_v35  ;;  %v4441_v27 = vld [vmem:[%s8010_s1 + $0x920] sm:$0xf]  ;;  %v5164_v28 = vld [vmem:[%s8010_s1 + $0x924] sm:$0xf0] }
  0x6f   :  { %2726 = vmatpush.bf16.msrb.mxu3 %v4274_v59  ;;  %v4242_v59 = vor.u32 %v5114_v44, %v4241_v42  ;;  %v5138_v42 = vld [vmem:[%s8010_s1 + $0x854] sm:$0xf0]  ;;  %v4401_v44 = vld [vmem:[%s8010_s1 + $0x8d0] sm:$0xf]  ;;  %v4505_v35 = vld [vmem:[%s8010_s1 + $0x9a0] sm:$0xf] }
  0x70   :  { %2688 = vmatpush.bf16.msrb.mxu0 %v4074_v60  ;;  %v4417_v60 = vld [vmem:[%s8010_s1 + $0x8f0] sm:$0xf]  ;;  %v5180_v37 = vld [vmem:[%s8010_s1 + $0x9a4] sm:$0xf0] }
  0x71   :  { %2701 = vmatpush.bf16.msrb.mxu1 %v4138_v63  ;;  %v4042_v63 = vor.u32 %v5064_v47, %v4041_v45  ;;  %v4418_v10 = vor.u32 %v5158_v61, %v4417_v60  ;;  %v5154_v45 = vld [vmem:[%s8010_s1 + $0x8d4] sm:$0xf0]  ;;  %v5168_v60 = vld [vmem:[%s8010_s1 + $0x944] sm:$0xf0] }
  0x72   :  { %2714 = vmatpush.bf16.msrb.mxu2 %v4202_v0  ;;  %v5174_v0 = vld [vmem:[%s8010_s1 + $0x974] sm:$0xf0]  ;;  %v4402_v53 = vor.u32 %v5154_v45, %v4401_v44  ;;  %v4369_v44 = vld [vmem:[%s8010_s1 + $0x890] sm:$0xf] }
  0x73   :  { %2727 = vmatpush.bf16.msrb.mxu3 %v4266_v8  ;;  %v467_v8 = vunpack.c.h.b16 %v28_v54  ;;  %v4482_v15 = vor.u32 %v5174_v0, %v4481_v62  ;;  %v5170_v47 = vld [vmem:[%s8010_s1 + $0x954] sm:$0xf0]  ;;  %v5184_v0 = vld [vmem:[%s8010_s1 + $0x9c4] sm:$0xf0] }
  0x74   :  { %2689 = vmatpush.bf16.msrb.mxu0 %v4066_v9  ;;  %v4354_v9 = vor.u32 %v5142_v58, %v4353_v57  ;;  %v4393_v57 = vld [vmem:[%s8010_s1 + $0x8c0] sm:$0xf]  ;;  %v5152_v58 = vld [vmem:[%s8010_s1 + $0x8c4] sm:$0xf0]  ;;  %v5146_v45 = vld [vmem:[%s8010_s1 + $0x894] sm:$0xf0] }
  0x75   :  { %2702 = vmatpush.bf16.msrb.mxu1 %v4130_v12  ;;  %v5190_v12 = vld [vmem:[%s8010_s1 + $0x9f4] sm:$0xf0]  ;;  %v4394_v1 = vor.u32 %v5152_v58, %v4393_v57  ;;  %v4370_v57 = vor.u32 %v5146_v45, %v4369_v44 }
  0x76   :  { %2715 = vmatpush.bf16.msrb.mxu2 %v4194_v14  ;;  %v469_v14 = vunpack.c.h.b16 %v29_v55  ;;  %v4329_v55 = vld [vmem:[%s8010_s1 + $0x840] sm:$0xf] }
  0x77   :  { %2728 = vmatpush.bf16.msrb.mxu3 %v4258_v23  ;;  %v6171_v23 = vpack.c.b16 %v468_v4, %v468_v4  ;;  %v4330_v62 = vor.u32 %v5136_v56, %v4329_v55  ;;  %v5134_v4 = vld [vmem:[%s8010_s1 + $0x834] sm:$0xf0]  ;;  %v4361_v55 = vld [vmem:[%s8010_s1 + $0x880] sm:$0xf]  ;;  %v5144_v56 = vld [vmem:[%s8010_s1 + $0x884] sm:$0xf0] }
  0x78   :  { %2690 = vmatpush.bf16.msrb.mxu0 %v4058_v26  ;;  %v5156_v26 = vld [vmem:[%s8010_s1 + $0x8e4] sm:$0xf0]  ;;  %v6184_v33 = vpack.c.b16 %v469_v14, %v469_v14  ;;  %v5182_v14 = vld [vmem:[%s8010_s1 + $0x9b4] sm:$0xf0] }
  0x79   :  { %2703 = vmatpush.bf16.msrb.mxu1 %v4122_v29  ;;  %v4546_v29 = vor.u32 %v5190_v12, %v4545_v11  ;;  %v4410_v38 = vor.u32 %v5156_v26, %v4409_v19  ;;  %v4322_v11 = vor.u32 %v5134_v4, %v4321_v3  ;;  %v4513_v12 = vld [vmem:[%s8010_s1 + $0x9b0] sm:$0xf]  ;;  %v4377_v19 = vld [vmem:[%s8010_s1 + $0x8a0] sm:$0xf]  ;;  %v5148_v26 = vld [vmem:[%s8010_s1 + $0x8a4] sm:$0xf0] }
  0x7a   :  { %2716 = vmatpush.bf16.msrb.mxu2 %v4186_v32  ;;  %v6182_v32 = vpack.c.b16 %v467_v8, %v467_v8  ;;  %v4449_v8 = vld [vmem:[%s8010_s1 + $0x930] sm:$0xf]  ;;  %v5222_v3 = vld [vmem:[%s8010_s1 + $0xaf4] sm:$0xf0] }
  0x7b   :  { %2729 = vmatpush.bf16.msrb.mxu3 %v4250_v41  ;;  %v4337_v41 = vld [vmem:[%s8010_s1 + $0x850] sm:$0xf] }
  0x7c   :  { %2691 = vmatpush.bf16.msrb.mxu0 %v4050_v46  ;;  %v4465_v46 = vld [vmem:[%s8010_s1 + $0x950] sm:$0xf]  ;;  %v4338_v50 = vor.u32 %v5138_v42, %v4337_v41  ;;  %v5130_v42 = vld [vmem:[%s8010_s1 + $0x814] sm:$0xf0] }
  0x7d   :  { %2704 = vmatpush.bf16.msrb.mxu1 %v4114_v51  ;;  %v4529_v51 = vld [vmem:[%s8010_s1 + $0x9d0] sm:$0xf]  ;;  %v4466_v54 = vor.u32 %v5170_v47, %v4465_v46  ;;  %v5162_v47 = vld [vmem:[%s8010_s1 + $0x914] sm:$0xf0] }
  0x7e   :  { %2717 = vmatpush.bf16.msrb.mxu2 %v4178_v52  ;;  %v5186_v52 = vld [vmem:[%s8010_s1 + $0x9d4] sm:$0xf0]  ;;  %v4305_v41 = vld [vmem:[%s8010_s1 + $0x810] sm:$0xf] }
  0x7f   :  { %2730 = vmatpush.bf16.msrb.mxu3 %v4242_v59  ;;  %v4457_v59 = vld [vmem:[%s8010_s1 + $0x940] sm:$0xf]  ;;  %v4530_v61 = vor.u32 %v5186_v52, %v4529_v51  ;;  %v4433_v46 = vld [vmem:[%s8010_s1 + $0x910] sm:$0xf]  ;;  %v5178_v51 = vld [vmem:[%s8010_s1 + $0x994] sm:$0xf0] }
  0x80   :  { %2692 = vmatpush.bf16.msrb.mxu0 %v4042_v63  ;;  %v4521_v63 = vld [vmem:[%s8010_s1 + $0x9c0] sm:$0xf]  ;;  %v4458_v2 = vor.u32 %v5168_v60, %v4457_v59  ;;  %v4434_v58 = vor.u32 %v5162_v47, %v4433_v46  ;;  %v4737_v4 = vld [vmem:[%s8010_s1 + $0xb70] sm:$0xf] }
  0x81   :  { %2705 = vmatpush.bf16.msrb.mxu1 %v4106_v5  ;;  %v4385_v5 = vld [vmem:[%s8010_s1 + $0x8b0] sm:$0xf]  ;;  %v4297_v52 = vld [vmem:[%s8010_s1 + $0x800] sm:$0xf] }
  0x82   :  { %2718 = vmatpush.bf16.msrb.mxu2 %v4170_v7  ;;  %v5150_v7 = vld [vmem:[%s8010_s1 + $0x8b4] sm:$0xf0]  ;;  %v4425_v59 = vld [vmem:[%s8010_s1 + $0x900] sm:$0xf] }
  0x83   :  { %2731 = vmatpush.bf16.msrb.mxu3 %v4234_v16  ;;  %2693 = vmatmul.bf16.vlgmr.msrb.gmra.mxu0 %v6169_v22  ;;  %v30_v60 = vld [vmem:[%s8011_s0 + $0x40] sm:$0xff] }
  0x84   :  { %2737 = vmatpush.bf16.msra.mxu0 %v4354_v9  ;;  %2706 = vmatmul.bf16.vlgmr.msrb.gmra.mxu1 %v6182_v32  ;;  %v5166_v9 = vld [vmem:[%s8010_s1 + $0x934] sm:$0xf0] }
  0x85   :  { %2750 = vmatpush.bf16.msra.mxu1 %v4418_v10  ;;  %2719 = vmatmul.bf16.vlgmr.msrb.gmra.mxu2 %v6171_v23  ;;  %v4522_v10 = vor.u32 %v5184_v0, %v4521_v63  ;;  %v4450_v16 = vor.u32 %v5166_v9, %v4449_v8  ;;  %v4609_v63 = vld [vmem:[%s8010_s1 + $0xa70] sm:$0xf]  ;;  %v5206_v0 = vld [vmem:[%s8010_s1 + $0xa74] sm:$0xf0]  ;;  %v4489_v8 = vld [vmem:[%s8010_s1 + $0x980] sm:$0xf] }
  0x86   :  { %2763 = vmatpush.bf16.msra.mxu2 %v4482_v15  ;;  %2732 = vmatmul.bf16.vlgmr.msrb.gmra.mxu3 %v6184_v33  ;;  %v4386_v15 = vor.u32 %v5150_v7, %v4385_v5  ;;  %v5238_v7 = vld [vmem:[%s8010_s1 + $0xb74] sm:$0xf0]  ;;  %v5176_v9 = vld [vmem:[%s8010_s1 + $0x984] sm:$0xf0] }
  0x87   :  { %2776 = vmatpush.bf16.msra.mxu3 %v4546_v29  ;;  %v4514_v29 = vor.u32 %v5182_v14, %v4513_v12  ;;  %v4362_v12 = vor.u32 %v5144_v56, %v4361_v55  ;;  %v4657_v55 = vld [vmem:[%s8010_s1 + $0xad0] sm:$0xf]  ;;  %v5218_v56 = vld [vmem:[%s8010_s1 + $0xad4] sm:$0xf0] }
  0x88   :  { %2738 = vmatpush.bf16.msra.mxu0 %v4346_v34  ;;  %v4314_v34 = vor.u32 %v5132_v18, %v4313_v17  ;;  %v4801_v18 = vld [vmem:[%s8010_s1 + $0xbf0] sm:$0xf] }
  0x89   :  { %2751 = vmatpush.bf16.msra.mxu1 %v4410_v38  ;;  %v4378_v38 = vor.u32 %v5148_v26, %v4377_v19  ;;  %v5254_v19 = vld [vmem:[%s8010_s1 + $0xbf4] sm:$0xf0] }
  0x8a   :  { %2764 = vmatpush.bf16.msra.mxu2 %v4474_v40  ;;  %v4442_v40 = vor.u32 %v5164_v28, %v4441_v27  ;;  %v4738_v27 = vor.u32 %v5238_v7, %v4737_v4  ;;  %v4490_v28 = vor.u32 %v5176_v9, %v4489_v8  ;;  %v4802_v44 = vor.u32 %v5254_v19, %v4801_v18  ;;  %v5216_v4 = vld [vmem:[%s8010_s1 + $0xac4] sm:$0xf0]  ;;  %v435_v18 = vld [vmem:[%s8012_s2] sm:$0x3]  ;;  %v5214_v19 = vld [vmem:[%s8010_s1 + $0xab4] sm:$0xf0] }
  0x8b   :  { %2777 = vmatpush.bf16.msra.mxu3 %v4538_v48  ;;  %v4506_v48 = vor.u32 %v5180_v37, %v4505_v35  ;;  %v4665_v35 = vld [vmem:[%s8010_s1 + $0xae0] sm:$0xf]  ;;  %v5232_v7 = vld [vmem:[%s8010_s1 + $0xb44] sm:$0xf0] }
  0x8c   :  { %2739 = vmatpush.bf16.msra.mxu0 %v4338_v50  ;;  %v4497_v50 = vld [vmem:[%s8010_s1 + $0x990] sm:$0xf] }
  0x8d   :  { %2752 = vmatpush.bf16.msra.mxu1 %v4402_v53  ;;  %v4306_v53 = vor.u32 %v5130_v42, %v4305_v41  ;;  %v4729_v41 = vld [vmem:[%s8010_s1 + $0xb60] sm:$0xf]  ;;  %v5236_v42 = vld [vmem:[%s8010_s1 + $0xb64] sm:$0xf0] }
  0x8e   :  { %2765 = vmatpush.bf16.msra.mxu2 %v4466_v54  ;;  %v5128_v54 = vld [vmem:[%s8010_s1 + $0x804] sm:$0xf0] }
  0x8f   :  { %2778 = vmatpush.bf16.msra.mxu3 %v4530_v61  ;;  %v31_v61 = vld [vmem:[%s8011_s0 + $0x48] sm:$0xff]  ;;  %v4298_v5 = vor.u32 %v5128_v54, %v4297_v52  ;;  %v4730_v52 = vor.u32 %v5236_v42, %v4729_v41  ;;  %v5202_v54 = vld [vmem:[%s8010_s1 + $0xa54] sm:$0xf0] }
  0x90   :  { %2740 = vmatpush.bf16.msra.mxu0 %v4330_v62  ;;  %v5160_v62 = vld [vmem:[%s8010_s1 + $0x904] sm:$0xf0]  ;;  %v473_v26 = vunpack.c.h.b16 %v31_v61 }
  0x91   :  { %2753 = vmatpush.bf16.msra.mxu1 %v4394_v1  ;;  %v4498_v1 = vor.u32 %v5178_v51, %v4497_v50  ;;  %v4426_v14 = vor.u32 %v5160_v62, %v4425_v59  ;;  %v5252_v50 = vld [vmem:[%s8010_s1 + $0xbe4] sm:$0xf0]  ;;  %v5250_v62 = vld [vmem:[%s8010_s1 + $0xbd4] sm:$0xf0] }
  0x92   :  { %2766 = vmatpush.bf16.msra.mxu2 %v4458_v2  ;;  %v4673_v2 = vld [vmem:[%s8010_s1 + $0xaf0] sm:$0xf]  ;;  %v6394_v46 = vpack.c.b16 %v473_v26, %v473_v26 }
  0x93   :  { %2779 = vmatpush.bf16.msra.mxu3 %v4522_v10  ;;  %v470_v10 = vunpack.c.l.b16 %v30_v60  ;;  %v4674_v17 = vor.u32 %v5222_v3, %v4673_v2  ;;  %v5200_v2 = vld [vmem:[%s8010_s1 + $0xa44] sm:$0xf0]  ;;  %v4649_v3 = vld [vmem:[%s8010_s1 + $0xac0] sm:$0xf]  ;;  %v4705_v26 = vld [vmem:[%s8010_s1 + $0xb30] sm:$0xf] }
  0x94   :  { %2741 = vmatpush.bf16.msra.mxu0 %v4322_v11  ;;  %v472_v11 = vunpack.c.l.b16 %v31_v61  ;;  %v4785_v61 = vld [vmem:[%s8010_s1 + $0xbd0] sm:$0xf] }
  0x95   :  { %2754 = vmatpush.bf16.msra.mxu1 %v4386_v15  ;;  %v471_v15 = vunpack.c.h.b16 %v30_v60  ;;  %v6379_v37 = vpack.c.b16 %v470_v10, %v470_v10  ;;  %v4786_v8 = vor.u32 %v5250_v62, %v4785_v61  ;;  %v4777_v10 = vld [vmem:[%s8010_s1 + $0xbc0] sm:$0xf]  ;;  %v4561_v62 = vld [vmem:[%s8010_s1 + $0xa10] sm:$0xf] }
  0x96   :  { %2767 = vmatpush.bf16.msra.mxu2 %v4450_v16  ;;  %v4610_v16 = vor.u32 %v5206_v0, %v4609_v63  ;;  %v4658_v63 = vor.u32 %v5218_v56, %v4657_v55  ;;  %v4761_v56 = vld [vmem:[%s8010_s1 + $0xba0] sm:$0xf] }
  0x97   :  { %2780 = vmatpush.bf16.msra.mxu3 %v4514_v29  ;;  %v4601_v29 = vld [vmem:[%s8010_s1 + $0xa60] sm:$0xf]  ;;  %v6392_v45 = vpack.c.b16 %v471_v15, %v471_v15 }
  0x98   :  { %2742 = vmatpush.bf16.msra.mxu0 %v4314_v34  ;;  %v5204_v34 = vld [vmem:[%s8010_s1 + $0xa64] sm:$0xf0] }
  0x99   :  { %2755 = vmatpush.bf16.msra.mxu1 %v4378_v38  ;;  %v6381_v38 = vpack.c.b16 %v472_v11, %v472_v11  ;;  %v4602_v47 = vor.u32 %v5204_v34, %v4601_v29  ;;  %v5248_v11 = vld [vmem:[%s8010_s1 + $0xbc4] sm:$0xf0]  ;;  %v4769_v34 = vld [vmem:[%s8010_s1 + $0xbb0] sm:$0xf] }
  0x9a   :  { %2768 = vmatpush.bf16.msra.mxu2 %v4442_v40  ;;  %v5220_v40 = vld [vmem:[%s8010_s1 + $0xae4] sm:$0xf0] }
  0x9b   :  { %2781 = vmatpush.bf16.msra.mxu3 %v4506_v48  ;;  %v4793_v48 = vld [vmem:[%s8010_s1 + $0xbe0] sm:$0xf]  ;;  %v4666_v51 = vor.u32 %v5220_v40, %v4665_v35  ;;  %v5246_v35 = vld [vmem:[%s8010_s1 + $0xbb4] sm:$0xf0]  ;;  %v437_v40 = vperm.slane %v435_v18, 0 }
  0x9c   :  { %2743 = vmatpush.bf16.msra.mxu0 %v4306_v53  ;;  %v4593_v53 = vld [vmem:[%s8010_s1 + $0xa50] sm:$0xf]  ;;  %v4794_v59 = vor.u32 %v5252_v50, %v4793_v48  ;;  %v4633_v48 = vld [vmem:[%s8010_s1 + $0xaa0] sm:$0xf]  ;;  %v5212_v50 = vld [vmem:[%s8010_s1 + $0xaa4] sm:$0xf0] }
  0x9d   :  { %2756 = vmatpush.bf16.msra.mxu1 %v4370_v57  ;;  %v4721_v57 = vld [vmem:[%s8010_s1 + $0xb50] sm:$0xf]  ;;  %v4594_v60 = vor.u32 %v5202_v54, %v4593_v53  ;;  %v4770_v53 = vor.u32 %v5246_v35, %v4769_v34  ;;  %v5270_v34 = vld [vmem:[%s8010_s1 + $0xc74] sm:$0xf0] }
  0x9e   :  { %2769 = vmatpush.bf16.msra.mxu2 %v4434_v58  ;;  %v5234_v58 = vld [vmem:[%s8010_s1 + $0xb54] sm:$0xf0] }
  0x9f   :  { %2782 = vmatpush.bf16.msra.mxu3 %v4498_v1  ;;  %v4722_v0 = vor.u32 %v5234_v58, %v4721_v57  ;;  %v4585_v1 = vld [vmem:[%s8010_s1 + $0xa40] sm:$0xf]  ;;  %v5244_v57 = vld [vmem:[%s8010_s1 + $0xba4] sm:$0xf0] }
  0xa0   :  { %2744 = vmatpush.bf16.msra.mxu0 %v4298_v5  ;;  %v4713_v5 = vld [vmem:[%s8010_s1 + $0xb40] sm:$0xf]  ;;  %v4586_v9 = vor.u32 %v5200_v2, %v4585_v1  ;;  %v5210_v1 = vld [vmem:[%s8010_s1 + $0xa94] sm:$0xf0]  ;;  %v4689_v2 = vld [vmem:[%s8010_s1 + $0xb10] sm:$0xf] }
  0xa1   :  { %2757 = vmatpush.bf16.msra.mxu1 %v4362_v12  ;;  %v4577_v12 = vld [vmem:[%s8010_s1 + $0xa30] sm:$0xf]  ;;  %v4714_v15 = vor.u32 %v5232_v7, %v4713_v5  ;;  %v4762_v7 = vor.u32 %v5244_v57, %v4761_v56 }
  0xa2   :  { %2770 = vmatpush.bf16.msra.mxu2 %v4426_v14  ;;  %v4650_v14 = vor.u32 %v5216_v4, %v4649_v3  ;;  %v5226_v3 = vld [vmem:[%s8010_s1 + $0xb14] sm:$0xf0] }
  0xa3   :  { %2783 = vmatpush.bf16.msra.mxu3 %v4490_v28  ;;  %2745 = vmatmul.bf16.vlgmr.msra.gmra.mxu0 %v6379_v37  ;;  %v4778_v28 = vor.u32 %v5248_v11, %v4777_v10  ;;  %v4553_v10 = vld [vmem:[%s8010_s1 + $0xa00] sm:$0xf]  ;;  %v4690_v18 = vor.u32 %v5226_v3, %v4689_v2  ;;  %v5268_v3 = vld [vmem:[%s8010_s1 + $0xc64] sm:$0xf0] }
  0xa4   :  { %2789 = vmatpush.bf16.msrb.mxu0 %v4610_v16  ;;  %2758 = vmatmul.bf16.vlgmr.msra.gmra.mxu1 %v6392_v45  ;;  %v5198_v16 = vld [vmem:[%s8010_s1 + $0xa34] sm:$0xf0]  ;;  %v2538_v54 = vpop.f32.mrf.mxu0  ;;  %v4857_v2 = vld [vmem:[%s8010_s1 + $0xc60] sm:$0xf] }
  0xa5   :  { %2802 = vmatpush.bf16.msrb.mxu1 %v4674_v17  ;;  %2771 = vmatmul.bf16.vlgmr.msra.gmra.mxu2 %v6381_v38  ;;  %v4641_v17 = vld [vmem:[%s8010_s1 + $0xab0] sm:$0xf]  ;;  %v4578_v29 = vor.u32 %v5198_v16, %v4577_v12  ;;  %v2539_v58 = vadd.f32 %v2538_v54, %v437_v40  ;;  %v5208_v16 = vld [vmem:[%s8010_s1 + $0xa84] sm:$0xf0]  ;;  %v4885_v40 = vld [vmem:[%s8010_s1 + $0x74] sm:$0xf] }
  0xa6   :  { %2815 = vmatpush.bf16.msrb.mxu2 %v4738_v27  ;;  %2784 = vmatmul.bf16.vlgmr.msra.gmra.mxu3 %v6394_v46  ;;  %v5230_v27 = vld [vmem:[%s8010_s1 + $0xb34] sm:$0xf0]  ;;  %v4642_v41 = vor.u32 %v5214_v19, %v4641_v17  ;;  %v4681_v19 = vld [vmem:[%s8010_s1 + $0xb00] sm:$0xf] }
  0xa7   :  { %2828 = vmatpush.bf16.msrb.mxu3 %v4802_v44  ;;  %v4706_v42 = vor.u32 %v5230_v27, %v4705_v26  ;;  %v4569_v44 = vld [vmem:[%s8010_s1 + $0xa20] sm:$0xf]  ;;  %v32_v26 = vld [vmem:[%s8011_s0 + $0x50] sm:$0xff]  ;;  %v33_v27 = vld [vmem:[%s8011_s0 + $0x58] sm:$0xff] }
  0xa8   :  { %2790 = vmatpush.bf16.msrb.mxu0 %v4602_v47  ;;  %v5196_v47 = vld [vmem:[%s8010_s1 + $0xa24] sm:$0xf0]  ;;  %v6525_v5 = vpop.f32.mrf.mxu2  ;;  %v475_v57 = vunpack.c.h.b16 %v32_v26 }
  0xa9   :  { %2803 = vmatpush.bf16.msrb.mxu1 %v4666_v51  ;;  %v4697_v51 = vld [vmem:[%s8010_s1 + $0xb20] sm:$0xf]  ;;  %v4570_v55 = vor.u32 %v5196_v47, %v4569_v44  ;;  %v6536_v11 = vpop.f32.mrf.mxu3 }
  0xaa   :  { %2816 = vmatpush.bf16.msrb.mxu2 %v4730_v52  ;;  %v5228_v52 = vld [vmem:[%s8010_s1 + $0xb24] sm:$0xf0] }
  0xab   :  { %2829 = vmatpush.bf16.msrb.mxu3 %v4794_v59  ;;  %v2551_v59 = vpop.f32.mrf.mxu1  ;;  %v4698_v61 = vor.u32 %v5228_v52, %v4697_v51  ;;  %v5240_v51 = vld [vmem:[%s8010_s1 + $0xb84] sm:$0xf0]  ;;  %v474_v52 = vunpack.c.l.b16 %v32_v26 }
  0xac   :  { %2791 = vmatpush.bf16.msrb.mxu0 %v4594_v60  ;;  %v4634_v60 = vor.u32 %v5212_v50, %v4633_v48  ;;  %v6523_v4 = vadd.f32 %v2551_v59, %v2539_v58  ;;  %v2540_v44 = vpop.f32.mrf.mxu0  ;;  %v3395_v48 = vld [vmem:[%s8010_s1 + $0xf8] sm:$0xf0]  ;;  %v4745_v50 = vld [vmem:[%s8010_s1 + $0xb80] sm:$0xf] }
  0xad   :  { %2804 = vmatpush.bf16.msrb.mxu1 %v4658_v63  ;;  %v5194_v63 = vld [vmem:[%s8010_s1 + $0xa14] sm:$0xf0] }
  0xae   :  { %2817 = vmatpush.bf16.msrb.mxu2 %v4722_v0  ;;  %v4625_v0 = vld [vmem:[%s8010_s1 + $0xa90] sm:$0xf]  ;;  %v4562_v12 = vor.u32 %v5194_v63, %v4561_v62  ;;  %v477_v62 = vunpack.c.h.b16 %v33_v27  ;;  %v2565_v26 = vadd.f32 %v6525_v5, %v6523_v4  ;;  %v5266_v4 = vld [vmem:[%s8010_s1 + $0xc54] sm:$0xf0]  ;;  %v4881_v5 = vld [vmem:[%s8010_s1 + $0x54] sm:$0xf] }
  0xaf   :  { %2830 = vmatpush.bf16.msrb.mxu3 %v4786_v8  ;;  %v4753_v8 = vld [vmem:[%s8010_s1 + $0xb90] sm:$0xf]  ;;  %v4626_v17 = vor.u32 %v5210_v1, %v4625_v0  ;;  %v4746_v1 = vor.u32 %v5240_v51, %v4745_v50  ;;  %v4913_v50 = vld [vmem:[%s8010_s1 + $0x154] sm:$0xf]  ;;  %v3443_v51 = vld [vmem:[%s8010_s1 + $0x158] sm:$0xf0] }
  0xb0   :  { %2792 = vmatpush.bf16.msrb.mxu0 %v4586_v9  ;;  %v5242_v9 = vld [vmem:[%s8010_s1 + $0xb94] sm:$0xf0]  ;;  %v2566_v63 = vpop.f32.mrf.mxu2 }
  0xb1   :  { %2805 = vmatpush.bf16.msrb.mxu1 %v4650_v14  ;;  %v5192_v14 = vld [vmem:[%s8010_s1 + $0xa04] sm:$0xf0]  ;;  %v4754_v35 = vor.u32 %v5242_v9, %v4753_v8  ;;  %v2579_v8 = vpop.f32.mrf.mxu3  ;;  %v6598_v9 = vpack.c.b16 %v474_v52, %v474_v52  ;;  %v3435_v63 = vld [vmem:[%s8010_s1 + $0x148] sm:$0xf0] }
  0xb2   :  { %2818 = vmatpush.bf16.msrb.mxu2 %v4714_v15  ;;  %v4617_v15 = vld [vmem:[%s8010_s1 + $0xa80] sm:$0xf]  ;;  %v4554_v47 = vor.u32 %v5192_v14, %v4553_v10  ;;  %v4899_v14 = vld [vmem:[%s8010_s1 + $0xe4] sm:$0xf]  ;;  %v4877_v8 = vld [vmem:[%s8010_s1 + $0x34] sm:$0xf] }
  0xb3   :  { %2831 = vmatpush.bf16.msrb.mxu3 %v4778_v28  ;;  %v5224_v28 = vld [vmem:[%s8010_s1 + $0xb04] sm:$0xf0]  ;;  %v2553_v54 = vpop.f32.mrf.mxu1 }
  0xb4   :  { %2793 = vmatpush.bf16.msrb.mxu0 %v4578_v29  ;;  %v4865_v29 = vld [vmem:[%s8010_s1 + $0xc70] sm:$0xf]  ;;  %v4682_v56 = vor.u32 %v5224_v28, %v4681_v19  ;;  %v4858_v19 = vor.u32 %v5268_v3, %v4857_v2  ;;  %v3451_v28 = vld [vmem:[%s8010_s1 + $0x168] sm:$0xf0]  ;;  %v4841_v54 = vld [vmem:[%s8010_s1 + $0xc40] sm:$0xf] }
  0xb5   :  { %2806 = vmatpush.bf16.msrb.mxu1 %v4642_v41  ;;  %v3331_v41 = vld [vmem:[%s8010_s1 + $0x78] sm:$0xf0]  ;;  %v4866_v58 = vor.u32 %v5270_v34, %v4865_v29  ;;  %v4833_v3 = vld [vmem:[%s8010_s1 + $0xc30] sm:$0xf] }
  0xb6   :  { %2819 = vmatpush.bf16.msrb.mxu2 %v4706_v42  ;;  %v4901_v42 = vld [vmem:[%s8010_s1 + $0xf4] sm:$0xf]  ;;  %v3334_v59 = vor.u32 %v4885_v40, %v3331_v41  ;;  %v3315_v40 = vld [vmem:[%s8010_s1 + $0x58] sm:$0xf0] }
  0xb7   :  { %2832 = vmatpush.bf16.msrb.mxu3 %v4770_v53  ;;  %v476_v53 = vunpack.c.l.b16 %v33_v27  ;;  %v3398_v0 = vor.u32 %v4901_v42, %v3395_v48  ;;  %v4915_v27 = vld [vmem:[%s8010_s1 + $0x164] sm:$0xf]  ;;  %v4897_v41 = vld [vmem:[%s8010_s1 + $0xd4] sm:$0xf]  ;;  %v3379_v42 = vld [vmem:[%s8010_s1 + $0xd8] sm:$0xf0]  ;;  %v3318_v52 = vor.u32 %v4881_v5, %v3315_v40 }
  0xb8   :  { %2794 = vmatpush.bf16.msrb.mxu0 %v4570_v55  ;;  %v4618_v55 = vor.u32 %v5208_v16, %v4617_v15  ;;  %v3387_v15 = vld [vmem:[%s8010_s1 + $0xe8] sm:$0xf0]  ;;  %v3454_v44 = vor.u32 %v4915_v27, %v3451_v28  ;;  %v4909_v28 = vld [vmem:[%s8010_s1 + $0x134] sm:$0xf]  ;;  %v5260_v5 = vld [vmem:[%s8010_s1 + $0xc24] sm:$0xf0] }
  0xb9   :  { %2807 = vmatpush.bf16.msrb.mxu1 %v4634_v60  ;;  %v4917_v60 = vld [vmem:[%s8010_s1 + $0x174] sm:$0xf]  ;;  %v6600_v10 = vpack.c.b16 %v476_v53, %v476_v53  ;;  %v3390_v34 = vor.u32 %v4899_v14, %v3387_v15  ;;  %v3382_v53 = vor.u32 %v4897_v41, %v3379_v42  ;;  %v3299_v14 = vld [vmem:[%s8010_s1 + $0x38] sm:$0xf0]  ;;  %v4875_v40 = vld [vmem:[%s8010_s1 + $0x24] sm:$0xf] }
  0xba   :  { %2820 = vmatpush.bf16.msrb.mxu2 %v4698_v61  ;;  %v3459_v61 = vld [vmem:[%s8010_s1 + $0x178] sm:$0xf0]  ;;  %v4893_v15 = vld [vmem:[%s8010_s1 + $0xb4] sm:$0xf]  ;;  %v3291_v41 = vld [vmem:[%s8010_s1 + $0x28] sm:$0xf0] }
  0xbb   :  { %2833 = vmatpush.bf16.msrb.mxu3 %v4762_v7  ;;  %v4883_v7 = vld [vmem:[%s8010_s1 + $0x64] sm:$0xf]  ;;  %v3462_v16 = vor.u32 %v4917_v60, %v3459_v61 }
  0xbc   :  { %2795 = vmatpush.bf16.msrb.mxu0 %v4562_v12  ;;  %v3323_v12 = vld [vmem:[%s8010_s1 + $0x68] sm:$0xf0]  ;;  %v4891_v42 = vld [vmem:[%s8010_s1 + $0xa4] sm:$0xf] }
  0xbd   :  { %2808 = vmatpush.bf16.msrb.mxu1 %v4626_v17  ;;  %v6611_v17 = vpack.c.b16 %v475_v57, %v475_v57  ;;  %v3326_v29 = vor.u32 %v4883_v7, %v3323_v12  ;;  %v4895_v57 = vld [vmem:[%s8010_s1 + $0xc4] sm:$0xf]  ;;  %v5262_v7 = vld [vmem:[%s8010_s1 + $0xc34] sm:$0xf0] }
  0xbe   :  { %2821 = vmatpush.bf16.msrb.mxu2 %v4690_v18  ;;  %v6613_v18 = vpack.c.b16 %v477_v62, %v477_v62  ;;  %v4911_v62 = vld [vmem:[%s8010_s1 + $0x144] sm:$0xf]  ;;  %v4834_v27 = vor.u32 %v5262_v7, %v4833_v3  ;;  %v3411_v3 = vld [vmem:[%s8010_s1 + $0x118] sm:$0xf0] }
  0xbf   :  { %2834 = vmatpush.bf16.msrb.mxu3 %v4754_v35  ;;  %v4849_v35 = vld [vmem:[%s8010_s1 + $0xc50] sm:$0xf] }
  0xc0   :  { %2796 = vmatpush.bf16.msrb.mxu0 %v4554_v47  ;;  %v2578_v47 = vadd.f32 %v6536_v11, %v2565_v26  ;;  %v4850_v48 = vor.u32 %v5266_v4, %v4849_v35  ;;  %v5264_v11 = vld [vmem:[%s8010_s1 + $0xc44] sm:$0xf0]  ;;  %v2590_v60 = vpop.f32.mrf.mxu0  ;;  %v3438_v26 = vor.u32 %v4911_v62, %v3435_v63  ;;  %v4825_v4 = vld [vmem:[%s8010_s1 + $0xc20] sm:$0xf]  ;;  %v3283_v62 = vld [vmem:[%s8010_s1 + $0x18] sm:$0xf0] }
  0xc1   :  { %2809 = vmatpush.bf16.msrb.mxu1 %v4618_v55  ;;  %v4879_v55 = vld [vmem:[%s8010_s1 + $0x44] sm:$0xf]  ;;  %v4842_v61 = vor.u32 %v5264_v11, %v4841_v54  ;;  %v2603_v12 = vpop.f32.mrf.mxu1  ;;  %v3419_v54 = vld [vmem:[%s8010_s1 + $0x128] sm:$0xf0]  ;;  %v3294_v11 = vor.u32 %v4875_v40, %v3291_v41  ;;  %v4889_v63 = vld [vmem:[%s8010_s1 + $0x94] sm:$0xf] }
  0xc2   :  { %2822 = vmatpush.bf16.msrb.mxu2 %v4682_v56  ;;  %v3307_v56 = vld [vmem:[%s8010_s1 + $0x48] sm:$0xf0]  ;;  %v3587_v40 = vld [vmem:[%s8010_s1 + $0x278] sm:$0xf0]  ;;  %v4965_v41 = vld [vmem:[%s8010_s1 + $0x2f4] sm:$0xf] }
  0xc3   :  { %2835 = vmatpush.bf16.msrb.mxu3 %v4746_v1  ;;  %2797 = vmatmul.bf16.vlgmr.msrb.gmra.mxu0 %v6598_v9  ;;  %v3310_v1 = vor.u32 %v4879_v55, %v3307_v56 }
  0xc4   :  { %2841 = vmatpush.bf16.msra.mxu0 %v4866_v58  ;;  %2810 = vmatmul.bf16.vlgmr.msrb.gmra.mxu1 %v6611_v17  ;;  %v3371_v58 = vld [vmem:[%s8010_s1 + $0xc8] sm:$0xf0] }
  0xc5   :  { %2854 = vmatpush.bf16.msra.mxu1 %v3334_v59  ;;  %2823 = vmatmul.bf16.vlgmr.msrb.gmra.mxu2 %v6600_v10  ;;  %v3446_v59 = vor.u32 %v4913_v50, %v3443_v51  ;;  %v3374_v2 = vor.u32 %v4895_v57, %v3371_v58  ;;  %v4817_v57 = vld [vmem:[%s8010_s1 + $0xc10] sm:$0xf]  ;;  %v5258_v58 = vld [vmem:[%s8010_s1 + $0xc14] sm:$0xf0] }
  0xc6   :  { %2867 = vmatpush.bf16.msra.mxu2 %v3398_v0  ;;  %2836 = vmatmul.bf16.vlgmr.msrb.gmra.mxu3 %v6613_v18  ;;  %v2591_v0 = vadd.f32 %v2590_v60, %v2578_v47  ;;  %v4818_v7 = vor.u32 %v5258_v58, %v4817_v57  ;;  %v4931_v57 = vld [vmem:[%s8010_s1 + $0x1e4] sm:$0xf] }
  0xc7   :  { %2880 = vmatpush.bf16.msra.mxu3 %v3462_v16  ;;  %v3363_v16 = vld [vmem:[%s8010_s1 + $0xb8] sm:$0xf0] }
  0xc8   :  { %2842 = vmatpush.bf16.msra.mxu0 %v4858_v19  ;;  %v2604_v19 = vadd.f32 %v2603_v12, %v2591_v0  ;;  %v3366_v35 = vor.u32 %v4893_v15, %v3363_v16  ;;  %v2616_v47 = vpop.f32.mrf.mxu2  ;;  %v2592_v51 = vpop.f32.mrf.mxu0  ;;  %v3347_v0 = vld [vmem:[%s8010_s1 + $0x98] sm:$0xf0]  ;;  %v5256_v12 = vld [vmem:[%s8010_s1 + $0xc04] sm:$0xf0] }
  0xc9   :  { %2855 = vmatpush.bf16.msra.mxu1 %v3326_v29  ;;  %v3427_v29 = vld [vmem:[%s8010_s1 + $0x138] sm:$0xf0]  ;;  %v2629_v56 = vpop.f32.mrf.mxu3  ;;  %v2605_v60 = vpop.f32.mrf.mxu1  ;;  %v3350_v16 = vor.u32 %v4889_v63, %v3347_v0  ;;  %v3579_v63 = vld [vmem:[%s8010_s1 + $0x268] sm:$0xf0] }
  0xca   :  { %2868 = vmatpush.bf16.msra.mxu2 %v3390_v34  ;;  %v3302_v34 = vor.u32 %v4877_v8, %v3299_v14  ;;  %v2617_v50 = vadd.f32 %v2616_v47, %v2604_v19  ;;  %v4809_v8 = vld [vmem:[%s8010_s1 + $0xc00] sm:$0xf]  ;;  %v4871_v14 = vld [vmem:[%s8010_s1 + $0x4] sm:$0xf]  ;;  %v3275_v19 = vld [vmem:[%s8010_s1 + $0x8] sm:$0xf0] }
  0xcb   :  { %2881 = vmatpush.bf16.msra.mxu3 %v3454_v44  ;;  %v3355_v44 = vld [vmem:[%s8010_s1 + $0xa8] sm:$0xf0]  ;;  %v4903_v47 = vld [vmem:[%s8010_s1 + $0x104] sm:$0xf]  ;;  %v3278_v51 = vor.u32 %v4871_v14, %v3275_v19  ;;  %v3507_v19 = vld [vmem:[%s8010_s1 + $0x1d8] sm:$0xf0] }
  0xcc   :  { %2843 = vmatpush.bf16.msra.mxu0 %v4850_v48  ;;  %v3430_v48 = vor.u32 %v4909_v28, %v3427_v29  ;;  %v3358_v55 = vor.u32 %v4891_v42, %v3355_v44  ;;  %v3339_v28 = vld [vmem:[%s8010_s1 + $0x88] sm:$0xf0]  ;;  %v4933_v29 = vld [vmem:[%s8010_s1 + $0x1f4] sm:$0xf]  ;;  %v4810_v42 = vor.u32 %v5256_v12, %v4809_v8  ;;  %v3651_v44 = vld [vmem:[%s8010_s1 + $0x2f8] sm:$0xf0] }
  0xcd   :  { %2856 = vmatpush.bf16.msra.mxu1 %v3318_v52  ;;  %v4826_v52 = vor.u32 %v5260_v5, %v4825_v4  ;;  %v4949_v5 = vld [vmem:[%s8010_s1 + $0x274] sm:$0xf]  ;;  %v3654_v58 = vor.u32 %v4965_v41, %v3651_v44  ;;  %v3515_v60 = vld [vmem:[%s8010_s1 + $0x1e8] sm:$0xf0]  ;;  %v4927_v41 = vld [vmem:[%s8010_s1 + $0x1c4] sm:$0xf] }
  0xce   :  { %2869 = vmatpush.bf16.msra.mxu2 %v3382_v53  ;;  %v4907_v53 = vld [vmem:[%s8010_s1 + $0x124] sm:$0xf]  ;;  %v3707_v8 = vld [vmem:[%s8010_s1 + $0x368] sm:$0xf0]  ;;  %v3518_v12 = vor.u32 %v4931_v57, %v3515_v60 }
  0xcf   :  { %2882 = vmatpush.bf16.msra.mxu3 %v3446_v59  ;;  %v4873_v59 = vld [vmem:[%s8010_s1 + $0x14] sm:$0xf]  ;;  %v3499_v44 = vld [vmem:[%s8010_s1 + $0x1c8] sm:$0xf0] }
  0xd0   :  { %2844 = vmatpush.bf16.msra.mxu0 %v4842_v61  ;;  %v6733_v61 = vadd.f32 %v2629_v56, %v2617_v50  ;;  %v3286_v15 = vor.u32 %v4873_v59, %v3283_v62  ;;  %v3590_v56 = vor.u32 %v4949_v5, %v3587_v40  ;;  %v4947_v62 = vld [vmem:[%s8010_s1 + $0x264] sm:$0xf] }
  0xd1   :  { %2857 = vmatpush.bf16.msra.mxu1 %v3310_v1  ;;  %v3422_v1 = vor.u32 %v4907_v53, %v3419_v54  ;;  %v4981_v53 = vld [vmem:[%s8010_s1 + $0x374] sm:$0xf]  ;;  %v3715_v54 = vld [vmem:[%s8010_s1 + $0x378] sm:$0xf0]  ;;  %v3582_v14 = vor.u32 %v4947_v62, %v3579_v63 }
  0xd2   :  { %2870 = vmatpush.bf16.msra.mxu2 %v3374_v2  ;;  %v4905_v2 = vld [vmem:[%s8010_s1 + $0x114] sm:$0xf] }
  0xd3   :  { %2883 = vmatpush.bf16.msra.mxu3 %v3438_v26  ;;  %v4887_v26 = vld [vmem:[%s8010_s1 + $0x84] sm:$0xf]  ;;  %v3414_v4 = vor.u32 %v4905_v2, %v3411_v3  ;;  %v3643_v3 = vld [vmem:[%s8010_s1 + $0x2e8] sm:$0xf0]  ;;  %v4957_v63 = vld [vmem:[%s8010_s1 + $0x2b4] sm:$0xf] }
  0xd4   :  { %2845 = vmatpush.bf16.msra.mxu0 %v4834_v27  ;;  %v34_v27 = vld [vmem:[%s8011_s0 + $0x60] sm:$0xf]  ;;  %v4963_v2 = vld [vmem:[%s8010_s1 + $0x2e4] sm:$0xf] }
  0xd5   :  { %2858 = vmatpush.bf16.msra.mxu1 %v3302_v34  ;;  %v3523_v34 = vld [vmem:[%s8010_s1 + $0x1f8] sm:$0xf0]  ;;  %v478_v50 = vunpack.c.l.b16 %v34_v27 }
  0xd6   :  { %2871 = vmatpush.bf16.msra.mxu2 %v3366_v35  ;;  %v2618_v35 = vpop.f32.mrf.mxu2  ;;  %v3571_v27 = vld [vmem:[%s8010_s1 + $0x258] sm:$0xf0] }
  0xd7   :  { %2884 = vmatpush.bf16.msra.mxu3 %v3430_v48  ;;  %v3403_v48 = vld [vmem:[%s8010_s1 + $0x108] sm:$0xf0]  ;;  %v6813_v0 = vpack.c.b16 %v478_v50, %v478_v50  ;;  %v4977_v35 = vld [vmem:[%s8010_s1 + $0x354] sm:$0xf] }
  0xd8   :  { %2846 = vmatpush.bf16.msra.mxu0 %v4826_v52  ;;  %v3342_v52 = vor.u32 %v4887_v26, %v3339_v28  ;;  %v3406_v59 = vor.u32 %v4903_v47, %v3403_v48  ;;  %v4945_v26 = vld [vmem:[%s8010_s1 + $0x254] sm:$0xf]  ;;  %v4959_v48 = vld [vmem:[%s8010_s1 + $0x2c4] sm:$0xf]  ;;  %v3627_v50 = vld [vmem:[%s8010_s1 + $0x2c8] sm:$0xf0] }
  0xd9   :  { %2859 = vmatpush.bf16.msra.mxu1 %v3294_v11  ;;  %v2631_v11 = vpop.f32.mrf.mxu3  ;;  %v3574_v40 = vor.u32 %v4945_v26, %v3571_v27  ;;  %v3630_v57 = vor.u32 %v4959_v48, %v3627_v50  ;;  %v3547_v26 = vld [vmem:[%s8010_s1 + $0x228] sm:$0xf0]  ;;  %v3475_v48 = vld [vmem:[%s8010_s1 + $0x198] sm:$0xf0]  ;;  %v4937_v50 = vld [vmem:[%s8010_s1 + $0x214] sm:$0xf] }
  0xda   :  { %2872 = vmatpush.bf16.msra.mxu2 %v3358_v55  ;;  %v3526_v55 = vor.u32 %v4933_v29, %v3523_v34  ;;  %v4961_v29 = vld [vmem:[%s8010_s1 + $0x2d4] sm:$0xf]  ;;  %v3635_v34 = vld [vmem:[%s8010_s1 + $0x2d8] sm:$0xf0] }
  0xdb   :  { %2885 = vmatpush.bf16.msra.mxu3 %v3422_v1  ;;  %v3718_v1 = vor.u32 %v4981_v53, %v3715_v54  ;;  %v3691_v53 = vld [vmem:[%s8010_s1 + $0x348] sm:$0xf0]  ;;  %v3502_v54 = vor.u32 %v4927_v41, %v3499_v44 }
  0xdc   :  { %2847 = vmatpush.bf16.msra.mxu0 %v4818_v7  ;;  %v4979_v7 = vld [vmem:[%s8010_s1 + $0x364] sm:$0xf] }
  0xdd   :  { %2860 = vmatpush.bf16.msra.mxu1 %v3286_v15  ;;  %v4929_v15 = vld [vmem:[%s8010_s1 + $0x1d4] sm:$0xf]  ;;  %v3710_v28 = vor.u32 %v4979_v7, %v3707_v8 }
  0xde   :  { %2873 = vmatpush.bf16.msra.mxu2 %v3350_v16  ;;  %v3646_v16 = vor.u32 %v4963_v2, %v3643_v3  ;;  %v3510_v5 = vor.u32 %v4929_v15, %v3507_v19  ;;  %v4973_v2 = vld [vmem:[%s8010_s1 + $0x334] sm:$0xf]  ;;  %v3683_v3 = vld [vmem:[%s8010_s1 + $0x338] sm:$0xf0]  ;;  %v4939_v19 = vld [vmem:[%s8010_s1 + $0x224] sm:$0xf] }
  0xdf   :  { %2886 = vmatpush.bf16.msra.mxu3 %v3414_v4  ;;  %v3699_v4 = vld [vmem:[%s8010_s1 + $0x358] sm:$0xf0]  ;;  %v3550_v44 = vor.u32 %v4939_v19, %v3547_v26 }
  0xe0   :  { %2848 = vmatpush.bf16.msra.mxu0 %v4810_v42  ;;  %v3638_v42 = vor.u32 %v4961_v29, %v3635_v34  ;;  %v3702_v47 = vor.u32 %v4977_v35, %v3699_v4  ;;  %v4955_v29 = vld [vmem:[%s8010_s1 + $0x2a4] sm:$0xf]  ;;  %v3611_v34 = vld [vmem:[%s8010_s1 + $0x2a8] sm:$0xf0] }
  0xe1   :  { %2861 = vmatpush.bf16.msra.mxu1 %v3278_v51  ;;  %v2642_v51 = vpop.f32.mrf.mxu0  ;;  %v4971_v4 = vld [vmem:[%s8010_s1 + $0x324] sm:$0xf] }
  0xe2   :  { %2874 = vmatpush.bf16.msra.mxu2 %v3342_v52  ;;  %v4975_v52 = vld [vmem:[%s8010_s1 + $0x344] sm:$0xf] }
  0xe3   :  { %2887 = vmatpush.bf16.msra.mxu3 %v3406_v59  ;;  %2849 = vmatmul.bf16.vlgmr.msra.gmra.mxu0 %v6813_v0  ;;  %v4941_v59 = vld [vmem:[%s8010_s1 + $0x234] sm:$0xf]  ;;  %v3694_v62 = vor.u32 %v4975_v52, %v3691_v53 }
  0xe4   :  { %2893 = vmatpush.bf16.msrb.mxu0 %v3526_v55  ;;  %2862 = vmatmul.bf16.vlgmr.msra.gmra.mxu1 %v5607_v20  ;;  %v3563_v20 = vld [vmem:[%s8010_s1 + $0x248] sm:$0xf0]  ;;  %v2655_v55 = vpop.f32.mrf.mxu1  ;;  %v4953_v53 = vld [vmem:[%s8010_s1 + $0x294] sm:$0xf] }
  0xe5   :  { %2906 = vmatpush.bf16.msrb.mxu1 %v3590_v56  ;;  %2875 = vmatmul.bf16.vlgmr.msra.gmra.mxu2 %v5610_v21  ;;  %v4943_v21 = vld [vmem:[%s8010_s1 + $0x244] sm:$0xf]  ;;  %v4925_v56 = vld [vmem:[%s8010_s1 + $0x1b4] sm:$0xf] }
  0xe6   :  { %2919 = vmatpush.bf16.msrb.mxu2 %v3654_v58  ;;  %2888 = vmatmul.bf16.vlgmr.msra.gmra.mxu3 %v5578_v6  ;;  %v2643_v6 = vadd.f32 %v2642_v51, %v6733_v61  ;;  %v3566_v11 = vor.u32 %v4943_v21, %v3563_v20  ;;  %v3491_v58 = vld [vmem:[%s8010_s1 + $0x1b8] sm:$0xf0]  ;;  %v4921_v21 = vld [vmem:[%s8010_s1 + $0x194] sm:$0xf] }
  0xe7   :  { %2932 = vmatpush.bf16.msrb.mxu3 %v3718_v1  ;;  %v3555_v61 = vld [vmem:[%s8010_s1 + $0x238] sm:$0xf0]  ;;  %v3494_v7 = vor.u32 %v4925_v56, %v3491_v58  ;;  %v3467_v58 = vld [vmem:[%s8010_s1 + $0x188] sm:$0xf0] }
  0xe8   :  { %2894 = vmatpush.bf16.msrb.mxu0 %v3518_v12  ;;  %v2656_v60 = vadd.f32 %v2655_v55, %v2643_v6  ;;  %v3619_v1 = vld [vmem:[%s8010_s1 + $0x2b8] sm:$0xf0]  ;;  %v3558_v8 = vor.u32 %v4941_v59, %v3555_v61  ;;  %v4923_v12 = vld [vmem:[%s8010_s1 + $0x1a4] sm:$0xf]  ;;  %v2668_v15 = vpop.f32.mrf.mxu2  ;;  %v3478_v55 = vor.u32 %v4921_v21, %v3475_v48 }
  0xe9   :  { %2907 = vmatpush.bf16.msrb.mxu1 %v3582_v14  ;;  %v3622_v14 = vor.u32 %v4957_v63, %v3619_v1  ;;  %v2681_v35 = vpop.f32.mrf.mxu3  ;;  %v3539_v51 = vld [vmem:[%s8010_s1 + $0x218] sm:$0xf0]  ;;  %v4935_v59 = vld [vmem:[%s8010_s1 + $0x204] sm:$0xf]  ;;  %v3595_v63 = vld [vmem:[%s8010_s1 + $0x288] sm:$0xf0] }
  0xea   :  { %2920 = vmatpush.bf16.msrb.mxu2 %v3646_v16  ;;  %v3483_v16 = vld [vmem:[%s8010_s1 + $0x1a8] sm:$0xf0]  ;;  %v2669_v27 = vadd.f32 %v2668_v15, %v2656_v60  ;;  %v3603_v6 = vld [vmem:[%s8010_s1 + $0x298] sm:$0xf0]  ;;  %v3542_v56 = vor.u32 %v4937_v50, %v3539_v51  ;;  %v5011_v21 = vld [vmem:[%s8010_s1 + $0x464] sm:$0xf] }
  0xeb   :  { %2933 = vmatpush.bf16.msrb.mxu3 %v3710_v28  ;;  %v3686_v28 = vor.u32 %v4973_v2, %v3683_v3  ;;  %v3606_v61 = vor.u32 %v4953_v53, %v3603_v6  ;;  %v3531_v60 = vld [vmem:[%s8010_s1 + $0x208] sm:$0xf0]  ;;  %v4997_v3 = vld [vmem:[%s8010_s1 + $0x3f4] sm:$0xf]  ;;  %v3907_v15 = vld [vmem:[%s8010_s1 + $0x4f8] sm:$0xf0] }
  0xec   :  { %2895 = vmatpush.bf16.msrb.mxu0 %v3510_v5  ;;  %v3675_v5 = vld [vmem:[%s8010_s1 + $0x328] sm:$0xf0]  ;;  %v6928_v41 = vadd.f32 %v2681_v35, %v2669_v27  ;;  %v2657_v20 = vpop.f32.mrf.mxu1  ;;  %v3534_v26 = vor.u32 %v4935_v59, %v3531_v60  ;;  %v4967_v27 = vld [vmem:[%s8010_s1 + $0x304] sm:$0xf]  ;;  %v5045_v35 = vld [vmem:[%s8010_s1 + $0x574] sm:$0xf] }
  0xed   :  { %2908 = vmatpush.bf16.msrb.mxu1 %v3574_v40  ;;  %v2644_v40 = vpop.f32.mrf.mxu0  ;;  %v3678_v52 = vor.u32 %v4971_v4, %v3675_v5  ;;  %v3971_v4 = vld [vmem:[%s8010_s1 + $0x578] sm:$0xf0]  ;;  %v5027_v48 = vld [vmem:[%s8010_s1 + $0x4e4] sm:$0xf]  ;;  %v3899_v50 = vld [vmem:[%s8010_s1 + $0x4e8] sm:$0xf0] }
  0xee   :  { %2921 = vmatpush.bf16.msrb.mxu2 %v3638_v42  ;;  %v3486_v42 = vor.u32 %v4923_v12, %v3483_v16  ;;  %v3843_v12 = vld [vmem:[%s8010_s1 + $0x478] sm:$0xf0]  ;;  %v3974_v51 = vor.u32 %v5045_v35, %v3971_v4  ;;  %v5043_v53 = vld [vmem:[%s8010_s1 + $0x564] sm:$0xf]  ;;  %v3963_v6 = vld [vmem:[%s8010_s1 + $0x568] sm:$0xf0] }
  0xef   :  { %2934 = vmatpush.bf16.msrb.mxu3 %v3702_v47  ;;  %v3614_v47 = vor.u32 %v4955_v29, %v3611_v34  ;;  %v5025_v59 = vld [vmem:[%s8010_s1 + $0x4d4] sm:$0xf]  ;;  %v3966_v60 = vor.u32 %v5043_v53, %v3963_v6  ;;  %v3747_v35 = vld [vmem:[%s8010_s1 + $0x3b8] sm:$0xf0]  ;;  %v5003_v53 = vld [vmem:[%s8010_s1 + $0x424] sm:$0xf] }
  0xf0   :  { %2896 = vmatpush.bf16.msrb.mxu0 %v3502_v54  ;;  %v4969_v54 = vld [vmem:[%s8010_s1 + $0x314] sm:$0xf]  ;;  %v2670_v1 = vpop.f32.mrf.mxu2 }
  0xf1   :  { %2909 = vmatpush.bf16.msrb.mxu1 %v3566_v11  ;;  %v3667_v11 = vld [vmem:[%s8010_s1 + $0x318] sm:$0xf0]  ;;  %v2683_v16 = vpop.f32.mrf.mxu3  ;;  %v5005_v4 = vld [vmem:[%s8010_s1 + $0x434] sm:$0xf] }
  0xf2   :  { %2922 = vmatpush.bf16.msrb.mxu2 %v3630_v57  ;;  %v4919_v57 = vld [vmem:[%s8010_s1 + $0x184] sm:$0xf]  ;;  %v3670_v2 = vor.u32 %v4969_v54, %v3667_v11  ;;  %v3902_v11 = vor.u32 %v5027_v48, %v3899_v50 }
  0xf3   :  { %2935 = vmatpush.bf16.msrb.mxu3 %v3694_v62  ;;  %v4951_v62 = vld [vmem:[%s8010_s1 + $0x284] sm:$0xf]  ;;  %v3470_v19 = vor.u32 %v4919_v57, %v3467_v58  ;;  %v5009_v57 = vld [vmem:[%s8010_s1 + $0x454] sm:$0xf]  ;;  %v3827_v58 = vld [vmem:[%s8010_s1 + $0x458] sm:$0xf0] }
  0xf4   :  { %2897 = vmatpush.bf16.msrb.mxu0 %v3494_v7  ;;  %v3779_v7 = vld [vmem:[%s8010_s1 + $0x3f8] sm:$0xf0]  ;;  %v3598_v29 = vor.u32 %v4951_v62, %v3595_v63  ;;  %v3830_v1 = vor.u32 %v5009_v57, %v3827_v58 }
  0xf5   :  { %2910 = vmatpush.bf16.msrb.mxu1 %v3558_v8  ;;  %v5013_v8 = vld [vmem:[%s8010_s1 + $0x474] sm:$0xf]  ;;  %v3782_v34 = vor.u32 %v4997_v3, %v3779_v7  ;;  %v3955_v63 = vld [vmem:[%s8010_s1 + $0x558] sm:$0xf0]  ;;  %v5007_v3 = vld [vmem:[%s8010_s1 + $0x444] sm:$0xf] }
  0xf6   :  { %2923 = vmatpush.bf16.msrb.mxu2 %v3622_v14  ;;  %v5029_v14 = vld [vmem:[%s8010_s1 + $0x4f4] sm:$0xf]  ;;  %v3846_v5 = vor.u32 %v5013_v8, %v3843_v12  ;;  %v3819_v7 = vld [vmem:[%s8010_s1 + $0x448] sm:$0xf0]  ;;  %v5023_v8 = vld [vmem:[%s8010_s1 + $0x4c4] sm:$0xf] }
  0xf7   :  { %2936 = vmatpush.bf16.msrb.mxu3 %v3686_v28  ;;  %v3659_v28 = vld [vmem:[%s8010_s1 + $0x308] sm:$0xf0]  ;;  %v3910_v40 = vor.u32 %v5029_v14, %v3907_v15 }
  0xf8   :  { %2898 = vmatpush.bf16.msrb.mxu0 %v3486_v42  ;;  %v4995_v42 = vld [vmem:[%s8010_s1 + $0x3e4] sm:$0xf]  ;;  %v3662_v20 = vor.u32 %v4967_v27, %v3659_v28  ;;  %v3883_v12 = vld [vmem:[%s8010_s1 + $0x4c8] sm:$0xf0]  ;;  %v3822_v27 = vor.u32 %v5007_v3, %v3819_v7  ;;  %v3795_v7 = vld [vmem:[%s8010_s1 + $0x418] sm:$0xf0] }
  0xf9   :  { %2911 = vmatpush.bf16.msrb.mxu1 %v3550_v44  ;;  %v3771_v44 = vld [vmem:[%s8010_s1 + $0x3e8] sm:$0xf0]  ;;  %v3886_v28 = vor.u32 %v5023_v8, %v3883_v12  ;;  %v5017_v8 = vld [vmem:[%s8010_s1 + $0x494] sm:$0xf]  ;;  %v3859_v12 = vld [vmem:[%s8010_s1 + $0x498] sm:$0xf0] }
  0xfa   :  { %2924 = vmatpush.bf16.msrb.mxu2 %v3614_v47  ;;  %v3835_v47 = vld [vmem:[%s8010_s1 + $0x468] sm:$0xf0] }
  0xfb   :  { %2937 = vmatpush.bf16.msrb.mxu3 %v3678_v52  ;;  %v3774_v52 = vor.u32 %v4995_v42, %v3771_v44  ;;  %v3838_v54 = vor.u32 %v5011_v21, %v3835_v47  ;;  %v3939_v47 = vld [vmem:[%s8010_s1 + $0x538] sm:$0xf0] }
  0xfc   :  { %2899 = vmatpush.bf16.msrb.mxu0 %v3478_v55  ;;  %v4993_v55 = vld [vmem:[%s8010_s1 + $0x3d4] sm:$0xf] }
  0xfd   :  { %2912 = vmatpush.bf16.msrb.mxu1 %v3542_v56  ;;  %v3763_v56 = vld [vmem:[%s8010_s1 + $0x3d8] sm:$0xf0] }
  0xfe   :  { %2925 = vmatpush.bf16.msrb.mxu2 %v3606_v61  ;;  %v3891_v61 = vld [vmem:[%s8010_s1 + $0x4d8] sm:$0xf0]  ;;  %v3766_v62 = vor.u32 %v4993_v55, %v3763_v56  ;;  %v3867_v55 = vld [vmem:[%s8010_s1 + $0x4a8] sm:$0xf0] }
  0xff   :  { %2938 = vmatpush.bf16.msrb.mxu3 %v3670_v2  ;;  %v3894_v2 = vor.u32 %v5025_v59, %v3891_v61  ;;  %v5035_v61 = vld [vmem:[%s8010_s1 + $0x524] sm:$0xf] }
 0x100   :  { %2900 = vmatpush.bf16.msrb.mxu0 %v3470_v19  ;;  %v2694_v15 = vpop.f32.mrf.mxu0  ;;  %v3947_v19 = vld [vmem:[%s8010_s1 + $0x548] sm:$0xf0] }
 0x101   :  { %2913 = vmatpush.bf16.msrb.mxu1 %v3534_v26  ;;  %v2695_v26 = vadd.f32 %v2694_v15, %v6928_v41  ;;  %v5021_v41 = vld [vmem:[%s8010_s1 + $0x4b4] sm:$0xf] }
 0x102   :  { %2926 = vmatpush.bf16.msrb.mxu2 %v3598_v29  ;;  %v2707_v29 = vpop.f32.mrf.mxu1  ;;  %v5033_v15 = vld [vmem:[%s8010_s1 + $0x514] sm:$0xf] }
 0x103   :  { %2939 = vmatpush.bf16.msrb.mxu3 %v3662_v20  ;;  %2901 = vmatmul.bf16.vlgmr.msrb.gmra.mxu0 %v5592_v13  ;;  %v5041_v13 = vld [vmem:[%s8010_s1 + $0x554] sm:$0xf]  ;;  %v2708_v42 = vadd.f32 %v2707_v29, %v2695_v26  ;;  %v3723_v26 = vld [vmem:[%s8010_s1 + $0x388] sm:$0xf0]  ;;  %v4999_v29 = vld [vmem:[%s8010_s1 + $0x404] sm:$0xf] }
 0x104   :  { %2945 = vmatpush.bf16.msra.mxu0 %v3782_v34  ;;  %2914 = vmatmul.bf16.vlgmr.msrb.gmra.mxu1 %v5758_v36  ;;  %v3755_v36 = vld [vmem:[%s8010_s1 + $0x3c8] sm:$0xf0]  ;;  %v3958_v14 = vor.u32 %v5041_v13, %v3955_v63  ;;  %v4989_v34 = vld [vmem:[%s8010_s1 + $0x3b4] sm:$0xf] }
 0x105   :  { %2958 = vmatpush.bf16.msra.mxu1 %v3846_v5  ;;  %2927 = vmatmul.bf16.vlgmr.msrb.gmra.mxu2 %v5768_v43  ;;  %v4991_v43 = vld [vmem:[%s8010_s1 + $0x3c4] sm:$0xf]  ;;  %v3811_v5 = vld [vmem:[%s8010_s1 + $0x438] sm:$0xf0]  ;;  %v3750_v21 = vor.u32 %v4989_v34, %v3747_v35  ;;  %v5037_v20 = vld [vmem:[%s8010_s1 + $0x534] sm:$0xf] }
 0x106   :  { %2971 = vmatpush.bf16.msra.mxu2 %v3910_v40  ;;  %2940 = vmatmul.bf16.vlgmr.msrb.gmra.mxu3 %v5760_v39  ;;  %v3758_v16 = vor.u32 %v4991_v43, %v3755_v36  ;;  %v5039_v39 = vld [vmem:[%s8010_s1 + $0x544] sm:$0xf]  ;;  %v3875_v40 = vld [vmem:[%s8010_s1 + $0x4b8] sm:$0xf0]  ;;  %v3814_v48 = vor.u32 %v5005_v4, %v3811_v5  ;;  %v3942_v57 = vor.u32 %v5037_v20, %v3939_v47  ;;  %v5001_v36 = vld [vmem:[%s8010_s1 + $0x414] sm:$0xf] }
 0x107   :  { %2984 = vmatpush.bf16.msra.mxu3 %v3974_v51  ;;  %v3950_v44 = vor.u32 %v5039_v39, %v3947_v19  ;;  %v3878_v50 = vor.u32 %v5021_v41, %v3875_v40  ;;  %v4987_v51 = vld [vmem:[%s8010_s1 + $0x3a4] sm:$0xf]  ;;  %v3731_v43 = vld [vmem:[%s8010_s1 + $0x398] sm:$0xf0]  ;;  %v3787_v34 = vld [vmem:[%s8010_s1 + $0x408] sm:$0xf0] }
 0x108   :  { %2946 = vmatpush.bf16.msra.mxu0 %v3774_v52  ;;  %v3739_v52 = vld [vmem:[%s8010_s1 + $0x3a8] sm:$0xf0]  ;;  %v2720_v6 = vpop.f32.mrf.mxu2  ;;  %v3923_v39 = vld [vmem:[%s8010_s1 + $0x518] sm:$0xf0]  ;;  %v4983_v19 = vld [vmem:[%s8010_s1 + $0x384] sm:$0xf] }
 0x109   :  { %2959 = vmatpush.bf16.msra.mxu1 %v3838_v54  ;;  %v3803_v54 = vld [vmem:[%s8010_s1 + $0x428] sm:$0xf0]  ;;  %v2721_v56 = vadd.f32 %v2720_v6, %v2708_v42  ;;  %v2733_v58 = vpop.f32.mrf.mxu3  ;;  %v3742_v59 = vor.u32 %v4987_v51, %v3739_v52  ;;  %v5015_v35 = vld [vmem:[%s8010_s1 + $0x484] sm:$0xf]  ;;  %v5061_v5 = vld [vmem:[%s8010_s1 + $0x5f4] sm:$0xf]  ;;  %v3926_v42 = vor.u32 %v5033_v15, %v3923_v39  ;;  %v3726_v47 = vor.u32 %v4983_v19, %v3723_v26 }
 0x10a   :  { %2972 = vmatpush.bf16.msra.mxu2 %v3902_v11  ;;  %v5019_v11 = vld [vmem:[%s8010_s1 + $0x4a4] sm:$0xf]  ;;  %v3806_v63 = vor.u32 %v5003_v53, %v3803_v54  ;;  %v2709_v3 = vpop.f32.mrf.mxu1  ;;  %v3851_v4 = vld [vmem:[%s8010_s1 + $0x488] sm:$0xf0]  ;;  %v4035_v41 = vld [vmem:[%s8010_s1 + $0x5f8] sm:$0xf0]  ;;  %v3790_v53 = vor.u32 %v4999_v29, %v3787_v34 }
 0x10b   :  { %2985 = vmatpush.bf16.msra.mxu3 %v3966_v60  ;;  %v3931_v60 = vld [vmem:[%s8010_s1 + $0x528] sm:$0xf0]  ;;  %v7127_v13 = vadd.f32 %v2733_v58, %v2721_v56  ;;  %v5093_v20 = vld [vmem:[%s8010_s1 + $0x6f4] sm:$0xf]  ;;  %v3854_v6 = vor.u32 %v5015_v35, %v3851_v4  ;;  %v4038_v54 = vor.u32 %v5061_v5, %v4035_v41  ;;  %v4227_v56 = vld [vmem:[%s8010_s1 + $0x778] sm:$0xf0] }
 0x10c   :  { %2947 = vmatpush.bf16.msra.mxu0 %v3766_v62  ;;  %v2696_v62 = vpop.f32.mrf.mxu0  ;;  %v3915_v51 = vld [vmem:[%s8010_s1 + $0x508] sm:$0xf0]  ;;  %v5073_v15 = vld [vmem:[%s8010_s1 + $0x654] sm:$0xf]  ;;  %v4147_v19 = vld [vmem:[%s8010_s1 + $0x6d8] sm:$0xf0] }
 0x10d   :  { %2960 = vmatpush.bf16.msra.mxu1 %v3830_v1  ;;  %v3870_v1 = vor.u32 %v5019_v11, %v3867_v55  ;;  %v5109_v55 = vld [vmem:[%s8010_s1 + $0x774] sm:$0xf]  ;;  %v4091_v62 = vld [vmem:[%s8010_s1 + $0x668] sm:$0xf0]  ;;  %v5071_v34 = vld [vmem:[%s8010_s1 + $0x644] sm:$0xf] }
 0x10e   :  { %2973 = vmatpush.bf16.msra.mxu2 %v3894_v2  ;;  %v4985_v2 = vld [vmem:[%s8010_s1 + $0x394] sm:$0xf]  ;;  %v4219_v3 = vld [vmem:[%s8010_s1 + $0x768] sm:$0xf0]  ;;  %v5087_v4 = vld [vmem:[%s8010_s1 + $0x6c4] sm:$0xf] }
 0x10f   :  { %2986 = vmatpush.bf16.msra.mxu3 %v3958_v14  ;;  %v3934_v14 = vor.u32 %v5035_v61, %v3931_v60  ;;  %v4027_v61 = vld [vmem:[%s8010_s1 + $0x5e8] sm:$0xf0]  ;;  %v5075_v60 = vld [vmem:[%s8010_s1 + $0x664] sm:$0xf]  ;;  %v5089_v39 = vld [vmem:[%s8010_s1 + $0x6d4] sm:$0xf] }
 0x110   :  { %2948 = vmatpush.bf16.msra.mxu0 %v3758_v16  ;;  %v3734_v16 = vor.u32 %v4985_v2, %v3731_v43  ;;  %v2722_v40 = vpop.f32.mrf.mxu2  ;;  %v4230_v2 = vor.u32 %v5109_v55, %v4227_v56  ;;  %v4150_v29 = vor.u32 %v5089_v39, %v4147_v19  ;;  %v4075_v35 = vld [vmem:[%s8010_s1 + $0x648] sm:$0xf0]  ;;  %v5101_v56 = vld [vmem:[%s8010_s1 + $0x734] sm:$0xf]  ;;  %v3987_v19 = vld [vmem:[%s8010_s1 + $0x598] sm:$0xf0] }
 0x111   :  { %2961 = vmatpush.bf16.msra.mxu1 %v3822_v27  ;;  %v3798_v27 = vor.u32 %v5001_v36, %v3795_v7  ;;  %v2735_v52 = vpop.f32.mrf.mxu3  ;;  %v5107_v36 = vld [vmem:[%s8010_s1 + $0x764] sm:$0xf]  ;;  %v4094_v7 = vor.u32 %v5075_v60, %v4091_v62  ;;  %v4139_v5 = vld [vmem:[%s8010_s1 + $0x6c8] sm:$0xf0]  ;;  %v5049_v39 = vld [vmem:[%s8010_s1 + $0x594] sm:$0xf] }
 0x112   :  { %2974 = vmatpush.bf16.msra.mxu2 %v3886_v28  ;;  %v3862_v28 = vor.u32 %v5017_v8, %v3859_v12  ;;  %v5057_v12 = vld [vmem:[%s8010_s1 + $0x5d4] sm:$0xf]  ;;  %v4222_v26 = vor.u32 %v5107_v36, %v4219_v3  ;;  %v3995_v60 = vld [vmem:[%s8010_s1 + $0x5a8] sm:$0xf0]  ;;  %v5067_v62 = vld [vmem:[%s8010_s1 + $0x624] sm:$0xf] }
 0x113   :  { %2987 = vmatpush.bf16.msra.mxu3 %v3950_v44  ;;  %v5077_v44 = vld [vmem:[%s8010_s1 + $0x674] sm:$0xf] }
 0x114   :  { %2949 = vmatpush.bf16.msra.mxu0 %v3750_v21  ;;  %v4099_v21 = vld [vmem:[%s8010_s1 + $0x678] sm:$0xf0]  ;;  %v5069_v52 = vld [vmem:[%s8010_s1 + $0x634] sm:$0xf] }
 0x115   :  { %2962 = vmatpush.bf16.msra.mxu1 %v3814_v48  ;;  %v4163_v48 = vld [vmem:[%s8010_s1 + $0x6f8] sm:$0xf0]  ;;  %v4102_v11 = vor.u32 %v5077_v44, %v4099_v21  ;;  %v5103_v44 = vld [vmem:[%s8010_s1 + $0x744] sm:$0xf]  ;;  %v4203_v21 = vld [vmem:[%s8010_s1 + $0x748] sm:$0xf0] }
 0x116   :  { %2975 = vmatpush.bf16.msra.mxu2 %v3878_v50  ;;  %v5031_v50 = vld [vmem:[%s8010_s1 + $0x504] sm:$0xf] }
 0x117   :  { %2988 = vmatpush.bf16.msra.mxu3 %v3942_v57  ;;  %v4166_v57 = vor.u32 %v5093_v20, %v4163_v48  ;;  %v3918_v58 = vor.u32 %v5031_v50, %v3915_v51  ;;  %v4078_v20 = vor.u32 %v5071_v34, %v4075_v35  ;;  %v5053_v50 = vld [vmem:[%s8010_s1 + $0x5b4] sm:$0xf]  ;;  %v4003_v51 = vld [vmem:[%s8010_s1 + $0x5b8] sm:$0xf0]  ;;  %v5047_v35 = vld [vmem:[%s8010_s1 + $0x584] sm:$0xf] }
 0x118   :  { %2950 = vmatpush.bf16.msra.mxu0 %v3742_v59  ;;  %v5059_v59 = vld [vmem:[%s8010_s1 + $0x5e4] sm:$0xf]  ;;  %v4006_v55 = vor.u32 %v5053_v50, %v4003_v51  ;;  %v4179_v34 = vld [vmem:[%s8010_s1 + $0x718] sm:$0xf0] }
 0x119   :  { %2963 = vmatpush.bf16.msra.mxu1 %v3806_v63  ;;  %v5091_v63 = vld [vmem:[%s8010_s1 + $0x6e4] sm:$0xf]  ;;  %v4030_v43 = vor.u32 %v5059_v59, %v4027_v61  ;;  %v4291_v50 = vld [vmem:[%s8010_s1 + $0x7f8] sm:$0xf0] }
 0x11a   :  { %2976 = vmatpush.bf16.msra.mxu2 %v3870_v1  ;;  %v4155_v1 = vld [vmem:[%s8010_s1 + $0x6e8] sm:$0xf0]  ;;  %v5051_v61 = vld [vmem:[%s8010_s1 + $0x5a4] sm:$0xf] }
 0x11b   :  { %2989 = vmatpush.bf16.msra.mxu3 %v3934_v14  ;;  %v4158_v8 = vor.u32 %v5091_v63, %v4155_v1  ;;  %v4019_v14 = vld [vmem:[%s8010_s1 + $0x5d8] sm:$0xf0]  ;;  %v4059_v1 = vld [vmem:[%s8010_s1 + $0x628] sm:$0xf0] }
 0x11c   :  { %2951 = vmatpush.bf16.msra.mxu0 %v3734_v16  ;;  %v4083_v16 = vld [vmem:[%s8010_s1 + $0x658] sm:$0xf0] }
 0x11d   :  { %2964 = vmatpush.bf16.msra.mxu1 %v3798_v27  ;;  %v4211_v27 = vld [vmem:[%s8010_s1 + $0x758] sm:$0xf0] }
 0x11e   :  { %2977 = vmatpush.bf16.msra.mxu2 %v3862_v28  ;;  %v4086_v28 = vor.u32 %v5073_v15, %v4083_v16  ;;  %v4062_v15 = vor.u32 %v5067_v62, %v4059_v1  ;;  %v5173_v1 = vld [vmem:[%s8010_s1 + $0x974] sm:$0xf] }
 0x11f   :  { %2990 = vmatpush.bf16.msra.mxu3 %v3926_v42 }
 0x120   :  { %2952 = vmatpush.bf16.msra.mxu0 %v3726_v47  ;;  %v7271_v40 = vpop.f32.mrf.mxu0  ;;  %v4142_v47 = vor.u32 %v5087_v4, %v4139_v5  ;;  %v3979_v4 = vld [vmem:[%s8010_s1 + $0x588] sm:$0xf0] }
 0x121   :  { %2965 = vmatpush.bf16.msra.mxu1 %v3790_v53  ;;  %v7279_v48 = vpop.f32.mrf.mxu1  ;;  %v4067_v53 = vld [vmem:[%s8010_s1 + $0x638] sm:$0xf0] }
 0x122   :  { %2978 = vmatpush.bf16.msra.mxu2 %v3854_v6  ;;  %v5085_v6 = vld [vmem:[%s8010_s1 + $0x6b4] sm:$0xf] }
 0x123   :  { %2991 = vmatpush.bf16.msra.mxu3 %v3918_v58  ;;  %2953 = vmatmul.bf16.vlgmr.msra.gmra.mxu0 %v5780_v49  ;;  %v4022_v49 = vor.u32 %v5057_v12, %v4019_v14  ;;  %v4070_v58 = vor.u32 %v5069_v52, %v4067_v53  ;;  %v4187_v12 = vld [vmem:[%s8010_s1 + $0x728] sm:$0xf0]  ;;  %v5141_v53 = vld [vmem:[%s8010_s1 + $0x874] sm:$0xf] }
 0x124   :  { %2997 = vmatpush.bf16.msrb.mxu0 %v4038_v54  ;;  %2966 = vmatmul.bf16.vlgmr.msra.gmra.mxu1 %v5959_v24  ;;  %v5055_v24 = vld [vmem:[%s8010_s1 + $0x5c4] sm:$0xf]  ;;  %v4131_v54 = vld [vmem:[%s8010_s1 + $0x6b8] sm:$0xf0] }
 0x125   :  { %3010 = vmatpush.bf16.msrb.mxu1 %v4102_v11  ;;  %2979 = vmatmul.bf16.vlgmr.msra.gmra.mxu2 %v5972_v30  ;;  %v5105_v30 = vld [vmem:[%s8010_s1 + $0x754] sm:$0xf]  ;;  %v4206_v11 = vor.u32 %v5103_v44, %v4203_v21  ;;  %v4134_v59 = vor.u32 %v5085_v6, %v4131_v54  ;;  %v4043_v44 = vld [vmem:[%s8010_s1 + $0x608] sm:$0xf0]  ;;  %v5079_v21 = vld [vmem:[%s8010_s1 + $0x684] sm:$0xf] }
 0x126   :  { %3023 = vmatpush.bf16.msrb.mxu2 %v4166_v57  ;;  %2992 = vmatmul.bf16.vlgmr.msra.gmra.mxu3 %v5961_v25  ;;  %v4011_v25 = vld [vmem:[%s8010_s1 + $0x5c8] sm:$0xf0]  ;;  %v4214_v41 = vor.u32 %v5105_v30, %v4211_v27  ;;  %v4195_v57 = vld [vmem:[%s8010_s1 + $0x738] sm:$0xf0]  ;;  %v5081_v27 = vld [vmem:[%s8010_s1 + $0x694] sm:$0xf] }
 0x127   :  { %3036 = vmatpush.bf16.msrb.mxu3 %v4230_v2  ;;  %v4014_v42 = vor.u32 %v5055_v24, %v4011_v25  ;;  %v5083_v2 = vld [vmem:[%s8010_s1 + $0x6a4] sm:$0xf]  ;;  %v4198_v36 = vor.u32 %v5101_v56, %v4195_v57  ;;  %v4051_v30 = vld [vmem:[%s8010_s1 + $0x618] sm:$0xf0]  ;;  %v5097_v24 = vld [vmem:[%s8010_s1 + $0x714] sm:$0xf]  ;;  %v3990_v25 = vor.u32 %v5049_v39, %v3987_v19 }
 0x128   :  { %2998 = vmatpush.bf16.msrb.mxu0 %v4030_v43  ;;  %v7314_v63 = vpop.f32.mrf.mxu2  ;;  %v4123_v43 = vld [vmem:[%s8010_s1 + $0x6a8] sm:$0xf0]  ;;  %v2748_v14 = vpop.f32.mrf.mxu0  ;;  %v4182_v52 = vor.u32 %v5097_v24, %v4179_v34  ;;  %v4355_v6 = vld [vmem:[%s8010_s1 + $0x878] sm:$0xf0]  ;;  %v5157_v54 = vld [vmem:[%s8010_s1 + $0x8f4] sm:$0xf] }
 0x129   :  { %3011 = vmatpush.bf16.msrb.mxu1 %v4094_v7  ;;  %v7325_v3 = vpop.f32.mrf.mxu3  ;;  %v3998_v7 = vor.u32 %v5051_v61, %v3995_v60  ;;  %v4126_v16 = vor.u32 %v5083_v2, %v4123_v43  ;;  %v5095_v56 = vld [vmem:[%s8010_s1 + $0x704] sm:$0xf]  ;;  %v4171_v57 = vld [vmem:[%s8010_s1 + $0x708] sm:$0xf0]  ;;  %v4358_v62 = vor.u32 %v5141_v53, %v4355_v6  ;;  %v4483_v2 = vld [vmem:[%s8010_s1 + $0x978] sm:$0xf0] }
 0x12a   :  { %3024 = vmatpush.bf16.msrb.mxu2 %v4158_v8  ;;  %v5099_v8 = vld [vmem:[%s8010_s1 + $0x724] sm:$0xf]  ;;  %v4347_v14 = vld [vmem:[%s8010_s1 + $0x868] sm:$0xf0]  ;;  %v4486_v39 = vor.u32 %v5173_v1, %v4483_v2  ;;  %v5137_v24 = vld [vmem:[%s8010_s1 + $0x854] sm:$0xf] }
 0x12b   :  { %3037 = vmatpush.bf16.msrb.mxu3 %v4222_v26  ;;  %v5065_v26 = vld [vmem:[%s8010_s1 + $0x614] sm:$0xf]  ;;  %v5167_v53 = vld [vmem:[%s8010_s1 + $0x944] sm:$0xf]  ;;  %v4459_v6 = vld [vmem:[%s8010_s1 + $0x948] sm:$0xf0] }
 0x12c   :  { %2999 = vmatpush.bf16.msrb.mxu0 %v4022_v49  ;;  %v2761_v49 = vpop.f32.mrf.mxu1  ;;  %v4054_v5 = vor.u32 %v5065_v26, %v4051_v30  ;;  %v5171_v26 = vld [vmem:[%s8010_s1 + $0x964] sm:$0xf]  ;;  %v5153_v34 = vld [vmem:[%s8010_s1 + $0x8d4] sm:$0xf] }
 0x12d   :  { %3012 = vmatpush.bf16.msrb.mxu1 %v4086_v28  ;;  %v4115_v28 = vld [vmem:[%s8010_s1 + $0x698] sm:$0xf0]  ;;  %v4475_v49 = vld [vmem:[%s8010_s1 + $0x968] sm:$0xf0]  ;;  %v5165_v2 = vld [vmem:[%s8010_s1 + $0x934] sm:$0xf] }
 0x12e   :  { %3025 = vmatpush.bf16.msrb.mxu2 %v4150_v29  ;;  %v4190_v29 = vor.u32 %v5099_v8, %v4187_v12  ;;  %v4283_v8 = vld [vmem:[%s8010_s1 + $0x7e8] sm:$0xf0]  ;;  %v5139_v12 = vld [vmem:[%s8010_s1 + $0x864] sm:$0xf] }
 0x12f   :  { %3038 = vmatpush.bf16.msrb.mxu3 %v4214_v41  ;;  %v4118_v41 = vor.u32 %v5081_v27, %v4115_v28  ;;  %v4350_v30 = vor.u32 %v5139_v12, %v4347_v14  ;;  %v5121_v28 = vld [vmem:[%s8010_s1 + $0x7d4] sm:$0xf]  ;;  %v4251_v12 = vld [vmem:[%s8010_s1 + $0x7a8] sm:$0xf0]  ;;  %v5131_v14 = vld [vmem:[%s8010_s1 + $0x824] sm:$0xf] }
 0x130   :  { %3000 = vmatpush.bf16.msrb.mxu0 %v4014_v42  ;;  %v5063_v42 = vld [vmem:[%s8010_s1 + $0x604] sm:$0xf]  ;;  %v2774_v51 = vpop.f32.mrf.mxu2 }
 0x131   :  { %3013 = vmatpush.bf16.msrb.mxu1 %v4078_v20  ;;  %v4107_v20 = vld [vmem:[%s8010_s1 + $0x688] sm:$0xf0] }
 0x132   :  { %3026 = vmatpush.bf16.msrb.mxu2 %v4142_v47  ;;  %v5125_v47 = vld [vmem:[%s8010_s1 + $0x7f4] sm:$0xf]  ;;  %v4110_v61 = vor.u32 %v5079_v21, %v4107_v20  ;;  %v4331_v21 = vld [vmem:[%s8010_s1 + $0x848] sm:$0xf0]  ;;  %v5151_v20 = vld [vmem:[%s8010_s1 + $0x8c4] sm:$0xf] }
 0x133   :  { %3039 = vmatpush.bf16.msrb.mxu3 %v4206_v11  ;;  %v3982_v11 = vor.u32 %v5047_v35, %v3979_v4  ;;  %v4294_v60 = vor.u32 %v5125_v47, %v4291_v50  ;;  %v4403_v35 = vld [vmem:[%s8010_s1 + $0x8d8] sm:$0xf0]  ;;  %v4478_v4 = vor.u32 %v5171_v26, %v4475_v49  ;;  %v4395_v47 = vld [vmem:[%s8010_s1 + $0x8c8] sm:$0xf0]  ;;  %v2747_v26 = vadd.f32 %v7271_v40, %v7127_v13  ;;  %v5113_v13 = vld [vmem:[%s8010_s1 + $0x794] sm:$0xf] }
 0x134   :  { %3001 = vmatpush.bf16.msrb.mxu0 %v4006_v55  ;;  %v4419_v55 = vld [vmem:[%s8010_s1 + $0x8f8] sm:$0xf0] }
 0x135   :  { %3014 = vmatpush.bf16.msrb.mxu1 %v4070_v58  ;;  %v2787_v58 = vpop.f32.mrf.mxu3  ;;  %v4422_v43 = vor.u32 %v5157_v54, %v4419_v55  ;;  %v4243_v40 = vld [vmem:[%s8010_s1 + $0x798] sm:$0xf0] }
 0x136   :  { %3027 = vmatpush.bf16.msrb.mxu2 %v4134_v59  ;;  %v4046_v59 = vor.u32 %v5063_v42, %v4043_v44  ;;  %v4406_v42 = vor.u32 %v5153_v34, %v4403_v35  ;;  %v5135_v44 = vld [vmem:[%s8010_s1 + $0x844] sm:$0xf]  ;;  %v5133_v58 = vld [vmem:[%s8010_s1 + $0x834] sm:$0xf] }
 0x137   :  { %3040 = vmatpush.bf16.msrb.mxu3 %v4198_v36  ;;  %v4174_v36 = vor.u32 %v5095_v56, %v4171_v57  ;;  %v4334_v54 = vor.u32 %v5135_v44, %v4331_v21  ;;  %v5117_v56 = vld [vmem:[%s8010_s1 + $0x7b4] sm:$0xf]  ;;  %v4259_v57 = vld [vmem:[%s8010_s1 + $0x7b8] sm:$0xf0]  ;;  %v5111_v21 = vld [vmem:[%s8010_s1 + $0x784] sm:$0xf] }
 0x138   :  { %3002 = vmatpush.bf16.msrb.mxu0 %v3998_v7  ;;  %v5123_v7 = vld [vmem:[%s8010_s1 + $0x7e4] sm:$0xf]  ;;  %v4262_v1 = vor.u32 %v5117_v56, %v4259_v57  ;;  %v5129_v35 = vld [vmem:[%s8010_s1 + $0x814] sm:$0xf]  ;;  %v4435_v44 = vld [vmem:[%s8010_s1 + $0x918] sm:$0xf0] }
 0x139   :  { %3015 = vmatpush.bf16.msrb.mxu1 %v4062_v15  ;;  %v5155_v15 = vld [vmem:[%s8010_s1 + $0x8e4] sm:$0xf]  ;;  %v4286_v19 = vor.u32 %v5123_v7, %v4283_v8 }
 0x13a   :  { %3028 = vmatpush.bf16.msrb.mxu2 %v4126_v16  ;;  %v4411_v16 = vld [vmem:[%s8010_s1 + $0x8e8] sm:$0xf0]  ;;  %v5115_v8 = vld [vmem:[%s8010_s1 + $0x7a4] sm:$0xf] }
 0x13b   :  { %3041 = vmatpush.bf16.msrb.mxu3 %v4190_v29  ;;  %v4414_v27 = vor.u32 %v5155_v15, %v4411_v16  ;;  %v4275_v29 = vld [vmem:[%s8010_s1 + $0x7d8] sm:$0xf0]  ;;  %v4315_v16 = vld [vmem:[%s8010_s1 + $0x828] sm:$0xf0] }
 0x13c   :  { %3003 = vmatpush.bf16.msrb.mxu0 %v3990_v25  ;;  %v4339_v25 = vld [vmem:[%s8010_s1 + $0x858] sm:$0xf0] }
 0x13d   :  { %3016 = vmatpush.bf16.msrb.mxu1 %v4054_v5  ;;  %v4467_v5 = vld [vmem:[%s8010_s1 + $0x958] sm:$0xf0] }
 0x13e   :  { %3029 = vmatpush.bf16.msrb.mxu2 %v4118_v41  ;;  %v4342_v41 = vor.u32 %v5137_v24, %v4339_v25  ;;  %v4318_v25 = vor.u32 %v5131_v14, %v4315_v16  ;;  %v5237_v16 = vld [vmem:[%s8010_s1 + $0xb74] sm:$0xf] }
 0x13f   :  { %3042 = vmatpush.bf16.msrb.mxu3 %v4182_v52 }
 0x140   :  { %3004 = vmatpush.bf16.msrb.mxu0 %v3982_v11  ;;  %v7475_v51 = vpop.f32.mrf.mxu0  ;;  %v4398_v11 = vor.u32 %v5151_v20, %v4395_v47 }
 0x141   :  { %3017 = vmatpush.bf16.msrb.mxu1 %v4046_v59  ;;  %v7483_v55 = vpop.f32.mrf.mxu1  ;;  %v4323_v59 = vld [vmem:[%s8010_s1 + $0x838] sm:$0xf0] }
 0x142   :  { %3030 = vmatpush.bf16.msrb.mxu2 %v4110_v61  ;;  %v5149_v61 = vld [vmem:[%s8010_s1 + $0x8b4] sm:$0xf] }
 0x143   :  { %3043 = vmatpush.bf16.msrb.mxu3 %v4174_v36  ;;  %3005 = vmatmul.bf16.vlgmr.msrb.gmra.mxu0 %v5974_v31  ;;  %v4278_v31 = vor.u32 %v5121_v28, %v4275_v29  ;;  %v4326_v36 = vor.u32 %v5133_v58, %v4323_v59  ;;  %v5163_v28 = vld [vmem:[%s8010_s1 + $0x924] sm:$0xf]  ;;  %v4443_v29 = vld [vmem:[%s8010_s1 + $0x928] sm:$0xf0]  ;;  %v5205_v58 = vld [vmem:[%s8010_s1 + $0xa74] sm:$0xf] }
 0x144   :  { %3049 = vmatpush.bf16.msra.mxu0 %v4294_v60  ;;  %3018 = vmatmul.bf16.vlgmr.msrb.gmra.mxu1 %v6169_v22  ;;  %v5119_v22 = vld [vmem:[%s8010_s1 + $0x7c4] sm:$0xf]  ;;  %v4387_v60 = vld [vmem:[%s8010_s1 + $0x8b8] sm:$0xf0] }
 0x145   :  { %3062 = vmatpush.bf16.msra.mxu1 %v4358_v62  ;;  %3031 = vmatmul.bf16.vlgmr.msrb.gmra.mxu2 %v6182_v32  ;;  %v5169_v32 = vld [vmem:[%s8010_s1 + $0x954] sm:$0xf]  ;;  %v4462_v62 = vor.u32 %v5167_v53, %v4459_v6  ;;  %v4390_v7 = vor.u32 %v5149_v61, %v4387_v60  ;;  %v4299_v53 = vld [vmem:[%s8010_s1 + $0x808] sm:$0xf0]  ;;  %v5143_v6 = vld [vmem:[%s8010_s1 + $0x884] sm:$0xf] }
 0x146   :  { %3075 = vmatpush.bf16.msra.mxu2 %v4422_v43  ;;  %3044 = vmatmul.bf16.vlgmr.msrb.gmra.mxu3 %v6171_v23  ;;  %v4267_v23 = vld [vmem:[%s8010_s1 + $0x7c8] sm:$0xf0]  ;;  %v4470_v50 = vor.u32 %v5169_v32, %v4467_v5  ;;  %v4451_v43 = vld [vmem:[%s8010_s1 + $0x938] sm:$0xf0]  ;;  %v5145_v32 = vld [vmem:[%s8010_s1 + $0x894] sm:$0xf] }
 0x147   :  { %3088 = vmatpush.bf16.msra.mxu3 %v4486_v39  ;;  %v4270_v52 = vor.u32 %v5119_v22, %v4267_v23  ;;  %v5147_v39 = vld [vmem:[%s8010_s1 + $0x8a4] sm:$0xf]  ;;  %v4454_v49 = vor.u32 %v5165_v2, %v4451_v43  ;;  %v4371_v5 = vld [vmem:[%s8010_s1 + $0x898] sm:$0xf0]  ;;  %v5161_v22 = vld [vmem:[%s8010_s1 + $0x914] sm:$0xf]  ;;  %v4246_v23 = vor.u32 %v5113_v13, %v4243_v40 }
 0x148   :  { %3050 = vmatpush.bf16.msra.mxu0 %v4286_v19  ;;  %v7518_v15 = vpop.f32.mrf.mxu2  ;;  %v4379_v19 = vld [vmem:[%s8010_s1 + $0x8a8] sm:$0xf0]  ;;  %v2800_v24 = vpop.f32.mrf.mxu0  ;;  %v4438_v57 = vor.u32 %v5161_v22, %v4435_v44  ;;  %v4611_v59 = vld [vmem:[%s8010_s1 + $0xa78] sm:$0xf0]  ;;  %v5221_v61 = vld [vmem:[%s8010_s1 + $0xaf4] sm:$0xf] }
 0x149   :  { %3063 = vmatpush.bf16.msra.mxu1 %v4350_v30  ;;  %v7531_v30 = vpop.f32.mrf.mxu3  ;;  %v4382_v34 = vor.u32 %v5147_v39, %v4379_v19  ;;  %v4427_v2 = vld [vmem:[%s8010_s1 + $0x908] sm:$0xf0]  ;;  %v4614_v14 = vor.u32 %v5205_v58, %v4611_v59  ;;  %v4739_v39 = vld [vmem:[%s8010_s1 + $0xb78] sm:$0xf0]  ;;  %v5235_v13 = vld [vmem:[%s8010_s1 + $0xb64] sm:$0xf] }
 0x14a   :  { %3076 = vmatpush.bf16.msra.mxu2 %v4414_v27  ;;  %v4254_v27 = vor.u32 %v5115_v8, %v4251_v12  ;;  %v4667_v24 = vld [vmem:[%s8010_s1 + $0xae8] sm:$0xf0]  ;;  %v4659_v22 = vld [vmem:[%s8010_s1 + $0xad8] sm:$0xf0]  ;;  %v5233_v44 = vld [vmem:[%s8010_s1 + $0xb54] sm:$0xf] }
 0x14b   :  { %3089 = vmatpush.bf16.msra.mxu3 %v4478_v4  ;;  %v2813_v4 = vpop.f32.mrf.mxu1  ;;  %v4731_v40 = vld [vmem:[%s8010_s1 + $0xb68] sm:$0xf0] }
 0x14c   :  { %3051 = vmatpush.bf16.msra.mxu0 %v4278_v31  ;;  %v4307_v31 = vld [vmem:[%s8010_s1 + $0x818] sm:$0xf0] }
 0x14d   :  { %3064 = vmatpush.bf16.msra.mxu1 %v4342_v41  ;;  %v2760_v41 = vadd.f32 %v7279_v48, %v2747_v26  ;;  %v4235_v48 = vld [vmem:[%s8010_s1 + $0x788] sm:$0xf0]  ;;  %v4310_v47 = vor.u32 %v5129_v35, %v4307_v31 }
 0x14e   :  { %3077 = vmatpush.bf16.msra.mxu2 %v4406_v42  ;;  %v4446_v42 = vor.u32 %v5163_v28, %v4443_v29  ;;  %v4238_v60 = vor.u32 %v5111_v21, %v4235_v48  ;;  %v5203_v28 = vld [vmem:[%s8010_s1 + $0xa64] sm:$0xf]  ;;  %v4723_v21 = vld [vmem:[%s8010_s1 + $0xb58] sm:$0xf0] }
 0x14f   :  { %3090 = vmatpush.bf16.msra.mxu3 %v4470_v50  ;;  %v2773_v20 = vadd.f32 %v7314_v63, %v2760_v41  ;;  %v4374_v50 = vor.u32 %v5145_v32, %v4371_v5  ;;  %v4363_v63 = vld [vmem:[%s8010_s1 + $0x888] sm:$0xf0]  ;;  %v5219_v29 = vld [vmem:[%s8010_s1 + $0xae4] sm:$0xf]  ;;  %v5185_v32 = vld [vmem:[%s8010_s1 + $0x9d4] sm:$0xf] }
 0x150   :  { %3052 = vmatpush.bf16.msra.mxu0 %v4270_v52  ;;  %v5127_v52 = vld [vmem:[%s8010_s1 + $0x804] sm:$0xf]  ;;  %v2826_v56 = vpop.f32.mrf.mxu2  ;;  %v4366_v8 = vor.u32 %v5143_v6, %v4363_v63  ;;  %v4670_v31 = vor.u32 %v5219_v29, %v4667_v24  ;;  %v4531_v5 = vld [vmem:[%s8010_s1 + $0x9d8] sm:$0xf0]  ;;  %v5201_v41 = vld [vmem:[%s8010_s1 + $0xa54] sm:$0xf]  ;;  %v4726_v6 = vor.u32 %v5233_v44, %v4723_v21 }
 0x151   :  { %3065 = vmatpush.bf16.msra.mxu1 %v4334_v54  ;;  %v5189_v54 = vld [vmem:[%s8010_s1 + $0x9f4] sm:$0xf]  ;;  %v2839_v43 = vpop.f32.mrf.mxu3  ;;  %v4715_v56 = vld [vmem:[%s8010_s1 + $0xb48] sm:$0xf0]  ;;  %v5211_v24 = vld [vmem:[%s8010_s1 + $0xaa4] sm:$0xf] }
 0x152   :  { %3078 = vmatpush.bf16.msra.mxu2 %v4398_v11  ;;  %v4547_v11 = vld [vmem:[%s8010_s1 + $0x9f8] sm:$0xf0]  ;;  %v4571_v29 = vld [vmem:[%s8010_s1 + $0xa28] sm:$0xf0]  ;;  %v5209_v44 = vld [vmem:[%s8010_s1 + $0xa94] sm:$0xf] }
 0x153   :  { %3091 = vmatpush.bf16.msra.mxu3 %v4462_v62  ;;  %v4675_v62 = vld [vmem:[%s8010_s1 + $0xaf8] sm:$0xf0]  ;;  %v4550_v12 = vor.u32 %v5189_v54, %v4547_v11  ;;  %v5231_v11 = vld [vmem:[%s8010_s1 + $0xb44] sm:$0xf] }
 0x154   :  { %3053 = vmatpush.bf16.msra.mxu0 %v4262_v1  ;;  %v5159_v1 = vld [vmem:[%s8010_s1 + $0x904] sm:$0xf]  ;;  %v4678_v26 = vor.u32 %v5221_v61, %v4675_v62  ;;  %v4515_v62 = vld [vmem:[%s8010_s1 + $0x9b8] sm:$0xf0] }
 0x155   :  { %3066 = vmatpush.bf16.msra.mxu1 %v4326_v36  ;;  %v2786_v36 = vadd.f32 %v7325_v3, %v2773_v20  ;;  %v5187_v3 = vld [vmem:[%s8010_s1 + $0x9e4] sm:$0xf]  ;;  %v4579_v43 = vld [vmem:[%s8010_s1 + $0xa38] sm:$0xf0] }
 0x156   :  { %3079 = vmatpush.bf16.msra.mxu2 %v4390_v7  ;;  %v4302_v7 = vor.u32 %v5127_v52, %v4299_v53  ;;  %v5199_v20 = vld [vmem:[%s8010_s1 + $0xa44] sm:$0xf]  ;;  %v4651_v52 = vld [vmem:[%s8010_s1 + $0xac8] sm:$0xf0]  ;;  %v4627_v21 = vld [vmem:[%s8010_s1 + $0xa98] sm:$0xf0] }
 0x157   :  { %3092 = vmatpush.bf16.msra.mxu3 %v4454_v49  ;;  %v2799_v19 = vadd.f32 %v7475_v51, %v2786_v36  ;;  %v4430_v49 = vor.u32 %v5159_v1, %v4427_v2  ;;  %v4603_v51 = vld [vmem:[%s8010_s1 + $0xa68] sm:$0xf0]  ;;  %v5197_v1 = vld [vmem:[%s8010_s1 + $0xa34] sm:$0xf] }
 0x158   :  { %3054 = vmatpush.bf16.msra.mxu0 %v4254_v27  ;;  %v4539_v27 = vld [vmem:[%s8010_s1 + $0x9e8] sm:$0xf0]  ;;  %v4606_v4 = vor.u32 %v5203_v28, %v4603_v51  ;;  %v5213_v36 = vld [vmem:[%s8010_s1 + $0xab4] sm:$0xf]  ;;  %v5195_v51 = vld [vmem:[%s8010_s1 + $0xa24] sm:$0xf] }
 0x159   :  { %3067 = vmatpush.bf16.msra.mxu1 %v4318_v25  ;;  %v4742_v25 = vor.u32 %v5237_v16, %v4739_v39  ;;  %v2812_v35 = vadd.f32 %v7483_v55, %v2799_v19  ;;  %v4595_v55 = vld [vmem:[%s8010_s1 + $0xa58] sm:$0xf0]  ;;  %v5229_v16 = vld [vmem:[%s8010_s1 + $0xb34] sm:$0xf]  ;;  %v4507_v28 = vld [vmem:[%s8010_s1 + $0x9a8] sm:$0xf0] }
 0x15a   :  { %3080 = vmatpush.bf16.msra.mxu2 %v4382_v34  ;;  %v4542_v34 = vor.u32 %v5187_v3, %v4539_v27  ;;  %v4598_v48 = vor.u32 %v5201_v41, %v4595_v55  ;;  %v4707_v39 = vld [vmem:[%s8010_s1 + $0xb38] sm:$0xf0]  ;;  %v5179_v27 = vld [vmem:[%s8010_s1 + $0x9a4] sm:$0xf]  ;;  %v5177_v55 = vld [vmem:[%s8010_s1 + $0x994] sm:$0xf] }
 0x15b   :  { %3093 = vmatpush.bf16.msra.mxu3 %v4446_v42  ;;  %v5217_v42 = vld [vmem:[%s8010_s1 + $0xad4] sm:$0xf] }
 0x15c   :  { %3055 = vmatpush.bf16.msra.mxu0 %v4246_v23  ;;  %v2825_v23 = vadd.f32 %v7518_v15, %v2812_v35  ;;  %v4662_v15 = vor.u32 %v5217_v42, %v4659_v22  ;;  %v5227_v35 = vld [vmem:[%s8010_s1 + $0xb24] sm:$0xf]  ;;  %v4499_v42 = vld [vmem:[%s8010_s1 + $0x998] sm:$0xf0]  ;;  %v5193_v22 = vld [vmem:[%s8010_s1 + $0xa14] sm:$0xf] }
 0x15d   :  { %3068 = vmatpush.bf16.msra.mxu1 %v4310_v47  ;;  %v4587_v47 = vld [vmem:[%s8010_s1 + $0xa48] sm:$0xf0] }
 0x15e   :  { %3081 = vmatpush.bf16.msra.mxu2 %v4374_v50  ;;  %v5215_v50 = vld [vmem:[%s8010_s1 + $0xac4] sm:$0xf]  ;;  %v2838_v53 = vadd.f32 %v7531_v30, %v2825_v23  ;;  %v4590_v59 = vor.u32 %v5199_v20, %v4587_v47  ;;  %v4691_v20 = vld [vmem:[%s8010_s1 + $0xb18] sm:$0xf0] }
 0x15f   :  { %3094 = vmatpush.bf16.msra.mxu3 %v4438_v57  ;;  %v5272_v57 = vld [vmem:[%s8012_s2] sm:$0x3]  ;;  %v4654_v61 = vor.u32 %v5215_v50, %v4651_v52  ;;  %v5175_v47 = vld [vmem:[%s8010_s1 + $0x984] sm:$0xf]  ;;  %v4630_v52 = vor.u32 %v5209_v44, %v4627_v21  ;;  %v4835_v44 = vld [vmem:[%s8010_s1 + $0xc38] sm:$0xf0] }
 0x160   :  { %3056 = vmatpush.bf16.msra.mxu0 %v4238_v60  ;;  %v2850_v63 = vpop.f32.mrf.mxu0  ;;  %v438_v58 = vperm.slane %v5272_v57, 1  ;;  %v5181_v60 = vld [vmem:[%s8010_s1 + $0x9b4] sm:$0xf] }
 0x161   :  { %3069 = vmatpush.bf16.msra.mxu1 %v4302_v7  ;;  %v2851_v30 = vadd.f32 %v2850_v63, %v2838_v53  ;;  %v2863_v2 = vpop.f32.mrf.mxu1  ;;  %v4643_v7 = vld [vmem:[%s8010_s1 + $0xab8] sm:$0xf0]  ;;  %v4491_v53 = vld [vmem:[%s8010_s1 + $0x988] sm:$0xf0] }
 0x162   :  { %3082 = vmatpush.bf16.msra.mxu2 %v4366_v8  ;;  %v2864_v19 = vadd.f32 %v2863_v2, %v438_v58  ;;  %v4646_v3 = vor.u32 %v5213_v36, %v4643_v7  ;;  %v4555_v63 = vld [vmem:[%s8010_s1 + $0xa08] sm:$0xf0]  ;;  %v4803_v58 = vld [vmem:[%s8010_s1 + $0xbf8] sm:$0xf0] }
 0x163   :  { %3095 = vmatpush.bf16.msra.mxu3 %v4430_v49  ;;  %3057 = vmatmul.bf16.vlgmr.msra.gmra.mxu0 %v6184_v33  ;;  %v4734_v33 = vor.u32 %v5235_v13, %v4731_v40  ;;  %v3179_v8 = vmul.f32 0.2, %v2851_v30  ;;  %v4582_v49 = vor.u32 %v5197_v1, %v4579_v43  ;;  %v4510_v40 = vor.u32 %v5179_v27, %v4507_v28  ;;  %v4683_v1 = vld [vmem:[%s8010_s1 + $0xb08] sm:$0xf0] }
 0x164   :  { %3101 = vmatpush.bf16.msrb.mxu0 %v4550_v12  ;;  %3070 = vmatmul.bf16.vlgmr.msra.gmra.mxu1 %v6379_v37  ;;  %v5183_v37 = vld [vmem:[%s8010_s1 + $0x9c4] sm:$0xf]  ;;  %v4718_v12 = vor.u32 %v5231_v11, %v4715_v56  ;;  %v4619_v11 = vld [vmem:[%s8010_s1 + $0xa88] sm:$0xf0]  ;;  %v5253_v56 = vld [vmem:[%s8010_s1 + $0xbf4] sm:$0xf] }
 0x165   :  { %3114 = vmatpush.bf16.msrb.mxu1 %v4614_v14  ;;  %3083 = vmatmul.bf16.vlgmr.msra.gmra.mxu2 %v6392_v45  ;;  %v4534_v45 = vor.u32 %v5185_v32, %v4531_v5  ;;  %v4518_v14 = vor.u32 %v5181_v60, %v4515_v62  ;;  %v4574_v5 = vor.u32 %v5195_v51, %v4571_v29  ;;  %v5223_v62 = vld [vmem:[%s8010_s1 + $0xb04] sm:$0xf]  ;;  %v5249_v51 = vld [vmem:[%s8010_s1 + $0xbd4] sm:$0xf]  ;;  %v4787_v29 = vld [vmem:[%s8010_s1 + $0xbd8] sm:$0xf0] }
 0x166   :  { %3127 = vmatpush.bf16.msrb.mxu2 %v4678_v26  ;;  %3096 = vmatmul.bf16.vlgmr.msra.gmra.mxu3 %v6381_v38  ;;  %v4523_v38 = vld [vmem:[%s8010_s1 + $0x9c8] sm:$0xf0]  ;;  %v7721_v26 = vmax.f32 %v2851_v30, %v3179_v8  ;;  %v5269_v30 = vld [vmem:[%s8010_s1 + $0xc74] sm:$0xf]  ;;  %v4494_v60 = vor.u32 %v5175_v47, %v4491_v53  ;;  %v4806_v7 = vor.u32 %v5253_v56, %v4803_v58  ;;  %v3192_v47 = vld [vmem:[%s8014_s3 + $0x38] sm:$0xff] }
 0x167   :  { %3140 = vmatpush.bf16.msrb.mxu3 %v4742_v25  ;;  %v4526_v54 = vor.u32 %v5183_v37, %v4523_v38  ;;  %v4635_v25 = vld [vmem:[%s8010_s1 + $0xaa8] sm:$0xf0]  ;;  %v4502_v37 = vor.u32 %v5177_v55, %v4499_v42  ;;  %v5225_v38 = vld [vmem:[%s8010_s1 + $0xb14] sm:$0xf] }
 0x168   :  { %3102 = vmatpush.bf16.msrb.mxu0 %v4542_v34  ;;  %3183 = vst [vmem:[%s8013_s5] sm:$0xff] %v7721_v26  ;;  %v4710_v34 = vor.u32 %v5229_v16, %v4707_v39  ;;  %v2876_v13 = vpop.f32.mrf.mxu2  ;;  %v2852_v32 = vpop.f32.mrf.mxu0  ;;  %v4638_v41 = vor.u32 %v5211_v24, %v4635_v25  ;;  %v4694_v57 = vor.u32 %v5225_v38, %v4691_v20  ;;  %v4795_v16 = vld [vmem:[%s8010_s1 + $0xbe8] sm:$0xf0]  ;;  %v3200_v39 = vld [vmem:[%s8014_s3 + $0x78] sm:$0xff]  ;;  %v5265_v25 = vld [vmem:[%s8010_s1 + $0xc54] sm:$0xf] }
 0x169   :  { %3115 = vmatpush.bf16.msrb.mxu1 %v4606_v4  ;;  %v4699_v4 = vld [vmem:[%s8010_s1 + $0xb28] sm:$0xf0]  ;;  %v2889_v23 = vpop.f32.mrf.mxu3  ;;  %v3195_v32 = vld [vmem:[%s8014_s3 + $0x50] sm:$0xff]  ;;  %v5243_v38 = vld [vmem:[%s8010_s1 + $0xba4] sm:$0xf] }
 0x16a   :  { %3128 = vmatpush.bf16.msrb.mxu2 %v4670_v31  ;;  %v2877_v31 = vadd.f32 %v2876_v13, %v2864_v19  ;;  %v5267_v19 = vld [vmem:[%s8010_s1 + $0xc64] sm:$0xf]  ;;  %v3198_v24 = vld [vmem:[%s8014_s3 + $0x68] sm:$0xff]  ;;  %v5245_v42 = vld [vmem:[%s8010_s1 + $0xbb4] sm:$0xf] }
 0x16b   :  { %3141 = vmatpush.bf16.msrb.mxu3 %v4734_v33  ;;  %v2865_v33 = vpop.f32.mrf.mxu1  ;;  %v4763_v20 = vld [vmem:[%s8010_s1 + $0xba8] sm:$0xf0]  ;;  %v5241_v58 = vld [vmem:[%s8010_s1 + $0xb94] sm:$0xf] }
 0x16c   :  { %3103 = vmatpush.bf16.msrb.mxu0 %v4534_v45  ;;  %v4563_v45 = vld [vmem:[%s8010_s1 + $0xa18] sm:$0xf0]  ;;  %v3194_v33 = vld [vmem:[%s8014_s3 + $0x48] sm:$0xff] }
 0x16d   :  { %3116 = vmatpush.bf16.msrb.mxu1 %v4598_v48  ;;  %v7769_v48 = vadd.f32 %v2889_v23, %v2877_v31  ;;  %v4566_v50 = vor.u32 %v5193_v22, %v4563_v45  ;;  %v4771_v22 = vld [vmem:[%s8010_s1 + $0xbb8] sm:$0xf0]  ;;  %v5261_v45 = vld [vmem:[%s8010_s1 + $0xc34] sm:$0xf] }
 0x16e   :  { %3129 = vmatpush.bf16.msrb.mxu2 %v4662_v15  ;;  %v4702_v15 = vor.u32 %v5227_v35, %v4699_v4  ;;  %v4779_v35 = vld [vmem:[%s8010_s1 + $0xbc8] sm:$0xf0] }
 0x16f   :  { %3142 = vmatpush.bf16.msrb.mxu3 %v4726_v6  ;;  %v5191_v6 = vld [vmem:[%s8010_s1 + $0xa04] sm:$0xf]  ;;  %v4843_v4 = vld [vmem:[%s8010_s1 + $0xc48] sm:$0xf0] }
 0x170   :  { %3104 = vmatpush.bf16.msrb.mxu0 %v4526_v54  ;;  %v5207_v54 = vld [vmem:[%s8010_s1 + $0xa84] sm:$0xf]  ;;  %v4558_v2 = vor.u32 %v5191_v6, %v4555_v63 }
 0x171   :  { %3117 = vmatpush.bf16.msrb.mxu1 %v4590_v59  ;;  %v4867_v59 = vld [vmem:[%s8010_s1 + $0xc78] sm:$0xf0]  ;;  %v4622_v43 = vor.u32 %v5207_v54, %v4619_v11  ;;  %v2891_v36 = vpop.f32.mrf.mxu3  ;;  %v3191_v54 = vld [vmem:[%s8014_s3 + $0x30] sm:$0xff]  ;;  %v4766_v11 = vor.u32 %v5243_v38, %v4763_v20  ;;  %v3213_v20 = vld [vmem:[%s8014_s3 + $0xe0] sm:$0xff] }
 0x172   :  { %3130 = vmatpush.bf16.msrb.mxu2 %v4654_v61  ;;  %v2878_v61 = vpop.f32.mrf.mxu2  ;;  %v4870_v8 = vor.u32 %v5269_v30, %v4867_v59  ;;  %v4755_v30 = vld [vmem:[%s8010_s1 + $0xb98] sm:$0xf0] }
 0x173   :  { %3143 = vmatpush.bf16.msrb.mxu3 %v4718_v12  ;;  %v4686_v12 = vor.u32 %v5223_v62, %v4683_v1  ;;  %v3190_v61 = vld [vmem:[%s8014_s3 + $0x28] sm:$0xff]  ;;  %v5257_v62 = vld [vmem:[%s8010_s1 + $0xc14] sm:$0xf]  ;;  %v4819_v1 = vld [vmem:[%s8010_s1 + $0xc18] sm:$0xf0] }
 0x174   :  { %3105 = vmatpush.bf16.msrb.mxu0 %v4518_v14  ;;  %v5251_v14 = vld [vmem:[%s8010_s1 + $0xbe4] sm:$0xf]  ;;  %v4822_v36 = vor.u32 %v5257_v62, %v4819_v1  ;;  %v3202_v62 = vld [vmem:[%s8014_s3 + $0x88] sm:$0xff] }
 0x175   :  { %3118 = vmatpush.bf16.msrb.mxu1 %v4582_v49  ;;  %v4859_v49 = vld [vmem:[%s8010_s1 + $0xc68] sm:$0xf0]  ;;  %v4798_v27 = vor.u32 %v5251_v14, %v4795_v16  ;;  %v5255_v14 = vld [vmem:[%s8010_s1 + $0xc04] sm:$0xf] }
 0x176   :  { %3131 = vmatpush.bf16.msrb.mxu2 %v4646_v3  ;;  %v3199_v3 = vld [vmem:[%s8014_s3 + $0x70] sm:$0xff]  ;;  %v4862_v28 = vor.u32 %v5267_v19, %v4859_v49  ;;  %v4811_v16 = vld [vmem:[%s8010_s1 + $0xc08] sm:$0xf0] }
 0x177   :  { %3144 = vmatpush.bf16.msrb.mxu3 %v4710_v34  ;;  %v4851_v34 = vld [vmem:[%s8010_s1 + $0xc58] sm:$0xf0]  ;;  %v3187_v19 = vld [vmem:[%s8014_s3 + $0x10] sm:$0xff] }
 0x178   :  { %3106 = vmatpush.bf16.msrb.mxu0 %v4510_v40  ;;  %v4854_v13 = vor.u32 %v5265_v25, %v4851_v34  ;;  %v5247_v40 = vld [vmem:[%s8010_s1 + $0xbc4] sm:$0xf] }
 0x179   :  { %3119 = vmatpush.bf16.msrb.mxu1 %v4574_v5  ;;  %v4782_v5 = vor.u32 %v5247_v40, %v4779_v35 }
 0x17a   :  { %3132 = vmatpush.bf16.msrb.mxu2 %v4638_v41 }
 0x17b   :  { %3145 = vmatpush.bf16.msrb.mxu3 %v4702_v15  ;;  %v4774_v15 = vor.u32 %v5245_v42, %v4771_v22 }
 0x17c   :  { %3107 = vmatpush.bf16.msrb.mxu0 %v4502_v37  ;;  %v4838_v37 = vor.u32 %v5261_v45, %v4835_v44  ;;  %v3216_v45 = vld [vmem:[%s8014_s3 + $0xf8] sm:$0xff] }
 0x17d   :  { %3120 = vmatpush.bf16.msrb.mxu1 %v4566_v50  ;;  %v5259_v50 = vld [vmem:[%s8010_s1 + $0xc24] sm:$0xf] }
 0x17e   :  { %3133 = vmatpush.bf16.msrb.mxu2 %v4630_v52  ;;  %v4827_v52 = vld [vmem:[%s8010_s1 + $0xc28] sm:$0xf0] }
 0x17f   :  { %3146 = vmatpush.bf16.msrb.mxu3 %v4694_v57  ;;  %v4830_v56 = vor.u32 %v5259_v50, %v4827_v52  ;;  %v3211_v50 = vld [vmem:[%s8014_s3 + $0xd0] sm:$0xff] }
 0x180   :  { %3108 = vmatpush.bf16.msrb.mxu0 %v4494_v60  ;;  %v2902_v31 = vpop.f32.mrf.mxu0 }
 0x181   :  { %3121 = vmatpush.bf16.msrb.mxu1 %v4558_v2  ;;  %v2903_v41 = vadd.f32 %v2902_v31, %v7769_v48  ;;  %v2915_v23 = vpop.f32.mrf.mxu1  ;;  %v3193_v48 = vld [vmem:[%s8014_s3 + $0x40] sm:$0xff] }
 0x182   :  { %3134 = vmatpush.bf16.msrb.mxu2 %v4622_v43  ;;  %v3189_v2 = vld [vmem:[%s8014_s3 + $0x20] sm:$0xff]  ;;  %v4758_v43 = vor.u32 %v5241_v58, %v4755_v30  ;;  %v3204_v58 = vld [vmem:[%s8014_s3 + $0x98] sm:$0xff] }
 0x183   :  { %3147 = vmatpush.bf16.msrb.mxu3 %v4686_v12  ;;  %3109 = vmatmul.bf16.vlgmr.msrb.gmra.mxu0 %v6394_v46  ;;  %v3197_v46 = vld [vmem:[%s8014_s3 + $0x60] sm:$0xff]  ;;  %v2916_v21 = vadd.f32 %v2915_v23, %v2903_v41  ;;  %v3188_v12 = vld [vmem:[%s8014_s3 + $0x18] sm:$0xff] }
 0x184   :  { %3153 = vmatpush.bf16.msra.mxu0 %v4806_v7  ;;  %3122 = vmatmul.bf16.vlgmr.msrb.gmra.mxu1 %v6598_v9  ;;  %v3196_v9 = vld [vmem:[%s8014_s3 + $0x58] sm:$0xff]  ;;  %v5239_v7 = vld [vmem:[%s8010_s1 + $0xb84] sm:$0xf] }
 0x185   :  { %3166 = vmatpush.bf16.msra.mxu1 %v4870_v8  ;;  %3135 = vmatmul.bf16.vlgmr.msrb.gmra.mxu2 %v6611_v17  ;;  %v4790_v17 = vor.u32 %v5249_v51, %v4787_v29  ;;  %v4747_v8 = vld [vmem:[%s8010_s1 + $0xb88] sm:$0xf0]  ;;  %v3185_v51 = vld [vmem:[%s8014_s3] sm:$0xff] }
 0x186   :  { %3221 = vmatpush.msra.mxu2 %v3200_v39  ;;  %3148 = vmatmul.bf16.vlgmr.msrb.gmra.mxu3 %v6600_v10  ;;  %v5263_v10 = vld [vmem:[%s8010_s1 + $0xc44] sm:$0xf]  ;;  %v4750_v49 = vor.u32 %v5239_v7, %v4747_v8 }
 0x187   :  { %v4846_v55 = vor.u32 %v5263_v10, %v4843_v4  ;;  %3241 = vmatpush.msra.mxu3 %v3216_v45 }
 0x188   :  { %3222 = vmatpush.msra.mxu2 %v3199_v3  ;;  %3154 = vmatpush.bf16.msra.mxu0 %v4798_v27  ;;  %v2928_v53 = vpop.f32.mrf.mxu2  ;;  %v2904_v63 = vpop.f32.mrf.mxu0  ;;  %v4814_v3 = vor.u32 %v5255_v14, %v4811_v16 }
 0x189   :  { %3167 = vmatpush.bf16.msra.mxu1 %v4862_v28  ;;  %v2929_v6 = vadd.f32 %v2928_v53, %v2916_v21  ;;  %v2941_v57 = vpop.f32.mrf.mxu3  ;;  %v2917_v59 = vpop.f32.mrf.mxu1  ;;  %v3186_v28 = vld [vmem:[%s8014_s3 + $0x8] sm:$0xff]  ;;  %v3215_v21 = vld [vmem:[%s8014_s3 + $0xf0] sm:$0xff]  ;;  %v3209_v63 = vld [vmem:[%s8014_s3 + $0xc0] sm:$0xff] }
 0x18a   :  { %3223 = vmatpush.msra.mxu2 %v3198_v24  ;;  %3242 = vmatpush.msra.mxu3 %v3215_v21  ;;  %v3210_v53 = vld [vmem:[%s8014_s3 + $0xc8] sm:$0xff] }
 0x18b   :  { %v2942_v60 = vadd.f32 %v2941_v57, %v2929_v6  ;;  %v3205_v57 = vld [vmem:[%s8014_s3 + $0xa0] sm:$0xff] }
 0x18c   :  { %3224 = vmatpush.msra.mxu2 %v3197_v46  ;;  %3155 = vmatpush.bf16.msra.mxu0 %v4790_v17 }
 0x18d   :  { %3168 = vmatpush.bf16.msra.mxu1 %v4854_v13 }
 0x18e   :  { %3225 = vmatpush.msra.mxu2 %v3196_v9 }
 0x190   :  { %3226 = vmatpush.msra.mxu2 %v3195_v32  ;;  %3156 = vmatpush.bf16.msra.mxu0 %v4782_v5  ;;  %v2930_v39 = vpop.f32.mrf.mxu2 }
 0x191   :  { %3169 = vmatpush.bf16.msra.mxu1 %v4846_v55  ;;  %v2943_v27 = vpop.f32.mrf.mxu3 }
 0x192   :  { %3227 = vmatpush.msra.mxu2 %v3194_v33 }
 0x194   :  { %3228 = vmatpush.msra.mxu2 %v3193_v48  ;;  %3157 = vmatpush.bf16.msra.mxu0 %v4774_v15  ;;  %v3214_v48 = vld [vmem:[%s8014_s3 + $0xe8] sm:$0xff] }
 0x195   :  { %3170 = vmatpush.bf16.msra.mxu1 %v4838_v37  ;;  %3243 = vmatpush.msra.mxu3 %v3214_v48 }
 0x196   :  { %3229 = vmatpush.msra.mxu2 %v3192_v47  ;;  %v3212_v47 = vld [vmem:[%s8014_s3 + $0xd8] sm:$0xff] }
 0x197   :  { %3244 = vmatpush.msra.mxu3 %v3213_v20 }
 0x198   :  { %3230 = vmatpush.msra.mxu2 %v3191_v54  ;;  %3158 = vmatpush.bf16.msra.mxu0 %v4766_v11  ;;  %v3208_v54 = vld [vmem:[%s8014_s3 + $0xb8] sm:$0xff]  ;;  %v3207_v11 = vld [vmem:[%s8014_s3 + $0xb0] sm:$0xff] }
 0x199   :  { %3171 = vmatpush.bf16.msra.mxu1 %v4830_v56  ;;  %3245 = vmatpush.msra.mxu3 %v3212_v47  ;;  %v3206_v56 = vld [vmem:[%s8014_s3 + $0xa8] sm:$0xff] }
 0x19a   :  { %3231 = vmatpush.msra.mxu2 %v3190_v61 }
 0x19b   :  { %3246 = vmatpush.msra.mxu3 %v3211_v50 }
 0x19c   :  { %3232 = vmatpush.msra.mxu2 %v3189_v2  ;;  %3159 = vmatpush.bf16.msra.mxu0 %v4758_v43  ;;  %v3201_v2 = vld [vmem:[%s8014_s3 + $0x80] sm:$0xff] }
 0x19d   :  { %3172 = vmatpush.bf16.msra.mxu1 %v4822_v36  ;;  %3247 = vmatpush.msra.mxu3 %v3210_v53 }
 0x19e   :  { %3233 = vmatpush.msra.mxu2 %v3188_v12 }
 0x19f   :  { %3248 = vmatpush.msra.mxu3 %v3209_v63 }
 0x1a0   :  { %3234 = vmatpush.msra.mxu2 %v3187_v19  ;;  %3160 = vmatpush.bf16.msra.mxu0 %v4750_v49  ;;  %v2954_v29 = vpop.f32.mrf.mxu0 }
 0x1a1   :  { %3173 = vmatpush.bf16.msra.mxu1 %v4814_v3  ;;  %v2955_v24 = vadd.f32 %v2954_v29, %v2942_v60  ;;  %v2967_v25 = vpop.f32.mrf.mxu1  ;;  %3249 = vmatpush.msra.mxu3 %v3208_v54  ;;  %v3203_v60 = vld [vmem:[%s8014_s3 + $0x90] sm:$0xff] }
 0x1a2   :  { %3235 = vmatpush.msra.mxu2 %v3186_v28 }
 0x1a3   :  { %3161 = vmatmul.bf16.vlgmr.msra.gmra.mxu0 %v6613_v18  ;;  %v2968_v34 = vadd.f32 %v2967_v25, %v2955_v24  ;;  %3250 = vmatpush.msra.mxu3 %v3207_v11 }
 0x1a4   :  { %3236 = vmatpush.msra.mxu2 %v3185_v51  ;;  %3174 = vmatmul.bf16.vlgmr.msra.gmra.mxu1 %v6813_v0 }
 0x1a5   :  { %3237 = vmatmul.f32.vlgmr.msra.gmra.mxu2 %v7721_v26  ;;  %3251 = vmatpush.msra.mxu3 %v3206_v56 }
 0x1a7   :  { %3252 = vmatpush.msra.mxu3 %v3205_v57 }
 0x1a8   :  { %v2980_v46 = vpop.f32.mrf.mxu2  ;;  %v2956_v40 = vpop.f32.mrf.mxu0 }
 0x1a9   :  { %v2981_v17 = vadd.f32 %v2980_v46, %v2968_v34  ;;  %v2993_v13 = vpop.f32.mrf.mxu3  ;;  %v2969_v9 = vpop.f32.mrf.mxu1  ;;  %3253 = vmatpush.msra.mxu3 %v3204_v58 }
 0x1ab   :  { %v2994_v35 = vadd.f32 %v2993_v13, %v2981_v17  ;;  %3254 = vmatpush.msra.mxu3 %v3203_v60 }
 0x1ad   :  { %3255 = vmatpush.msra.mxu3 %v3202_v62 }
 0x1af   :  { %3256 = vmatpush.msra.mxu3 %v3201_v2 }
 0x1b0   :  { %v2982_v10 = vpop.f32.mrf.mxu2 }
 0x1b1   :  { %v2995_v4 = vpop.f32.mrf.mxu3 }
 0x1c0   :  { %v3006_v31 = vpop.f32.mrf.mxu0 }
 0x1c1   :  { %v3007_v32 = vadd.f32 %v3006_v31, %v2994_v35  ;;  %v3019_v5 = vpop.f32.mrf.mxu1  ;;  %v5271_v35 = vld [vmem:[%s8015_s4] ss:$0 sm:$0xff] }
 0x1c3   :  { %v3020_v18 = vadd.f32 %v3019_v5, %v3007_v32 }
 0x1c8   :  { %v3032_v41 = vpop.f32.mrf.mxu2  ;;  %v3008_v55 = vpop.f32.mrf.mxu0 }
 0x1c9   :  { %v3045_v0 = vpop.f32.mrf.mxu3  ;;  %v3021_v26 = vpop.f32.mrf.mxu1  ;;  %v3033_v30 = vadd.f32 %v3032_v41, %v3020_v18 }
 0x1cb   :  { %v3046_v1 = vadd.f32 %v3045_v0, %v3033_v30 }
 0x1d0   :  { %v3034_v42 = vpop.f32.mrf.mxu2 }
 0x1d1   :  { %v3047_v22 = vpop.f32.mrf.mxu3 }
 0x1e0   :  { %v3058_v23 = vpop.f32.mrf.mxu0 }
 0x1e1   :  { %v3071_v33 = vpop.f32.mrf.mxu1  ;;  %v3059_v43 = vadd.f32 %v3058_v23, %v3046_v1 }
 0x1e3   :  { %v3072_v14 = vadd.f32 %v3071_v33, %v3059_v43 }
 0x1e8   :  { %v3084_v44 = vpop.f32.mrf.mxu2  ;;  %v3060_v37 = vpop.f32.mrf.mxu0 }
 0x1e9   :  { %v3097_v15 = vpop.f32.mrf.mxu3  ;;  %v3073_v38 = vpop.f32.mrf.mxu1  ;;  %v3085_v16 = vadd.f32 %v3084_v44, %v3072_v14 }
 0x1eb   :  { %v3098_v19 = vadd.f32 %v3097_v15, %v3085_v16 }
 0x1f0   :  { %v3086_v52 = vpop.f32.mrf.mxu2 }
 0x1f1   :  { %v3099_v6 = vpop.f32.mrf.mxu3 }
 0x200   :  { %v3110_v59 = vpop.f32.mrf.mxu0 }
 0x201   :  { %v3123_v61 = vpop.f32.mrf.mxu1  ;;  %v3111_v3 = vadd.f32 %v3110_v59, %v3098_v19 }
 0x203   :  { %v3124_v27 = vadd.f32 %v3123_v61, %v3111_v3 }
 0x208   :  { %v3136_v36 = vpop.f32.mrf.mxu2  ;;  %v3112_v8 = vpop.f32.mrf.mxu0 }
 0x209   :  { %v3149_v7 = vpop.f32.mrf.mxu3  ;;  %v3125_v12 = vpop.f32.mrf.mxu1  ;;  %v3137_v28 = vadd.f32 %v3136_v36, %v3124_v27 }
 0x20b   :  { %v3150_v51 = vadd.f32 %v3149_v7, %v3137_v28 }
 0x210   :  { %v3138_v39 = vpop.f32.mrf.mxu2 }
 0x211   :  { %v3151_v49 = vpop.f32.mrf.mxu3 }
 0x220   :  { %v3162_v29 = vpop.f32.mrf.mxu0 }
 0x221   :  { %v3163_v24 = vadd.f32 %v3162_v29, %v3150_v51  ;;  %v3175_v25 = vpop.f32.mrf.mxu1 }
 0x223   :  { %v3176_v34 = vadd.f32 %v3175_v25, %v3163_v24 }
 0x225   :  { %v3180_v46 = vmul.f32 0.2, %v3176_v34 }
 0x227   :  { %v3182_v17 = vmax.f32 %v3176_v34, %v3180_v46 }
 0x228   :  { %v3164_v13 = vpop.f32.mrf.mxu0  ;;  %v3238_v9 = vpop.f32.mrf.mxu2 }
 0x229   :  { %3184 = vst [vmem:[%s8013_s5 + $0x8] sm:$0xff] %v3182_v17  ;;  %v3177_v40 = vpop.f32.mrf.mxu1  ;;  %3257 = vmatmul.f32.vlgmr.msra.gmra.mxu3 %v3182_v17  ;;  %v3239_v10 = vadd.f32 %v5271_v35, %v3238_v9 }
 0x2ac   :  { %v3258_v4 = vpop.f32.mrf.mxu3 }
 0x2ad   :  { %v3259_v31 = vadd.f32 %v3258_v4, %v3239_v10 }
 0x2af   :  { %3262 = vst.msk [vmem:[%s8016_s6] sm:$0xff] %vm3261_vm0, %v3259_v31 }

</bundles_post_ra>
